<compile_context>
chip_gen: v5e
topology: v5e:2x2
jax: 0.10.0
libtpu: 0.0.40
codegen_flags: <defaults>
</compile_context>

<pallas_src>
import functools

import numpy as np
import jax
import jax.numpy as jnp
from jax import lax
from jax.experimental import pallas as pl
from jax.experimental.pallas import tpu as pltpu


# ----------------------------------------------------------------------------
# host-side constant builders (passed as runtime inputs, NOT baked constants)
# ----------------------------------------------------------------------------
def _subsample_matrix(h, w):
    """(h//2*w//2, h*w) 0/1: row q selects flattened position (2r, 2c)."""
    ho, wo = h // 2, w // 2
    m = np.zeros((ho * wo, h * w), np.float32)
    for q in range(ho * wo):
        r, c = q // wo, q % wo
        m[q, (2 * r) * w + (2 * c)] = 1.0
    return m


def _upsample_matrix(h, w):
    """(4*h*w, h*w) bilinear x2, align_corners=False (PyTorch semantics)."""
    def up1d(n):
        m = np.zeros((2 * n, n), np.float64)
        for o in range(2 * n):
            src = (o + 0.5) / 2.0 - 0.5
            f = int(np.floor(src))
            frac = src - f
            f0 = min(max(f, 0), n - 1)
            f1 = min(max(f + 1, 0), n - 1)
            m[o, f0] += 1.0 - frac
            m[o, f1] += frac
        return m
    return np.kron(up1d(h), up1d(w)).astype(np.float32)


# ----------------------------------------------------------------------------
# in-kernel helpers (operate on flattened (H*W, C) f32 activations)
# ----------------------------------------------------------------------------
def _shift_rows(x, t):
    """y[i, :] = x[i + t, :] if 0 <= i + t < P else 0.   (t is a static int)"""
    if t == 0:
        return x
    p, c = x.shape
    pad = jnp.zeros((abs(t), c), x.dtype)
    if t > 0:
        return jnp.concatenate([x[t:, :], pad], axis=0)
    return jnp.concatenate([pad, x[:p + t, :]], axis=0)


def _conv3x3_relu(x, w_ref, b_ref, *, w):
    """Zero-padded 3x3 conv + bias + ReLU as ONE wide-K im2col MXU matmul.

    x: (P, Cin) f32, flattened row-major image of width `w`.
    w_ref: (9*Cin, Cout) bf16, rows grouped tap-major in (dy, dx) order
           (dy, dx in {-1, 0, 1}, dy outer), input channel within each group.
    b_ref: (1, Cout) f32.
    """
    p, _ = x.shape
    col = lax.broadcasted_iota(jnp.int32, (p, 1), 0) % w     # in-kernel mask
    taps = []
    for dy in (-1, 0, 1):
        for dx in (-1, 0, 1):
            s = _shift_rows(x, dy * w + dx)       # rows off the image -> 0
            if dx == 1:                           # kill cross-row wrap of dx
                s = jnp.where(col < w - 1, s, 0.0)
            elif dx == -1:
                s = jnp.where(col >= 1, s, 0.0)
            taps.append(s)
    slab = jnp.concatenate(taps, axis=1).astype(jnp.bfloat16)   # (P, 9*Cin)
    acc = jnp.dot(slab, w_ref[...], preferred_element_type=jnp.float32)
    return jnp.maximum(acc + b_ref[...], 0.0)                   # (P, Cout) f32


def _maxpool2x2(x, sel_ref, *, w):
    """2x2/stride-2 max pool: max of 4 shifted views + one 0/1 subsample matmul."""
    m = jnp.maximum(jnp.maximum(x, _shift_rows(x, 1)),
                    jnp.maximum(_shift_rows(x, w), _shift_rows(x, w + 1)))
    return jnp.dot(sel_ref[...], m, preferred_element_type=jnp.float32)


def _up_block(x_low, skip, pw_w_ref, pw_b_ref, u_ref, cw_ref, cb_ref, *, w):
    """Upsample(x2, bilinear) -> 1x1 conv (commuted, exact) -> cat([skip, up])
    -> 3x3 conv -> ReLU."""
    pw = jnp.dot(x_low.astype(jnp.bfloat16), pw_w_ref[...],
                 preferred_element_type=jnp.float32) + pw_b_ref[...]
    up = jnp.dot(u_ref[...], pw, preferred_element_type=jnp.float32)
    cat = jnp.concatenate([skip, up], axis=1)      # torch.cat([skip, up], 1)
    return _conv3x3_relu(cat, cw_ref, cb_ref, w=w)


# ----------------------------------------------------------------------------
# the single fused kernel (one grid step == one batch element)
# ----------------------------------------------------------------------------
def _unet_kernel(*refs, n_levels, ww):
    it = iter(refs)
    x_ref = next(it)
    down = [(next(it), next(it)) for _ in range(n_levels + 1)]          # (w, b)
    up = [(next(it), next(it), next(it), next(it)) for _ in range(n_levels)]
    lw_ref, lb_ref = next(it), next(it)
    sels = [next(it) for _ in range(n_levels)]
    umats = [next(it) for _ in range(n_levels)]
    o_ref = next(it)
    assert next(it, None) is None

    widths = [ww >> i for i in range(n_levels + 1)]

    # down path (first block has no pooling) + bottom
    f = _conv3x3_relu(x_ref[0], *down[0], w=widths[0])
    fmaps = [f]
    for i in range(1, n_levels + 1):
        pooled = _maxpool2x2(fmaps[-1], sels[i - 1], w=widths[i - 1])
        fmaps.append(_conv3x3_relu(pooled, *down[i], w=widths[i]))

    # up path
    y = fmaps[-1]
    for i in range(n_levels):
        lvl = n_levels - 1 - i
        pw_w, pw_b, cw, cb = up[i]
        y = _up_block(y, fmaps[lvl], pw_w, pw_b, umats[i], cw, cb,
                      w=widths[lvl])

    # final 1x1 conv + ReLU (F.relu in the reference forward)
    out = jnp.dot(y.astype(jnp.bfloat16), lw_ref[...],
                  preferred_element_type=jnp.float32) + lb_ref[...]
    o_ref[0] = jnp.maximum(out, 0.0).astype(o_ref.dtype)


# ----------------------------------------------------------------------------
# parameters & forward
# ----------------------------------------------------------------------------
def _param_order(n_levels):
    order = []
    for i in range(n_levels + 1):
        order += [f"cw{i}", f"cb{i}"]
    for i in range(n_levels):
        order += [f"pw{i}_w", f"pw{i}_b", f"uw{i}", f"ub{i}"]
    order += ["lw", "lb"]
    order += [f"sel{i}" for i in range(1, n_levels + 1)]
    order += [f"um{i}" for i in range(n_levels)]
    return order


def init_params(key, in_ch, m_channels, out_ch, n_levels, hh, ww):
    channels = [m_channels * (2 ** i) for i in range(n_levels + 1)]
    n_keys = 2 * (n_levels + 1) + 4 * n_levels + 2
    keys = iter(jax.random.split(key, n_keys))

    def w(shape):   # conv weights in bf16 (MXU), f32 accumulation in-kernel
        return (0.1 * jax.random.normal(next(keys), shape, jnp.float32)
                ).astype(jnp.bfloat16)

    def b(c):
        return 0.05 * jax.random.normal(next(keys), (1, c), jnp.float32)

    p = {}
    prev = in_ch
    for i, ch in enumerate(channels):                 # down path + bottom
        p[f"cw{i}"] = w((9 * prev, ch))               # im2col layout
        p[f"cb{i}"] = b(ch)
        prev = ch
    for i, ch in enumerate(reversed(channels[1:])):   # up path
        p[f"pw{i}_w"] = w((ch, ch // 2))              # 1x1 conv (upsampling)
        p[f"pw{i}_b"] = b(ch // 2)
        p[f"uw{i}"] = w((9 * ch, ch // 2))            # 3x3 conv after concat
        p[f"ub{i}"] = b(ch // 2)
    p["lw"] = w((channels[0], out_ch))                # final 1x1 conv
    p["lb"] = b(out_ch)

    # pooling / bilinear matrices: runtime inputs (built on host once)
    sizes = [(hh >> i, ww >> i) for i in range(n_levels + 1)]
    for i in range(1, n_levels + 1):
        p[f"sel{i}"] = jnp.asarray(_subsample_matrix(*sizes[i - 1]))
    for i in range(n_levels):
        lvl = n_levels - 1 - i
        p[f"um{i}"] = jnp.asarray(_upsample_matrix(sizes[lvl][0] // 2,
                                                   sizes[lvl][1] // 2))
    return p


def unet_reg_forward(x_nchw, params, *, n_levels=3):
    n, cin, hh, ww = x_nchw.shape
    assert hh % (1 << n_levels) == 0 and ww % (1 << n_levels) == 0
    p0 = hh * ww

    # NCHW -> flattened (N, H*W, C); free for C == 1
    x = jnp.transpose(x_nchw.reshape(n, cin, p0), (0, 2, 1))

    args = [params[k] for k in _param_order(n_levels)]
    out_ch = params["lw"].shape[-1]

    def full_spec(a):
        return pl.BlockSpec(a.shape, lambda i, _nd=a.ndim: (0,) * _nd)

    out = pl.pallas_call(
        functools.partial(_unet_kernel, n_levels=n_levels, ww=ww),
        out_shape=jax.ShapeDtypeStruct((n, p0, out_ch), jnp.float32),
        grid=(n,),
        in_specs=[pl.BlockSpec((1, p0, cin), lambda i: (i, 0, 0))]
                 + [full_spec(a) for a in args],
        out_specs=pl.BlockSpec((1, p0, out_ch), lambda i: (i, 0, 0)),
        compiler_params=pltpu.CompilerParams(
            dimension_semantics=("parallel",)),
    )(x, *args)

    # flattened (N, H*W, Cout) -> NCHW (degenerate-dim transpose, free here)
    return jnp.transpose(out, (0, 2, 1)).reshape(n, out_ch, hh, ww)


if __name__ == "__main__":
    N, IN_CH, H, W = 2, 1, 16, 16
    M_CHANNELS, OUT_CH, N_LEVELS = 8, 1, 3       # verify_input_size-compatible

    key = jax.random.PRNGKey(0)
    pkey, xkey = jax.random.split(key)
    params = init_params(pkey, IN_CH, M_CHANNELS, OUT_CH, N_LEVELS, H, W)
    x = jax.random.normal(xkey, (N, IN_CH, H, W), jnp.float32)

    fwd = jax.jit(functools.partial(unet_reg_forward, n_levels=N_LEVELS))
    y = jax.block_until_ready(fwd(x, params))

    assert y.shape == (N, OUT_CH, H, W), y.shape
    assert bool(jnp.all(jnp.isfinite(y)))
    assert bool(jnp.all(y >= 0.0))               # final F.relu
    print("KERNEL_OK")
</pallas_src>

<mosaic_0001>
module attributes {stable_mosaic.version = 11 : i64} {
  func.func @_unet_kernel(%arg0: i32, %arg1: memref<1x256x1xf32, #tpu.memory_space<vmem>>, %arg2: memref<9x8xbf16, #tpu.memory_space<vmem>>, %arg3: memref<1x8xf32, #tpu.memory_space<vmem>>, %arg4: memref<72x16xbf16, #tpu.memory_space<vmem>>, %arg5: memref<1x16xf32, #tpu.memory_space<vmem>>, %arg6: memref<144x32xbf16, #tpu.memory_space<vmem>>, %arg7: memref<1x32xf32, #tpu.memory_space<vmem>>, %arg8: memref<288x64xbf16, #tpu.memory_space<vmem>>, %arg9: memref<1x64xf32, #tpu.memory_space<vmem>>, %arg10: memref<64x32xbf16, #tpu.memory_space<vmem>>, %arg11: memref<1x32xf32, #tpu.memory_space<vmem>>, %arg12: memref<576x32xbf16, #tpu.memory_space<vmem>>, %arg13: memref<1x32xf32, #tpu.memory_space<vmem>>, %arg14: memref<32x16xbf16, #tpu.memory_space<vmem>>, %arg15: memref<1x16xf32, #tpu.memory_space<vmem>>, %arg16: memref<288x16xbf16, #tpu.memory_space<vmem>>, %arg17: memref<1x16xf32, #tpu.memory_space<vmem>>, %arg18: memref<16x8xbf16, #tpu.memory_space<vmem>>, %arg19: memref<1x8xf32, #tpu.memory_space<vmem>>, %arg20: memref<144x8xbf16, #tpu.memory_space<vmem>>, %arg21: memref<1x8xf32, #tpu.memory_space<vmem>>, %arg22: memref<8x1xbf16, #tpu.memory_space<vmem>>, %arg23: memref<1x1xf32, #tpu.memory_space<vmem>>, %arg24: memref<64x256xf32, #tpu.memory_space<vmem>>, %arg25: memref<16x64xf32, #tpu.memory_space<vmem>>, %arg26: memref<4x16xf32, #tpu.memory_space<vmem>>, %arg27: memref<16x4xf32, #tpu.memory_space<vmem>>, %arg28: memref<64x16xf32, #tpu.memory_space<vmem>>, %arg29: memref<256x64xf32, #tpu.memory_space<vmem>>, %arg30: memref<1x256x1xf32, #tpu.memory_space<vmem>>) attributes {dimension_semantics = [#tpu.dimension_semantics<parallel>], iteration_bounds = array<i64: 2>, scalar_prefetch = 0 : i64, scratch_operands = 0 : i64, tpu.core_type = #tpu.core_type<tc>, window_params = [{transform_indices = @transform_0, window_bounds = array<i64: 1, 256, 1>}, {pipeline_mode = #tpu.pipeline_mode<synchronous>, transform_indices = @transform_1, window_bounds = array<i64: 9, 8>}, {pipeline_mode = #tpu.pipeline_mode<synchronous>, transform_indices = @transform_2, window_bounds = array<i64: 1, 8>}, {pipeline_mode = #tpu.pipeline_mode<synchronous>, transform_indices = @transform_3, window_bounds = array<i64: 72, 16>}, {pipeline_mode = #tpu.pipeline_mode<synchronous>, transform_indices = @transform_4, window_bounds = array<i64: 1, 16>}, {pipeline_mode = #tpu.pipeline_mode<synchronous>, transform_indices = @transform_5, window_bounds = array<i64: 144, 32>}, {pipeline_mode = #tpu.pipeline_mode<synchronous>, transform_indices = @transform_6, window_bounds = array<i64: 1, 32>}, {pipeline_mode = #tpu.pipeline_mode<synchronous>, transform_indices = @transform_7, window_bounds = array<i64: 288, 64>}, {pipeline_mode = #tpu.pipeline_mode<synchronous>, transform_indices = @transform_8, window_bounds = array<i64: 1, 64>}, {pipeline_mode = #tpu.pipeline_mode<synchronous>, transform_indices = @transform_9, window_bounds = array<i64: 64, 32>}, {pipeline_mode = #tpu.pipeline_mode<synchronous>, transform_indices = @transform_10, window_bounds = array<i64: 1, 32>}, {pipeline_mode = #tpu.pipeline_mode<synchronous>, transform_indices = @transform_11, window_bounds = array<i64: 576, 32>}, {pipeline_mode = #tpu.pipeline_mode<synchronous>, transform_indices = @transform_12, window_bounds = array<i64: 1, 32>}, {pipeline_mode = #tpu.pipeline_mode<synchronous>, transform_indices = @transform_13, window_bounds = array<i64: 32, 16>}, {pipeline_mode = #tpu.pipeline_mode<synchronous>, transform_indices = @transform_14, window_bounds = array<i64: 1, 16>}, {pipeline_mode = #tpu.pipeline_mode<synchronous>, transform_indices = @transform_15, window_bounds = array<i64: 288, 16>}, {pipeline_mode = #tpu.pipeline_mode<synchronous>, transform_indices = @transform_16, window_bounds = array<i64: 1, 16>}, {pipeline_mode = #tpu.pipeline_mode<synchronous>, transform_indices = @transform_17, window_bounds = array<i64: 16, 8>}, {pipeline_mode = #tpu.pipeline_mode<synchronous>, transform_indices = @transform_18, window_bounds = array<i64: 1, 8>}, {pipeline_mode = #tpu.pipeline_mode<synchronous>, transform_indices = @transform_19, window_bounds = array<i64: 144, 8>}, {pipeline_mode = #tpu.pipeline_mode<synchronous>, transform_indices = @transform_20, window_bounds = array<i64: 1, 8>}, {pipeline_mode = #tpu.pipeline_mode<synchronous>, transform_indices = @transform_21, window_bounds = array<i64: 8, 1>}, {pipeline_mode = #tpu.pipeline_mode<synchronous>, transform_indices = @transform_22, window_bounds = array<i64: 1, 1>}, {pipeline_mode = #tpu.pipeline_mode<synchronous>, transform_indices = @transform_23, window_bounds = array<i64: 64, 256>}, {pipeline_mode = #tpu.pipeline_mode<synchronous>, transform_indices = @transform_24, window_bounds = array<i64: 16, 64>}, {pipeline_mode = #tpu.pipeline_mode<synchronous>, transform_indices = @transform_25, window_bounds = array<i64: 4, 16>}, {pipeline_mode = #tpu.pipeline_mode<synchronous>, transform_indices = @transform_26, window_bounds = array<i64: 16, 4>}, {pipeline_mode = #tpu.pipeline_mode<synchronous>, transform_indices = @transform_27, window_bounds = array<i64: 64, 16>}, {pipeline_mode = #tpu.pipeline_mode<synchronous>, transform_indices = @transform_28, window_bounds = array<i64: 256, 64>}, {transform_indices = @transform_29, window_bounds = array<i64: 1, 256, 1>}]} {
    %c0 = arith.constant 0 : index
    %c0_0 = arith.constant 0 : index
    %c0_1 = arith.constant 0 : index
    %0 = vector.load %arg1[%c0, %c0_0, %c0_1] : memref<1x256x1xf32, #tpu.memory_space<vmem>>, vector<1x256x1xf32>
    %1 = vector.shape_cast %0 : vector<1x256x1xf32> to vector<256x1xf32>
    %2 = tpu.iota {dimensions = array<i32: 0>} : vector<256x1xi32>
    %c16_i32 = arith.constant 16 : i32
    %c0_i32 = arith.constant 0 : i32
    %3 = arith.cmpi eq, %c16_i32, %c0_i32 : i32
    %c1_i32 = arith.constant 1 : i32
    %4 = arith.select %3, %c1_i32, %c16_i32 : i32
    %5 = vector.broadcast %4 : i32 to vector<256x1xi32>
    %6 = arith.remsi %2, %5 : vector<256x1xi32>
    %c0_i32_2 = arith.constant 0 : i32
    %7 = vector.broadcast %c0_i32_2 : i32 to vector<256x1xi32>
    %8 = arith.cmpi ne, %6, %7 : vector<256x1xi32>
    %c0_i32_3 = arith.constant 0 : i32
    %9 = vector.broadcast %c0_i32_3 : i32 to vector<256x1xi32>
    %10 = arith.cmpi slt, %6, %9 : vector<256x1xi32>
    %c0_i32_4 = arith.constant 0 : i32
    %11 = arith.cmpi slt, %4, %c0_i32_4 : i32
    %12 = vector.broadcast %11 : i1 to vector<256x1xi1>
    %13 = vector.broadcast %12 : vector<256x1xi1> to vector<256x1xi1>
    %14 = arith.xori %10, %13 : vector<256x1xi1>
    %15 = arith.andi %14, %8 : vector<256x1xi1>
    %16 = vector.broadcast %4 : i32 to vector<256x1xi32>
    %17 = arith.addi %6, %16 : vector<256x1xi32>
    %18 = arith.select %15, %17, %6 : vector<256x1xi1>, vector<256x1xi32>
    %cst = arith.constant 0.000000e+00 : f32
    %19 = vector.broadcast %cst : f32 to vector<17x1xf32>
    %20 = vector.extract_strided_slice %1 {offsets = [0, 0], sizes = [239, 1], strides = [1, 1]} : vector<256x1xf32> to vector<239x1xf32>
    %21 = tpu.concatenate %19, %20 in 0 : vector<17x1xf32>, vector<239x1xf32> -> vector<256x1xf32>
    %c1_i32_5 = arith.constant 1 : i32
    %22 = vector.broadcast %c1_i32_5 : i32 to vector<256x1xi32>
    %23 = arith.cmpi sge, %18, %22 : vector<256x1xi32>
    %cst_6 = arith.constant 0.000000e+00 : f32
    %24 = vector.broadcast %cst_6 : f32 to vector<256x1xf32>
    %25 = arith.select %23, %21, %24 : vector<256x1xi1>, vector<256x1xf32>
    %cst_7 = arith.constant 0.000000e+00 : f32
    %26 = vector.broadcast %cst_7 : f32 to vector<16x1xf32>
    %27 = vector.extract_strided_slice %1 {offsets = [0, 0], sizes = [240, 1], strides = [1, 1]} : vector<256x1xf32> to vector<240x1xf32>
    %28 = tpu.concatenate %26, %27 in 0 : vector<16x1xf32>, vector<240x1xf32> -> vector<256x1xf32>
    %cst_8 = arith.constant 0.000000e+00 : f32
    %29 = vector.broadcast %cst_8 : f32 to vector<15x1xf32>
    %30 = vector.extract_strided_slice %1 {offsets = [0, 0], sizes = [241, 1], strides = [1, 1]} : vector<256x1xf32> to vector<241x1xf32>
    %31 = tpu.concatenate %29, %30 in 0 : vector<15x1xf32>, vector<241x1xf32> -> vector<256x1xf32>
    %c15_i32 = arith.constant 15 : i32
    %32 = vector.broadcast %c15_i32 : i32 to vector<256x1xi32>
    %33 = arith.cmpi slt, %18, %32 : vector<256x1xi32>
    %cst_9 = arith.constant 0.000000e+00 : f32
    %34 = vector.broadcast %cst_9 : f32 to vector<256x1xf32>
    %35 = arith.select %33, %31, %34 : vector<256x1xi1>, vector<256x1xf32>
    %cst_10 = arith.constant 0.000000e+00 : f32
    %36 = vector.broadcast %cst_10 : f32 to vector<1x1xf32>
    %37 = vector.extract_strided_slice %1 {offsets = [0, 0], sizes = [255, 1], strides = [1, 1]} : vector<256x1xf32> to vector<255x1xf32>
    %38 = tpu.concatenate %36, %37 in 0 : vector<1x1xf32>, vector<255x1xf32> -> vector<256x1xf32>
    %c1_i32_11 = arith.constant 1 : i32
    %39 = vector.broadcast %c1_i32_11 : i32 to vector<256x1xi32>
    %40 = arith.cmpi sge, %18, %39 : vector<256x1xi32>
    %cst_12 = arith.constant 0.000000e+00 : f32
    %41 = vector.broadcast %cst_12 : f32 to vector<256x1xf32>
    %42 = arith.select %40, %38, %41 : vector<256x1xi1>, vector<256x1xf32>
    %cst_13 = arith.constant 0.000000e+00 : f32
    %43 = vector.broadcast %cst_13 : f32 to vector<1x1xf32>
    %44 = vector.extract_strided_slice %1 {offsets = [1, 0], sizes = [255, 1], strides = [1, 1]} : vector<256x1xf32> to vector<255x1xf32>
    %45 = tpu.concatenate %44, %43 in 0 : vector<255x1xf32>, vector<1x1xf32> -> vector<256x1xf32>
    %c15_i32_14 = arith.constant 15 : i32
    %46 = vector.broadcast %c15_i32_14 : i32 to vector<256x1xi32>
    %47 = arith.cmpi slt, %18, %46 : vector<256x1xi32>
    %cst_15 = arith.constant 0.000000e+00 : f32
    %48 = vector.broadcast %cst_15 : f32 to vector<256x1xf32>
    %49 = arith.select %47, %45, %48 : vector<256x1xi1>, vector<256x1xf32>
    %cst_16 = arith.constant 0.000000e+00 : f32
    %50 = vector.broadcast %cst_16 : f32 to vector<15x1xf32>
    %51 = vector.extract_strided_slice %1 {offsets = [15, 0], sizes = [241, 1], strides = [1, 1]} : vector<256x1xf32> to vector<241x1xf32>
    %52 = tpu.concatenate %51, %50 in 0 : vector<241x1xf32>, vector<15x1xf32> -> vector<256x1xf32>
    %c1_i32_17 = arith.constant 1 : i32
    %53 = vector.broadcast %c1_i32_17 : i32 to vector<256x1xi32>
    %54 = arith.cmpi sge, %18, %53 : vector<256x1xi32>
    %cst_18 = arith.constant 0.000000e+00 : f32
    %55 = vector.broadcast %cst_18 : f32 to vector<256x1xf32>
    %56 = arith.select %54, %52, %55 : vector<256x1xi1>, vector<256x1xf32>
    %cst_19 = arith.constant 0.000000e+00 : f32
    %57 = vector.broadcast %cst_19 : f32 to vector<16x1xf32>
    %58 = vector.extract_strided_slice %1 {offsets = [16, 0], sizes = [240, 1], strides = [1, 1]} : vector<256x1xf32> to vector<240x1xf32>
    %59 = tpu.concatenate %58, %57 in 0 : vector<240x1xf32>, vector<16x1xf32> -> vector<256x1xf32>
    %cst_20 = arith.constant 0.000000e+00 : f32
    %60 = vector.broadcast %cst_20 : f32 to vector<17x1xf32>
    %61 = vector.extract_strided_slice %1 {offsets = [17, 0], sizes = [239, 1], strides = [1, 1]} : vector<256x1xf32> to vector<239x1xf32>
    %62 = tpu.concatenate %61, %60 in 0 : vector<239x1xf32>, vector<17x1xf32> -> vector<256x1xf32>
    %c15_i32_21 = arith.constant 15 : i32
    %63 = vector.broadcast %c15_i32_21 : i32 to vector<256x1xi32>
    %64 = arith.cmpi slt, %18, %63 : vector<256x1xi32>
    %cst_22 = arith.constant 0.000000e+00 : f32
    %65 = vector.broadcast %cst_22 : f32 to vector<256x1xf32>
    %66 = arith.select %64, %62, %65 : vector<256x1xi1>, vector<256x1xf32>
    %67 = tpu.concatenate %25, %28, %35, %42, %1, %49, %56, %59, %66 in 1 : vector<256x1xf32>, vector<256x1xf32>, vector<256x1xf32>, vector<256x1xf32>, vector<256x1xf32>, vector<256x1xf32>, vector<256x1xf32>, vector<256x1xf32>, vector<256x1xf32> -> vector<256x9xf32>
    %68 = arith.truncf %67 : vector<256x9xf32> to vector<256x9xbf16>
    %c0_23 = arith.constant 0 : index
    %c0_24 = arith.constant 0 : index
    %69 = vector.load %arg2[%c0_23, %c0_24] : memref<9x8xbf16, #tpu.memory_space<vmem>>, vector<9x8xbf16>
    %cst_25 = arith.constant dense<0.000000e+00> : vector<256x8xf32>
    %70 = tpu.matmul %68, %69, %cst_25 {dimension_numbers = #tpu.dot_dimension_numbers<[1], [0], [0], [1], [0, 0, 1, 1], [], []>} : vector<256x9xbf16>, vector<9x8xbf16>, vector<256x8xf32> -> vector<256x8xf32>
    %c0_26 = arith.constant 0 : index
    %c0_27 = arith.constant 0 : index
    %71 = vector.load %arg3[%c0_26, %c0_27] : memref<1x8xf32, #tpu.memory_space<vmem>>, vector<1x8xf32>
    %72 = vector.broadcast %71 : vector<1x8xf32> to vector<256x8xf32>
    %73 = arith.addf %70, %72 : vector<256x8xf32>
    %cst_28 = arith.constant 0.000000e+00 : f32
    %74 = vector.broadcast %cst_28 : f32 to vector<256x8xf32>
    %75 = arith.maximumf %73, %74 : vector<256x8xf32>
    %cst_29 = arith.constant 0.000000e+00 : f32
    %76 = vector.broadcast %cst_29 : f32 to vector<1x8xf32>
    %77 = vector.extract_strided_slice %75 {offsets = [1, 0], sizes = [255, 8], strides = [1, 1]} : vector<256x8xf32> to vector<255x8xf32>
    %78 = tpu.concatenate %77, %76 in 0 : vector<255x8xf32>, vector<1x8xf32> -> vector<256x8xf32>
    %79 = arith.maximumf %75, %78 : vector<256x8xf32>
    %cst_30 = arith.constant 0.000000e+00 : f32
    %80 = vector.broadcast %cst_30 : f32 to vector<16x8xf32>
    %81 = vector.extract_strided_slice %75 {offsets = [16, 0], sizes = [240, 8], strides = [1, 1]} : vector<256x8xf32> to vector<240x8xf32>
    %82 = tpu.concatenate %81, %80 in 0 : vector<240x8xf32>, vector<16x8xf32> -> vector<256x8xf32>
    %cst_31 = arith.constant 0.000000e+00 : f32
    %83 = vector.broadcast %cst_31 : f32 to vector<17x8xf32>
    %84 = vector.extract_strided_slice %75 {offsets = [17, 0], sizes = [239, 8], strides = [1, 1]} : vector<256x8xf32> to vector<239x8xf32>
    %85 = tpu.concatenate %84, %83 in 0 : vector<239x8xf32>, vector<17x8xf32> -> vector<256x8xf32>
    %86 = arith.maximumf %82, %85 : vector<256x8xf32>
    %87 = arith.maximumf %79, %86 : vector<256x8xf32>
    %c0_32 = arith.constant 0 : index
    %c0_33 = arith.constant 0 : index
    %88 = vector.load %arg24[%c0_32, %c0_33] : memref<64x256xf32, #tpu.memory_space<vmem>>, vector<64x256xf32>
    %cst_34 = arith.constant dense<0.000000e+00> : vector<64x8xf32>
    %89 = tpu.matmul %88, %87, %cst_34 {dimension_numbers = #tpu.dot_dimension_numbers<[1], [0], [0], [1], [0, 0, 1, 1], [], []>} : vector<64x256xf32>, vector<256x8xf32>, vector<64x8xf32> -> vector<64x8xf32>
    %90 = tpu.iota {dimensions = array<i32: 0>} : vector<64x1xi32>
    %c8_i32 = arith.constant 8 : i32
    %c0_i32_35 = arith.constant 0 : i32
    %91 = arith.cmpi eq, %c8_i32, %c0_i32_35 : i32
    %c1_i32_36 = arith.constant 1 : i32
    %92 = arith.select %91, %c1_i32_36, %c8_i32 : i32
    %93 = vector.broadcast %92 : i32 to vector<64x1xi32>
    %94 = arith.remsi %90, %93 : vector<64x1xi32>
    %c0_i32_37 = arith.constant 0 : i32
    %95 = vector.broadcast %c0_i32_37 : i32 to vector<64x1xi32>
    %96 = arith.cmpi ne, %94, %95 : vector<64x1xi32>
    %c0_i32_38 = arith.constant 0 : i32
    %97 = vector.broadcast %c0_i32_38 : i32 to vector<64x1xi32>
    %98 = arith.cmpi slt, %94, %97 : vector<64x1xi32>
    %c0_i32_39 = arith.constant 0 : i32
    %99 = arith.cmpi slt, %92, %c0_i32_39 : i32
    %100 = vector.broadcast %99 : i1 to vector<64x1xi1>
    %101 = vector.broadcast %100 : vector<64x1xi1> to vector<64x1xi1>
    %102 = arith.xori %98, %101 : vector<64x1xi1>
    %103 = arith.andi %102, %96 : vector<64x1xi1>
    %104 = vector.broadcast %92 : i32 to vector<64x1xi32>
    %105 = arith.addi %94, %104 : vector<64x1xi32>
    %106 = arith.select %103, %105, %94 : vector<64x1xi1>, vector<64x1xi32>
    %cst_40 = arith.constant 0.000000e+00 : f32
    %107 = vector.broadcast %cst_40 : f32 to vector<9x8xf32>
    %108 = vector.extract_strided_slice %89 {offsets = [0, 0], sizes = [55, 8], strides = [1, 1]} : vector<64x8xf32> to vector<55x8xf32>
    %109 = tpu.concatenate %107, %108 in 0 : vector<9x8xf32>, vector<55x8xf32> -> vector<64x8xf32>
    %c1_i32_41 = arith.constant 1 : i32
    %110 = vector.broadcast %c1_i32_41 : i32 to vector<64x1xi32>
    %111 = arith.cmpi sge, %106, %110 : vector<64x1xi32>
    %cst_42 = arith.constant 0.000000e+00 : f32
    %112 = vector.shape_cast %111 : vector<64x1xi1> to vector<64x1xi1>
    %113 = vector.broadcast %112 : vector<64x1xi1> to vector<64x8xi1>
    %114 = vector.broadcast %cst_42 : f32 to vector<64x8xf32>
    %115 = arith.select %113, %109, %114 : vector<64x8xi1>, vector<64x8xf32>
    %cst_43 = arith.constant 0.000000e+00 : f32
    %116 = vector.broadcast %cst_43 : f32 to vector<8x8xf32>
    %117 = vector.extract_strided_slice %89 {offsets = [0, 0], sizes = [56, 8], strides = [1, 1]} : vector<64x8xf32> to vector<56x8xf32>
    %118 = tpu.concatenate %116, %117 in 0 : vector<8x8xf32>, vector<56x8xf32> -> vector<64x8xf32>
    %cst_44 = arith.constant 0.000000e+00 : f32
    %119 = vector.broadcast %cst_44 : f32 to vector<7x8xf32>
    %120 = vector.extract_strided_slice %89 {offsets = [0, 0], sizes = [57, 8], strides = [1, 1]} : vector<64x8xf32> to vector<57x8xf32>
    %121 = tpu.concatenate %119, %120 in 0 : vector<7x8xf32>, vector<57x8xf32> -> vector<64x8xf32>
    %c7_i32 = arith.constant 7 : i32
    %122 = vector.broadcast %c7_i32 : i32 to vector<64x1xi32>
    %123 = arith.cmpi slt, %106, %122 : vector<64x1xi32>
    %cst_45 = arith.constant 0.000000e+00 : f32
    %124 = vector.shape_cast %123 : vector<64x1xi1> to vector<64x1xi1>
    %125 = vector.broadcast %124 : vector<64x1xi1> to vector<64x8xi1>
    %126 = vector.broadcast %cst_45 : f32 to vector<64x8xf32>
    %127 = arith.select %125, %121, %126 : vector<64x8xi1>, vector<64x8xf32>
    %cst_46 = arith.constant 0.000000e+00 : f32
    %128 = vector.broadcast %cst_46 : f32 to vector<1x8xf32>
    %129 = vector.extract_strided_slice %89 {offsets = [0, 0], sizes = [63, 8], strides = [1, 1]} : vector<64x8xf32> to vector<63x8xf32>
    %130 = tpu.concatenate %128, %129 in 0 : vector<1x8xf32>, vector<63x8xf32> -> vector<64x8xf32>
    %c1_i32_47 = arith.constant 1 : i32
    %131 = vector.broadcast %c1_i32_47 : i32 to vector<64x1xi32>
    %132 = arith.cmpi sge, %106, %131 : vector<64x1xi32>
    %cst_48 = arith.constant 0.000000e+00 : f32
    %133 = vector.shape_cast %132 : vector<64x1xi1> to vector<64x1xi1>
    %134 = vector.broadcast %133 : vector<64x1xi1> to vector<64x8xi1>
    %135 = vector.broadcast %cst_48 : f32 to vector<64x8xf32>
    %136 = arith.select %134, %130, %135 : vector<64x8xi1>, vector<64x8xf32>
    %cst_49 = arith.constant 0.000000e+00 : f32
    %137 = vector.broadcast %cst_49 : f32 to vector<1x8xf32>
    %138 = vector.extract_strided_slice %89 {offsets = [1, 0], sizes = [63, 8], strides = [1, 1]} : vector<64x8xf32> to vector<63x8xf32>
    %139 = tpu.concatenate %138, %137 in 0 : vector<63x8xf32>, vector<1x8xf32> -> vector<64x8xf32>
    %c7_i32_50 = arith.constant 7 : i32
    %140 = vector.broadcast %c7_i32_50 : i32 to vector<64x1xi32>
    %141 = arith.cmpi slt, %106, %140 : vector<64x1xi32>
    %cst_51 = arith.constant 0.000000e+00 : f32
    %142 = vector.shape_cast %141 : vector<64x1xi1> to vector<64x1xi1>
    %143 = vector.broadcast %142 : vector<64x1xi1> to vector<64x8xi1>
    %144 = vector.broadcast %cst_51 : f32 to vector<64x8xf32>
    %145 = arith.select %143, %139, %144 : vector<64x8xi1>, vector<64x8xf32>
    %cst_52 = arith.constant 0.000000e+00 : f32
    %146 = vector.broadcast %cst_52 : f32 to vector<7x8xf32>
    %147 = vector.extract_strided_slice %89 {offsets = [7, 0], sizes = [57, 8], strides = [1, 1]} : vector<64x8xf32> to vector<57x8xf32>
    %148 = tpu.concatenate %147, %146 in 0 : vector<57x8xf32>, vector<7x8xf32> -> vector<64x8xf32>
    %c1_i32_53 = arith.constant 1 : i32
    %149 = vector.broadcast %c1_i32_53 : i32 to vector<64x1xi32>
    %150 = arith.cmpi sge, %106, %149 : vector<64x1xi32>
    %cst_54 = arith.constant 0.000000e+00 : f32
    %151 = vector.shape_cast %150 : vector<64x1xi1> to vector<64x1xi1>
    %152 = vector.broadcast %151 : vector<64x1xi1> to vector<64x8xi1>
    %153 = vector.broadcast %cst_54 : f32 to vector<64x8xf32>
    %154 = arith.select %152, %148, %153 : vector<64x8xi1>, vector<64x8xf32>
    %cst_55 = arith.constant 0.000000e+00 : f32
    %155 = vector.broadcast %cst_55 : f32 to vector<8x8xf32>
    %156 = vector.extract_strided_slice %89 {offsets = [8, 0], sizes = [56, 8], strides = [1, 1]} : vector<64x8xf32> to vector<56x8xf32>
    %157 = tpu.concatenate %156, %155 in 0 : vector<56x8xf32>, vector<8x8xf32> -> vector<64x8xf32>
    %cst_56 = arith.constant 0.000000e+00 : f32
    %158 = vector.broadcast %cst_56 : f32 to vector<9x8xf32>
    %159 = vector.extract_strided_slice %89 {offsets = [9, 0], sizes = [55, 8], strides = [1, 1]} : vector<64x8xf32> to vector<55x8xf32>
    %160 = tpu.concatenate %159, %158 in 0 : vector<55x8xf32>, vector<9x8xf32> -> vector<64x8xf32>
    %c7_i32_57 = arith.constant 7 : i32
    %161 = vector.broadcast %c7_i32_57 : i32 to vector<64x1xi32>
    %162 = arith.cmpi slt, %106, %161 : vector<64x1xi32>
    %cst_58 = arith.constant 0.000000e+00 : f32
    %163 = vector.shape_cast %162 : vector<64x1xi1> to vector<64x1xi1>
    %164 = vector.broadcast %163 : vector<64x1xi1> to vector<64x8xi1>
    %165 = vector.broadcast %cst_58 : f32 to vector<64x8xf32>
    %166 = arith.select %164, %160, %165 : vector<64x8xi1>, vector<64x8xf32>
    %167 = tpu.concatenate %115, %118, %127, %136, %89, %145, %154, %157, %166 in 1 : vector<64x8xf32>, vector<64x8xf32>, vector<64x8xf32>, vector<64x8xf32>, vector<64x8xf32>, vector<64x8xf32>, vector<64x8xf32>, vector<64x8xf32>, vector<64x8xf32> -> vector<64x72xf32>
    %168 = arith.truncf %167 : vector<64x72xf32> to vector<64x72xbf16>
    %c0_59 = arith.constant 0 : index
    %c0_60 = arith.constant 0 : index
    %169 = vector.load %arg4[%c0_59, %c0_60] : memref<72x16xbf16, #tpu.memory_space<vmem>>, vector<72x16xbf16>
    %cst_61 = arith.constant dense<0.000000e+00> : vector<64x16xf32>
    %170 = tpu.matmul %168, %169, %cst_61 {dimension_numbers = #tpu.dot_dimension_numbers<[1], [0], [0], [1], [0, 0, 1, 1], [], []>} : vector<64x72xbf16>, vector<72x16xbf16>, vector<64x16xf32> -> vector<64x16xf32>
    %c0_62 = arith.constant 0 : index
    %c0_63 = arith.constant 0 : index
    %171 = vector.load %arg5[%c0_62, %c0_63] : memref<1x16xf32, #tpu.memory_space<vmem>>, vector<1x16xf32>
    %172 = vector.broadcast %171 : vector<1x16xf32> to vector<64x16xf32>
    %173 = arith.addf %170, %172 : vector<64x16xf32>
    %cst_64 = arith.constant 0.000000e+00 : f32
    %174 = vector.broadcast %cst_64 : f32 to vector<64x16xf32>
    %175 = arith.maximumf %173, %174 : vector<64x16xf32>
    %cst_65 = arith.constant 0.000000e+00 : f32
    %176 = vector.broadcast %cst_65 : f32 to vector<1x16xf32>
    %177 = vector.extract_strided_slice %175 {offsets = [1, 0], sizes = [63, 16], strides = [1, 1]} : vector<64x16xf32> to vector<63x16xf32>
    %178 = tpu.concatenate %177, %176 in 0 : vector<63x16xf32>, vector<1x16xf32> -> vector<64x16xf32>
    %179 = arith.maximumf %175, %178 : vector<64x16xf32>
    %cst_66 = arith.constant 0.000000e+00 : f32
    %180 = vector.broadcast %cst_66 : f32 to vector<8x16xf32>
    %181 = vector.extract_strided_slice %175 {offsets = [8, 0], sizes = [56, 16], strides = [1, 1]} : vector<64x16xf32> to vector<56x16xf32>
    %182 = tpu.concatenate %181, %180 in 0 : vector<56x16xf32>, vector<8x16xf32> -> vector<64x16xf32>
    %cst_67 = arith.constant 0.000000e+00 : f32
    %183 = vector.broadcast %cst_67 : f32 to vector<9x16xf32>
    %184 = vector.extract_strided_slice %175 {offsets = [9, 0], sizes = [55, 16], strides = [1, 1]} : vector<64x16xf32> to vector<55x16xf32>
    %185 = tpu.concatenate %184, %183 in 0 : vector<55x16xf32>, vector<9x16xf32> -> vector<64x16xf32>
    %186 = arith.maximumf %182, %185 : vector<64x16xf32>
    %187 = arith.maximumf %179, %186 : vector<64x16xf32>
    %c0_68 = arith.constant 0 : index
    %c0_69 = arith.constant 0 : index
    %188 = vector.load %arg25[%c0_68, %c0_69] : memref<16x64xf32, #tpu.memory_space<vmem>>, vector<16x64xf32>
    %cst_70 = arith.constant dense<0.000000e+00> : vector<16x16xf32>
    %189 = tpu.matmul %188, %187, %cst_70 {dimension_numbers = #tpu.dot_dimension_numbers<[1], [0], [0], [1], [0, 0, 1, 1], [], []>} : vector<16x64xf32>, vector<64x16xf32>, vector<16x16xf32> -> vector<16x16xf32>
    %190 = tpu.iota {dimensions = array<i32: 0>} : vector<16x1xi32>
    %c4_i32 = arith.constant 4 : i32
    %c0_i32_71 = arith.constant 0 : i32
    %191 = arith.cmpi eq, %c4_i32, %c0_i32_71 : i32
    %c1_i32_72 = arith.constant 1 : i32
    %192 = arith.select %191, %c1_i32_72, %c4_i32 : i32
    %193 = vector.broadcast %192 : i32 to vector<16x1xi32>
    %194 = arith.remsi %190, %193 : vector<16x1xi32>
    %c0_i32_73 = arith.constant 0 : i32
    %195 = vector.broadcast %c0_i32_73 : i32 to vector<16x1xi32>
    %196 = arith.cmpi ne, %194, %195 : vector<16x1xi32>
    %c0_i32_74 = arith.constant 0 : i32
    %197 = vector.broadcast %c0_i32_74 : i32 to vector<16x1xi32>
    %198 = arith.cmpi slt, %194, %197 : vector<16x1xi32>
    %c0_i32_75 = arith.constant 0 : i32
    %199 = arith.cmpi slt, %192, %c0_i32_75 : i32
    %200 = vector.broadcast %199 : i1 to vector<16x1xi1>
    %201 = vector.broadcast %200 : vector<16x1xi1> to vector<16x1xi1>
    %202 = arith.xori %198, %201 : vector<16x1xi1>
    %203 = arith.andi %202, %196 : vector<16x1xi1>
    %204 = vector.broadcast %192 : i32 to vector<16x1xi32>
    %205 = arith.addi %194, %204 : vector<16x1xi32>
    %206 = arith.select %203, %205, %194 : vector<16x1xi1>, vector<16x1xi32>
    %cst_76 = arith.constant 0.000000e+00 : f32
    %207 = vector.broadcast %cst_76 : f32 to vector<5x16xf32>
    %208 = vector.extract_strided_slice %189 {offsets = [0, 0], sizes = [11, 16], strides = [1, 1]} : vector<16x16xf32> to vector<11x16xf32>
    %209 = tpu.concatenate %207, %208 in 0 : vector<5x16xf32>, vector<11x16xf32> -> vector<16x16xf32>
    %c1_i32_77 = arith.constant 1 : i32
    %210 = vector.broadcast %c1_i32_77 : i32 to vector<16x1xi32>
    %211 = arith.cmpi sge, %206, %210 : vector<16x1xi32>
    %cst_78 = arith.constant 0.000000e+00 : f32
    %212 = vector.shape_cast %211 : vector<16x1xi1> to vector<16x1xi1>
    %213 = vector.broadcast %212 : vector<16x1xi1> to vector<16x16xi1>
    %214 = vector.broadcast %cst_78 : f32 to vector<16x16xf32>
    %215 = arith.select %213, %209, %214 : vector<16x16xi1>, vector<16x16xf32>
    %cst_79 = arith.constant 0.000000e+00 : f32
    %216 = vector.broadcast %cst_79 : f32 to vector<4x16xf32>
    %217 = vector.extract_strided_slice %189 {offsets = [0, 0], sizes = [12, 16], strides = [1, 1]} : vector<16x16xf32> to vector<12x16xf32>
    %218 = tpu.concatenate %216, %217 in 0 : vector<4x16xf32>, vector<12x16xf32> -> vector<16x16xf32>
    %cst_80 = arith.constant 0.000000e+00 : f32
    %219 = vector.broadcast %cst_80 : f32 to vector<3x16xf32>
    %220 = vector.extract_strided_slice %189 {offsets = [0, 0], sizes = [13, 16], strides = [1, 1]} : vector<16x16xf32> to vector<13x16xf32>
    %221 = tpu.concatenate %219, %220 in 0 : vector<3x16xf32>, vector<13x16xf32> -> vector<16x16xf32>
    %c3_i32 = arith.constant 3 : i32
    %222 = vector.broadcast %c3_i32 : i32 to vector<16x1xi32>
    %223 = arith.cmpi slt, %206, %222 : vector<16x1xi32>
    %cst_81 = arith.constant 0.000000e+00 : f32
    %224 = vector.shape_cast %223 : vector<16x1xi1> to vector<16x1xi1>
    %225 = vector.broadcast %224 : vector<16x1xi1> to vector<16x16xi1>
    %226 = vector.broadcast %cst_81 : f32 to vector<16x16xf32>
    %227 = arith.select %225, %221, %226 : vector<16x16xi1>, vector<16x16xf32>
    %cst_82 = arith.constant 0.000000e+00 : f32
    %228 = vector.broadcast %cst_82 : f32 to vector<1x16xf32>
    %229 = vector.extract_strided_slice %189 {offsets = [0, 0], sizes = [15, 16], strides = [1, 1]} : vector<16x16xf32> to vector<15x16xf32>
    %230 = tpu.concatenate %228, %229 in 0 : vector<1x16xf32>, vector<15x16xf32> -> vector<16x16xf32>
    %c1_i32_83 = arith.constant 1 : i32
    %231 = vector.broadcast %c1_i32_83 : i32 to vector<16x1xi32>
    %232 = arith.cmpi sge, %206, %231 : vector<16x1xi32>
    %cst_84 = arith.constant 0.000000e+00 : f32
    %233 = vector.shape_cast %232 : vector<16x1xi1> to vector<16x1xi1>
    %234 = vector.broadcast %233 : vector<16x1xi1> to vector<16x16xi1>
    %235 = vector.broadcast %cst_84 : f32 to vector<16x16xf32>
    %236 = arith.select %234, %230, %235 : vector<16x16xi1>, vector<16x16xf32>
    %cst_85 = arith.constant 0.000000e+00 : f32
    %237 = vector.broadcast %cst_85 : f32 to vector<1x16xf32>
    %238 = vector.extract_strided_slice %189 {offsets = [1, 0], sizes = [15, 16], strides = [1, 1]} : vector<16x16xf32> to vector<15x16xf32>
    %239 = tpu.concatenate %238, %237 in 0 : vector<15x16xf32>, vector<1x16xf32> -> vector<16x16xf32>
    %c3_i32_86 = arith.constant 3 : i32
    %240 = vector.broadcast %c3_i32_86 : i32 to vector<16x1xi32>
    %241 = arith.cmpi slt, %206, %240 : vector<16x1xi32>
    %cst_87 = arith.constant 0.000000e+00 : f32
    %242 = vector.shape_cast %241 : vector<16x1xi1> to vector<16x1xi1>
    %243 = vector.broadcast %242 : vector<16x1xi1> to vector<16x16xi1>
    %244 = vector.broadcast %cst_87 : f32 to vector<16x16xf32>
    %245 = arith.select %243, %239, %244 : vector<16x16xi1>, vector<16x16xf32>
    %cst_88 = arith.constant 0.000000e+00 : f32
    %246 = vector.broadcast %cst_88 : f32 to vector<3x16xf32>
    %247 = vector.extract_strided_slice %189 {offsets = [3, 0], sizes = [13, 16], strides = [1, 1]} : vector<16x16xf32> to vector<13x16xf32>
    %248 = tpu.concatenate %247, %246 in 0 : vector<13x16xf32>, vector<3x16xf32> -> vector<16x16xf32>
    %c1_i32_89 = arith.constant 1 : i32
    %249 = vector.broadcast %c1_i32_89 : i32 to vector<16x1xi32>
    %250 = arith.cmpi sge, %206, %249 : vector<16x1xi32>
    %cst_90 = arith.constant 0.000000e+00 : f32
    %251 = vector.shape_cast %250 : vector<16x1xi1> to vector<16x1xi1>
    %252 = vector.broadcast %251 : vector<16x1xi1> to vector<16x16xi1>
    %253 = vector.broadcast %cst_90 : f32 to vector<16x16xf32>
    %254 = arith.select %252, %248, %253 : vector<16x16xi1>, vector<16x16xf32>
    %cst_91 = arith.constant 0.000000e+00 : f32
    %255 = vector.broadcast %cst_91 : f32 to vector<4x16xf32>
    %256 = vector.extract_strided_slice %189 {offsets = [4, 0], sizes = [12, 16], strides = [1, 1]} : vector<16x16xf32> to vector<12x16xf32>
    %257 = tpu.concatenate %256, %255 in 0 : vector<12x16xf32>, vector<4x16xf32> -> vector<16x16xf32>
    %cst_92 = arith.constant 0.000000e+00 : f32
    %258 = vector.broadcast %cst_92 : f32 to vector<5x16xf32>
    %259 = vector.extract_strided_slice %189 {offsets = [5, 0], sizes = [11, 16], strides = [1, 1]} : vector<16x16xf32> to vector<11x16xf32>
    %260 = tpu.concatenate %259, %258 in 0 : vector<11x16xf32>, vector<5x16xf32> -> vector<16x16xf32>
    %c3_i32_93 = arith.constant 3 : i32
    %261 = vector.broadcast %c3_i32_93 : i32 to vector<16x1xi32>
    %262 = arith.cmpi slt, %206, %261 : vector<16x1xi32>
    %cst_94 = arith.constant 0.000000e+00 : f32
    %263 = vector.shape_cast %262 : vector<16x1xi1> to vector<16x1xi1>
    %264 = vector.broadcast %263 : vector<16x1xi1> to vector<16x16xi1>
    %265 = vector.broadcast %cst_94 : f32 to vector<16x16xf32>
    %266 = arith.select %264, %260, %265 : vector<16x16xi1>, vector<16x16xf32>
    %267 = tpu.concatenate %215, %218, %227, %236, %189, %245, %254, %257, %266 in 1 : vector<16x16xf32>, vector<16x16xf32>, vector<16x16xf32>, vector<16x16xf32>, vector<16x16xf32>, vector<16x16xf32>, vector<16x16xf32>, vector<16x16xf32>, vector<16x16xf32> -> vector<16x144xf32>
    %268 = arith.truncf %267 : vector<16x144xf32> to vector<16x144xbf16>
    %c0_95 = arith.constant 0 : index
    %c0_96 = arith.constant 0 : index
    %269 = vector.load %arg6[%c0_95, %c0_96] : memref<144x32xbf16, #tpu.memory_space<vmem>>, vector<144x32xbf16>
    %cst_97 = arith.constant dense<0.000000e+00> : vector<16x32xf32>
    %270 = tpu.matmul %268, %269, %cst_97 {dimension_numbers = #tpu.dot_dimension_numbers<[1], [0], [0], [1], [0, 0, 1, 1], [], []>} : vector<16x144xbf16>, vector<144x32xbf16>, vector<16x32xf32> -> vector<16x32xf32>
    %c0_98 = arith.constant 0 : index
    %c0_99 = arith.constant 0 : index
    %271 = vector.load %arg7[%c0_98, %c0_99] : memref<1x32xf32, #tpu.memory_space<vmem>>, vector<1x32xf32>
    %272 = vector.broadcast %271 : vector<1x32xf32> to vector<16x32xf32>
    %273 = arith.addf %270, %272 : vector<16x32xf32>
    %cst_100 = arith.constant 0.000000e+00 : f32
    %274 = vector.broadcast %cst_100 : f32 to vector<16x32xf32>
    %275 = arith.maximumf %273, %274 : vector<16x32xf32>
    %cst_101 = arith.constant 0.000000e+00 : f32
    %276 = vector.broadcast %cst_101 : f32 to vector<1x32xf32>
    %277 = vector.extract_strided_slice %275 {offsets = [1, 0], sizes = [15, 32], strides = [1, 1]} : vector<16x32xf32> to vector<15x32xf32>
    %278 = tpu.concatenate %277, %276 in 0 : vector<15x32xf32>, vector<1x32xf32> -> vector<16x32xf32>
    %279 = arith.maximumf %275, %278 : vector<16x32xf32>
    %cst_102 = arith.constant 0.000000e+00 : f32
    %280 = vector.broadcast %cst_102 : f32 to vector<4x32xf32>
    %281 = vector.extract_strided_slice %275 {offsets = [4, 0], sizes = [12, 32], strides = [1, 1]} : vector<16x32xf32> to vector<12x32xf32>
    %282 = tpu.concatenate %281, %280 in 0 : vector<12x32xf32>, vector<4x32xf32> -> vector<16x32xf32>
    %cst_103 = arith.constant 0.000000e+00 : f32
    %283 = vector.broadcast %cst_103 : f32 to vector<5x32xf32>
    %284 = vector.extract_strided_slice %275 {offsets = [5, 0], sizes = [11, 32], strides = [1, 1]} : vector<16x32xf32> to vector<11x32xf32>
    %285 = tpu.concatenate %284, %283 in 0 : vector<11x32xf32>, vector<5x32xf32> -> vector<16x32xf32>
    %286 = arith.maximumf %282, %285 : vector<16x32xf32>
    %287 = arith.maximumf %279, %286 : vector<16x32xf32>
    %c0_104 = arith.constant 0 : index
    %c0_105 = arith.constant 0 : index
    %288 = vector.load %arg26[%c0_104, %c0_105] : memref<4x16xf32, #tpu.memory_space<vmem>>, vector<4x16xf32>
    %cst_106 = arith.constant dense<0.000000e+00> : vector<4x32xf32>
    %289 = tpu.matmul %288, %287, %cst_106 {dimension_numbers = #tpu.dot_dimension_numbers<[1], [0], [0], [1], [0, 0, 1, 1], [], []>} : vector<4x16xf32>, vector<16x32xf32>, vector<4x32xf32> -> vector<4x32xf32>
    %290 = tpu.iota {dimensions = array<i32: 0>} : vector<4x1xi32>
    %c2_i32 = arith.constant 2 : i32
    %c0_i32_107 = arith.constant 0 : i32
    %291 = arith.cmpi eq, %c2_i32, %c0_i32_107 : i32
    %c1_i32_108 = arith.constant 1 : i32
    %292 = arith.select %291, %c1_i32_108, %c2_i32 : i32
    %293 = vector.broadcast %292 : i32 to vector<4x1xi32>
    %294 = arith.remsi %290, %293 : vector<4x1xi32>
    %c0_i32_109 = arith.constant 0 : i32
    %295 = vector.broadcast %c0_i32_109 : i32 to vector<4x1xi32>
    %296 = arith.cmpi ne, %294, %295 : vector<4x1xi32>
    %c0_i32_110 = arith.constant 0 : i32
    %297 = vector.broadcast %c0_i32_110 : i32 to vector<4x1xi32>
    %298 = arith.cmpi slt, %294, %297 : vector<4x1xi32>
    %c0_i32_111 = arith.constant 0 : i32
    %299 = arith.cmpi slt, %292, %c0_i32_111 : i32
    %300 = vector.broadcast %299 : i1 to vector<4x1xi1>
    %301 = vector.broadcast %300 : vector<4x1xi1> to vector<4x1xi1>
    %302 = arith.xori %298, %301 : vector<4x1xi1>
    %303 = arith.andi %302, %296 : vector<4x1xi1>
    %304 = vector.broadcast %292 : i32 to vector<4x1xi32>
    %305 = arith.addi %294, %304 : vector<4x1xi32>
    %306 = arith.select %303, %305, %294 : vector<4x1xi1>, vector<4x1xi32>
    %cst_112 = arith.constant 0.000000e+00 : f32
    %307 = vector.broadcast %cst_112 : f32 to vector<3x32xf32>
    %308 = vector.extract_strided_slice %289 {offsets = [0, 0], sizes = [1, 32], strides = [1, 1]} : vector<4x32xf32> to vector<1x32xf32>
    %309 = tpu.concatenate %307, %308 in 0 : vector<3x32xf32>, vector<1x32xf32> -> vector<4x32xf32>
    %c1_i32_113 = arith.constant 1 : i32
    %310 = vector.broadcast %c1_i32_113 : i32 to vector<4x1xi32>
    %311 = arith.cmpi sge, %306, %310 : vector<4x1xi32>
    %cst_114 = arith.constant 0.000000e+00 : f32
    %312 = vector.shape_cast %311 : vector<4x1xi1> to vector<4x1xi1>
    %313 = vector.broadcast %312 : vector<4x1xi1> to vector<4x32xi1>
    %314 = vector.broadcast %cst_114 : f32 to vector<4x32xf32>
    %315 = arith.select %313, %309, %314 : vector<4x32xi1>, vector<4x32xf32>
    %cst_115 = arith.constant 0.000000e+00 : f32
    %316 = vector.broadcast %cst_115 : f32 to vector<2x32xf32>
    %317 = vector.extract_strided_slice %289 {offsets = [0, 0], sizes = [2, 32], strides = [1, 1]} : vector<4x32xf32> to vector<2x32xf32>
    %318 = tpu.concatenate %316, %317 in 0 : vector<2x32xf32>, vector<2x32xf32> -> vector<4x32xf32>
    %cst_116 = arith.constant 0.000000e+00 : f32
    %319 = vector.broadcast %cst_116 : f32 to vector<1x32xf32>
    %320 = vector.extract_strided_slice %289 {offsets = [0, 0], sizes = [3, 32], strides = [1, 1]} : vector<4x32xf32> to vector<3x32xf32>
    %321 = tpu.concatenate %319, %320 in 0 : vector<1x32xf32>, vector<3x32xf32> -> vector<4x32xf32>
    %c1_i32_117 = arith.constant 1 : i32
    %322 = vector.broadcast %c1_i32_117 : i32 to vector<4x1xi32>
    %323 = arith.cmpi slt, %306, %322 : vector<4x1xi32>
    %cst_118 = arith.constant 0.000000e+00 : f32
    %324 = vector.shape_cast %323 : vector<4x1xi1> to vector<4x1xi1>
    %325 = vector.broadcast %324 : vector<4x1xi1> to vector<4x32xi1>
    %326 = vector.broadcast %cst_118 : f32 to vector<4x32xf32>
    %327 = arith.select %325, %321, %326 : vector<4x32xi1>, vector<4x32xf32>
    %cst_119 = arith.constant 0.000000e+00 : f32
    %328 = vector.broadcast %cst_119 : f32 to vector<1x32xf32>
    %329 = vector.extract_strided_slice %289 {offsets = [0, 0], sizes = [3, 32], strides = [1, 1]} : vector<4x32xf32> to vector<3x32xf32>
    %330 = tpu.concatenate %328, %329 in 0 : vector<1x32xf32>, vector<3x32xf32> -> vector<4x32xf32>
    %c1_i32_120 = arith.constant 1 : i32
    %331 = vector.broadcast %c1_i32_120 : i32 to vector<4x1xi32>
    %332 = arith.cmpi sge, %306, %331 : vector<4x1xi32>
    %cst_121 = arith.constant 0.000000e+00 : f32
    %333 = vector.shape_cast %332 : vector<4x1xi1> to vector<4x1xi1>
    %334 = vector.broadcast %333 : vector<4x1xi1> to vector<4x32xi1>
    %335 = vector.broadcast %cst_121 : f32 to vector<4x32xf32>
    %336 = arith.select %334, %330, %335 : vector<4x32xi1>, vector<4x32xf32>
    %cst_122 = arith.constant 0.000000e+00 : f32
    %337 = vector.broadcast %cst_122 : f32 to vector<1x32xf32>
    %338 = vector.extract_strided_slice %289 {offsets = [1, 0], sizes = [3, 32], strides = [1, 1]} : vector<4x32xf32> to vector<3x32xf32>
    %339 = tpu.concatenate %338, %337 in 0 : vector<3x32xf32>, vector<1x32xf32> -> vector<4x32xf32>
    %c1_i32_123 = arith.constant 1 : i32
    %340 = vector.broadcast %c1_i32_123 : i32 to vector<4x1xi32>
    %341 = arith.cmpi slt, %306, %340 : vector<4x1xi32>
    %cst_124 = arith.constant 0.000000e+00 : f32
    %342 = vector.shape_cast %341 : vector<4x1xi1> to vector<4x1xi1>
    %343 = vector.broadcast %342 : vector<4x1xi1> to vector<4x32xi1>
    %344 = vector.broadcast %cst_124 : f32 to vector<4x32xf32>
    %345 = arith.select %343, %339, %344 : vector<4x32xi1>, vector<4x32xf32>
    %cst_125 = arith.constant 0.000000e+00 : f32
    %346 = vector.broadcast %cst_125 : f32 to vector<1x32xf32>
    %347 = vector.extract_strided_slice %289 {offsets = [1, 0], sizes = [3, 32], strides = [1, 1]} : vector<4x32xf32> to vector<3x32xf32>
    %348 = tpu.concatenate %347, %346 in 0 : vector<3x32xf32>, vector<1x32xf32> -> vector<4x32xf32>
    %c1_i32_126 = arith.constant 1 : i32
    %349 = vector.broadcast %c1_i32_126 : i32 to vector<4x1xi32>
    %350 = arith.cmpi sge, %306, %349 : vector<4x1xi32>
    %cst_127 = arith.constant 0.000000e+00 : f32
    %351 = vector.shape_cast %350 : vector<4x1xi1> to vector<4x1xi1>
    %352 = vector.broadcast %351 : vector<4x1xi1> to vector<4x32xi1>
    %353 = vector.broadcast %cst_127 : f32 to vector<4x32xf32>
    %354 = arith.select %352, %348, %353 : vector<4x32xi1>, vector<4x32xf32>
    %cst_128 = arith.constant 0.000000e+00 : f32
    %355 = vector.broadcast %cst_128 : f32 to vector<2x32xf32>
    %356 = vector.extract_strided_slice %289 {offsets = [2, 0], sizes = [2, 32], strides = [1, 1]} : vector<4x32xf32> to vector<2x32xf32>
    %357 = tpu.concatenate %356, %355 in 0 : vector<2x32xf32>, vector<2x32xf32> -> vector<4x32xf32>
    %cst_129 = arith.constant 0.000000e+00 : f32
    %358 = vector.broadcast %cst_129 : f32 to vector<3x32xf32>
    %359 = vector.extract_strided_slice %289 {offsets = [3, 0], sizes = [1, 32], strides = [1, 1]} : vector<4x32xf32> to vector<1x32xf32>
    %360 = tpu.concatenate %359, %358 in 0 : vector<1x32xf32>, vector<3x32xf32> -> vector<4x32xf32>
    %c1_i32_130 = arith.constant 1 : i32
    %361 = vector.broadcast %c1_i32_130 : i32 to vector<4x1xi32>
    %362 = arith.cmpi slt, %306, %361 : vector<4x1xi32>
    %cst_131 = arith.constant 0.000000e+00 : f32
    %363 = vector.shape_cast %362 : vector<4x1xi1> to vector<4x1xi1>
    %364 = vector.broadcast %363 : vector<4x1xi1> to vector<4x32xi1>
    %365 = vector.broadcast %cst_131 : f32 to vector<4x32xf32>
    %366 = arith.select %364, %360, %365 : vector<4x32xi1>, vector<4x32xf32>
    %367 = tpu.concatenate %315, %318, %327, %336, %289, %345, %354, %357, %366 in 1 : vector<4x32xf32>, vector<4x32xf32>, vector<4x32xf32>, vector<4x32xf32>, vector<4x32xf32>, vector<4x32xf32>, vector<4x32xf32>, vector<4x32xf32>, vector<4x32xf32> -> vector<4x288xf32>
    %368 = arith.truncf %367 : vector<4x288xf32> to vector<4x288xbf16>
    %c0_132 = arith.constant 0 : index
    %c0_133 = arith.constant 0 : index
    %369 = vector.load %arg8[%c0_132, %c0_133] : memref<288x64xbf16, #tpu.memory_space<vmem>>, vector<288x64xbf16>
    %cst_134 = arith.constant dense<0.000000e+00> : vector<4x64xf32>
    %370 = tpu.matmul %368, %369, %cst_134 {dimension_numbers = #tpu.dot_dimension_numbers<[1], [0], [0], [1], [0, 0, 1, 1], [], []>} : vector<4x288xbf16>, vector<288x64xbf16>, vector<4x64xf32> -> vector<4x64xf32>
    %c0_135 = arith.constant 0 : index
    %c0_136 = arith.constant 0 : index
    %371 = vector.load %arg9[%c0_135, %c0_136] : memref<1x64xf32, #tpu.memory_space<vmem>>, vector<1x64xf32>
    %372 = vector.broadcast %371 : vector<1x64xf32> to vector<4x64xf32>
    %373 = arith.addf %370, %372 : vector<4x64xf32>
    %cst_137 = arith.constant 0.000000e+00 : f32
    %374 = vector.broadcast %cst_137 : f32 to vector<4x64xf32>
    %375 = arith.maximumf %373, %374 : vector<4x64xf32>
    %376 = arith.truncf %375 : vector<4x64xf32> to vector<4x64xbf16>
    %c0_138 = arith.constant 0 : index
    %c0_139 = arith.constant 0 : index
    %377 = vector.load %arg10[%c0_138, %c0_139] : memref<64x32xbf16, #tpu.memory_space<vmem>>, vector<64x32xbf16>
    %cst_140 = arith.constant dense<0.000000e+00> : vector<4x32xf32>
    %378 = tpu.matmul %376, %377, %cst_140 {dimension_numbers = #tpu.dot_dimension_numbers<[1], [0], [0], [1], [0, 0, 1, 1], [], []>} : vector<4x64xbf16>, vector<64x32xbf16>, vector<4x32xf32> -> vector<4x32xf32>
    %c0_141 = arith.constant 0 : index
    %c0_142 = arith.constant 0 : index
    %379 = vector.load %arg11[%c0_141, %c0_142] : memref<1x32xf32, #tpu.memory_space<vmem>>, vector<1x32xf32>
    %380 = vector.broadcast %379 : vector<1x32xf32> to vector<4x32xf32>
    %381 = arith.addf %378, %380 : vector<4x32xf32>
    %c0_143 = arith.constant 0 : index
    %c0_144 = arith.constant 0 : index
    %382 = vector.load %arg27[%c0_143, %c0_144] : memref<16x4xf32, #tpu.memory_space<vmem>>, vector<16x4xf32>
    %cst_145 = arith.constant dense<0.000000e+00> : vector<16x32xf32>
    %383 = tpu.matmul %382, %381, %cst_145 {dimension_numbers = #tpu.dot_dimension_numbers<[1], [0], [0], [1], [0, 0, 1, 1], [], []>} : vector<16x4xf32>, vector<4x32xf32>, vector<16x32xf32> -> vector<16x32xf32>
    %384 = tpu.concatenate %275, %383 in 1 : vector<16x32xf32>, vector<16x32xf32> -> vector<16x64xf32>
    %385 = tpu.iota {dimensions = array<i32: 0>} : vector<16x1xi32>
    %c4_i32_146 = arith.constant 4 : i32
    %c0_i32_147 = arith.constant 0 : i32
    %386 = arith.cmpi eq, %c4_i32_146, %c0_i32_147 : i32
    %c1_i32_148 = arith.constant 1 : i32
    %387 = arith.select %386, %c1_i32_148, %c4_i32_146 : i32
    %388 = vector.broadcast %387 : i32 to vector<16x1xi32>
    %389 = arith.remsi %385, %388 : vector<16x1xi32>
    %c0_i32_149 = arith.constant 0 : i32
    %390 = vector.broadcast %c0_i32_149 : i32 to vector<16x1xi32>
    %391 = arith.cmpi ne, %389, %390 : vector<16x1xi32>
    %c0_i32_150 = arith.constant 0 : i32
    %392 = vector.broadcast %c0_i32_150 : i32 to vector<16x1xi32>
    %393 = arith.cmpi slt, %389, %392 : vector<16x1xi32>
    %c0_i32_151 = arith.constant 0 : i32
    %394 = arith.cmpi slt, %387, %c0_i32_151 : i32
    %395 = vector.broadcast %394 : i1 to vector<16x1xi1>
    %396 = vector.broadcast %395 : vector<16x1xi1> to vector<16x1xi1>
    %397 = arith.xori %393, %396 : vector<16x1xi1>
    %398 = arith.andi %397, %391 : vector<16x1xi1>
    %399 = vector.broadcast %387 : i32 to vector<16x1xi32>
    %400 = arith.addi %389, %399 : vector<16x1xi32>
    %401 = arith.select %398, %400, %389 : vector<16x1xi1>, vector<16x1xi32>
    %cst_152 = arith.constant 0.000000e+00 : f32
    %402 = vector.broadcast %cst_152 : f32 to vector<5x64xf32>
    %403 = vector.extract_strided_slice %384 {offsets = [0, 0], sizes = [11, 64], strides = [1, 1]} : vector<16x64xf32> to vector<11x64xf32>
    %404 = tpu.concatenate %402, %403 in 0 : vector<5x64xf32>, vector<11x64xf32> -> vector<16x64xf32>
    %c1_i32_153 = arith.constant 1 : i32
    %405 = vector.broadcast %c1_i32_153 : i32 to vector<16x1xi32>
    %406 = arith.cmpi sge, %401, %405 : vector<16x1xi32>
    %cst_154 = arith.constant 0.000000e+00 : f32
    %407 = vector.shape_cast %406 : vector<16x1xi1> to vector<16x1xi1>
    %408 = vector.broadcast %407 : vector<16x1xi1> to vector<16x64xi1>
    %409 = vector.broadcast %cst_154 : f32 to vector<16x64xf32>
    %410 = arith.select %408, %404, %409 : vector<16x64xi1>, vector<16x64xf32>
    %cst_155 = arith.constant 0.000000e+00 : f32
    %411 = vector.broadcast %cst_155 : f32 to vector<4x64xf32>
    %412 = vector.extract_strided_slice %384 {offsets = [0, 0], sizes = [12, 64], strides = [1, 1]} : vector<16x64xf32> to vector<12x64xf32>
    %413 = tpu.concatenate %411, %412 in 0 : vector<4x64xf32>, vector<12x64xf32> -> vector<16x64xf32>
    %cst_156 = arith.constant 0.000000e+00 : f32
    %414 = vector.broadcast %cst_156 : f32 to vector<3x64xf32>
    %415 = vector.extract_strided_slice %384 {offsets = [0, 0], sizes = [13, 64], strides = [1, 1]} : vector<16x64xf32> to vector<13x64xf32>
    %416 = tpu.concatenate %414, %415 in 0 : vector<3x64xf32>, vector<13x64xf32> -> vector<16x64xf32>
    %c3_i32_157 = arith.constant 3 : i32
    %417 = vector.broadcast %c3_i32_157 : i32 to vector<16x1xi32>
    %418 = arith.cmpi slt, %401, %417 : vector<16x1xi32>
    %cst_158 = arith.constant 0.000000e+00 : f32
    %419 = vector.shape_cast %418 : vector<16x1xi1> to vector<16x1xi1>
    %420 = vector.broadcast %419 : vector<16x1xi1> to vector<16x64xi1>
    %421 = vector.broadcast %cst_158 : f32 to vector<16x64xf32>
    %422 = arith.select %420, %416, %421 : vector<16x64xi1>, vector<16x64xf32>
    %cst_159 = arith.constant 0.000000e+00 : f32
    %423 = vector.broadcast %cst_159 : f32 to vector<1x64xf32>
    %424 = vector.extract_strided_slice %384 {offsets = [0, 0], sizes = [15, 64], strides = [1, 1]} : vector<16x64xf32> to vector<15x64xf32>
    %425 = tpu.concatenate %423, %424 in 0 : vector<1x64xf32>, vector<15x64xf32> -> vector<16x64xf32>
    %c1_i32_160 = arith.constant 1 : i32
    %426 = vector.broadcast %c1_i32_160 : i32 to vector<16x1xi32>
    %427 = arith.cmpi sge, %401, %426 : vector<16x1xi32>
    %cst_161 = arith.constant 0.000000e+00 : f32
    %428 = vector.shape_cast %427 : vector<16x1xi1> to vector<16x1xi1>
    %429 = vector.broadcast %428 : vector<16x1xi1> to vector<16x64xi1>
    %430 = vector.broadcast %cst_161 : f32 to vector<16x64xf32>
    %431 = arith.select %429, %425, %430 : vector<16x64xi1>, vector<16x64xf32>
    %cst_162 = arith.constant 0.000000e+00 : f32
    %432 = vector.broadcast %cst_162 : f32 to vector<1x64xf32>
    %433 = vector.extract_strided_slice %384 {offsets = [1, 0], sizes = [15, 64], strides = [1, 1]} : vector<16x64xf32> to vector<15x64xf32>
    %434 = tpu.concatenate %433, %432 in 0 : vector<15x64xf32>, vector<1x64xf32> -> vector<16x64xf32>
    %c3_i32_163 = arith.constant 3 : i32
    %435 = vector.broadcast %c3_i32_163 : i32 to vector<16x1xi32>
    %436 = arith.cmpi slt, %401, %435 : vector<16x1xi32>
    %cst_164 = arith.constant 0.000000e+00 : f32
    %437 = vector.shape_cast %436 : vector<16x1xi1> to vector<16x1xi1>
    %438 = vector.broadcast %437 : vector<16x1xi1> to vector<16x64xi1>
    %439 = vector.broadcast %cst_164 : f32 to vector<16x64xf32>
    %440 = arith.select %438, %434, %439 : vector<16x64xi1>, vector<16x64xf32>
    %cst_165 = arith.constant 0.000000e+00 : f32
    %441 = vector.broadcast %cst_165 : f32 to vector<3x64xf32>
    %442 = vector.extract_strided_slice %384 {offsets = [3, 0], sizes = [13, 64], strides = [1, 1]} : vector<16x64xf32> to vector<13x64xf32>
    %443 = tpu.concatenate %442, %441 in 0 : vector<13x64xf32>, vector<3x64xf32> -> vector<16x64xf32>
    %c1_i32_166 = arith.constant 1 : i32
    %444 = vector.broadcast %c1_i32_166 : i32 to vector<16x1xi32>
    %445 = arith.cmpi sge, %401, %444 : vector<16x1xi32>
    %cst_167 = arith.constant 0.000000e+00 : f32
    %446 = vector.shape_cast %445 : vector<16x1xi1> to vector<16x1xi1>
    %447 = vector.broadcast %446 : vector<16x1xi1> to vector<16x64xi1>
    %448 = vector.broadcast %cst_167 : f32 to vector<16x64xf32>
    %449 = arith.select %447, %443, %448 : vector<16x64xi1>, vector<16x64xf32>
    %cst_168 = arith.constant 0.000000e+00 : f32
    %450 = vector.broadcast %cst_168 : f32 to vector<4x64xf32>
    %451 = vector.extract_strided_slice %384 {offsets = [4, 0], sizes = [12, 64], strides = [1, 1]} : vector<16x64xf32> to vector<12x64xf32>
    %452 = tpu.concatenate %451, %450 in 0 : vector<12x64xf32>, vector<4x64xf32> -> vector<16x64xf32>
    %cst_169 = arith.constant 0.000000e+00 : f32
    %453 = vector.broadcast %cst_169 : f32 to vector<5x64xf32>
    %454 = vector.extract_strided_slice %384 {offsets = [5, 0], sizes = [11, 64], strides = [1, 1]} : vector<16x64xf32> to vector<11x64xf32>
    %455 = tpu.concatenate %454, %453 in 0 : vector<11x64xf32>, vector<5x64xf32> -> vector<16x64xf32>
    %c3_i32_170 = arith.constant 3 : i32
    %456 = vector.broadcast %c3_i32_170 : i32 to vector<16x1xi32>
    %457 = arith.cmpi slt, %401, %456 : vector<16x1xi32>
    %cst_171 = arith.constant 0.000000e+00 : f32
    %458 = vector.shape_cast %457 : vector<16x1xi1> to vector<16x1xi1>
    %459 = vector.broadcast %458 : vector<16x1xi1> to vector<16x64xi1>
    %460 = vector.broadcast %cst_171 : f32 to vector<16x64xf32>
    %461 = arith.select %459, %455, %460 : vector<16x64xi1>, vector<16x64xf32>
    %462 = tpu.concatenate %410, %413, %422, %431, %384, %440, %449, %452, %461 in 1 : vector<16x64xf32>, vector<16x64xf32>, vector<16x64xf32>, vector<16x64xf32>, vector<16x64xf32>, vector<16x64xf32>, vector<16x64xf32>, vector<16x64xf32>, vector<16x64xf32> -> vector<16x576xf32>
    %463 = arith.truncf %462 : vector<16x576xf32> to vector<16x576xbf16>
    %c0_172 = arith.constant 0 : index
    %c0_173 = arith.constant 0 : index
    %464 = vector.load %arg12[%c0_172, %c0_173] : memref<576x32xbf16, #tpu.memory_space<vmem>>, vector<576x32xbf16>
    %cst_174 = arith.constant dense<0.000000e+00> : vector<16x32xf32>
    %465 = tpu.matmul %463, %464, %cst_174 {dimension_numbers = #tpu.dot_dimension_numbers<[1], [0], [0], [1], [0, 0, 1, 1], [], []>} : vector<16x576xbf16>, vector<576x32xbf16>, vector<16x32xf32> -> vector<16x32xf32>
    %c0_175 = arith.constant 0 : index
    %c0_176 = arith.constant 0 : index
    %466 = vector.load %arg13[%c0_175, %c0_176] : memref<1x32xf32, #tpu.memory_space<vmem>>, vector<1x32xf32>
    %467 = vector.broadcast %466 : vector<1x32xf32> to vector<16x32xf32>
    %468 = arith.addf %465, %467 : vector<16x32xf32>
    %cst_177 = arith.constant 0.000000e+00 : f32
    %469 = vector.broadcast %cst_177 : f32 to vector<16x32xf32>
    %470 = arith.maximumf %468, %469 : vector<16x32xf32>
    %471 = arith.truncf %470 : vector<16x32xf32> to vector<16x32xbf16>
    %c0_178 = arith.constant 0 : index
    %c0_179 = arith.constant 0 : index
    %472 = vector.load %arg14[%c0_178, %c0_179] : memref<32x16xbf16, #tpu.memory_space<vmem>>, vector<32x16xbf16>
    %cst_180 = arith.constant dense<0.000000e+00> : vector<16x16xf32>
    %473 = tpu.matmul %471, %472, %cst_180 {dimension_numbers = #tpu.dot_dimension_numbers<[1], [0], [0], [1], [0, 0, 1, 1], [], []>} : vector<16x32xbf16>, vector<32x16xbf16>, vector<16x16xf32> -> vector<16x16xf32>
    %c0_181 = arith.constant 0 : index
    %c0_182 = arith.constant 0 : index
    %474 = vector.load %arg15[%c0_181, %c0_182] : memref<1x16xf32, #tpu.memory_space<vmem>>, vector<1x16xf32>
    %475 = vector.broadcast %474 : vector<1x16xf32> to vector<16x16xf32>
    %476 = arith.addf %473, %475 : vector<16x16xf32>
    %c0_183 = arith.constant 0 : index
    %c0_184 = arith.constant 0 : index
    %477 = vector.load %arg28[%c0_183, %c0_184] : memref<64x16xf32, #tpu.memory_space<vmem>>, vector<64x16xf32>
    %cst_185 = arith.constant dense<0.000000e+00> : vector<64x16xf32>
    %478 = tpu.matmul %477, %476, %cst_185 {dimension_numbers = #tpu.dot_dimension_numbers<[1], [0], [0], [1], [0, 0, 1, 1], [], []>} : vector<64x16xf32>, vector<16x16xf32>, vector<64x16xf32> -> vector<64x16xf32>
    %479 = tpu.concatenate %175, %478 in 1 : vector<64x16xf32>, vector<64x16xf32> -> vector<64x32xf32>
    %480 = tpu.iota {dimensions = array<i32: 0>} : vector<64x1xi32>
    %c8_i32_186 = arith.constant 8 : i32
    %c0_i32_187 = arith.constant 0 : i32
    %481 = arith.cmpi eq, %c8_i32_186, %c0_i32_187 : i32
    %c1_i32_188 = arith.constant 1 : i32
    %482 = arith.select %481, %c1_i32_188, %c8_i32_186 : i32
    %483 = vector.broadcast %482 : i32 to vector<64x1xi32>
    %484 = arith.remsi %480, %483 : vector<64x1xi32>
    %c0_i32_189 = arith.constant 0 : i32
    %485 = vector.broadcast %c0_i32_189 : i32 to vector<64x1xi32>
    %486 = arith.cmpi ne, %484, %485 : vector<64x1xi32>
    %c0_i32_190 = arith.constant 0 : i32
    %487 = vector.broadcast %c0_i32_190 : i32 to vector<64x1xi32>
    %488 = arith.cmpi slt, %484, %487 : vector<64x1xi32>
    %c0_i32_191 = arith.constant 0 : i32
    %489 = arith.cmpi slt, %482, %c0_i32_191 : i32
    %490 = vector.broadcast %489 : i1 to vector<64x1xi1>
    %491 = vector.broadcast %490 : vector<64x1xi1> to vector<64x1xi1>
    %492 = arith.xori %488, %491 : vector<64x1xi1>
    %493 = arith.andi %492, %486 : vector<64x1xi1>
    %494 = vector.broadcast %482 : i32 to vector<64x1xi32>
    %495 = arith.addi %484, %494 : vector<64x1xi32>
    %496 = arith.select %493, %495, %484 : vector<64x1xi1>, vector<64x1xi32>
    %cst_192 = arith.constant 0.000000e+00 : f32
    %497 = vector.broadcast %cst_192 : f32 to vector<9x32xf32>
    %498 = vector.extract_strided_slice %479 {offsets = [0, 0], sizes = [55, 32], strides = [1, 1]} : vector<64x32xf32> to vector<55x32xf32>
    %499 = tpu.concatenate %497, %498 in 0 : vector<9x32xf32>, vector<55x32xf32> -> vector<64x32xf32>
    %c1_i32_193 = arith.constant 1 : i32
    %500 = vector.broadcast %c1_i32_193 : i32 to vector<64x1xi32>
    %501 = arith.cmpi sge, %496, %500 : vector<64x1xi32>
    %cst_194 = arith.constant 0.000000e+00 : f32
    %502 = vector.shape_cast %501 : vector<64x1xi1> to vector<64x1xi1>
    %503 = vector.broadcast %502 : vector<64x1xi1> to vector<64x32xi1>
    %504 = vector.broadcast %cst_194 : f32 to vector<64x32xf32>
    %505 = arith.select %503, %499, %504 : vector<64x32xi1>, vector<64x32xf32>
    %cst_195 = arith.constant 0.000000e+00 : f32
    %506 = vector.broadcast %cst_195 : f32 to vector<8x32xf32>
    %507 = vector.extract_strided_slice %479 {offsets = [0, 0], sizes = [56, 32], strides = [1, 1]} : vector<64x32xf32> to vector<56x32xf32>
    %508 = tpu.concatenate %506, %507 in 0 : vector<8x32xf32>, vector<56x32xf32> -> vector<64x32xf32>
    %cst_196 = arith.constant 0.000000e+00 : f32
    %509 = vector.broadcast %cst_196 : f32 to vector<7x32xf32>
    %510 = vector.extract_strided_slice %479 {offsets = [0, 0], sizes = [57, 32], strides = [1, 1]} : vector<64x32xf32> to vector<57x32xf32>
    %511 = tpu.concatenate %509, %510 in 0 : vector<7x32xf32>, vector<57x32xf32> -> vector<64x32xf32>
    %c7_i32_197 = arith.constant 7 : i32
    %512 = vector.broadcast %c7_i32_197 : i32 to vector<64x1xi32>
    %513 = arith.cmpi slt, %496, %512 : vector<64x1xi32>
    %cst_198 = arith.constant 0.000000e+00 : f32
    %514 = vector.shape_cast %513 : vector<64x1xi1> to vector<64x1xi1>
    %515 = vector.broadcast %514 : vector<64x1xi1> to vector<64x32xi1>
    %516 = vector.broadcast %cst_198 : f32 to vector<64x32xf32>
    %517 = arith.select %515, %511, %516 : vector<64x32xi1>, vector<64x32xf32>
    %cst_199 = arith.constant 0.000000e+00 : f32
    %518 = vector.broadcast %cst_199 : f32 to vector<1x32xf32>
    %519 = vector.extract_strided_slice %479 {offsets = [0, 0], sizes = [63, 32], strides = [1, 1]} : vector<64x32xf32> to vector<63x32xf32>
    %520 = tpu.concatenate %518, %519 in 0 : vector<1x32xf32>, vector<63x32xf32> -> vector<64x32xf32>
    %c1_i32_200 = arith.constant 1 : i32
    %521 = vector.broadcast %c1_i32_200 : i32 to vector<64x1xi32>
    %522 = arith.cmpi sge, %496, %521 : vector<64x1xi32>
    %cst_201 = arith.constant 0.000000e+00 : f32
    %523 = vector.shape_cast %522 : vector<64x1xi1> to vector<64x1xi1>
    %524 = vector.broadcast %523 : vector<64x1xi1> to vector<64x32xi1>
    %525 = vector.broadcast %cst_201 : f32 to vector<64x32xf32>
    %526 = arith.select %524, %520, %525 : vector<64x32xi1>, vector<64x32xf32>
    %cst_202 = arith.constant 0.000000e+00 : f32
    %527 = vector.broadcast %cst_202 : f32 to vector<1x32xf32>
    %528 = vector.extract_strided_slice %479 {offsets = [1, 0], sizes = [63, 32], strides = [1, 1]} : vector<64x32xf32> to vector<63x32xf32>
    %529 = tpu.concatenate %528, %527 in 0 : vector<63x32xf32>, vector<1x32xf32> -> vector<64x32xf32>
    %c7_i32_203 = arith.constant 7 : i32
    %530 = vector.broadcast %c7_i32_203 : i32 to vector<64x1xi32>
    %531 = arith.cmpi slt, %496, %530 : vector<64x1xi32>
    %cst_204 = arith.constant 0.000000e+00 : f32
    %532 = vector.shape_cast %531 : vector<64x1xi1> to vector<64x1xi1>
    %533 = vector.broadcast %532 : vector<64x1xi1> to vector<64x32xi1>
    %534 = vector.broadcast %cst_204 : f32 to vector<64x32xf32>
    %535 = arith.select %533, %529, %534 : vector<64x32xi1>, vector<64x32xf32>
    %cst_205 = arith.constant 0.000000e+00 : f32
    %536 = vector.broadcast %cst_205 : f32 to vector<7x32xf32>
    %537 = vector.extract_strided_slice %479 {offsets = [7, 0], sizes = [57, 32], strides = [1, 1]} : vector<64x32xf32> to vector<57x32xf32>
    %538 = tpu.concatenate %537, %536 in 0 : vector<57x32xf32>, vector<7x32xf32> -> vector<64x32xf32>
    %c1_i32_206 = arith.constant 1 : i32
    %539 = vector.broadcast %c1_i32_206 : i32 to vector<64x1xi32>
    %540 = arith.cmpi sge, %496, %539 : vector<64x1xi32>
    %cst_207 = arith.constant 0.000000e+00 : f32
    %541 = vector.shape_cast %540 : vector<64x1xi1> to vector<64x1xi1>
    %542 = vector.broadcast %541 : vector<64x1xi1> to vector<64x32xi1>
    %543 = vector.broadcast %cst_207 : f32 to vector<64x32xf32>
    %544 = arith.select %542, %538, %543 : vector<64x32xi1>, vector<64x32xf32>
    %cst_208 = arith.constant 0.000000e+00 : f32
    %545 = vector.broadcast %cst_208 : f32 to vector<8x32xf32>
    %546 = vector.extract_strided_slice %479 {offsets = [8, 0], sizes = [56, 32], strides = [1, 1]} : vector<64x32xf32> to vector<56x32xf32>
    %547 = tpu.concatenate %546, %545 in 0 : vector<56x32xf32>, vector<8x32xf32> -> vector<64x32xf32>
    %cst_209 = arith.constant 0.000000e+00 : f32
    %548 = vector.broadcast %cst_209 : f32 to vector<9x32xf32>
    %549 = vector.extract_strided_slice %479 {offsets = [9, 0], sizes = [55, 32], strides = [1, 1]} : vector<64x32xf32> to vector<55x32xf32>
    %550 = tpu.concatenate %549, %548 in 0 : vector<55x32xf32>, vector<9x32xf32> -> vector<64x32xf32>
    %c7_i32_210 = arith.constant 7 : i32
    %551 = vector.broadcast %c7_i32_210 : i32 to vector<64x1xi32>
    %552 = arith.cmpi slt, %496, %551 : vector<64x1xi32>
    %cst_211 = arith.constant 0.000000e+00 : f32
    %553 = vector.shape_cast %552 : vector<64x1xi1> to vector<64x1xi1>
    %554 = vector.broadcast %553 : vector<64x1xi1> to vector<64x32xi1>
    %555 = vector.broadcast %cst_211 : f32 to vector<64x32xf32>
    %556 = arith.select %554, %550, %555 : vector<64x32xi1>, vector<64x32xf32>
    %557 = tpu.concatenate %505, %508, %517, %526, %479, %535, %544, %547, %556 in 1 : vector<64x32xf32>, vector<64x32xf32>, vector<64x32xf32>, vector<64x32xf32>, vector<64x32xf32>, vector<64x32xf32>, vector<64x32xf32>, vector<64x32xf32>, vector<64x32xf32> -> vector<64x288xf32>
    %558 = arith.truncf %557 : vector<64x288xf32> to vector<64x288xbf16>
    %c0_212 = arith.constant 0 : index
    %c0_213 = arith.constant 0 : index
    %559 = vector.load %arg16[%c0_212, %c0_213] : memref<288x16xbf16, #tpu.memory_space<vmem>>, vector<288x16xbf16>
    %cst_214 = arith.constant dense<0.000000e+00> : vector<64x16xf32>
    %560 = tpu.matmul %558, %559, %cst_214 {dimension_numbers = #tpu.dot_dimension_numbers<[1], [0], [0], [1], [0, 0, 1, 1], [], []>} : vector<64x288xbf16>, vector<288x16xbf16>, vector<64x16xf32> -> vector<64x16xf32>
    %c0_215 = arith.constant 0 : index
    %c0_216 = arith.constant 0 : index
    %561 = vector.load %arg17[%c0_215, %c0_216] : memref<1x16xf32, #tpu.memory_space<vmem>>, vector<1x16xf32>
    %562 = vector.broadcast %561 : vector<1x16xf32> to vector<64x16xf32>
    %563 = arith.addf %560, %562 : vector<64x16xf32>
    %cst_217 = arith.constant 0.000000e+00 : f32
    %564 = vector.broadcast %cst_217 : f32 to vector<64x16xf32>
    %565 = arith.maximumf %563, %564 : vector<64x16xf32>
    %566 = arith.truncf %565 : vector<64x16xf32> to vector<64x16xbf16>
    %c0_218 = arith.constant 0 : index
    %c0_219 = arith.constant 0 : index
    %567 = vector.load %arg18[%c0_218, %c0_219] : memref<16x8xbf16, #tpu.memory_space<vmem>>, vector<16x8xbf16>
    %cst_220 = arith.constant dense<0.000000e+00> : vector<64x8xf32>
    %568 = tpu.matmul %566, %567, %cst_220 {dimension_numbers = #tpu.dot_dimension_numbers<[1], [0], [0], [1], [0, 0, 1, 1], [], []>} : vector<64x16xbf16>, vector<16x8xbf16>, vector<64x8xf32> -> vector<64x8xf32>
    %c0_221 = arith.constant 0 : index
    %c0_222 = arith.constant 0 : index
    %569 = vector.load %arg19[%c0_221, %c0_222] : memref<1x8xf32, #tpu.memory_space<vmem>>, vector<1x8xf32>
    %570 = vector.broadcast %569 : vector<1x8xf32> to vector<64x8xf32>
    %571 = arith.addf %568, %570 : vector<64x8xf32>
    %c0_223 = arith.constant 0 : index
    %c0_224 = arith.constant 0 : index
    %572 = vector.load %arg29[%c0_223, %c0_224] : memref<256x64xf32, #tpu.memory_space<vmem>>, vector<256x64xf32>
    %cst_225 = arith.constant dense<0.000000e+00> : vector<256x8xf32>
    %573 = tpu.matmul %572, %571, %cst_225 {dimension_numbers = #tpu.dot_dimension_numbers<[1], [0], [0], [1], [0, 0, 1, 1], [], []>} : vector<256x64xf32>, vector<64x8xf32>, vector<256x8xf32> -> vector<256x8xf32>
    %574 = tpu.concatenate %75, %573 in 1 : vector<256x8xf32>, vector<256x8xf32> -> vector<256x16xf32>
    %575 = tpu.iota {dimensions = array<i32: 0>} : vector<256x1xi32>
    %c16_i32_226 = arith.constant 16 : i32
    %c0_i32_227 = arith.constant 0 : i32
    %576 = arith.cmpi eq, %c16_i32_226, %c0_i32_227 : i32
    %c1_i32_228 = arith.constant 1 : i32
    %577 = arith.select %576, %c1_i32_228, %c16_i32_226 : i32
    %578 = vector.broadcast %577 : i32 to vector<256x1xi32>
    %579 = arith.remsi %575, %578 : vector<256x1xi32>
    %c0_i32_229 = arith.constant 0 : i32
    %580 = vector.broadcast %c0_i32_229 : i32 to vector<256x1xi32>
    %581 = arith.cmpi ne, %579, %580 : vector<256x1xi32>
    %c0_i32_230 = arith.constant 0 : i32
    %582 = vector.broadcast %c0_i32_230 : i32 to vector<256x1xi32>
    %583 = arith.cmpi slt, %579, %582 : vector<256x1xi32>
    %c0_i32_231 = arith.constant 0 : i32
    %584 = arith.cmpi slt, %577, %c0_i32_231 : i32
    %585 = vector.broadcast %584 : i1 to vector<256x1xi1>
    %586 = vector.broadcast %585 : vector<256x1xi1> to vector<256x1xi1>
    %587 = arith.xori %583, %586 : vector<256x1xi1>
    %588 = arith.andi %587, %581 : vector<256x1xi1>
    %589 = vector.broadcast %577 : i32 to vector<256x1xi32>
    %590 = arith.addi %579, %589 : vector<256x1xi32>
    %591 = arith.select %588, %590, %579 : vector<256x1xi1>, vector<256x1xi32>
    %cst_232 = arith.constant 0.000000e+00 : f32
    %592 = vector.broadcast %cst_232 : f32 to vector<17x16xf32>
    %593 = vector.extract_strided_slice %574 {offsets = [0, 0], sizes = [239, 16], strides = [1, 1]} : vector<256x16xf32> to vector<239x16xf32>
    %594 = tpu.concatenate %592, %593 in 0 : vector<17x16xf32>, vector<239x16xf32> -> vector<256x16xf32>
    %c1_i32_233 = arith.constant 1 : i32
    %595 = vector.broadcast %c1_i32_233 : i32 to vector<256x1xi32>
    %596 = arith.cmpi sge, %591, %595 : vector<256x1xi32>
    %cst_234 = arith.constant 0.000000e+00 : f32
    %597 = vector.shape_cast %596 : vector<256x1xi1> to vector<256x1xi1>
    %598 = vector.broadcast %597 : vector<256x1xi1> to vector<256x16xi1>
    %599 = vector.broadcast %cst_234 : f32 to vector<256x16xf32>
    %600 = arith.select %598, %594, %599 : vector<256x16xi1>, vector<256x16xf32>
    %cst_235 = arith.constant 0.000000e+00 : f32
    %601 = vector.broadcast %cst_235 : f32 to vector<16x16xf32>
    %602 = vector.extract_strided_slice %574 {offsets = [0, 0], sizes = [240, 16], strides = [1, 1]} : vector<256x16xf32> to vector<240x16xf32>
    %603 = tpu.concatenate %601, %602 in 0 : vector<16x16xf32>, vector<240x16xf32> -> vector<256x16xf32>
    %cst_236 = arith.constant 0.000000e+00 : f32
    %604 = vector.broadcast %cst_236 : f32 to vector<15x16xf32>
    %605 = vector.extract_strided_slice %574 {offsets = [0, 0], sizes = [241, 16], strides = [1, 1]} : vector<256x16xf32> to vector<241x16xf32>
    %606 = tpu.concatenate %604, %605 in 0 : vector<15x16xf32>, vector<241x16xf32> -> vector<256x16xf32>
    %c15_i32_237 = arith.constant 15 : i32
    %607 = vector.broadcast %c15_i32_237 : i32 to vector<256x1xi32>
    %608 = arith.cmpi slt, %591, %607 : vector<256x1xi32>
    %cst_238 = arith.constant 0.000000e+00 : f32
    %609 = vector.shape_cast %608 : vector<256x1xi1> to vector<256x1xi1>
    %610 = vector.broadcast %609 : vector<256x1xi1> to vector<256x16xi1>
    %611 = vector.broadcast %cst_238 : f32 to vector<256x16xf32>
    %612 = arith.select %610, %606, %611 : vector<256x16xi1>, vector<256x16xf32>
    %cst_239 = arith.constant 0.000000e+00 : f32
    %613 = vector.broadcast %cst_239 : f32 to vector<1x16xf32>
    %614 = vector.extract_strided_slice %574 {offsets = [0, 0], sizes = [255, 16], strides = [1, 1]} : vector<256x16xf32> to vector<255x16xf32>
    %615 = tpu.concatenate %613, %614 in 0 : vector<1x16xf32>, vector<255x16xf32> -> vector<256x16xf32>
    %c1_i32_240 = arith.constant 1 : i32
    %616 = vector.broadcast %c1_i32_240 : i32 to vector<256x1xi32>
    %617 = arith.cmpi sge, %591, %616 : vector<256x1xi32>
    %cst_241 = arith.constant 0.000000e+00 : f32
    %618 = vector.shape_cast %617 : vector<256x1xi1> to vector<256x1xi1>
    %619 = vector.broadcast %618 : vector<256x1xi1> to vector<256x16xi1>
    %620 = vector.broadcast %cst_241 : f32 to vector<256x16xf32>
    %621 = arith.select %619, %615, %620 : vector<256x16xi1>, vector<256x16xf32>
    %cst_242 = arith.constant 0.000000e+00 : f32
    %622 = vector.broadcast %cst_242 : f32 to vector<1x16xf32>
    %623 = vector.extract_strided_slice %574 {offsets = [1, 0], sizes = [255, 16], strides = [1, 1]} : vector<256x16xf32> to vector<255x16xf32>
    %624 = tpu.concatenate %623, %622 in 0 : vector<255x16xf32>, vector<1x16xf32> -> vector<256x16xf32>
    %c15_i32_243 = arith.constant 15 : i32
    %625 = vector.broadcast %c15_i32_243 : i32 to vector<256x1xi32>
    %626 = arith.cmpi slt, %591, %625 : vector<256x1xi32>
    %cst_244 = arith.constant 0.000000e+00 : f32
    %627 = vector.shape_cast %626 : vector<256x1xi1> to vector<256x1xi1>
    %628 = vector.broadcast %627 : vector<256x1xi1> to vector<256x16xi1>
    %629 = vector.broadcast %cst_244 : f32 to vector<256x16xf32>
    %630 = arith.select %628, %624, %629 : vector<256x16xi1>, vector<256x16xf32>
    %cst_245 = arith.constant 0.000000e+00 : f32
    %631 = vector.broadcast %cst_245 : f32 to vector<15x16xf32>
    %632 = vector.extract_strided_slice %574 {offsets = [15, 0], sizes = [241, 16], strides = [1, 1]} : vector<256x16xf32> to vector<241x16xf32>
    %633 = tpu.concatenate %632, %631 in 0 : vector<241x16xf32>, vector<15x16xf32> -> vector<256x16xf32>
    %c1_i32_246 = arith.constant 1 : i32
    %634 = vector.broadcast %c1_i32_246 : i32 to vector<256x1xi32>
    %635 = arith.cmpi sge, %591, %634 : vector<256x1xi32>
    %cst_247 = arith.constant 0.000000e+00 : f32
    %636 = vector.shape_cast %635 : vector<256x1xi1> to vector<256x1xi1>
    %637 = vector.broadcast %636 : vector<256x1xi1> to vector<256x16xi1>
    %638 = vector.broadcast %cst_247 : f32 to vector<256x16xf32>
    %639 = arith.select %637, %633, %638 : vector<256x16xi1>, vector<256x16xf32>
    %cst_248 = arith.constant 0.000000e+00 : f32
    %640 = vector.broadcast %cst_248 : f32 to vector<16x16xf32>
    %641 = vector.extract_strided_slice %574 {offsets = [16, 0], sizes = [240, 16], strides = [1, 1]} : vector<256x16xf32> to vector<240x16xf32>
    %642 = tpu.concatenate %641, %640 in 0 : vector<240x16xf32>, vector<16x16xf32> -> vector<256x16xf32>
    %cst_249 = arith.constant 0.000000e+00 : f32
    %643 = vector.broadcast %cst_249 : f32 to vector<17x16xf32>
    %644 = vector.extract_strided_slice %574 {offsets = [17, 0], sizes = [239, 16], strides = [1, 1]} : vector<256x16xf32> to vector<239x16xf32>
    %645 = tpu.concatenate %644, %643 in 0 : vector<239x16xf32>, vector<17x16xf32> -> vector<256x16xf32>
    %c15_i32_250 = arith.constant 15 : i32
    %646 = vector.broadcast %c15_i32_250 : i32 to vector<256x1xi32>
    %647 = arith.cmpi slt, %591, %646 : vector<256x1xi32>
    %cst_251 = arith.constant 0.000000e+00 : f32
    %648 = vector.shape_cast %647 : vector<256x1xi1> to vector<256x1xi1>
    %649 = vector.broadcast %648 : vector<256x1xi1> to vector<256x16xi1>
    %650 = vector.broadcast %cst_251 : f32 to vector<256x16xf32>
    %651 = arith.select %649, %645, %650 : vector<256x16xi1>, vector<256x16xf32>
    %652 = tpu.concatenate %600, %603, %612, %621, %574, %630, %639, %642, %651 in 1 : vector<256x16xf32>, vector<256x16xf32>, vector<256x16xf32>, vector<256x16xf32>, vector<256x16xf32>, vector<256x16xf32>, vector<256x16xf32>, vector<256x16xf32>, vector<256x16xf32> -> vector<256x144xf32>
    %653 = arith.truncf %652 : vector<256x144xf32> to vector<256x144xbf16>
    %c0_252 = arith.constant 0 : index
    %c0_253 = arith.constant 0 : index
    %654 = vector.load %arg20[%c0_252, %c0_253] : memref<144x8xbf16, #tpu.memory_space<vmem>>, vector<144x8xbf16>
    %cst_254 = arith.constant dense<0.000000e+00> : vector<256x8xf32>
    %655 = tpu.matmul %653, %654, %cst_254 {dimension_numbers = #tpu.dot_dimension_numbers<[1], [0], [0], [1], [0, 0, 1, 1], [], []>} : vector<256x144xbf16>, vector<144x8xbf16>, vector<256x8xf32> -> vector<256x8xf32>
    %c0_255 = arith.constant 0 : index
    %c0_256 = arith.constant 0 : index
    %656 = vector.load %arg21[%c0_255, %c0_256] : memref<1x8xf32, #tpu.memory_space<vmem>>, vector<1x8xf32>
    %657 = vector.broadcast %656 : vector<1x8xf32> to vector<256x8xf32>
    %658 = arith.addf %655, %657 : vector<256x8xf32>
    %cst_257 = arith.constant 0.000000e+00 : f32
    %659 = vector.broadcast %cst_257 : f32 to vector<256x8xf32>
    %660 = arith.maximumf %658, %659 : vector<256x8xf32>
    %661 = arith.truncf %660 : vector<256x8xf32> to vector<256x8xbf16>
    %c0_258 = arith.constant 0 : index
    %c0_259 = arith.constant 0 : index
    %662 = vector.load %arg22[%c0_258, %c0_259] : memref<8x1xbf16, #tpu.memory_space<vmem>>, vector<8x1xbf16>
    %cst_260 = arith.constant dense<0.000000e+00> : vector<256x1xf32>
    %663 = tpu.matmul %661, %662, %cst_260 {dimension_numbers = #tpu.dot_dimension_numbers<[1], [0], [0], [1], [0, 0, 1, 1], [], []>} : vector<256x8xbf16>, vector<8x1xbf16>, vector<256x1xf32> -> vector<256x1xf32>
    %c0_261 = arith.constant 0 : index
    %c0_262 = arith.constant 0 : index
    %664 = vector.load %arg23[%c0_261, %c0_262] : memref<1x1xf32, #tpu.memory_space<vmem>>, vector<1x1xf32>
    %665 = vector.broadcast %664 : vector<1x1xf32> to vector<256x1xf32>
    %666 = arith.addf %663, %665 : vector<256x1xf32>
    %cst_263 = arith.constant 0.000000e+00 : f32
    %667 = vector.broadcast %cst_263 : f32 to vector<256x1xf32>
    %668 = arith.maximumf %666, %667 : vector<256x1xf32>
    %c0_264 = arith.constant 0 : index
    %c0_265 = arith.constant 0 : index
    %c0_266 = arith.constant 0 : index
    %669 = vector.load %arg30[%c0_264, %c0_265, %c0_266] : memref<1x256x1xf32, #tpu.memory_space<vmem>>, vector<1x256x1xf32>
    %670 = vector.shape_cast %669 : vector<1x256x1xf32> to vector<256x1xf32>
    %671 = vector.shape_cast %668 : vector<256x1xf32> to vector<1x256x1xf32>
    tpu.vector_store %arg30[%c0_264, %c0_265, %c0_266], %671 {strides = array<i32>} : memref<1x256x1xf32, #tpu.memory_space<vmem>>, vector<1x256x1xf32>,
    return
  }
  func.func @transform_0(%arg0: i32) -> (i32, i32, i32) {
    %c0_i32 = arith.constant 0 : i32
    %c0_i32_0 = arith.constant 0 : i32
    %c0_i32_1 = arith.constant 0 : i32
    return %arg0, %c0_i32, %c0_i32_0 : i32, i32, i32
  }
  func.func @transform_1(%arg0: i32) -> (i32, i32) {
    %c0_i32 = arith.constant 0 : i32
    %c0_i32_0 = arith.constant 0 : i32
    %c0_i32_1 = arith.constant 0 : i32
    return %c0_i32, %c0_i32_0 : i32, i32
  }
  func.func @transform_2(%arg0: i32) -> (i32, i32) {
    %c0_i32 = arith.constant 0 : i32
    %c0_i32_0 = arith.constant 0 : i32
    %c0_i32_1 = arith.constant 0 : i32
    return %c0_i32, %c0_i32_0 : i32, i32
  }
  func.func @transform_3(%arg0: i32) -> (i32, i32) {
    %c0_i32 = arith.constant 0 : i32
    %c0_i32_0 = arith.constant 0 : i32
    %c0_i32_1 = arith.constant 0 : i32
    return %c0_i32, %c0_i32_0 : i32, i32
  }
  func.func @transform_4(%arg0: i32) -> (i32, i32) {
    %c0_i32 = arith.constant 0 : i32
    %c0_i32_0 = arith.constant 0 : i32
    %c0_i32_1 = arith.constant 0 : i32
    return %c0_i32, %c0_i32_0 : i32, i32
  }
  func.func @transform_5(%arg0: i32) -> (i32, i32) {
    %c0_i32 = arith.constant 0 : i32
    %c0_i32_0 = arith.constant 0 : i32
    %c0_i32_1 = arith.constant 0 : i32
    return %c0_i32, %c0_i32_0 : i32, i32
  }
  func.func @transform_6(%arg0: i32) -> (i32, i32) {
    %c0_i32 = arith.constant 0 : i32
    %c0_i32_0 = arith.constant 0 : i32
    %c0_i32_1 = arith.constant 0 : i32
    return %c0_i32, %c0_i32_0 : i32, i32
  }
  func.func @transform_7(%arg0: i32) -> (i32, i32) {
    %c0_i32 = arith.constant 0 : i32
    %c0_i32_0 = arith.constant 0 : i32
    %c0_i32_1 = arith.constant 0 : i32
    return %c0_i32, %c0_i32_0 : i32, i32
  }
  func.func @transform_8(%arg0: i32) -> (i32, i32) {
    %c0_i32 = arith.constant 0 : i32
    %c0_i32_0 = arith.constant 0 : i32
    %c0_i32_1 = arith.constant 0 : i32
    return %c0_i32, %c0_i32_0 : i32, i32
  }
  func.func @transform_9(%arg0: i32) -> (i32, i32) {
    %c0_i32 = arith.constant 0 : i32
    %c0_i32_0 = arith.constant 0 : i32
    %c0_i32_1 = arith.constant 0 : i32
    return %c0_i32, %c0_i32_0 : i32, i32
  }
  func.func @transform_10(%arg0: i32) -> (i32, i32) {
    %c0_i32 = arith.constant 0 : i32
    %c0_i32_0 = arith.constant 0 : i32
    %c0_i32_1 = arith.constant 0 : i32
    return %c0_i32, %c0_i32_0 : i32, i32
  }
  func.func @transform_11(%arg0: i32) -> (i32, i32) {
    %c0_i32 = arith.constant 0 : i32
    %c0_i32_0 = arith.constant 0 : i32
    %c0_i32_1 = arith.constant 0 : i32
    return %c0_i32, %c0_i32_0 : i32, i32
  }
  func.func @transform_12(%arg0: i32) -> (i32, i32) {
    %c0_i32 = arith.constant 0 : i32
    %c0_i32_0 = arith.constant 0 : i32
    %c0_i32_1 = arith.constant 0 : i32
    return %c0_i32, %c0_i32_0 : i32, i32
  }
  func.func @transform_13(%arg0: i32) -> (i32, i32) {
    %c0_i32 = arith.constant 0 : i32
    %c0_i32_0 = arith.constant 0 : i32
    %c0_i32_1 = arith.constant 0 : i32
    return %c0_i32, %c0_i32_0 : i32, i32
  }
  func.func @transform_14(%arg0: i32) -> (i32, i32) {
    %c0_i32 = arith.constant 0 : i32
    %c0_i32_0 = arith.constant 0 : i32
    %c0_i32_1 = arith.constant 0 : i32
    return %c0_i32, %c0_i32_0 : i32, i32
  }
  func.func @transform_15(%arg0: i32) -> (i32, i32) {
    %c0_i32 = arith.constant 0 : i32
    %c0_i32_0 = arith.constant 0 : i32
    %c0_i32_1 = arith.constant 0 : i32
    return %c0_i32, %c0_i32_0 : i32, i32
  }
  func.func @transform_16(%arg0: i32) -> (i32, i32) {
    %c0_i32 = arith.constant 0 : i32
    %c0_i32_0 = arith.constant 0 : i32
    %c0_i32_1 = arith.constant 0 : i32
    return %c0_i32, %c0_i32_0 : i32, i32
  }
  func.func @transform_17(%arg0: i32) -> (i32, i32) {
    %c0_i32 = arith.constant 0 : i32
    %c0_i32_0 = arith.constant 0 : i32
    %c0_i32_1 = arith.constant 0 : i32
    return %c0_i32, %c0_i32_0 : i32, i32
  }
  func.func @transform_18(%arg0: i32) -> (i32, i32) {
    %c0_i32 = arith.constant 0 : i32
    %c0_i32_0 = arith.constant 0 : i32
    %c0_i32_1 = arith.constant 0 : i32
    return %c0_i32, %c0_i32_0 : i32, i32
  }
  func.func @transform_19(%arg0: i32) -> (i32, i32) {
    %c0_i32 = arith.constant 0 : i32
    %c0_i32_0 = arith.constant 0 : i32
    %c0_i32_1 = arith.constant 0 : i32
    return %c0_i32, %c0_i32_0 : i32, i32
  }
  func.func @transform_20(%arg0: i32) -> (i32, i32) {
    %c0_i32 = arith.constant 0 : i32
    %c0_i32_0 = arith.constant 0 : i32
    %c0_i32_1 = arith.constant 0 : i32
    return %c0_i32, %c0_i32_0 : i32, i32
  }
  func.func @transform_21(%arg0: i32) -> (i32, i32) {
    %c0_i32 = arith.constant 0 : i32
    %c0_i32_0 = arith.constant 0 : i32
    %c0_i32_1 = arith.constant 0 : i32
    return %c0_i32, %c0_i32_0 : i32, i32
  }
  func.func @transform_22(%arg0: i32) -> (i32, i32) {
    %c0_i32 = arith.constant 0 : i32
    %c0_i32_0 = arith.constant 0 : i32
    %c0_i32_1 = arith.constant 0 : i32
    return %c0_i32, %c0_i32_0 : i32, i32
  }
  func.func @transform_23(%arg0: i32) -> (i32, i32) {
    %c0_i32 = arith.constant 0 : i32
    %c0_i32_0 = arith.constant 0 : i32
    %c0_i32_1 = arith.constant 0 : i32
    return %c0_i32, %c0_i32_0 : i32, i32
  }
  func.func @transform_24(%arg0: i32) -> (i32, i32) {
    %c0_i32 = arith.constant 0 : i32
    %c0_i32_0 = arith.constant 0 : i32
    %c0_i32_1 = arith.constant 0 : i32
    return %c0_i32, %c0_i32_0 : i32, i32
  }
  func.func @transform_25(%arg0: i32) -> (i32, i32) {
    %c0_i32 = arith.constant 0 : i32
    %c0_i32_0 = arith.constant 0 : i32
    %c0_i32_1 = arith.constant 0 : i32
    return %c0_i32, %c0_i32_0 : i32, i32
  }
  func.func @transform_26(%arg0: i32) -> (i32, i32) {
    %c0_i32 = arith.constant 0 : i32
    %c0_i32_0 = arith.constant 0 : i32
    %c0_i32_1 = arith.constant 0 : i32
    return %c0_i32, %c0_i32_0 : i32, i32
  }
  func.func @transform_27(%arg0: i32) -> (i32, i32) {
    %c0_i32 = arith.constant 0 : i32
    %c0_i32_0 = arith.constant 0 : i32
    %c0_i32_1 = arith.constant 0 : i32
    return %c0_i32, %c0_i32_0 : i32, i32
  }
  func.func @transform_28(%arg0: i32) -> (i32, i32) {
    %c0_i32 = arith.constant 0 : i32
    %c0_i32_0 = arith.constant 0 : i32
    %c0_i32_1 = arith.constant 0 : i32
    return %c0_i32, %c0_i32_0 : i32, i32
  }
  func.func @transform_29(%arg0: i32) -> (i32, i32, i32) {
    %c0_i32 = arith.constant 0 : i32
    %c0_i32_0 = arith.constant 0 : i32
    %c0_i32_1 = arith.constant 0 : i32
    return %arg0, %c0_i32, %c0_i32_0 : i32, i32, i32
  }
}

</mosaic_0001>

<bundles_post_ra>
// kernel: unet_reg_forward.1
= control target key start
LH: loop header
LB: loop body
LE: loop exit
PB: predicated region body
PF: predicated region fallthrough
CT: control target
= control target key end

     0   :  { %s11119_s6 = smov 1   ;;  %s11120_s10 = smov 2   ;;  %s15905_s0 = inlined_call_operand.smem [shape: u32[30], index: -1, kind: input, shape index: {}] }
   0x1   :  { %s11177_s5 = sld [smem:[%s15905_s0]]   ;;  %s11121_s14 = smov 3  }
   0x2   :  { %s11182_s9 = sld [smem:[%s15905_s0 + %s11119_s6]]   ;;  %s11122_s18 = smov 4  }
   0x3   :  { %s11187_s13 = sld [smem:[%s15905_s0 + %s11120_s10]]   ;;  %s11123_s22 = smov 5  }
   0x4   :  { %s11192_s17 = sld [smem:[%s15905_s0 + %s11121_s14]]   ;;  %s11124_s26 = smov 6  }
   0x5   :  { %s11197_s21 = sld [smem:[%s15905_s0 + %s11122_s18]]   ;;  %s11125_s30 = smov 7  }
   0x6   :  { %s11202_s25 = sld [smem:[%s15905_s0 + %s11123_s22]]   ;;  %s11126_s4 = smov 8  }
   0x7   :  { %s11207_s29 = sld [smem:[%s15905_s0 + %s11124_s26]]   ;;  %s11127_s10 = smov 9  }
   0x8   :  { %s11212_s3 = sld [smem:[%s15905_s0 + %s11125_s30]]   ;;  %s11128_s15 = smov 10  }
   0x9   :  { %s11217_s8 = sld [smem:[%s15905_s0 + %s11126_s4]]   ;;  %s11129_s20 = smov 11  }
   0xa   :  { %s11222_s14 = sld [smem:[%s15905_s0 + %s11127_s10]]   ;;  %s11130_s26 = smov 12  }
   0xb   :  { %s11227_s19 = sld [smem:[%s15905_s0 + %s11128_s15]]   ;;  %s11131_s1 = smov 13  }
   0xc   :  { %s11232_s24 = sld [smem:[%s15905_s0 + %s11129_s20]]   ;;  %s11132_s7 = smov 14  }
   0xd   :  { %s11237_s30 = sld [smem:[%s15905_s0 + %s11130_s26]]   ;;  %s11133_s15 = smov 15  }
   0xe   :  { %s11242_s6 = sld [smem:[%s15905_s0 + %s11131_s1]]   ;;  %s11134_s22 = smov 16  }
   0xf   :  { %s11247_s12 = sld [smem:[%s15905_s0 + %s11132_s7]]   ;;  %s11135_s28 = smov 17  }
  0x10   :  { %s11252_s20 = sld [smem:[%s15905_s0 + %s11133_s15]]   ;;  %s11136_s7 = smov 18  }
  0x11   :  { %s11257_s27 = sld [smem:[%s15905_s0 + %s11134_s22]]   ;;  %s11137_s15 = smov 19  }
  0x12   :  { %16139 = sst [smem:[#allocation3_spill]] %s11232_s24  ;;  %s11138_s22 = smov 20  }
  0x13   :  { %16140 = sst [smem:[#allocation4_spill]] %s11237_s30  ;;  %s11141_s16 = smov 23  }
  0x14   :  { %16141 = sst [smem:[#allocation5_spill]] %s11242_s6  ;;  %s11142_s23 = smov 24  }
  0x15   :  { %16142 = sst [smem:[#allocation6_spill]] %s11247_s12  ;;  %s11143_s1 = smov 25  }
  0x16   :  { %16143 = sst [smem:[#allocation7_spill]] %s11252_s20  ;;  %s11144_s10 = smov 26  }
  0x17   :  { %16144 = sst [smem:[#allocation8_spill]] %s11257_s27 }
  0x18   :  { %s11262_s4 = sld [smem:[%s15905_s0 + %s11135_s28]]   ;;  %s11139_s28 = smov 21  }
  0x19   :  { %s11267_s12 = sld [smem:[%s15905_s0 + %s11136_s7]]   ;;  %s11140_s7 = smov 22  }
  0x1a   :  { %s11272_s20 = sld [smem:[%s15905_s0 + %s11137_s15]]  }
  0x1b   :  { %s11277_s27 = sld [smem:[%s15905_s0 + %s11138_s22]]  }
  0x1c   :  { %s11305_s30 = sld [smem:[%s15905_s0 + %s11144_s10]]   ;;  %s11322_s10 = smov 0  }
  0x1e   :  { %16145 = sst [smem:[#allocation9_spill]] %s11262_s4 }
  0x1f   :  { %16146 = sst [smem:[#allocation10_spill]] %s11267_s12 }
  0x20   :  { %16147 = sst [smem:[#allocation11_spill]] %s11272_s20 }
  0x21   :  { %16148 = sst [smem:[#allocation12_spill]] %s11277_s27 }
  0x22   :  { %s11282_s4 = sld [smem:[%s15905_s0 + %s11139_s28]]  }
  0x23   :  { %s8794_s12 = sld [smem:[%s15905_s0 + %s11140_s7]]  }
  0x24   :  { %s11290_s20 = sld [smem:[%s15905_s0 + %s11141_s16]]   ;;  %s11145_s16 = smov 27  }
  0x25   :  { %s11295_s27 = sld [smem:[%s15905_s0 + %s11142_s23]]   ;;  %s11146_s23 = smov 28  }
  0x26   :  { %s11310_s6 = sld [smem:[%s15905_s0 + %s11145_s16]]  }
  0x27   :  { %s11315_s24 = sld [smem:[%s15905_s0 + %s11146_s23]]  }
  0x28   :  { %16149 = sst [smem:[#allocation13_spill]] %s11282_s4 }
  0x29   :  { %s11300_s4 = sld [smem:[%s15905_s0 + %s11143_s1]]   ;;  %v64_v0 = vstv %s8794_s12  ;;  %s11147_s1 = smov 29  }
  0x2a   :  { %s11320_s7 = sld [smem:[%s15905_s0 + %s11147_s1]]   ;;  %65 = vst [vmem:[#allocation2] sm:$0x1] %v64_v0 }
  0x2b LB: > { %s8802_s11 = sadd.s32 4294967295, %s11117_s10   ;;  %p8806_p0 = scmp.ge.s32.totalorder %s11117_s10, 1  ;;  %s11117_s10 = sphi %s11322_s10, %s71_s10  }
  0x2c   : > { %p819_p1 = scmp.lt.s32.totalorder %s11117_s10, 3 }
  0x2e   : > { %p820_p2 = pnand %p8806_p0, %p819_p1 }
  0x30   : > { %823 = sbr.rel (%p820_p2) target bundleno = 4608 (0x1200), region = 136 }
  0x35   : > { %p895_p3 = scmp.lt.s32.totalorder %s8802_s11, 1  ;;  %v938_v1 = vlaneseq  ;;  %vm15913_vm0 = vcmask 1046528   ;;  %vm15914_vm1 = vcmask 1040384   ;;  %v15919_v10 = vmov 0.0   ;;  %s11149_s16 = smov 4  }
  0x36   : > { %v16150_v15 = vmov 0  ;;  %s11150_s15 = smov 1   ;;  %v16153_v20 = vmov 0  ;;  %s11151_s18 = smov 5   ;;  %v16156_v49 = vmov 0  ;;  %v16159_v50 = vmov 0 }
  0x37   : > { %s17334_s11 = smov (!%p895_p3, %s8802_s11), 1  ;;  %v11332_v2 = vshrl.u32 %v938_v1, 7  ;;  %s11152_s23 = smov 2   ;;  %vm15912_vm12 = vcmask 1043456   ;;  %vm15911_vm13 = vcmask 1044480  }
  0x38   : > { %s16122_s0 = sshll.u32 %s17334_s11, 8  ;;  %s11153_s22 = smov 3  }
  0x39   : > { %v11336_v3 = vadd.s32 8, %v11332_v2  ;;  %s11341_s12 = scalar_lea.vmem %s11177_s5, %s16122_s0  ;;  %v975_v4 = vand.u32 15, %v11332_v2  ;;  %v11397_v36 = vadd.s32 24, %v11332_v2  ;;  %v11400_v37 = vadd.s32 16, %v11332_v2  ;;  %s11154_s26 = smov 6  }
  0x3a   : > { %v906_v5 = vld [vmem:[%s11341_s12] sm:$0xff]  ;;  %v11346_v6 = vld [vmem:[%s11341_s12 + $0x8] sm:$0xff]  ;;  %v11349_v7 = vld [vmem:[%s11341_s12 + $0x10] sm:$0xff]  ;;  %s11155_s1 = smov 7   ;;  %s16129_s28 = smov 8  }
  0x3b   : > { %v982_v8 = vand.u32 15, %v11336_v3  ;;  %v9499_v9 = vpack.i.bf16 %v11346_v6, %v906_v5  ;;  %v9494_v11 = vpack.i.bf16 %v906_v5, %v15919_v10  ;;  %v1540_v12 = vrot.slane %v906_v5, 1  ;;  %v11376_v24 = vld [vmem:[%s11341_s12 + $0x18] sm:$0xff]  ;;  %v11384_v27 = vld [vmem:[%s11341_s12 + $0x20] sm:$0xff]  ;;  %v11441_v54 = vld [vmem:[%s11341_s12 + $0x28] sm:$0xff]  ;;  %s11158_s2 = smov 16  }
  0x3c   : > { %v1541_v13 = vrot.slane %v11346_v6, 1  ;;  %v1543_v14 = vrot.slane %v11349_v7, 1  ;;  %v1386_v16 = vrot.slane %v906_v5, 7  ;;  %v1387_v19 = vrot.slane %v11346_v6, 7  ;;  %v11451_v60 = vld [vmem:[%s11341_s12 + $0x30] sm:$0xff]  ;;  %s16814_s0 = sld [smem:[#allocation4_spill]] }
  0x3d   : > { %vm11356_vm2 = vcmp.lt.s32.totalorder %v982_v8, 15  ;;  %9500 = vrot.lane.b32.xlu1 %v9499_v9, %s11149_s16  ;;  %9495 = vrot.lane.b32.xlu0 %v9494_v11, %s11150_s15  ;;  %v1632_v18 = vsel %vm15913_vm0, 0.0, %v1540_v12  ;;  %vm11365_vm3 = vcmp.ge.s32.totalorder %v975_v4, 1  ;;  %v1389_v32 = vrot.slane %v11349_v7, 7 }
  0x3e   : > { %v16151_v15 = vsel %vm11356_vm2, 4294967295, %v16150_v15  ;;  %v1542_v17 = vsel %vm15913_vm0, %v1540_v12, %v1541_v13  ;;  %v16154_v20 = vsel %vm11365_vm3, 4294967295, %v16153_v20  ;;  %v1544_v21 = vsel %vm15913_vm0, %v1541_v13, %v1543_v14 }
  0x3f   : > { %16152 = vst [vmem:[#allocation14_spill] sm:$0xff] %v16151_v15  ;;  %v1665_v22 = vsel %vm11356_vm2, %v1632_v18, 0.0  ;;  %v11373_v23 = vsel %vm15914_vm1, 0.0, %v1386_v16  ;;  %v1741_v25 = vsel %vm11356_vm2, %v1544_v21, 0.0  ;;  %v11381_v26 = vsel %vm15914_vm1, %v1386_v16, %v1387_v19 }
  0x40   : > { %16155 = vst [vmem:[#allocation15_spill] sm:$0xff] %v16154_v20  ;;  %v9519_v28 = vpack.i.bf16 %v1741_v25, %v1542_v17  ;;  %v1703_v29 = vsel %vm11365_vm3, %v11373_v23, 0.0  ;;  %v9504_v30 = vpack.i.bf16 %v1665_v22, %v15919_v10  ;;  %v1391_v33 = vrot.slane %v11376_v24, 7 }
  0x41   : > { %v9514_v31 = vpack.i.bf16 %v11381_v26, %v1703_v29  ;;  %v1545_v34 = vrot.slane %v11376_v24, 1  ;;  %v1547_v35 = vrot.slane %v11384_v27, 1  ;;  %v11403_v38 = vsel %vm15914_vm1, %v1387_v19, %v1389_v32  ;;  %v11507_v29 = vld [vmem:[%s11341_s12 + $0x40] sm:$0xff] }
  0x42   : > { %9520 = vrot.lane.b32.xlu2 %v9519_v28, %s11151_s18  ;;  %v11406_v39 = vsel %vm15914_vm1, %v1389_v32, %v1391_v33  ;;  %v1774_v40 = vsel %vm11365_vm3, %v11403_v38, 0.0  ;;  %v996_v45 = vand.u32 15, %v11397_v36  ;;  %v989_v46 = vand.u32 15, %v11400_v37  ;;  %v11502_v28 = vld [vmem:[%s11341_s12 + $0x38] sm:$0xff] }
  0x43   : > { %v1548_v41 = vsel %vm15913_vm0, %v1545_v34, %v1547_v35  ;;  %v9524_v42 = vpack.i.bf16 %v11406_v39, %v1774_v40  ;;  %v1546_v43 = vsel %vm15913_vm0, %v1543_v14, %v1545_v34  ;;  %v9509_v47 = vpack.i.bf16 %v11376_v24, %v11349_v7 }
  0x44   : > { %v1806_v44 = vsel %vm11356_vm2, %v1548_v41, 0.0  ;;  %vm11423_vm4 = vcmp.lt.s32.totalorder %v996_v45, 15  ;;  %vm11427_vm5 = vcmp.ge.s32.totalorder %v989_v46, 1  ;;  %v9534_v52 = vpack.i.bf16 %v11349_v7, %v11346_v6 }
  0x45   : > { %9505 = vrot.lane.b32.xlu0 %v9504_v30, %s11152_s23  ;;  %9515 = vrot.lane.b32.xlu1 %v9514_v31, %s11153_s22  ;;  %v9529_v48 = vpack.i.bf16 %v1806_v44, %v1546_v43  ;;  %v16157_v49 = vsel %vm11423_vm4, 4294967295, %v16156_v49  ;;  %v16160_v50 = vsel %vm11427_vm5, 4294967295, %v16159_v50  ;;  %v1667_v51 = vsel %vm11423_vm4, %v1544_v21, 0.0 }
  0x46   : > { %16158 = vst [vmem:[#allocation16_spill] sm:$0xff] %v16157_v49  ;;  %v1705_v53 = vsel %vm11427_vm5, %v11403_v38, 0.0  ;;  %v1393_v55 = vrot.slane %v11384_v27, 7  ;;  %v9539_v56 = vpack.i.bf16 %v1667_v51, %v1542_v17  ;;  %v1395_v58 = vrot.slane %v11441_v54, 7 }
  0x47   : > { %16161 = vst [vmem:[#allocation17_spill] sm:$0xff] %v16160_v50  ;;  %v9544_v57 = vpack.i.bf16 %v11406_v39, %v1705_v53  ;;  %v1743_v61 = vsel %vm11423_vm4, %v1548_v41, 0.0  ;;  %v1549_v0 = vrot.slane %v11441_v54, 1  ;;  %v1551_v1 = vrot.slane %v11451_v60, 1 }
  0x48   : > { %v11448_v59 = vsel %vm15914_vm1, %v1391_v33, %v1393_v55  ;;  %v11458_v62 = vsel %vm15914_vm1, %v1393_v55, %v1395_v58  ;;  %v11466_v4 = vadd.s32 40, %v11332_v2  ;;  %v9554_v5 = vpack.i.bf16 %v1743_v61, %v1546_v43 }
  0x49   : > { %v1776_v63 = vsel %vm11427_vm5, %v11448_v59, 0.0  ;;  %v11471_v7 = vadd.s32 32, %v11332_v2  ;;  %v1552_v8 = vsel %vm15913_vm0, %v1549_v0, %v1551_v1  ;;  %v9564_v11 = vpack.i.bf16 %v11441_v54, %v11384_v27 }
  0x4a   : > { %9525 = vrot.lane.b32.xlu2 %v9524_v42, %s11154_s26  ;;  %16162 = vst [vmem:[#allocation18_spill] sm:$0xff] %v11466_v4  ;;  %v9559_v6 = vpack.i.bf16 %v11458_v62, %v1776_v63  ;;  %v1010_v9 = vand.u32 15, %v11466_v4  ;;  %v1550_v12 = vsel %vm15913_vm0, %v1547_v35, %v1549_v0  ;;  %v1808_v13 = vsel %vm11423_vm4, %v1552_v8, 0.0  ;;  %v11561_v0 = vld [vmem:[%s11341_s12 + $0x48] sm:$0xff] }
  0x4b   : > { %16163 = vst [vmem:[#allocation19_spill] sm:$0xff] %v11471_v7  ;;  %v1003_v14 = vand.u32 15, %v11471_v7  ;;  %v16164_v16 = vmov 0  ;;  %v9569_v17 = vpack.i.bf16 %v1808_v13, %v1550_v12  ;;  %v9574_v18 = vpack.i.bf16 %v11384_v27, %v11376_v24 }
  0x4c   : > { %vm11483_vm6 = vcmp.lt.s32.totalorder %v1010_v9, 15  ;;  %v16167_v19 = vmov 0  ;;  %v1397_v24 = vrot.slane %v11451_v60, 7  ;;  %v1399_v30 = vrot.slane %v11502_v28, 7 }
  0x4d   : > { %9510 = vrot.lane.b32.xlu0 %v9509_v47, %s11155_s1  ;;  %9530 = vrot.lane.b32.xlu1 %v9529_v48, %s16129_s28  ;;  %v16165_v16 = vsel %vm11483_vm6, 4294967295, %v16164_v16  ;;  %vm11490_vm7 = vcmp.ge.s32.totalorder %v1003_v14, 1  ;;  %v1669_v21 = vsel %vm11483_vm6, %v1548_v41, 0.0  ;;  %v1745_v31 = vsel %vm11483_vm6, %v1552_v8, 0.0 }
  0x4e   : > { %16166 = vst [vmem:[#allocation20_spill] sm:$0xff] %v16165_v16  ;;  %v16168_v19 = vsel %vm11490_vm7, 4294967295, %v16167_v19  ;;  %v9579_v22 = vpack.i.bf16 %v1669_v21, %v1546_v43  ;;  %v1707_v25 = vsel %vm11490_vm7, %v11448_v59, 0.0  ;;  %v11514_v32 = vsel %vm15914_vm1, %v1395_v58, %v1397_v24 }
  0x4f   : > { %16169 = vst [vmem:[#allocation21_spill] sm:$0xff] %v16168_v19  ;;  %v9584_v27 = vpack.i.bf16 %v11458_v62, %v1707_v25  ;;  %v11517_v33 = vadd.s32 56, %v11332_v2  ;;  %v1553_v34 = vrot.slane %v11502_v28, 1  ;;  %v1555_v35 = vrot.slane %v11507_v29, 1 }
  0x50   : > { %v9594_v40 = vpack.i.bf16 %v1745_v31, %v1550_v12  ;;  %v11524_v41 = vsel %vm15914_vm1, %v1397_v24, %v1399_v30  ;;  %v1778_v42 = vsel %vm11490_vm7, %v11514_v32, 0.0  ;;  %v11531_v44 = vadd.s32 48, %v11332_v2 }
  0x51   : > { %16170 = vst [vmem:[#allocation22_spill] sm:$0xff] %v11517_v33  ;;  %v1024_v43 = vand.u32 15, %v11517_v33  ;;  %v1556_v45 = vsel %vm15913_vm0, %v1553_v34, %v1555_v35  ;;  %v9599_v46 = vpack.i.bf16 %v11524_v41, %v1778_v42  ;;  %v1554_v48 = vsel %vm15913_vm0, %v1551_v1, %v1553_v34 }
  0x52   : > { %9535 = vrot.lane.b32.xlu2 %v9534_v52, %s11150_s15  ;;  %16171 = vst [vmem:[#allocation23_spill] sm:$0xff] %v11531_v44  ;;  %v1810_v51 = vsel %vm11483_vm6, %v1556_v45, 0.0  ;;  %v16172_v52 = vmov 0  ;;  %v1017_v53 = vand.u32 15, %v11531_v44  ;;  %v9614_v58 = vpack.i.bf16 %v11451_v60, %v11441_v54 }
  0x53   : > { %vm11541_vm8 = vcmp.lt.s32.totalorder %v1024_v43, 15  ;;  %v9609_v55 = vpack.i.bf16 %v1810_v51, %v1554_v48  ;;  %v1401_v1 = vrot.slane %v11507_v29, 7  ;;  %v947_v13 = vadd.s32 64, %v11332_v2 }
  0x54   : > { %v16173_v52 = vsel %vm11541_vm8, 4294967295, %v16172_v52  ;;  %vm11550_vm9 = vcmp.ge.s32.totalorder %v1017_v53, 1  ;;  %v1747_v54 = vsel %vm11541_vm8, %v1556_v45, 0.0  ;;  %v948_v21 = vadd.s32 72, %v11332_v2 }
  0x55   : > { %9540 = vrot.lane.b32.xlu0 %v9539_v56, %s11152_s23  ;;  %9545 = vrot.lane.b32.xlu1 %v9544_v57, %s11153_s22  ;;  %16174 = vst [vmem:[#allocation24_spill] sm:$0xff] %v16173_v52  ;;  %v1671_v56 = vsel %vm11541_vm8, %v1552_v8, 0.0  ;;  %v16175_v57 = vmov 0  ;;  %v1709_v63 = vsel %vm11550_vm9, %v11514_v32, 0.0  ;;  %v1557_v8 = vrot.slane %v11561_v0, 1 }
  0x56   : > { %v16176_v57 = vsel %vm11550_vm9, 4294967295, %v16175_v57  ;;  %v9619_v61 = vpack.i.bf16 %v1671_v56, %v1550_v12  ;;  %v9634_v12 = vpack.i.bf16 %v1747_v54, %v1554_v48  ;;  %v9644_v31 = vpack.i.bf16 %v11561_v0, %v11507_v29 }
  0x57   : > { %16177 = vst [vmem:[#allocation25_spill] sm:$0xff] %v16176_v57  ;;  %v11594_v25 = vsel %vm15913_vm0, %v1555_v35, %v1557_v8  ;;  %v16181_v35 = vmov 0  ;;  %v9654_v42 = vpack.i.bf16 %v11507_v29, %v11502_v28  ;;  %v11631_v29 = vld [vmem:[%s11341_s12 + $0x60] sm:$0xff]  ;;  %vm16205_vm6 = vcmask 64512  }
  0x58   : > { %vm16294_vm4 = vcmask 64512  }
  0x5a   : > { %9550 = vrot.lane.b32.xlu2 %v9509_v47, %s11149_s16  ;;  %v9604_v47 = vpack.i.bf16 %v11502_v28, %v11451_v60  ;;  %v1403_v60 = vrot.slane %v11561_v0, 7 }
  0x5c   : > { %v11581_v14 = vsel %vm15914_vm1, %v1401_v1, %v1403_v60 }
  0x5d   : > { %9555 = vrot.lane.b32.xlu0 %v9554_v5, %s11151_s18  ;;  %9560 = vrot.lane.b32.xlu1 %v9559_v6, %s11154_s26  ;;  %v11565_v5 = vld [vmem:[%s11341_s12 + $0x50] sm:$0xff]  ;;  %v9624_v6 = vpack.i.bf16 %v11524_v41, %v1709_v63  ;;  %v1563_v63 = vrot.slane %v11631_v29, 1 }
  0x5e   : > { %v1559_v9 = vrot.slane %v11565_v5, 1  ;;  %v1405_v51 = vrot.slane %v11565_v5, 7 }
  0x60   : > { %v11628_v28 = vsel %vm15914_vm1, %v1403_v60, %v1405_v51 }
  0x62   : > { %9565 = vrot.lane.b32.xlu2 %v9564_v11, %s11155_s1 }
  0x65   : > { %9570 = vrot.lane.b32.xlu0 %v9569_v17, %s16129_s28  ;;  %9575 = vrot.lane.b32.xlu1 %v9574_v18, %s11150_s15  ;;  %v11587_v18 = vsel %vm15913_vm0, %v1557_v8, %v1559_v9  ;;  %v949_v8 = vadd.s32 80, %v11332_v2 }
  0x66   : > { %v1812_v24 = vsel %vm11541_vm8, %v11587_v18, 0.0  ;;  %vm16201_vm8 = vcmask 1040384  }
  0x67   : > { %v9649_v34 = vpack.i.bf16 %v1812_v24, %v11594_v25  ;;  %v8813_v24 = vld [vmem:[%s11182_s9] sm:$0xf] }
  0x6a   : > { %9580 = vrot.lane.b32.xlu2 %v9579_v22, %s11152_s23 }
  0x6d   : > { %9585 = vrot.lane.b32.xlu0 %v9584_v27, %s11153_s22  ;;  %9590 = vrot.lane.b32.xlu1 %v9564_v11, %s11149_s16  ;;  %v11576_v11 = vsel %vm15914_vm1, %v1399_v30, %v1401_v1  ;;  %v1031_v27 = vand.u32 15, %v947_v13  ;;  %v1038_v30 = vand.u32 15, %v948_v21  ;;  %v950_v1 = vadd.s32 88, %v11332_v2 }
  0x6e   : > { %v1780_v17 = vsel %vm11550_vm9, %v11576_v11, 0.0 }
  0x6f   : > { %v9639_v22 = vpack.i.bf16 %v11581_v14, %v1780_v17  ;;  %vm11603_vm10 = vcmp.ge.s32.totalorder %v1031_v27, 1  ;;  %vm11607_vm11 = vcmp.lt.s32.totalorder %v1038_v30, 15  ;;  %v1052_v13 = vand.u32 15, %v950_v1  ;;  %v9333_v27 = vld [vmem:[%s11182_s9] sm:$0x10] }
  0x70   : > { %v16182_v35 = vsel %vm11607_vm11, 4294967295, %v16181_v35  ;;  %v1673_v43 = vsel %vm11607_vm11, %v1556_v45, 0.0  ;;  %v1749_v45 = vsel %vm11607_vm11, %v11587_v18, 0.0  ;;  %v1045_v30 = vand.u32 15, %v949_v8 }
  0x71   : > { %16183 = vst [vmem:[#allocation27_spill] sm:$0xff] %v16182_v35  ;;  %v9659_v53 = vpack.i.bf16 %v1673_v43, %v1554_v48  ;;  %vm11671_vm14 = vcmp.lt.s32.totalorder %v1052_v13, 15  ;;  %v16184_v43 = vmov 0  ;;  %v1409_v1 = vrot.slane %v11631_v29, 7 }
  0x72   : > { %9595 = vrot.lane.b32.xlu2 %v9594_v40, %s11151_s18  ;;  %v16178_v40 = vmov 0  ;;  %v16185_v43 = vsel %vm11671_vm14, 4294967295, %v16184_v43  ;;  %vm11680_vm15 = vcmp.ge.s32.totalorder %v1045_v30, 1  ;;  %v951_v30 = vadd.s32 96, %v11332_v2 }
  0x73   : > { %v16179_v40 = vsel %vm11603_vm10, 4294967295, %v16178_v40  ;;  %16186 = vst [vmem:[#allocation28_spill] sm:$0xff] %v16185_v43 }
  0x74   : > { %16180 = vst [vmem:[#allocation26_spill] sm:$0xff] %v16179_v40 }
  0x75   : > { %9600 = vrot.lane.b32.xlu0 %v9599_v46, %s11154_s26  ;;  %9605 = vrot.lane.b32.xlu1 %v9604_v47, %s11155_s1  ;;  %v1711_v46 = vsel %vm11603_vm10, %v11576_v11, 0.0 }
  0x7a   : > { %9610 = vrot.lane.b32.xlu2 %v9609_v55, %s16129_s28  ;;  %v9664_v55 = vpack.i.bf16 %v11581_v14, %v1711_v46 }
  0x7d   : > { %9615 = vrot.lane.b32.xlu0 %v9614_v58, %s11150_s15  ;;  %9620 = vrot.lane.b32.xlu1 %v9619_v61, %s11152_s23  ;;  %v1782_v58 = vsel %vm11603_vm10, %v11628_v28, 0.0 }
  0x82   : > { %9625 = vrot.lane.b32.xlu2 %v9624_v6, %s11153_s22  ;;  %v9674_v6 = vpack.i.bf16 %v1749_v45, %v11594_v25  ;;  %v1675_v45 = vsel %vm11671_vm14, %v11587_v18, 0.0 }
  0x85   : > { %9630 = vrot.lane.b32.xlu0 %v9604_v47, %s11149_s16  ;;  %9635 = vrot.lane.b32.xlu1 %v9634_v12, %s11151_s18  ;;  %v11621_v47 = vld [vmem:[%s11341_s12 + $0x58] sm:$0xff] }
  0x86   : > { %v1407_v56 = vrot.slane %v11621_v47, 7  ;;  %v1561_v61 = vrot.slane %v11621_v47, 1  ;;  %v9684_v21 = vpack.i.bf16 %v11621_v47, %v11565_v5 }
  0x88   : > { %v11639_v48 = vsel %vm15914_vm1, %v1405_v51, %v1407_v56  ;;  %v11653_v60 = vsel %vm15913_vm0, %v1561_v61, %v1563_v63  ;;  %v11710_v13 = vsel %vm15914_vm1, %v1407_v56, %v1409_v1 }
  0x89   : > { %v9679_v54 = vpack.i.bf16 %v11639_v48, %v1782_v58  ;;  %v1814_v17 = vsel %vm11607_vm11, %v11653_v60, 0.0 }
  0x8a   : > { %9640 = vrot.lane.b32.xlu2 %v9639_v22, %s11154_s26  ;;  %v11666_v22 = vsel %vm15913_vm0, %v1559_v9, %v1561_v61  ;;  %v9694_v9 = vpack.i.bf16 %v11565_v5, %v11561_v0  ;;  %v9699_v0 = vpack.i.bf16 %v1675_v45, %v11594_v25  ;;  %v1713_v5 = vsel %vm11680_vm15, %v11628_v28, 0.0  ;;  %v11696_v61 = vld [vmem:[%s11341_s12 + $0x68] sm:$0xff] }
  0x8b   : > { %v9689_v51 = vpack.i.bf16 %v1814_v17, %v11666_v22  ;;  %v9704_v18 = vpack.i.bf16 %v11639_v48, %v1713_v5  ;;  %v15922_v8 = vrot.slane %v11696_v61, 7  ;;  %v1751_v25 = vsel %vm11671_vm14, %v11653_v60, 0.0 }
  0x8c   : > { %v11738_v45 = vpack.i.bf16 %v11696_v61, %v11631_v29 }
  0x8d   : > { %9645 = vrot.lane.b32.xlu0 %v9644_v31, %s11155_s1  ;;  %9650 = vrot.lane.b32.xlu1 %v9649_v34, %s16129_s28  ;;  %v11157_v34 = vmov 65535   ;;  %v11723_v56 = vsel %vm15914_vm1, %v1409_v1, %v15922_v8  ;;  %vm15934_vm1 = vcmask 15360  }
  0x92   : > { %9655 = vrot.lane.b32.xlu2 %v9654_v42, %s11150_s15  ;;  %v3092_v42 = vsel %vm15912_vm12, 4294967295, %v11157_v34  ;;  %v9714_v34 = vpack.i.bf16 %v1751_v25, %v11666_v22  ;;  %v16193_v25 = vmov 0 }
  0x93   : > { %v3093_v46 = vsel %vm15911_vm13, %v3092_v42, 0  ;;  %v1784_v42 = vsel %vm11680_vm15, %v11710_v13, 0.0 }
  0x95   : > { %9660 = vrot.lane.b32.xlu0 %v9659_v53, %s11152_s23  ;;  %9665 = vrot.lane.b32.xlu1 %v9664_v55, %s11153_s22  ;;  %v16187_v55 = vmov 0 }
  0x96   : > { %v16188_v55 = vsel %vm11680_vm15, 4294967295, %v16187_v55 }
  0x97   : > { %16189 = vst [vmem:[#allocation29_spill] sm:$0xff] %v16188_v55 }
  0x9a   : > { %9670 = vrot.lane.b32.xlu2 %v9644_v31, %s11149_s16  ;;  %v8814_v31 = vor.u32 %v9333_v27, %v8813_v24  ;;  %v1565_v24 = vrot.slane %v11696_v61, 1 }
  0x9c   : > { %v11656_v12 = vpop.permute.xlu2 %9520  ;;  %v3095_v53 = vand.u32 %v8814_v31, %v3093_v46  ;;  %v11748_v5 = vsel %vm15913_vm0, %v1563_v63, %v1565_v24  ;;  %v11767_v63 = vadd.s32 112, %v11332_v2 }
  0x9d   : > { %9675 = vrot.lane.b32.xlu0 %v9674_v6, %s11151_s18  ;;  %9680 = vrot.lane.b32.xlu1 %v9679_v54, %s11154_s26  ;;  %v11701_v6 = vld [vmem:[%s11341_s12 + $0x70] sm:$0xff]  ;;  %v952_v54 = vadd.s32 104, %v11332_v2  ;;  %v9523_v8 = vunpack.i.h.bf16 %v11656_v12 }
  0x9e   : > { %3104 = vmatpush.bf16.msra.mxu0 %v3095_v53  ;;  %9435 = vmatpush.bf16.msra.mxu3 %v3095_v53  ;;  %v15921_v27 = vrot.slane %v11701_v6, 1  ;;  %v9719_v53 = vpack.i.bf16 %v11723_v56, %v1784_v42 }
  0x9f   : > { %v1066_v31 = vand.u32 15, %v952_v54 }
  0xa1   : > { %vm11740_vm13 = vcmp.lt.s32.totalorder %v1066_v31, 15 }
  0xa2   : > { %9685 = vrot.lane.b32.xlu2 %v9684_v21, %s11155_s1  ;;  %v1677_v54 = vsel %vm11740_vm13, %v11653_v60, 0.0 }
  0xa3   : > { %v9739_v42 = vpack.i.bf16 %v1677_v54, %v11666_v22  ;;  %v9522_v22 = vunpack.i.l.bf16 %v11656_v12 }
  0xa4   : > { %v11687_v58 = vpop.permute.xlu2 %9525 }
  0xa5   : > { %9690 = vrot.lane.b32.xlu0 %v9689_v51, %s16129_s28  ;;  %9695 = vrot.lane.b32.xlu1 %v9694_v9, %s11150_s15  ;;  %v11733_v9 = vsel %vm15913_vm0, %v1565_v24, %v15921_v27  ;;  %vm15929_vm0 = vcmask 7168   ;;  %v9528_v12 = vunpack.i.h.bf16 %v11687_v58 }
  0xa6   : > { %v1816_v1 = vsel %vm11671_vm14, %v11733_v9, 0.0  ;;  %vm15935_vm14 = vcmask 23552  }
  0xa7   : > { %v9729_v24 = vpack.i.bf16 %v1816_v1, %v11748_v5 }
  0xaa   : > { %9700 = vrot.lane.b32.xlu2 %v9699_v0, %s11152_s23  ;;  %v16190_v0 = vmov 0 }
  0xab   : > { %v16191_v0 = vsel %vm11740_vm13, 4294967295, %v16190_v0 }
  0xac   : > { %v11712_v17 = vpop.permute.xlu2 %9535  ;;  %16192 = vst [vmem:[#allocation30_spill] sm:$0xff] %v16191_v0 }
  0xad   : > { %9705 = vrot.lane.b32.xlu0 %v9704_v18, %s11153_s22  ;;  %9710 = vrot.lane.b32.xlu1 %v9684_v21, %s11149_s16  ;;  %v1059_v21 = vand.u32 15, %v951_v30 }
  0xaf   : > { %v9501_v46 = vpop.permute.xlu1 %9500  ;;  %v11728_v51 = vpop.permute.xlu0 %9495  ;;  %vm11758_vm12 = vcmp.ge.s32.totalorder %v1059_v21, 1 }
  0xb0   : > { %v16194_v25 = vsel %vm11758_vm12, 4294967295, %v16193_v25  ;;  %v9497_v30 = vunpack.i.l.bf16 %v11728_v51  ;;  %v1715_v1 = vsel %vm11758_vm12, %v11710_v13, 0.0  ;;  %v9503_v35 = vunpack.i.h.bf16 %v9501_v46 }
  0xb1   : > { %16195 = vst [vmem:[#allocation31_spill] sm:$0xff] %v16194_v25  ;;  %v9502_v52 = vunpack.i.l.bf16 %v9501_v46  ;;  %v966_v25 = vadd.s32 216, %v11332_v2 }
  0xb2   : > { %9715 = vrot.lane.b32.xlu2 %v9714_v34, %s11151_s18  ;;  %v9734_v34 = vpack.i.bf16 %v11631_v29, %v11621_v47  ;;  %v2752_v43 = vsel %vm15929_vm0, 0.0, %v9497_v30  ;;  %vm16196_vm0 = vcmask 31744  }
  0xb3   : > { %vm16197_vm11 = vmmov %vm16196_vm0 }
  0xb4   : > { %v11753_v18 = vpop.permute.xlu2 %9550 }
  0xb5   : > { %9720 = vrot.lane.b32.xlu0 %v9719_v53, %s11154_s26  ;;  %9725 = vrot.lane.b32.xlu1 %v11738_v45, %s11155_s1 }
  0xb7   : > { %v9506_v31 = vpop.permute.xlu0 %9505  ;;  %v9516_v60 = vpop.permute.xlu1 %9515 }
  0xb8   : > { %v9508_v21 = vunpack.i.h.bf16 %v9506_v31  ;;  %v9507_v53 = vunpack.i.l.bf16 %v9506_v31  ;;  %v9518_v10 = vunpack.i.h.bf16 %v9516_v60  ;;  %v9517_v27 = vunpack.i.l.bf16 %v9516_v60  ;;  %v11785_v31 = vld [vmem:[%s11341_s12 + $0x78] sm:$0xff] }
  0xb9   : > { %v1413_v60 = vrot.slane %v11701_v6, 7  ;;  %v16204_v20 = vrot.slane %v11785_v31, 7 }
  0xba   : > { %v2785_v47 = vsel %vm15934_vm1, %v2752_v43, %v9508_v21  ;;  %v2784_v29 = vsel %vm15934_vm1, %v2752_v43, %v9507_v53  ;;  %9730 = vrot.lane.b32.xlu2 %v9729_v24, %s16129_s28  ;;  %v9744_v43 = vpack.i.bf16 %v11723_v56, %v1715_v1  ;;  %v11794_v24 = vld [vmem:[%s11341_s12 + $0x80] sm:$0xff]  ;;  %vm15942_vm1 = vcmask 72704  }
  0xbb   : > { %v2818_v54 = vsel %vm15935_vm14, %v2785_v47, %v9518_v10  ;;  %v2817_v30 = vsel %vm15935_vm14, %v2784_v29, %v9517_v27  ;;  %v9527_v10 = vunpack.i.l.bf16 %v11687_v58  ;;  %vm15943_vm14 = vcmask 56320  }
  0xbc   : > { %v2851_v16 = vsel %vm16196_vm0, %v2818_v54, %v9503_v35  ;;  %v2850_v46 = vsel %vm16197_vm11, %v2817_v30, %v9502_v52  ;;  %v11790_v49 = vpop.permute.xlu2 %9565  ;;  %v1753_v52 = vsel %vm11740_vm13, %v11733_v9, 0.0  ;;  %vm16198_vm0 = vcmask 39936  }
  0xbd   : > { %9735 = vrot.lane.b32.xlu0 %v9734_v34, %s11150_s15  ;;  %9740 = vrot.lane.b32.xlu1 %v9739_v42, %s11152_s23  ;;  %v2883_v35 = vsel %vm16198_vm0, %v2850_v46, %v9522_v22  ;;  %vm16199_vm11 = vmmov %vm16198_vm0  ;;  %v16200_v58 = vrot.slane %v11696_v61, 7  ;;  %v1569_v42 = vrot.slane %v11785_v31, 1  ;;  %vm16202_vm0 = vcmask 48128  }
  0xbe   : > { %v2884_v27 = vsel %vm16199_vm11, %v2851_v16, %v9523_v8  ;;  %v9754_v16 = vpack.i.bf16 %v1753_v52, %v11748_v5  ;;  %v2916_v8 = vsel %vm16202_vm0, %v2883_v35, %v9527_v10  ;;  %vm16203_vm11 = vmmov %vm16202_vm0  ;;  %v11822_v47 = vsel %vm16201_vm8, %v1413_v60, %v16204_v20 }
  0xbf   : > { %v9511_v53 = vpop.permute.xlu0 %9510  ;;  %v9531_v1 = vpop.permute.xlu1 %9530  ;;  %v11809_v34 = vsel %vm16201_vm8, %v16200_v58, %v1413_v60  ;;  %v2917_v46 = vsel %vm16203_vm11, %v2884_v27, %v9528_v12  ;;  %vm16206_vm0 = vmmov %vm16205_vm6  ;;  %v16207_v35 = vrot.slane %v11794_v24, 1  ;;  %vm16208_vm11 = vcmask 1046528  }
  0xc0   : > { %v9513_v29 = vunpack.i.h.bf16 %v9511_v53  ;;  %v9512_v54 = vunpack.i.l.bf16 %v9511_v53  ;;  %v9533_v30 = vunpack.i.h.bf16 %v9531_v1  ;;  %v9532_v22 = vunpack.i.l.bf16 %v9531_v1 }
  0xc1   : > { %v1786_v52 = vsel %vm11758_vm12, %v11809_v34, 0.0  ;;  %v954_v27 = vadd.s32 120, %v11332_v2  ;;  %v9537_v20 = vunpack.i.l.bf16 %v11712_v17  ;;  %v1073_v60 = vand.u32 15, %v11767_v63 }
  0xc2   : > { %9745 = vrot.lane.b32.xlu2 %v9744_v43, %s11153_s22  ;;  %v2949_v58 = vsel %vm15943_vm14, %v2916_v8, %v9512_v54  ;;  %v2950_v21 = vsel %vm15943_vm14, %v2917_v46, %v9513_v29  ;;  %v11832_v43 = vsel %vm16208_vm11, %v1569_v42, %v16207_v35  ;;  %v16209_v29 = vrot.slane %v11701_v6, 1 }
  0xc3   : > { %v2982_v10 = vsel %vm16205_vm6, %v2949_v58, %v9532_v22  ;;  %v2983_v12 = vsel %vm16206_vm0, %v2950_v21, %v9533_v30  ;;  %v9759_v21 = vpack.i.bf16 %v11822_v47, %v1786_v52  ;;  %vm16210_vm6 = vmmov %vm16208_vm11  ;;  %v1818_v30 = vsel %vm11740_vm13, %v11832_v43, 0.0 }
  0xc4   : > { %v11835_v53 = vpop.permute.xlu2 %9580  ;;  %v3014_v1 = vpack.c.bf16 %v2983_v12, %v2982_v10  ;;  %v11847_v54 = vsel %vm16210_vm6, %v16209_v29, %v1569_v42  ;;  %v9498_v22 = vunpack.i.h.bf16 %v11728_v51  ;;  %v1508_v63 = vsel %vm11427_vm5, %v11373_v23, 0.0 }
  0xc5   : > { %9750 = vrot.lane.b32.xlu0 %v11738_v45, %s11149_s16  ;;  %9755 = vrot.lane.b32.xlu1 %v9754_v16, %s11151_s18  ;;  %v1080_v16 = vand.u32 15, %v954_v27  ;;  %vm16211_vm8 = vcmask 7168   ;;  %v9764_v42 = vpack.i.bf16 %v11785_v31, %v11701_v6  ;;  %v9769_v10 = vpack.i.bf16 %v1818_v30, %v11847_v54 }
  0xc6   : > { %8815 = vmatmul.msk.bf16.vlgmr.msra.gmra.mxu0 %vm15942_vm1, %v3014_v1  ;;  %v2754_v52 = vsel %vm16211_vm8, %v11381_v26, %v9537_v20  ;;  %vm11861_vm0 = vcmp.ge.s32.totalorder %v1073_v60, 1  ;;  %v16212_v12 = vmov 0  ;;  %vm16215_vm11 = vmmov %vm16211_vm8  ;;  %v16216_v27 = vmov 0 }
  0xc7   : > { %v9541_v45 = vpop.permute.xlu0 %9540  ;;  %v9546_v8 = vpop.permute.xlu1 %9545  ;;  %v16213_v12 = vsel %vm11861_vm0, 4294967295, %v16212_v12  ;;  %v2753_v51 = vsel %vm16215_vm11, %v1508_v63, %v9498_v22  ;;  %vm11867_vm6 = vcmp.lt.s32.totalorder %v1080_v16, 15  ;;  %vm16219_vm8 = vcmask 15360  }
  0xc8   : > { %v9543_v46 = vunpack.i.h.bf16 %v9541_v45  ;;  %v9542_v58 = vunpack.i.l.bf16 %v9541_v45  ;;  %16214 = vst [vmem:[#allocation32_spill] sm:$0xff] %v16213_v12  ;;  %v9548_v23 = vunpack.i.h.bf16 %v9546_v8  ;;  %v9547_v35 = vunpack.i.l.bf16 %v9546_v8  ;;  %vm16220_vm1 = vmmov %vm16219_vm8  ;;  %v11888_v45 = vld [vmem:[%s11341_s12 + $0x88] sm:$0xff] }
  0xc9   : > { %v16217_v27 = vsel %vm11867_vm6, 4294967295, %v16216_v27  ;;  %v9774_v60 = vpack.i.bf16 %v11701_v6, %v11696_v61  ;;  %v9552_v29 = vunpack.i.l.bf16 %v11753_v18  ;;  %v1679_v30 = vsel %vm11867_vm6, %v11733_v9, 0.0 }
  0xca   : > { %9760 = vrot.lane.b32.xlu2 %v9759_v21, %s11154_s26  ;;  %16218 = vst [vmem:[#allocation33_spill] sm:$0xff] %v16217_v27  ;;  %v2786_v26 = vsel %vm16219_vm8, %v2753_v51, %v9542_v58  ;;  %v2787_v1 = vsel %vm16220_vm1, %v2754_v52, %v9543_v46  ;;  %v9553_v21 = vunpack.i.h.bf16 %v11753_v18  ;;  %v1717_v22 = vsel %vm11861_vm0, %v11809_v34, 0.0 }
  0xcb   : > { %vm16221_vm1 = vcmask 23552   ;;  %v1417_v6 = vrot.slane %v11794_v24, 7  ;;  %v9779_v58 = vpack.i.bf16 %v1679_v30, %v11748_v5  ;;  %v9784_v9 = vpack.i.bf16 %v11822_v47, %v1717_v22  ;;  %v11909_v22 = vld [vmem:[%s11341_s12 + $0x90] sm:$0xff] }
  0xcc   : > { %v11873_v20 = vpop.permute.xlu2 %9595  ;;  %v2819_v8 = vsel %vm16221_vm1, %v2786_v26, %v9547_v35  ;;  %vm16222_vm11 = vmmov %vm16221_vm1  ;;  %v15946_v52 = vrot.slane %v11888_v45, 7  ;;  %vm16223_vm8 = vcmask 31744   ;;  %vm16225_vm1 = vcmask 39936  }
  0xcd   : > { %9765 = vrot.lane.b32.xlu0 %v9764_v42, %s11155_s1  ;;  %9770 = vrot.lane.b32.xlu1 %v9769_v10, %s16129_s28  ;;  %v2820_v16 = vsel %vm16222_vm11, %v2787_v1, %v9548_v23  ;;  %v2852_v10 = vsel %vm16223_vm8, %v2819_v8, %v9552_v29  ;;  %vm16224_vm14 = vmmov %vm16223_vm8  ;;  %vm16228_vm13 = vcmask 1040384   ;;  %v9568_v29 = vunpack.i.h.bf16 %v11790_v49 }
  0xce   : > { %v2853_v51 = vsel %vm16224_vm14, %v2820_v16, %v9553_v21  ;;  %vm16226_vm11 = vmmov %vm16225_vm1  ;;  %v9567_v21 = vunpack.i.l.bf16 %v11790_v49  ;;  %vm16229_vm14 = vcmask 48128   ;;  %vm16231_vm8 = vcmask 1040384  }
  0xcf   : > { %v9556_v63 = vpop.permute.xlu0 %9555  ;;  %v9561_v61 = vpop.permute.xlu1 %9560 }
  0xd0   : > { %v9558_v18 = vunpack.i.h.bf16 %v9556_v63  ;;  %v9557_v46 = vunpack.i.l.bf16 %v9556_v63  ;;  %v9563_v35 = vunpack.i.h.bf16 %v9561_v61  ;;  %v9562_v26 = vunpack.i.l.bf16 %v9561_v61 }
  0xd1   : > { %v16227_v63 = vrot.slane %v11785_v31, 7  ;;  %v11923_v61 = vsel %vm16231_vm8, %v1417_v6, %v15946_v52  ;;  %vm16237_vm8 = vcmask 1046528  }
  0xd2   : > { %9775 = vrot.lane.b32.xlu2 %v9774_v60, %s11150_s15  ;;  %v2885_v23 = vsel %vm16225_vm1, %v2852_v10, %v9557_v46  ;;  %v2886_v1 = vsel %vm16226_vm11, %v2853_v51, %v9558_v18  ;;  %v1755_v60 = vsel %vm11867_vm6, %v11832_v43, 0.0  ;;  %vm16232_vm1 = vcmask 56320  }
  0xd3   : > { %v11904_v5 = vsel %vm16228_vm13, %v16227_v63, %v1417_v6  ;;  %v2918_v8 = vsel %vm16229_vm14, %v2885_v23, %v9562_v26  ;;  %vm16230_vm13 = vmmov %vm16229_vm14  ;;  %v9794_v26 = vpack.i.bf16 %v1755_v60, %v11847_v54  ;;  %v955_v63 = vadd.s32 128, %v11332_v2 }
  0xd4   : > { %v11906_v30 = vpop.permute.xlu2 %9610  ;;  %v2919_v16 = vsel %vm16230_vm13, %v2886_v1, %v9563_v35  ;;  %v1788_v49 = vsel %vm11861_vm0, %v11904_v5, 0.0  ;;  %v956_v35 = vadd.s32 136, %v11332_v2  ;;  %v2951_v23 = vsel %vm16232_vm1, %v2918_v8, %v9567_v21  ;;  %vm16233_vm11 = vmmov %vm16232_vm1 }
  0xd5   : > { %9780 = vrot.lane.b32.xlu0 %v9779_v58, %s11152_s23  ;;  %9785 = vrot.lane.b32.xlu1 %v9784_v9, %s11153_s22  ;;  %v1573_v58 = vrot.slane %v11888_v45, 1  ;;  %v9799_v6 = vpack.i.bf16 %v11923_v61, %v1788_v49  ;;  %v2952_v1 = vsel %vm16233_vm11, %v2919_v16, %v9568_v29  ;;  %vm16234_vm14 = vcmask 64512   ;;  %vm16240_vm11 = vmmov %vm16237_vm8 }
  0xd6   : > { %vm16235_vm13 = vmmov %vm16234_vm14  ;;  %v16236_v60 = vrot.slane %v11909_v22, 1  ;;  %v1510_v29 = vsel %vm11490_vm7, %v11403_v38, 0.0  ;;  %v9582_v8 = vunpack.i.l.bf16 %v11835_v53  ;;  %vm16238_vm1 = vcmask 72704  }
  0xd7   : > { %v9571_v18 = vpop.permute.xlu0 %9570  ;;  %v11928_v46 = vpop.permute.xlu1 %9575  ;;  %v16239_v16 = vrot.slane %v11794_v24, 1  ;;  %vm16259_vm7 = vcmask 56320  }
  0xd8   : > { %v9573_v10 = vunpack.i.h.bf16 %v9571_v18  ;;  %v9572_v51 = vunpack.i.l.bf16 %v9571_v18  ;;  %v9538_v18 = vunpack.i.h.bf16 %v11712_v17  ;;  %v9577_v0 = vunpack.i.l.bf16 %v11928_v46 }
  0xd9   : > { %v11946_v49 = vsel %vm16237_vm8, %v1573_v58, %v16236_v60  ;;  %v11957_v17 = vpack.i.bf16 %v11888_v45, %v11794_v24  ;;  %v11965_v38 = vsel %vm16240_vm11, %v16239_v16, %v1573_v58 }
  0xda   : > { %9790 = vrot.lane.b32.xlu2 %v9764_v42, %s11149_s16  ;;  %v2984_v52 = vsel %vm16234_vm14, %v2951_v23, %v9572_v51  ;;  %v2985_v9 = vsel %vm16235_vm13, %v2952_v1, %v9573_v10  ;;  %v1094_v42 = vand.u32 15, %v956_v35  ;;  %vm16241_vm14 = vcmask 7168  }
  0xdb   : > { %v3015_v50 = vpack.c.bf16 %v2985_v9, %v2984_v52  ;;  %v9583_v52 = vunpack.i.h.bf16 %v11835_v53  ;;  %v1820_v9 = vsel %vm11867_vm6, %v11946_v49, 0.0  ;;  %v2755_v10 = vsel %vm16241_vm14, %v1510_v29, %v9538_v18  ;;  %vm16242_vm13 = vmmov %vm16241_vm14 }
  0xdc   : > { %v11951_v21 = vpop.permute.xlu2 %9625  ;;  %v1087_v51 = vand.u32 15, %v955_v63  ;;  %v2756_v35 = vsel %vm16242_vm13, %v11406_v39, %v9577_v0  ;;  %vm11973_vm8 = vcmp.lt.s32.totalorder %v1094_v42, 15  ;;  %v9809_v58 = vpack.i.bf16 %v1820_v9, %v11965_v38 }
  0xdd   : > { %9795 = vrot.lane.b32.xlu0 %v9794_v26, %s11151_s18  ;;  %9800 = vrot.lane.b32.xlu1 %v9799_v6, %s11154_s26  ;;  %v9814_v1 = vpack.i.bf16 %v11794_v24, %v11785_v31  ;;  %v16248_v39 = vmov 0  ;;  %vm16251_vm13 = vcmask 23552   ;;  %v1681_v31 = vsel %vm11973_vm8, %v11832_v43, 0.0 }
  0xde   : > { %8816 = vmatmul.msk.bf16.gmra.mxu0 %vm16238_vm1, %v3015_v50  ;;  %v16243_v50 = vmov 0  ;;  %vm16246_vm1 = vcmask 15360   ;;  %vm11984_vm14 = vcmp.ge.s32.totalorder %v1087_v51, 1  ;;  %vm16252_vm6 = vmmov %vm16251_vm13  ;;  %v9613_v51 = vunpack.i.h.bf16 %v11906_v30 }
  0xdf   : > { %v9586_v26 = vpop.permute.xlu0 %9585  ;;  %v9591_v6 = vpop.permute.xlu1 %9590  ;;  %v16244_v50 = vsel %vm11973_vm8, 4294967295, %v16243_v50  ;;  %v2788_v60 = vsel %vm16246_vm1, %v2755_v10, %v9582_v8  ;;  %vm16247_vm11 = vmmov %vm16246_vm1  ;;  %v16249_v39 = vsel %vm11984_vm14, 4294967295, %v16248_v39  ;;  %v9597_v8 = vunpack.i.l.bf16 %v11873_v20 }
  0xe0   : > { %v9588_v53 = vunpack.i.h.bf16 %v9586_v26  ;;  %v9587_v23 = vunpack.i.l.bf16 %v9586_v26  ;;  %16245 = vst [vmem:[#allocation34_spill] sm:$0xff] %v16244_v50  ;;  %v2789_v63 = vsel %vm16247_vm11, %v2756_v35, %v9583_v52  ;;  %v9593_v18 = vunpack.i.h.bf16 %v9591_v6  ;;  %v12114_v50 = vld [vmem:[%s11341_s12 + $0xa8] sm:$0xff] }
  0xe1   : > { %v9592_v29 = vunpack.i.l.bf16 %v9591_v6  ;;  %16250 = vst [vmem:[#allocation35_spill] sm:$0xff] %v16249_v39  ;;  %v9598_v52 = vunpack.i.h.bf16 %v11873_v20  ;;  %vm16253_vm1 = vcmask 31744   ;;  %v9819_v10 = vpack.i.bf16 %v1681_v31, %v11847_v54  ;;  %v12008_v6 = vld [vmem:[%s11341_s12 + $0x98] sm:$0xff] }
  0xe2   : > { %9805 = vrot.lane.b32.xlu2 %v11957_v17, %s11155_s1  ;;  %v2821_v0 = vsel %vm16251_vm13, %v2788_v60, %v9587_v23  ;;  %v2822_v42 = vsel %vm16252_vm6, %v2789_v63, %v9588_v53  ;;  %vm16254_vm11 = vmmov %vm16253_vm1  ;;  %v1719_v43 = vsel %vm11984_vm14, %v11904_v5, 0.0  ;;  %v9612_v35 = vunpack.i.l.bf16 %v11906_v30 }
  0xe3   : > { %v2854_v16 = vsel %vm16253_vm1, %v2821_v0, %v9592_v29  ;;  %v2855_v9 = vsel %vm16254_vm11, %v2822_v42, %v9593_v18  ;;  %v1421_v53 = vrot.slane %v11909_v22, 7  ;;  %vm16255_vm6 = vcmask 39936   ;;  %v12015_v29 = vld [vmem:[%s11341_s12 + $0xa0] sm:$0xff] }
  0xe4   : > { %v11993_v24 = vpop.permute.xlu2 %9640  ;;  %v2887_v54 = vsel %vm16255_vm6, %v2854_v16, %v9597_v8  ;;  %vm16256_vm13 = vmmov %vm16255_vm6  ;;  %v9824_v18 = vpack.i.bf16 %v11923_v61, %v1719_v43  ;;  %vm16257_vm1 = vcmask 48128   ;;  %v1757_v42 = vsel %vm11973_vm8, %v11946_v49, 0.0 }
  0xe5   : > { %9810 = vrot.lane.b32.xlu0 %v9809_v58, %s16129_s28  ;;  %9815 = vrot.lane.b32.xlu1 %v9814_v1, %s11150_s15  ;;  %v2888_v63 = vsel %vm16256_vm13, %v2855_v9, %v9598_v52  ;;  %vm16258_vm11 = vmmov %vm16257_vm1  ;;  %v15956_v31 = vrot.slane %v12008_v6, 7  ;;  %v16261_v16 = vrot.slane %v11888_v45, 7  ;;  %vm16262_vm13 = vcmask 1040384  }
  0xe6   : > { %vm16260_vm6 = vmmov %vm16259_vm7  ;;  %v958_v43 = vadd.s32 152, %v11332_v2  ;;  %v16292_v19 = vrot.slane %v12114_v50, 7 }
  0xe7   : > { %v9601_v20 = vpop.permute.xlu0 %9600  ;;  %v9606_v26 = vpop.permute.xlu1 %9605  ;;  %v12029_v9 = vsel %vm16262_vm13, %v16261_v16, %v1421_v53  ;;  %v1512_v16 = vsel %vm11550_vm9, %v11448_v59, 0.0  ;;  %vm16293_vm9 = vcmask 1040384  }
  0xe8   : > { %v9603_v23 = vunpack.i.h.bf16 %v9601_v20  ;;  %v9602_v58 = vunpack.i.l.bf16 %v9601_v20  ;;  %v9608_v1 = vunpack.i.h.bf16 %v9606_v26  ;;  %v9607_v60 = vunpack.i.l.bf16 %v9606_v26 }
  0xea   : > { %v2920_v30 = vsel %vm16257_vm1, %v2887_v54, %v9602_v58  ;;  %v2921_v0 = vsel %vm16258_vm11, %v2888_v63, %v9603_v23  ;;  %9820 = vrot.lane.b32.xlu2 %v9819_v10, %s11152_s23  ;;  %vm16263_vm1 = vcmask 64512   ;;  %v1577_v23 = vrot.slane %v12008_v6, 1 }
  0xeb   : > { %v2953_v8 = vsel %vm16259_vm7, %v2920_v30, %v9607_v60  ;;  %v2954_v52 = vsel %vm16260_vm6, %v2921_v0, %v9608_v1  ;;  %vm16264_vm11 = vmmov %vm16263_vm1  ;;  %v15955_v58 = vrot.slane %v12015_v29, 1  ;;  %v957_v60 = vadd.s32 144, %v11332_v2 }
  0xec   : > { %v12032_v20 = vpop.permute.xlu2 %9655  ;;  %v2986_v10 = vsel %vm16263_vm1, %v2953_v8, %v9612_v35  ;;  %v2987_v26 = vsel %vm16264_vm11, %v2954_v52, %v9613_v51  ;;  %v9834_v54 = vpack.i.bf16 %v1757_v42, %v11965_v38  ;;  %vm16265_vm7 = vmmov %vm16262_vm13  ;;  %v1790_v51 = vsel %vm11984_vm14, %v12029_v9, 0.0 }
  0xed   : > { %9825 = vrot.lane.b32.xlu0 %v9824_v18, %s11153_s22  ;;  %9830 = vrot.lane.b32.xlu1 %v11957_v17, %s11149_s16  ;;  %v3016_v1 = vpack.c.bf16 %v2987_v26, %v2986_v10  ;;  %v12046_v35 = vsel %vm16265_vm7, %v1421_v53, %v15956_v31  ;;  %vm16266_vm6 = vcmask 72704   ;;  %v1108_v18 = vand.u32 15, %v958_v43 }
  0xee   : > { %vm16267_vm13 = vcmask 1046528   ;;  %v9578_v53 = vunpack.i.h.bf16 %v11928_v46  ;;  %v1101_v42 = vand.u32 15, %v957_v60  ;;  %v9839_v8 = vpack.i.bf16 %v12046_v35, %v1790_v51 }
  0xef   : > { %v12051_v63 = vpop.permute.xlu0 %9615  ;;  %v9621_v30 = vpop.permute.xlu1 %9620  ;;  %8817 = vmatmul.msk.bf16.gmra.mxu0 %vm16266_vm6, %v3016_v1  ;;  %v12058_v0 = vsel %vm16267_vm13, %v1577_v23, %v15955_v58  ;;  %v12064_v52 = vpack.i.bf16 %v12008_v6, %v11909_v22  ;;  %v16268_v43 = vrot.slane %v11909_v22, 1  ;;  %vm16269_vm1 = vmmov %vm16267_vm13  ;;  %vm12078_vm11 = vcmp.lt.s32.totalorder %v1108_v18, 15 }
  0xf0   : > { %v9617_v17 = vunpack.i.l.bf16 %v12051_v63  ;;  %v9623_v26 = vunpack.i.h.bf16 %v9621_v30  ;;  %v9622_v46 = vunpack.i.l.bf16 %v9621_v30  ;;  %v1822_v60 = vsel %vm11973_vm8, %v12058_v0, 0.0 }
  0xf1   : > { %v12073_v10 = vsel %vm16269_vm1, %v16268_v43, %v1577_v23  ;;  %v16270_v1 = vmov 0  ;;  %vm16273_vm7 = vcmask 7168   ;;  %vm12087_vm13 = vcmp.ge.s32.totalorder %v1101_v42, 1 }
  0xf2   : > { %9835 = vrot.lane.b32.xlu2 %v9834_v54, %s11151_s18  ;;  %v16271_v1 = vsel %vm12078_vm11, 4294967295, %v16270_v1  ;;  %v2758_v59 = vsel %vm16273_vm7, %v11458_v62, %v9617_v17  ;;  %vm16274_vm6 = vmmov %vm16273_vm7  ;;  %v16275_v23 = vmov 0  ;;  %v9628_v30 = vunpack.i.h.bf16 %v11951_v21 }
  0xf3   : > { %16272 = vst [vmem:[#allocation36_spill] sm:$0xff] %v16271_v1  ;;  %v2757_v54 = vsel %vm16274_vm6, %v1512_v16, %v9578_v53  ;;  %v16276_v23 = vsel %vm12087_vm13, 4294967295, %v16275_v23  ;;  %v9627_v18 = vunpack.i.l.bf16 %v11951_v21  ;;  %v9849_v43 = vpack.i.bf16 %v1822_v60, %v12073_v10 }
  0xf4   : > { %v12084_v51 = vpop.permute.xlu2 %9670  ;;  %16277 = vst [vmem:[#allocation37_spill] sm:$0xff] %v16276_v23  ;;  %v1683_v62 = vsel %vm12078_vm11, %v11946_v49, 0.0  ;;  %vm16278_vm1 = vcmask 15360   ;;  %v9854_v31 = vpack.i.bf16 %v11909_v22, %v11888_v45  ;;  %v1721_v60 = vsel %vm12087_vm13, %v12029_v9, 0.0 }
  0xf5   : > { %9840 = vrot.lane.b32.xlu0 %v9839_v8, %s11154_s26  ;;  %9845 = vrot.lane.b32.xlu1 %v12064_v52, %s11155_s1  ;;  %v2791_v17 = vsel %vm16278_vm1, %v2758_v59, %v9623_v26  ;;  %vm16279_vm7 = vmmov %vm16278_vm1  ;;  %v9859_v21 = vpack.i.bf16 %v1683_v62, %v11965_v38  ;;  %vm16280_vm6 = vcmask 23552   ;;  %v1425_v45 = vrot.slane %v12015_v29, 7  ;;  %v12120_v38 = vld [vmem:[%s11341_s12 + $0xb0] sm:$0xff] }
  0xf6   : > { %v2790_v53 = vsel %vm16279_vm7, %v2757_v54, %v9622_v46  ;;  %vm16281_vm1 = vmmov %vm16280_vm6  ;;  %vm16282_vm7 = vcmask 31744   ;;  %v9658_v1 = vunpack.i.h.bf16 %v12032_v20 }
  0xf7   : > { %v9631_v42 = vpop.permute.xlu0 %9630  ;;  %v9636_v8 = vpop.permute.xlu1 %9635  ;;  %v2823_v49 = vsel %vm16280_vm6, %v2790_v53, %v9627_v18  ;;  %v2824_v26 = vsel %vm16281_vm1, %v2791_v17, %v9628_v30  ;;  %vm16283_vm8 = vmmov %vm16282_vm7  ;;  %v9643_v18 = vunpack.i.h.bf16 %v11993_v24  ;;  %v9642_v30 = vunpack.i.l.bf16 %v11993_v24 }
  0xf8   : > { %v9633_v16 = vunpack.i.h.bf16 %v9631_v42  ;;  %v9632_v58 = vunpack.i.l.bf16 %v9631_v42  ;;  %v9638_v59 = vunpack.i.h.bf16 %v9636_v8  ;;  %v9637_v46 = vunpack.i.l.bf16 %v9636_v8 }
  0xf9   : > { %vm16284_vm6 = vcmask 39936   ;;  %v1759_v17 = vsel %vm12078_vm11, %v12058_v0, 0.0  ;;  %v959_v8 = vadd.s32 160, %v11332_v2  ;;  %vm16287_vm1 = vcmask 1040384  }
  0xfa   : > { %9850 = vrot.lane.b32.xlu2 %v9849_v43, %s16129_s28  ;;  %v2856_v54 = vsel %vm16282_vm7, %v2823_v49, %v9632_v58  ;;  %v2857_v42 = vsel %vm16283_vm8, %v2824_v26, %v9633_v16  ;;  %v9864_v58 = vpack.i.bf16 %v12046_v35, %v1721_v60  ;;  %vm16285_vm8 = vmmov %vm16284_vm6  ;;  %v1581_v60 = vrot.slane %v12114_v50, 1 }
  0xfb   : > { %v2889_v43 = vsel %vm16284_vm6, %v2856_v54, %v9637_v46  ;;  %v2890_v62 = vsel %vm16285_vm8, %v2857_v42, %v9638_v59  ;;  %v9874_v42 = vpack.i.bf16 %v1759_v17, %v12073_v10  ;;  %vm16288_vm7 = vcmask 48128  }
  0xfc   : > { %v12117_v22 = vpop.permute.xlu2 %9685  ;;  %v2922_v53 = vsel %vm16288_vm7, %v2889_v43, %v9642_v30  ;;  %vm16289_vm6 = vmmov %vm16288_vm7  ;;  %vm16290_vm8 = vcmask 56320   ;;  %v12150_v49 = vsel %vm16293_vm9, %v1425_v45, %v16292_v19  ;;  %v9657_v19 = vunpack.i.l.bf16 %v12032_v20 }
  0xfd   : > { %9855 = vrot.lane.b32.xlu0 %v9854_v31, %s11150_s15  ;;  %9860 = vrot.lane.b32.xlu1 %v9859_v21, %s11152_s23  ;;  %v16286_v31 = vrot.slane %v12008_v6, 7  ;;  %v2923_v27 = vsel %vm16289_vm6, %v2890_v62, %v9643_v18  ;;  %vm16295_vm7 = vmmov %vm16294_vm4  ;;  %v16296_v18 = vrot.slane %v12120_v38, 1  ;;  %vm16297_vm6 = vcmask 1046528  }
  0xfe   : > { %vm16300_vm9 = vmmov %vm16297_vm6 }
  0xff   : > { %v9646_v16 = vpop.permute.xlu0 %9645  ;;  %v9651_v24 = vpop.permute.xlu1 %9650  ;;  %v12137_v21 = vsel %vm16287_vm1, %v16286_v31, %v1425_v45  ;;  %vm16291_vm1 = vmmov %vm16290_vm8 }
 0x100   : > { %v9648_v26 = vunpack.i.h.bf16 %v9646_v16  ;;  %v9647_v59 = vunpack.i.l.bf16 %v9646_v16  ;;  %v9653_v46 = vunpack.i.h.bf16 %v9651_v24  ;;  %v9652_v54 = vunpack.i.l.bf16 %v9651_v24 }
 0x101   : > { %v1792_v16 = vsel %vm12087_vm13, %v12137_v21, 0.0 }
 0x102   : > { %9865 = vrot.lane.b32.xlu2 %v9864_v58, %s11153_s22  ;;  %v2955_v57 = vsel %vm16290_vm8, %v2922_v53, %v9647_v59  ;;  %v2956_v31 = vsel %vm16291_vm1, %v2923_v27, %v9648_v26  ;;  %v12160_v58 = vsel %vm16297_vm6, %v1581_v60, %v16296_v18  ;;  %v960_v27 = vadd.s32 168, %v11332_v2 }
 0x103   : > { %v2988_v17 = vsel %vm16294_vm4, %v2955_v57, %v9652_v54  ;;  %v2989_v30 = vsel %vm16295_vm7, %v2956_v31, %v9653_v46  ;;  %v1115_v57 = vand.u32 15, %v959_v8  ;;  %vm16298_vm4 = vcmask 72704  }
 0x104   : > { %v12163_v43 = vpop.permute.xlu2 %9700  ;;  %v3017_v62 = vpack.c.bf16 %v2989_v30, %v2988_v17  ;;  %v9879_v45 = vpack.i.bf16 %v12150_v49, %v1792_v16  ;;  %v16299_v53 = vrot.slane %v12015_v29, 1  ;;  %v1824_v26 = vsel %vm12078_vm11, %v12160_v58, 0.0 }
 0x105   : > { %9870 = vrot.lane.b32.xlu0 %v12064_v52, %s11149_s16  ;;  %9875 = vrot.lane.b32.xlu1 %v9874_v42, %s11151_s18  ;;  %v9618_v59 = vunpack.i.h.bf16 %v12051_v63  ;;  %v1122_v54 = vand.u32 15, %v960_v27  ;;  %v1514_v8 = vsel %vm11603_vm10, %v11514_v32, 0.0  ;;  %vm16301_vm8 = vcmask 7168  }
 0x106   : > { %8818 = vmatmul.msk.bf16.gmra.mxu0 %vm16298_vm4, %v3017_v62  ;;  %v12174_v24 = vsel %vm16300_vm9, %v16299_v53, %v1581_v60  ;;  %v2760_v16 = vsel %vm16301_vm8, %v11524_v41, %v9657_v19  ;;  %v9884_v60 = vpack.i.bf16 %v12114_v50, %v12015_v29  ;;  %vm12188_vm1 = vcmp.ge.s32.totalorder %v1115_v57, 1  ;;  %vm16305_vm7 = vmmov %vm16301_vm8 }
 0x107   : > { %v9661_v46 = vpop.permute.xlu0 %9660  ;;  %v9666_v52 = vpop.permute.xlu1 %9665  ;;  %v9889_v17 = vpack.i.bf16 %v1824_v26, %v12174_v24  ;;  %v16302_v30 = vmov 0  ;;  %v2759_v63 = vsel %vm16305_vm7, %v1514_v8, %v9618_v59  ;;  %vm12194_vm6 = vcmp.lt.s32.totalorder %v1122_v54, 15 }
 0x108   : > { %v9663_v42 = vunpack.i.h.bf16 %v9661_v46  ;;  %v9662_v31 = vunpack.i.l.bf16 %v9661_v46  ;;  %v16303_v30 = vsel %vm12188_vm1, 4294967295, %v16302_v30  ;;  %v9668_v32 = vunpack.i.h.bf16 %v9666_v52  ;;  %v12215_v46 = vld [vmem:[%s11341_s12 + $0xb8] sm:$0xff] }
 0x109   : > { %16304 = vst [vmem:[#allocation38_spill] sm:$0xff] %v16303_v30  ;;  %v9667_v18 = vunpack.i.l.bf16 %v9666_v52  ;;  %v16306_v27 = vmov 0  ;;  %vm16309_vm4 = vcmask 15360   ;;  %v9894_v57 = vpack.i.bf16 %v12015_v29, %v12008_v6 }
 0x10a   : > { %9880 = vrot.lane.b32.xlu2 %v9879_v45, %s11154_s26  ;;  %v16307_v27 = vsel %vm12194_vm6, 4294967295, %v16306_v27  ;;  %v2792_v41 = vsel %vm16309_vm4, %v2759_v63, %v9662_v31  ;;  %vm16310_vm9 = vmmov %vm16309_vm4  ;;  %v9673_v45 = vunpack.i.h.bf16 %v12084_v51  ;;  %v9672_v53 = vunpack.i.l.bf16 %v12084_v51 }
 0x10b   : > { %16308 = vst [vmem:[#allocation39_spill] sm:$0xff] %v16307_v27  ;;  %v2793_v62 = vsel %vm16310_vm9, %v2760_v16, %v9663_v42  ;;  %v1685_v26 = vsel %vm12194_vm6, %v12058_v0, 0.0  ;;  %v1723_v59 = vsel %vm12188_vm1, %v12137_v21, 0.0  ;;  %vm16311_vm8 = vcmask 23552  }
 0x10c   : > { %v12200_v19 = vpop.permute.xlu2 %9715  ;;  %v2826_v52 = vsel %vm16311_vm8, %v2793_v62, %v9668_v32  ;;  %vm16312_vm7 = vmmov %vm16311_vm8  ;;  %v1429_v29 = vrot.slane %v12120_v38, 7  ;;  %v9899_v31 = vpack.i.bf16 %v1685_v26, %v12073_v10  ;;  %v9904_v0 = vpack.i.bf16 %v12150_v49, %v1723_v59  ;;  %v12236_v59 = vld [vmem:[%s11341_s12 + $0xc0] sm:$0xff] }
 0x10d   : > { %9885 = vrot.lane.b32.xlu0 %v9884_v60, %s11155_s1  ;;  %9890 = vrot.lane.b32.xlu1 %v9889_v17, %s16129_s28  ;;  %v2825_v54 = vsel %vm16312_vm7, %v2792_v41, %v9667_v18  ;;  %v15973_v16 = vrot.slane %v12215_v46, 7  ;;  %vm16313_vm4 = vcmask 31744   ;;  %vm16315_vm8 = vcmask 39936  }
 0x10e   : > { %v2858_v17 = vsel %vm16313_vm4, %v2825_v54, %v9672_v53  ;;  %vm16314_vm9 = vmmov %vm16313_vm4  ;;  %vm16318_vm11 = vcmask 1040384   ;;  %v9688_v53 = vunpack.i.h.bf16 %v12117_v22  ;;  %vm16319_vm4 = vcmask 48128  }
 0x10f   : > { %v9676_v8 = vpop.permute.xlu0 %9675  ;;  %v9681_v6 = vpop.permute.xlu1 %9680  ;;  %v2859_v63 = vsel %vm16314_vm9, %v2826_v52, %v9673_v45  ;;  %vm16316_vm7 = vmmov %vm16315_vm8  ;;  %v9687_v45 = vunpack.i.l.bf16 %v12117_v22  ;;  %vm16321_vm9 = vcmask 1040384   ;;  %v16326_v15 = vrot.slane %v12236_v59, 1 }
 0x110   : > { %v9678_v51 = vunpack.i.h.bf16 %v9676_v8  ;;  %v9677_v42 = vunpack.i.l.bf16 %v9676_v8  ;;  %v9683_v32 = vunpack.i.h.bf16 %v9681_v6  ;;  %v9682_v62 = vunpack.i.l.bf16 %v9681_v6 }
 0x111   : > { %v16317_v8 = vrot.slane %v12114_v50, 7  ;;  %v12250_v6 = vsel %vm16321_vm9, %v1429_v29, %v15973_v16  ;;  %vm16327_vm9 = vcmask 1046528   ;;  %v9924_v20 = vpack.i.bf16 %v12215_v46, %v12120_v38 }
 0x112   : > { %9895 = vrot.lane.b32.xlu2 %v9894_v57, %s11150_s15  ;;  %v2891_v18 = vsel %vm16315_vm8, %v2858_v17, %v9677_v42  ;;  %v2892_v41 = vsel %vm16316_vm7, %v2859_v63, %v9678_v51  ;;  %v1761_v57 = vsel %vm12194_vm6, %v12160_v58, 0.0  ;;  %v961_v17 = vadd.s32 176, %v11332_v2 }
 0x113   : > { %v12231_v10 = vsel %vm16318_vm11, %v16317_v8, %v1429_v29  ;;  %v2924_v52 = vsel %vm16319_vm4, %v2891_v18, %v9682_v62  ;;  %vm16320_vm11 = vmmov %vm16319_vm4  ;;  %v962_v62 = vadd.s32 184, %v11332_v2  ;;  %v9914_v29 = vpack.i.bf16 %v1761_v57, %v12174_v24 }
 0x114   : > { %v12233_v26 = vpop.permute.xlu2 %9730  ;;  %v2925_v54 = vsel %vm16320_vm11, %v2892_v41, %v9683_v32  ;;  %v1794_v22 = vsel %vm12188_vm1, %v12231_v10, 0.0  ;;  %vm16322_vm8 = vcmask 56320   ;;  %vm16324_vm4 = vcmask 64512  }
 0x115   : > { %9900 = vrot.lane.b32.xlu0 %v9899_v31, %s11152_s23  ;;  %9905 = vrot.lane.b32.xlu1 %v9904_v0, %s11153_s22  ;;  %v1585_v31 = vrot.slane %v12215_v46, 1  ;;  %v9919_v18 = vpack.i.bf16 %v12250_v6, %v1794_v22  ;;  %v2957_v41 = vsel %vm16322_vm8, %v2924_v52, %v9687_v45  ;;  %vm16323_vm7 = vmmov %vm16322_vm8  ;;  %v1129_v52 = vand.u32 15, %v961_v17 }
 0x116   : > { %v2958_v8 = vsel %vm16323_vm7, %v2925_v54, %v9688_v53  ;;  %vm16325_vm11 = vmmov %vm16324_vm4  ;;  %v1516_v53 = vsel %vm11680_vm15, %v11576_v11, 0.0  ;;  %vm16328_vm8 = vcmask 72704   ;;  %v16329_v54 = vrot.slane %v12120_v38, 1 }
 0x117   : > { %v9691_v51 = vpop.permute.xlu0 %9690  ;;  %v12255_v42 = vpop.permute.xlu1 %9695  ;;  %v12273_v57 = vsel %vm16327_vm9, %v1585_v31, %v16326_v15  ;;  %v9702_v15 = vunpack.i.l.bf16 %v12163_v43  ;;  %vm16330_vm7 = vmmov %vm16327_vm9  ;;  %vm16350_vm15 = vcmask 1040384   ;;  %vm16351_vm10 = vcmask 56320  }
 0x118   : > { %v9693_v63 = vunpack.i.h.bf16 %v9691_v51  ;;  %v9692_v32 = vunpack.i.l.bf16 %v9691_v51  ;;  %v9697_v51 = vunpack.i.l.bf16 %v12255_v42  ;;  %v12290_v11 = vsel %vm16330_vm7, %v16329_v54, %v1585_v31  ;;  %vm16352_vm5 = vmmov %vm16351_vm10 }
 0x119   : > { %v1826_v22 = vsel %vm12194_vm6, %v12273_v57, 0.0  ;;  %v16336_v31 = vmov 0  ;;  %vm16339_vm7 = vcmask 15360  }
 0x11a   : > { %9910 = vrot.lane.b32.xlu2 %v9884_v60, %s11149_s16  ;;  %v2990_v16 = vsel %vm16324_vm4, %v2957_v41, %v9692_v32  ;;  %v2991_v0 = vsel %vm16325_vm11, %v2958_v8, %v9693_v63  ;;  %v1136_v60 = vand.u32 15, %v962_v62  ;;  %vm16331_vm4 = vcmask 7168  }
 0x11b   : > { %v3018_v40 = vpack.c.bf16 %v2991_v0, %v2990_v16  ;;  %v9703_v16 = vunpack.i.h.bf16 %v12163_v43  ;;  %v2761_v0 = vsel %vm16331_vm4, %v1516_v53, %v9658_v1  ;;  %vm16332_vm11 = vmmov %vm16331_vm4  ;;  %v9934_v1 = vpack.i.bf16 %v12120_v38, %v12114_v50 }
 0x11c   : > { %v12278_v45 = vpop.permute.xlu2 %9745  ;;  %v2762_v17 = vsel %vm16332_vm11, %v11581_v14, %v9697_v51  ;;  %vm12298_vm9 = vcmp.lt.s32.totalorder %v1136_v60, 15  ;;  %vm16340_vm4 = vmmov %vm16339_vm7  ;;  %vm16341_vm11 = vcmask 23552   ;;  %v9718_v38 = vunpack.i.h.bf16 %v12200_v19 }
 0x11d   : > { %9915 = vrot.lane.b32.xlu0 %v9914_v29, %s11151_s18  ;;  %9920 = vrot.lane.b32.xlu1 %v9919_v18, %s11154_s26  ;;  %v9929_v29 = vpack.i.bf16 %v1826_v22, %v12290_v11  ;;  %v2794_v18 = vsel %vm16339_vm7, %v2761_v0, %v9702_v15  ;;  %v2795_v14 = vsel %vm16340_vm4, %v2762_v17, %v9703_v16  ;;  %vm16342_vm6 = vmmov %vm16341_vm11  ;;  %v1687_v60 = vsel %vm12298_vm9, %v12160_v58, 0.0  ;;  %v12330_v22 = vld [vmem:[%s11341_s12 + $0xc8] sm:$0xff] }
 0x11e   : > { %8819 = vmatmul.msk.bf16.gmra.mxu0 %vm16328_vm8, %v3018_v40  ;;  %v16333_v40 = vmov 0  ;;  %vm12302_vm8 = vcmp.ge.s32.totalorder %v1129_v52, 1  ;;  %v9717_v16 = vunpack.i.l.bf16 %v12200_v19  ;;  %vm16343_vm7 = vcmask 31744  }
 0x11f   : > { %v9706_v63 = vpop.permute.xlu0 %9705  ;;  %v9711_v32 = vpop.permute.xlu1 %9710  ;;  %v16334_v40 = vsel %vm12298_vm9, 4294967295, %v16333_v40  ;;  %v16337_v31 = vsel %vm12302_vm8, 4294967295, %v16336_v31  ;;  %v1725_v50 = vsel %vm12302_vm8, %v12231_v10, 0.0  ;;  %v9939_v58 = vpack.i.bf16 %v1687_v60, %v12174_v24 }
 0x120   : > { %v9708_v62 = vunpack.i.h.bf16 %v9706_v63  ;;  %v9707_v43 = vunpack.i.l.bf16 %v9706_v63  ;;  %16335 = vst [vmem:[#allocation40_spill] sm:$0xff] %v16334_v40  ;;  %v9713_v41 = vunpack.i.h.bf16 %v9711_v32  ;;  %v9712_v8 = vunpack.i.l.bf16 %v9711_v32 }
 0x121   : > { %16338 = vst [vmem:[#allocation41_spill] sm:$0xff] %v16337_v31  ;;  %v1433_v0 = vrot.slane %v12236_v59, 7  ;;  %v9733_v17 = vunpack.i.h.bf16 %v12233_v26  ;;  %v9732_v63 = vunpack.i.l.bf16 %v12233_v26  ;;  %vm16345_vm4 = vcmask 39936  }
 0x122   : > { %9925 = vrot.lane.b32.xlu2 %v9924_v20, %s11155_s1  ;;  %v2827_v51 = vsel %vm16341_vm11, %v2794_v18, %v9707_v43  ;;  %v2828_v53 = vsel %vm16342_vm6, %v2795_v14, %v9708_v62  ;;  %vm16344_vm6 = vmmov %vm16343_vm7  ;;  %v9944_v62 = vpack.i.bf16 %v12250_v6, %v1725_v50  ;;  %v16349_v26 = vrot.slane %v12215_v46, 7 }
 0x123   : > { %v2860_v15 = vsel %vm16343_vm7, %v2827_v51, %v9712_v8  ;;  %v2861_v54 = vsel %vm16344_vm6, %v2828_v53, %v9713_v41  ;;  %vm16346_vm11 = vmmov %vm16345_vm4  ;;  %v15989_v41 = vrot.slane %v12330_v22, 7  ;;  %vm16347_vm7 = vcmask 48128  }
 0x124   : > { %v12317_v52 = vpop.permute.xlu2 %9760  ;;  %v2893_v14 = vsel %vm16345_vm4, %v2860_v15, %v9717_v16  ;;  %v2894_v24 = vsel %vm16346_vm11, %v2861_v54, %v9718_v38  ;;  %vm16348_vm6 = vmmov %vm16347_vm7  ;;  %v12345_v53 = vsel %vm16350_vm15, %v16349_v26, %v1433_v0  ;;  %v964_v16 = vadd.s32 200, %v11332_v2  ;;  %v12351_v38 = vld [vmem:[%s11341_s12 + $0xd0] sm:$0xff] }
 0x125   : > { %9930 = vrot.lane.b32.xlu0 %v9929_v29, %s16129_s28  ;;  %9935 = vrot.lane.b32.xlu1 %v9934_v1, %s11150_s15  ;;  %v1763_v15 = vsel %vm12298_vm9, %v12273_v57, 0.0  ;;  %vm16353_vm4 = vcmask 64512   ;;  %v1518_v26 = vsel %vm11758_vm12, %v11628_v28, 0.0 }
 0x126   : > { %vm16354_vm11 = vmmov %vm16353_vm4 }
 0x127   : > { %v9721_v32 = vpop.permute.xlu0 %9720  ;;  %v9726_v19 = vpop.permute.xlu1 %9725 }
 0x128   : > { %v9723_v43 = vunpack.i.h.bf16 %v9721_v32  ;;  %v9722_v29 = vunpack.i.l.bf16 %v9721_v32  ;;  %v9728_v1 = vunpack.i.h.bf16 %v9726_v19  ;;  %v9727_v18 = vunpack.i.l.bf16 %v9726_v19 }
 0x12a   : > { %v2926_v8 = vsel %vm16347_vm7, %v2893_v14, %v9722_v29  ;;  %v2927_v51 = vsel %vm16348_vm6, %v2894_v24, %v9723_v43  ;;  %9940 = vrot.lane.b32.xlu2 %v9939_v58, %s11152_s23  ;;  %v1796_v29 = vsel %vm12302_vm8, %v12345_v53, 0.0  ;;  %v963_v14 = vadd.s32 192, %v11332_v2 }
 0x12b   : > { %v2959_v60 = vsel %vm16351_vm10, %v2926_v8, %v9727_v18  ;;  %v2960_v50 = vsel %vm16352_vm5, %v2927_v51, %v9728_v1  ;;  %vm16355_vm5 = vmmov %vm16350_vm15  ;;  %v1589_v1 = vrot.slane %v12330_v22, 1  ;;  %vm16356_vm10 = vcmask 72704  }
 0x12c   : > { %v12356_v54 = vpop.permute.xlu2 %9775  ;;  %v2992_v58 = vsel %vm16353_vm4, %v2959_v60, %v9732_v63  ;;  %v2993_v32 = vsel %vm16354_vm11, %v2960_v50, %v9733_v17  ;;  %v12365_v43 = vsel %vm16355_vm5, %v1433_v0, %v15989_v41  ;;  %v15988_v63 = vrot.slane %v12351_v38, 1 }
 0x12d   : > { %9945 = vrot.lane.b32.xlu0 %v9944_v62, %s11153_s22  ;;  %9950 = vrot.lane.b32.xlu1 %v9924_v20, %s11149_s16  ;;  %v3019_v19 = vpack.c.bf16 %v2993_v32, %v2992_v58  ;;  %v9954_v17 = vpack.i.bf16 %v1763_v15, %v12290_v11  ;;  %v1150_v20 = vand.u32 15, %v964_v16  ;;  %v9698_v24 = vunpack.i.h.bf16 %v12255_v42 }
 0x12e   : > { %v9959_v8 = vpack.i.bf16 %v12365_v43, %v1796_v29  ;;  %v12382_v51 = vpack.i.bf16 %v12330_v22, %v12236_v59  ;;  %vm16357_vm15 = vcmask 1046528   ;;  %v16358_v42 = vmov 0 }
 0x12f   : > { %v12373_v18 = vpop.permute.xlu0 %9735  ;;  %v9741_v62 = vpop.permute.xlu1 %9740  ;;  %8820 = vmatmul.msk.bf16.gmra.mxu0 %vm16356_vm10, %v3019_v19  ;;  %v12390_v60 = vsel %vm16357_vm15, %v1589_v1, %v15988_v63  ;;  %vm12393_vm7 = vcmp.lt.s32.totalorder %v1150_v20, 15  ;;  %v1143_v58 = vand.u32 15, %v963_v14  ;;  %vm16361_vm6 = vcmask 7168   ;;  %vm16364_vm11 = vmmov %vm16357_vm15 }
 0x130   : > { %v9737_v0 = vunpack.i.l.bf16 %v12373_v18  ;;  %v9743_v50 = vunpack.i.h.bf16 %v9741_v62  ;;  %v9742_v16 = vunpack.i.l.bf16 %v9741_v62  ;;  %v16359_v42 = vsel %vm12393_vm7, 4294967295, %v16358_v42  ;;  %vm16362_vm4 = vmmov %vm16361_vm6 }
 0x131   : > { %16360 = vst [vmem:[#allocation42_spill] sm:$0xff] %v16359_v42  ;;  %v1828_v15 = vsel %vm12298_vm9, %v12390_v60, 0.0  ;;  %v2763_v19 = vsel %vm16362_vm4, %v1518_v26, %v9698_v24  ;;  %v16363_v29 = vrot.slane %v12236_v59, 1  ;;  %v9748_v62 = vunpack.i.h.bf16 %v12278_v45 }
 0x132   : > { %9955 = vrot.lane.b32.xlu2 %v9954_v17, %s11151_s18  ;;  %v2764_v28 = vsel %vm16361_vm6, %v11639_v48, %v9737_v0  ;;  %v9747_v20 = vunpack.i.l.bf16 %v12278_v45  ;;  %v1689_v48 = vsel %vm12393_vm7, %v12273_v57, 0.0  ;;  %vm16365_vm5 = vcmask 15360  }
 0x133   : > { %v12411_v17 = vsel %vm16364_vm11, %v16363_v29, %v1589_v1  ;;  %v2797_v0 = vsel %vm16365_vm5, %v2764_v28, %v9743_v50  ;;  %vm16366_vm10 = vmmov %vm16365_vm5  ;;  %vm12421_vm15 = vcmp.ge.s32.totalorder %v1143_v58, 1  ;;  %v16367_v1 = vmov 0 }
 0x134   : > { %v12402_v32 = vpop.permute.xlu2 %9790  ;;  %v9969_v14 = vpack.i.bf16 %v1828_v15, %v12411_v17  ;;  %v2796_v24 = vsel %vm16366_vm10, %v2763_v19, %v9742_v16  ;;  %v16368_v1 = vsel %vm12421_vm15, 4294967295, %v16367_v1  ;;  %v9974_v63 = vpack.i.bf16 %v12236_v59, %v12215_v46  ;;  %v12439_v46 = vld [vmem:[%s11341_s12 + $0xd8] sm:$0xff]  ;;  %v12442_v59 = vld [vmem:[%s11341_s12 + $0xe0] sm:$0xff] }
 0x135   : > { %9960 = vrot.lane.b32.xlu0 %v9959_v8, %s11154_s26  ;;  %9965 = vrot.lane.b32.xlu1 %v12382_v51, %s11155_s1  ;;  %16369 = vst [vmem:[#allocation43_spill] sm:$0xff] %v16368_v1  ;;  %v9979_v57 = vpack.i.bf16 %v1689_v48, %v12290_v11  ;;  %vm16370_vm6 = vcmask 23552   ;;  %vm16372_vm11 = vcmask 31744   ;;  %v9763_v11 = vunpack.i.h.bf16 %v12317_v52 }
 0x136   : > { %v2829_v15 = vsel %vm16370_vm6, %v2796_v24, %v9747_v20  ;;  %vm16371_vm4 = vmmov %vm16370_vm6  ;;  %v1765_v20 = vsel %vm12393_vm7, %v12390_v60, 0.0  ;;  %vm16374_vm10 = vcmask 39936   ;;  %vm16382_vm9 = vcmask 64512  }
 0x137   : > { %v9751_v8 = vpop.permute.xlu0 %9750  ;;  %v9756_v26 = vpop.permute.xlu1 %9755  ;;  %v2830_v50 = vsel %vm16371_vm4, %v2797_v0, %v9748_v62  ;;  %vm16373_vm5 = vmmov %vm16372_vm11  ;;  %v9762_v62 = vunpack.i.l.bf16 %v12317_v52  ;;  %v1437_v0 = vrot.slane %v12351_v38, 7  ;;  %vm16376_vm4 = vcmask 48128  }
 0x138   : > { %v9753_v29 = vunpack.i.h.bf16 %v9751_v8  ;;  %v9752_v45 = vunpack.i.l.bf16 %v9751_v8  ;;  %v9758_v16 = vunpack.i.h.bf16 %v9756_v26  ;;  %v9757_v28 = vunpack.i.l.bf16 %v9756_v26  ;;  %vm16375_vm6 = vmmov %vm16374_vm10 }
 0x139   : > { %v1727_v8 = vsel %vm12421_vm15, %v12345_v53, 0.0  ;;  %v965_v26 = vadd.s32 208, %v11332_v2  ;;  %v3526_v1 = vand.u32 7, %v11400_v37  ;;  %v16644_v37 = vmov 0 }
 0x13a   : > { %9970 = vrot.lane.b32.xlu2 %v9969_v14, %s16129_s28  ;;  %v2862_v58 = vsel %vm16372_vm11, %v2829_v15, %v9752_v45  ;;  %v2863_v19 = vsel %vm16373_vm5, %v2830_v50, %v9753_v29  ;;  %v9984_v24 = vpack.i.bf16 %v12365_v43, %v1727_v8  ;;  %vm16377_vm11 = vmmov %vm16376_vm4  ;;  %vm16378_vm5 = vcmask 56320  }
 0x13b   : > { %v2895_v48 = vsel %vm16374_vm10, %v2862_v58, %v9757_v28  ;;  %v2896_v14 = vsel %vm16375_vm6, %v2863_v19, %v9758_v16  ;;  %v9994_v28 = vpack.i.bf16 %v1765_v20, %v12411_v17  ;;  %v15998_v19 = vrot.slane %v12439_v46, 7  ;;  %vm16379_vm10 = vmmov %vm16378_vm5 }
 0x13c   : > { %v12436_v41 = vpop.permute.xlu2 %9805  ;;  %v2928_v16 = vsel %vm16376_vm4, %v2895_v48, %v9762_v62  ;;  %v2929_v58 = vsel %vm16377_vm11, %v2896_v14, %v9763_v11  ;;  %v16380_v45 = vrot.slane %v12330_v22, 7  ;;  %vm16381_vm6 = vcmask 1040384   ;;  %vm16383_vm4 = vmmov %vm16382_vm9 }
 0x13d   : > { %9975 = vrot.lane.b32.xlu0 %v9974_v63, %s11150_s15  ;;  %9980 = vrot.lane.b32.xlu1 %v9979_v57, %s11152_s23  ;;  %v1593_v63 = vrot.slane %v12439_v46, 1  ;;  %v16384_v11 = vrot.slane %v12442_v59, 1  ;;  %vm16385_vm11 = vcmask 1046528  }
 0x13f   : > { %v9766_v29 = vpop.permute.xlu0 %9765  ;;  %v9771_v52 = vpop.permute.xlu1 %9770  ;;  %v12476_v48 = vsel %vm16385_vm11, %v1593_v63, %v16384_v11  ;;  %v12510_v11 = vpack.i.bf16 %v12439_v46, %v12351_v38 }
 0x140   : > { %v9768_v57 = vunpack.i.h.bf16 %v9766_v29  ;;  %v9767_v15 = vunpack.i.l.bf16 %v9766_v29  ;;  %v9773_v50 = vunpack.i.h.bf16 %v9771_v52  ;;  %v9772_v40 = vunpack.i.l.bf16 %v9771_v52 }
 0x141   : > { %v12468_v29 = vsel %vm16381_vm6, %v16380_v45, %v1437_v0  ;;  %v9777_v45 = vunpack.i.l.bf16 %v12356_v54 }
 0x142   : > { %v2961_v8 = vsel %vm16378_vm5, %v2928_v16, %v9767_v15  ;;  %v2962_v27 = vsel %vm16379_vm10, %v2929_v58, %v9768_v57  ;;  %9985 = vrot.lane.b32.xlu2 %v9984_v24, %s11153_s22  ;;  %v1798_v14 = vsel %vm12421_vm15, %v12468_v29, 0.0  ;;  %vm16387_vm5 = vcmask 72704   ;;  %vm16389_vm10 = vmmov %vm16385_vm11 }
 0x143   : > { %v2994_v20 = vsel %vm16382_vm9, %v2961_v8, %v9772_v40  ;;  %v2995_v62 = vsel %vm16383_vm4, %v2962_v27, %v9773_v50  ;;  %vm16386_vm9 = vmmov %vm16381_vm6  ;;  %v16388_v40 = vrot.slane %v12351_v38, 1  ;;  %v1830_v15 = vsel %vm12393_vm7, %v12476_v48, 0.0 }
 0x144   : > { %v12481_v52 = vpop.permute.xlu2 %9820  ;;  %v3020_v57 = vpack.c.bf16 %v2995_v62, %v2994_v20  ;;  %v12490_v27 = vsel %vm16386_vm9, %v1437_v0, %v15998_v19  ;;  %v1164_v50 = vand.u32 15, %v966_v25  ;;  %v1157_v16 = vand.u32 15, %v965_v26 }
 0x145   : > { %9990 = vrot.lane.b32.xlu0 %v12382_v51, %s11149_s16  ;;  %9995 = vrot.lane.b32.xlu1 %v9994_v28, %s11151_s18  ;;  %v12496_v24 = vsel %vm16389_vm10, %v16388_v40, %v1593_v63  ;;  %v9999_v51 = vpack.i.bf16 %v12490_v27, %v1798_v14  ;;  %v9738_v28 = vunpack.i.h.bf16 %v12373_v18  ;;  %v1520_v8 = vsel %vm11861_vm0, %v11710_v13, 0.0 }
 0x146   : > { %8821 = vmatmul.msk.bf16.gmra.mxu0 %vm16387_vm5, %v3020_v57  ;;  %vm16390_vm6 = vcmask 7168   ;;  %v10009_v25 = vpack.i.bf16 %v1830_v15, %v12496_v24  ;;  %vm12513_vm4 = vcmp.lt.s32.totalorder %v1164_v50, 15  ;;  %v16391_v18 = vmov 0 }
 0x147   : > { %v9781_v58 = vpop.permute.xlu0 %9780  ;;  %v9786_v0 = vpop.permute.xlu1 %9785  ;;  %v2766_v63 = vsel %vm16390_vm6, %v11723_v56, %v9777_v45  ;;  %v16392_v18 = vsel %vm12513_vm4, 4294967295, %v16391_v18  ;;  %vm16394_vm11 = vmmov %vm16390_vm6  ;;  %vm12519_vm9 = vcmp.ge.s32.totalorder %v1157_v16, 1  ;;  %v16395_v26 = vmov 0  ;;  %v12539_v16 = vld [vmem:[%s11341_s12 + $0xe8] sm:$0xff] }
 0x148   : > { %v9783_v20 = vunpack.i.h.bf16 %v9781_v58  ;;  %v9782_v62 = vunpack.i.l.bf16 %v9781_v58  ;;  %16393 = vst [vmem:[#allocation44_spill] sm:$0xff] %v16392_v18  ;;  %v2765_v13 = vsel %vm16394_vm11, %v1520_v8, %v9738_v28  ;;  %v16396_v26 = vsel %vm12519_vm9, 4294967295, %v16395_v26 }
 0x149   : > { %16397 = vst [vmem:[#allocation45_spill] sm:$0xff] %v16396_v26  ;;  %v9788_v56 = vunpack.i.h.bf16 %v9786_v0  ;;  %v9787_v14 = vunpack.i.l.bf16 %v9786_v0  ;;  %vm16398_vm5 = vcmask 15360   ;;  %v1691_v15 = vsel %vm12513_vm4, %v12390_v60, 0.0 }
 0x14a   : > { %10000 = vrot.lane.b32.xlu2 %v9999_v51, %s11154_s26  ;;  %v2798_v57 = vsel %vm16398_vm5, %v2765_v13, %v9782_v62  ;;  %vm16399_vm10 = vmmov %vm16398_vm5  ;;  %v9793_v50 = vunpack.i.h.bf16 %v12402_v32  ;;  %v9792_v51 = vunpack.i.l.bf16 %v12402_v32  ;;  %v1729_v28 = vsel %vm12519_vm9, %v12468_v29, 0.0 }
 0x14b   : > { %v2799_v45 = vsel %vm16399_vm10, %v2766_v63, %v9783_v20  ;;  %v10014_v58 = vpack.i.bf16 %v12442_v59, %v12330_v22  ;;  %vm16400_vm6 = vcmask 23552   ;;  %v1441_v60 = vrot.slane %v12442_v59, 7 }
 0x14c   : > { %v12525_v40 = vpop.permute.xlu2 %9835  ;;  %v2832_v0 = vsel %vm16400_vm6, %v2799_v45, %v9788_v56  ;;  %vm16401_vm11 = vmmov %vm16400_vm6  ;;  %v10024_v13 = vpack.i.bf16 %v12490_v27, %v1729_v28  ;;  %v16005_v19 = vrot.slane %v12539_v16, 7  ;;  %vm16402_vm5 = vcmask 31744  }
 0x14d   : > { %10005 = vrot.lane.b32.xlu0 %v12510_v11, %s11155_s1  ;;  %10010 = vrot.lane.b32.xlu1 %v10009_v25, %s16129_s28  ;;  %v2831_v8 = vsel %vm16401_vm11, %v2798_v57, %v9787_v14  ;;  %v10019_v25 = vpack.i.bf16 %v1691_v15, %v12411_v17  ;;  %vm16403_vm10 = vmmov %vm16402_vm5  ;;  %vm16404_vm6 = vcmask 39936   ;;  %vm16407_vm7 = vcmask 1040384  }
 0x14e   : > { %v2864_v42 = vsel %vm16402_vm5, %v2831_v8, %v9792_v51  ;;  %v2865_v22 = vsel %vm16403_vm10, %v2832_v0, %v9793_v50  ;;  %vm16405_vm11 = vmmov %vm16404_vm6  ;;  %v970_v15 = vadd.s32 248, %v11332_v2  ;;  %v12563_v51 = vld [vmem:[%s11341_s12 + $0xf0] sm:$0xff]  ;;  %v9808_v50 = vunpack.i.h.bf16 %v12436_v41 }
 0x14f   : > { %v9796_v20 = vpop.permute.xlu0 %9795  ;;  %v9801_v62 = vpop.permute.xlu1 %9800  ;;  %v9807_v0 = vunpack.i.l.bf16 %v12436_v41  ;;  %vm16408_vm5 = vcmask 48128  }
 0x150   : > { %v9798_v63 = vunpack.i.h.bf16 %v9796_v20  ;;  %v9797_v32 = vunpack.i.l.bf16 %v9796_v20  ;;  %v9803_v56 = vunpack.i.h.bf16 %v9801_v62  ;;  %v9802_v45 = vunpack.i.l.bf16 %v9801_v62  ;;  %vm16409_vm10 = vmmov %vm16408_vm5 }
 0x151   : > { %v16406_v20 = vrot.slane %v12439_v46, 7 }
 0x152   : > { %10015 = vrot.lane.b32.xlu2 %v10014_v58, %s11150_s15  ;;  %v2897_v14 = vsel %vm16404_vm6, %v2864_v42, %v9797_v32  ;;  %v2898_v57 = vsel %vm16405_vm11, %v2865_v22, %v9798_v63  ;;  %v1767_v42 = vsel %vm12513_vm4, %v12476_v48, 0.0  ;;  %v12575_v58 = vsel %vm16407_vm7, %v1441_v60, %v16005_v19 }
 0x153   : > { %v12557_v17 = vsel %vm16407_vm7, %v16406_v20, %v1441_v60  ;;  %v2930_v8 = vsel %vm16408_vm5, %v2897_v14, %v9802_v45  ;;  %v2931_v62 = vsel %vm16409_vm10, %v2898_v57, %v9803_v56  ;;  %v16008_v22 = vrot.slane %v12563_v51, 1 }
 0x154   : > { %v12560_v28 = vpop.permute.xlu2 %9850  ;;  %v1800_v41 = vsel %vm12519_vm9, %v12557_v17, 0.0  ;;  %v10034_v60 = vpack.i.bf16 %v1767_v42, %v12496_v24  ;;  %v969_v45 = vadd.s32 240, %v11332_v2  ;;  %vm16410_vm6 = vcmask 56320  }
 0x155   : > { %10020 = vrot.lane.b32.xlu0 %v10019_v25, %s11152_s23  ;;  %10025 = vrot.lane.b32.xlu1 %v10024_v13, %s11153_s22  ;;  %v1192_v25 = vand.u32 15, %v970_v15  ;;  %v1597_v13 = vrot.slane %v12539_v16, 1  ;;  %v10039_v56 = vpack.i.bf16 %v12575_v58, %v1800_v41  ;;  %v2963_v14 = vsel %vm16410_vm6, %v2930_v8, %v9807_v0  ;;  %vm16411_vm11 = vmmov %vm16410_vm6  ;;  %v12619_v8 = vld [vmem:[%s11341_s12 + $0xf8] sm:$0xff]  ;;  %s11159_s12 = smov 24  }
 0x156   : > { %v2964_v57 = vsel %vm16411_vm11, %v2931_v62, %v9808_v50  ;;  %v9778_v19 = vunpack.i.h.bf16 %v12356_v54  ;;  %vm16412_vm7 = vcmask 64512   ;;  %vm16414_vm10 = vcmask 1046528  }
 0x157   : > { %v9811_v63 = vpop.permute.xlu0 %9810  ;;  %v12582_v32 = vpop.permute.xlu1 %9815  ;;  %vm16413_vm5 = vmmov %vm16412_vm7  ;;  %v12600_v41 = vsel %vm16414_vm10, %v1597_v13, %v16008_v22  ;;  %vm12602_vm6 = vcmp.lt.s32.totalorder %v1192_v25, 15  ;;  %v16415_v0 = vmov 0  ;;  %v1697_v62 = vrot.slane %v12563_v51, 7 }
 0x158   : > { %v9813_v20 = vunpack.i.h.bf16 %v9811_v63  ;;  %v9812_v12 = vunpack.i.l.bf16 %v9811_v63  ;;  %v9817_v42 = vunpack.i.l.bf16 %v12582_v32  ;;  %v16416_v0 = vsel %vm12602_vm6, 4294967295, %v16415_v0  ;;  %vm16419_vm11 = vmmov %vm16414_vm10  ;;  %v12622_v25 = vpop.f32.mrf.mxu0 }
 0x159   : > { %16417 = vst [vmem:[#allocation46_spill] sm:$0xff] %v16416_v0  ;;  %v12642_v22 = vpack.i.bf16 %v12539_v16, %v12442_v59 }
 0x15a   : > { %v2996_v15 = vsel %vm16412_vm7, %v2963_v14, %v9812_v12  ;;  %v2997_v55 = vsel %vm16413_vm5, %v2964_v57, %v9813_v20  ;;  %10030 = vrot.lane.b32.xlu2 %v12510_v11, %s11149_s16  ;;  %v1522_v12 = vsel %vm11984_vm14, %v11809_v34, 0.0  ;;  %v1185_v11 = vand.u32 15, %v969_v45 }
 0x15b   : > { %v3021_v63 = vpack.c.bf16 %v2997_v55, %v2996_v15  ;;  %v16418_v55 = vrot.slane %v12442_v59, 1  ;;  %v9823_v34 = vunpack.i.h.bf16 %v12481_v52  ;;  %v9822_v20 = vunpack.i.l.bf16 %v12481_v52 }
 0x15c   : > { %v12609_v54 = vpop.permute.xlu2 %9865  ;;  %vm16420_vm7 = vcmask 72704   ;;  %vm16421_vm5 = vcmask 7168   ;;  %v1699_v52 = vrot.slane %v12619_v8, 7  ;;  %vm16430_vm14 = vcmask 23552  }
 0x15d   : > { %10035 = vrot.lane.b32.xlu0 %v10034_v60, %s11151_s18  ;;  %10040 = vrot.lane.b32.xlu1 %v10039_v56, %s11154_s26  ;;  %v12616_v50 = vsel %vm16419_vm11, %v16418_v55, %v1597_v13  ;;  %v1695_v60 = vsel %vm12602_vm6, %v12600_v41, 0.0  ;;  %v10044_v13 = vpack.i.bf16 %v12351_v38, %v12539_v16  ;;  %v2767_v45 = vsel %vm16421_vm5, %v1522_v12, %v9778_v19  ;;  %vm16422_vm10 = vmmov %vm16421_vm5 }
 0x15e   : > { %8822 = vmatmul.msk.bf16.gmra.mxu0 %vm16420_vm7, %v3021_v63  ;;  %v2768_v56 = vsel %vm16422_vm10, %v11822_v47, %v9817_v42  ;;  %vm12636_vm11 = vcmp.ge.s32.totalorder %v1185_v11, 1  ;;  %v16423_v63 = vmov 0  ;;  %v10054_v38 = vpack.i.bf16 %v1695_v60, %v12616_v50  ;;  %vm16431_vm0 = vmmov %vm16430_vm14 }
 0x15f   : > { %v9826_v14 = vpop.permute.xlu0 %9825  ;;  %v9831_v57 = vpop.permute.xlu1 %9830  ;;  %v16424_v63 = vsel %vm12636_vm11, 4294967295, %v16423_v63  ;;  %v16426_v19 = vrot.slane %v12539_v16, 7  ;;  %vm16427_vm7 = vcmask 1040384   ;;  %vm16428_vm5 = vcmask 15360  }
 0x160   : > { %v9828_v15 = vunpack.i.h.bf16 %v9826_v14  ;;  %v9827_v55 = vunpack.i.l.bf16 %v9826_v14  ;;  %16425 = vst [vmem:[#allocation47_spill] sm:$0xff] %v16424_v63  ;;  %v2800_v42 = vsel %vm16428_vm5, %v2767_v45, %v9822_v20  ;;  %vm16429_vm10 = vmmov %vm16428_vm5  ;;  %v9833_v14 = vunpack.i.h.bf16 %v9831_v57 }
 0x161   : > { %v12648_v47 = vsel %vm16427_vm7, %v16426_v19, %v1697_v62  ;;  %v2801_v12 = vsel %vm16429_vm10, %v2768_v56, %v9823_v34  ;;  %v9832_v11 = vunpack.i.l.bf16 %v9831_v57  ;;  %v1832_v60 = vsel %vm12513_vm4, %v12600_v41, 0.0 }
 0x162   : > { %10045 = vrot.lane.b32.xlu2 %v10044_v13, %s11150_s15  ;;  %v2833_v39 = vsel %vm16430_vm14, %v2800_v42, %v9827_v55  ;;  %v2834_v59 = vsel %vm16431_vm0, %v2801_v12, %v9828_v15  ;;  %v12661_v19 = vsel %vm16427_vm7, %v1697_v62, %v1699_v52  ;;  %v1733_v34 = vsel %vm12636_vm11, %v12648_v47, 0.0 }
 0x163   : > { %v1735_v20 = vrot.slane %v12619_v8, 1  ;;  %v9838_v13 = vunpack.i.h.bf16 %v12525_v40  ;;  %v9837_v45 = vunpack.i.l.bf16 %v12525_v40  ;;  %vm16432_vm0 = vcmask 31744   ;;  %v12678_v40 = vpop.f32.mrf.mxu0 }
 0x164   : > { %v12658_v16 = vpop.permute.xlu2 %9880  ;;  %v2866_v56 = vsel %vm16432_vm0, %v2833_v39, %v9832_v11  ;;  %vm16433_vm14 = vmmov %vm16432_vm0  ;;  %v10059_v57 = vpack.i.bf16 %v1832_v60, %v12616_v50  ;;  %v9853_v15 = vunpack.i.h.bf16 %v12560_v28  ;;  %v9852_v55 = vunpack.i.l.bf16 %v12560_v28 }
 0x165   : > { %10050 = vrot.lane.b32.xlu0 %v12642_v22, %s11155_s1  ;;  %10055 = vrot.lane.b32.xlu1 %v10054_v38, %s11152_s23  ;;  %v2867_v62 = vsel %vm16433_vm14, %v2834_v59, %v9833_v14  ;;  %v10064_v18 = vpack.i.bf16 %v12661_v19, %v1733_v34  ;;  %vm16434_vm5 = vcmask 1046528   ;;  %vm16435_vm10 = vcmask 39936  }
 0x166   : > { %v12681_v38 = vsel %vm16434_vm5, %v1735_v20, 0.0  ;;  %v2899_v39 = vsel %vm16435_vm10, %v2866_v56, %v9837_v45  ;;  %vm16436_vm7 = vmmov %vm16435_vm10  ;;  %v10069_v28 = vpack.i.bf16 %v12619_v8, %v12563_v51  ;;  %vm16437_vm0 = vcmask 48128  }
 0x167   : > { %v9841_v42 = vpop.permute.xlu0 %9840  ;;  %v9846_v12 = vpop.permute.xlu1 %9845  ;;  %v2900_v14 = vsel %vm16436_vm7, %v2867_v62, %v9838_v13  ;;  %vm16438_vm14 = vmmov %vm16437_vm0  ;;  %vm16439_vm4 = vcmask 1040384   ;;  %vm16440_vm5 = vcmask 56320   ;;  %v16442_v13 = vrot.slane %v12563_v51, 1 }
 0x168   : > { %v9843_v44 = vunpack.i.h.bf16 %v9841_v42  ;;  %v9842_v33 = vunpack.i.l.bf16 %v9841_v42  ;;  %v9848_v7 = vunpack.i.h.bf16 %v9846_v12  ;;  %v9847_v11 = vunpack.i.l.bf16 %v9846_v12  ;;  %vm16441_vm12 = vmmov %vm16440_vm5 }
 0x169   : > { %v1773_v34 = vsel %vm16439_vm4, %v1699_v52, 0.0  ;;  %v968_v42 = vadd.s32 232, %v11332_v2  ;;  %vm16443_vm10 = vcmask 1046528   ;;  %vm16444_vm4 = vcmask 64512  }
 0x16a   : > { %v2932_v59 = vsel %vm16437_vm0, %v2899_v39, %v9842_v33  ;;  %v2933_v60 = vsel %vm16438_vm14, %v2900_v14, %v9843_v44  ;;  %10060 = vrot.lane.b32.xlu2 %v10059_v57, %s16129_s28  ;;  %v12697_v56 = vsel %vm16443_vm10, %v16442_v13, %v1735_v20  ;;  %v1771_v33 = vsel %vm12602_vm6, %v12681_v38, 0.0  ;;  %vm16445_vm7 = vmmov %vm16444_vm4 }
 0x16b   : > { %v2965_v4 = vsel %vm16440_vm5, %v2932_v59, %v9847_v11  ;;  %v2966_v45 = vsel %vm16441_vm12, %v2933_v60, %v9848_v7  ;;  %v1804_v57 = vsel %vm12636_vm11, %v1773_v34, 0.0  ;;  %v10074_v20 = vpack.i.bf16 %v1771_v33, %v12697_v56 }
 0x16c   : > { %v12702_v44 = vpop.permute.xlu2 %9895  ;;  %v2998_v52 = vsel %vm16444_vm4, %v2965_v4, %v9852_v55  ;;  %v2999_v62 = vsel %vm16445_vm7, %v2966_v45, %v9853_v15  ;;  %vm16446_vm12 = vcmask 72704   ;;  %v1178_v14 = vand.u32 15, %v968_v42  ;;  %v12715_v55 = vpop.f32.mrf.mxu0 }
 0x16d   : > { %10065 = vrot.lane.b32.xlu0 %v10064_v18, %s11153_s22  ;;  %10070 = vrot.lane.b32.xlu1 %v10069_v28, %s11149_s16  ;;  %v3022_v7 = vpack.c.bf16 %v2999_v62, %v2998_v52  ;;  %v967_v4 = vadd.s32 224, %v11332_v2  ;;  %v10079_v15 = vpack.i.bf16 0.0, %v1804_v57  ;;  %v16447_v11 = vmov 0.0  }
 0x16e   : > { %v10084_v28 = vpack.i.bf16 %v12563_v51, %v16447_v11  ;;  %v9818_v59 = vunpack.i.h.bf16 %v12582_v32  ;;  %v1524_v60 = vsel %vm12087_vm13, %v11904_v5, 0.0  ;;  %vm12725_vm0 = vcmp.lt.s32.totalorder %v1178_v14, 15 }
 0x16f   : > { %v12711_v12 = vpop.permute.xlu0 %9855  ;;  %v9861_v39 = vpop.permute.xlu1 %9860  ;;  %8823 = vmatmul.msk.bf16.gmra.mxu0 %vm16446_vm12, %v3022_v7  ;;  %v16448_v45 = vmov 0  ;;  %v1171_v13 = vand.u32 15, %v967_v4  ;;  %vm16451_vm14 = vcmask 7168   ;;  %v9868_v5 = vunpack.i.h.bf16 %v12609_v54 }
 0x170   : > { %v9857_v18 = vunpack.i.l.bf16 %v12711_v12  ;;  %v9863_v34 = vunpack.i.h.bf16 %v9861_v39  ;;  %v9862_v42 = vunpack.i.l.bf16 %v9861_v39  ;;  %v16449_v45 = vsel %vm12725_vm0, 4294967295, %v16448_v45  ;;  %vm16452_vm5 = vmmov %vm16451_vm14 }
 0x171   : > { %16450 = vst [vmem:[#allocation48_spill] sm:$0xff] %v16449_v45  ;;  %v2769_v51 = vsel %vm16452_vm5, %v1524_v60, %v9818_v59  ;;  %v9867_v32 = vunpack.i.l.bf16 %v12609_v54  ;;  %v1693_v62 = vsel %vm12725_vm0, %v12476_v48, 0.0  ;;  %vm16453_vm10 = vcmask 15360  }
 0x172   : > { %10075 = vrot.lane.b32.xlu2 %v10074_v20, %s11151_s18  ;;  %v2770_v33 = vsel %vm16451_vm14, %v11923_v61, %v9857_v18  ;;  %vm16454_vm4 = vmmov %vm16453_vm10  ;;  %vm12743_vm7 = vcmp.ge.s32.totalorder %v1171_v13, 1  ;;  %v16455_v39 = vmov 0  ;;  %v10089_v18 = vpack.i.bf16 %v1693_v62, %v12496_v24 }
 0x173   : > { %v2803_v7 = vsel %vm16453_vm10, %v2770_v33, %v9863_v34  ;;  %v2802_v61 = vsel %vm16454_vm4, %v2769_v51, %v9862_v42  ;;  %v16456_v39 = vsel %vm12743_vm7, 4294967295, %v16455_v39  ;;  %vm16458_vm12 = vcmask 23552  }
 0x174   : > { %v12731_v52 = vpop.permute.xlu2 %9910  ;;  %16457 = vst [vmem:[#allocation49_spill] sm:$0xff] %v16456_v39  ;;  %v2835_v54 = vsel %vm16458_vm12, %v2802_v61, %v9867_v32  ;;  %vm16459_vm14 = vmmov %vm16458_vm12  ;;  %vm16460_vm5 = vcmask 31744   ;;  %v1731_v42 = vsel %vm12743_vm7, %v12557_v17, 0.0  ;;  %v9883_v13 = vunpack.i.h.bf16 %v12658_v16 }
 0x175   : > { %10080 = vrot.lane.b32.xlu0 %v10079_v15, %s11154_s26  ;;  %10085 = vrot.lane.b32.xlu1 %v10084_v28, %s11155_s1  ;;  %v12748_v15 = vpop.f32.mrf.mxu0  ;;  %v2836_v48 = vsel %vm16459_vm14, %v2803_v7, %v9868_v5  ;;  %vm16461_vm10 = vmmov %vm16460_vm5  ;;  %v9882_v33 = vunpack.i.l.bf16 %v12658_v16  ;;  %vm16462_vm4 = vcmask 39936   ;;  %v1769_v32 = vsel %vm12725_vm0, %v12600_v41, 0.0 }
 0x176   : > { %vm16463_vm12 = vmmov %vm16462_vm4  ;;  %v10094_v62 = vpack.i.bf16 %v12575_v58, %v1731_v42  ;;  %vm16464_vm14 = vcmask 48128   ;;  %v9897_v42 = vunpack.i.l.bf16 %v12702_v44  ;;  %vm16665_vm13 = vcmask 1040384  }
 0x177   : > { %v9871_v57 = vpop.permute.xlu0 %9870  ;;  %v9876_v20 = vpop.permute.xlu1 %9875 }
 0x178   : > { %v9873_v14 = vunpack.i.h.bf16 %v9871_v57  ;;  %v9872_v4 = vunpack.i.l.bf16 %v9871_v57  ;;  %v9878_v28 = vunpack.i.h.bf16 %v9876_v20  ;;  %v9877_v59 = vunpack.i.l.bf16 %v9876_v20 }
 0x17a   : > { %2718 = vrot.lane.b32.xlu2 %v16447_v11, %s16129_s28  ;;  %v2868_v60 = vsel %vm16460_vm5, %v2835_v54, %v9872_v4  ;;  %v2869_v34 = vsel %vm16461_vm10, %v2836_v48, %v9873_v14  ;;  %vm16465_vm5 = vmmov %vm16464_vm14  ;;  %vm16466_vm10 = vcmask 56320  }
 0x17b   : > { %v2901_v51 = vsel %vm16462_vm4, %v2868_v60, %v9877_v59  ;;  %v2902_v5 = vsel %vm16463_vm12, %v2869_v34, %v9878_v28  ;;  %vm16467_vm4 = vmmov %vm16466_vm10  ;;  %vm16468_vm12 = vcmask 64512  }
 0x17c   : > { %v12759_v24 = vpop.permute.xlu2 %9925  ;;  %v2934_v4 = vsel %vm16464_vm14, %v2901_v51, %v9882_v33  ;;  %vm16469_vm6 = vmmov %vm16468_vm12  ;;  %vm16470_vm14 = vcmask 72704  }
 0x17d   : > { %1892 = vrot.lane.b32.xlu0 %v12439_v46, %s11150_s15  ;;  %10090 = vrot.lane.b32.xlu1 %v10089_v18, %s11152_s23  ;;  %v10104_v46 = vpack.i.bf16 %v1769_v32, %v12616_v50  ;;  %v2935_v18 = vsel %vm16465_vm5, %v2902_v5, %v9883_v13  ;;  %v12775_v54 = vpop.f32.mrf.mxu0  ;;  %v1802_v50 = vsel %vm12743_vm7, %v12648_v47, 0.0  ;;  %v1834_v13 = vsel %vm12725_vm0, %v12681_v38, 0.0  ;;  %s11161_s15 = smov 40   ;;  %s11163_s23 = smov 56  }
 0x17e   : > { %v10109_v33 = vpack.i.bf16 %v12661_v19, %v1802_v50  ;;  %v9858_v47 = vunpack.i.h.bf16 %v12711_v12  ;;  %v1526_v32 = vsel %vm12188_vm1, %v12029_v9, 0.0  ;;  %vm16502_vm0 = vcmask 64512  }
 0x17f   : > { %v9886_v7 = vpop.permute.xlu0 %9885  ;;  %v9891_v61 = vpop.permute.xlu1 %9890  ;;  %vm16504_vm1 = vcmask 72704  }
 0x180   : > { %v9888_v57 = vunpack.i.h.bf16 %v9886_v7  ;;  %v9887_v20 = vunpack.i.l.bf16 %v9886_v7  ;;  %v9893_v16 = vunpack.i.h.bf16 %v9891_v61  ;;  %v9892_v14 = vunpack.i.l.bf16 %v9891_v61 }
 0x181   : > { %v10114_v61 = vpack.i.bf16 %v1834_v13, %v12697_v56  ;;  %v9912_v56 = vunpack.i.l.bf16 %v12731_v52 }
 0x182   : > { %v2967_v48 = vsel %vm16466_vm10, %v2934_v4, %v9887_v20  ;;  %v2968_v41 = vsel %vm16467_vm4, %v2935_v18, %v9888_v57  ;;  %10095 = vrot.lane.b32.xlu2 %v10094_v62, %s11153_s22  ;;  %vm16473_vm10 = vcmask 15360   ;;  %s16135_s22 = smov 64  }
 0x183   : > { %v3000_v28 = vsel %vm16468_vm12, %v2967_v48, %v9892_v14  ;;  %v3001_v59 = vsel %vm16469_vm6, %v2968_v41, %v9893_v16  ;;  %vm16471_vm6 = vcmask 7168   ;;  %vm16474_vm4 = vmmov %vm16473_vm10  ;;  %vm16475_vm12 = vcmask 23552  }
 0x184   : > { %v12785_v60 = vpop.permute.xlu2 %9940  ;;  %v3023_v34 = vpack.c.bf16 %v3001_v59, %v3000_v28  ;;  %v2772_v7 = vsel %vm16471_vm6, %v12046_v35, %v9897_v42  ;;  %vm16472_vm5 = vmmov %vm16471_vm6  ;;  %v9913_v35 = vunpack.i.h.bf16 %v12731_v52  ;;  %vm16477_vm6 = vcmask 31744  }
 0x185   : > { %10100 = vrot.lane.b32.xlu0 %v12642_v22, %s11149_s16  ;;  %10105 = vrot.lane.b32.xlu1 %v10104_v46, %s11151_s18  ;;  %v2771_v38 = vsel %vm16472_vm5, %v1526_v32, %v9858_v47  ;;  %v12805_v12 = vpop.f32.mrf.mxu0  ;;  %vm16478_vm5 = vmmov %vm16477_vm6  ;;  %v9927_v47 = vunpack.i.l.bf16 %v12759_v24  ;;  %s16131_s16 = smov 32   ;;  %s16133_s18 = smov 48  }
 0x186   : > { %8824 = vmatmul.msk.bf16.gmra.mxu0 %vm16470_vm14, %v3023_v34  ;;  %vm16476_vm14 = vmmov %vm16475_vm12 }
 0x187   : > { %v9901_v51 = vpop.permute.xlu0 %9900  ;;  %v9906_v5 = vpop.permute.xlu1 %9905 }
 0x188   : > { %v9903_v62 = vunpack.i.h.bf16 %v9901_v51  ;;  %v9902_v22 = vunpack.i.l.bf16 %v9901_v51  ;;  %v9908_v19 = vunpack.i.h.bf16 %v9906_v5  ;;  %v9907_v57 = vunpack.i.l.bf16 %v9906_v5 }
 0x18a   : > { %10110 = vrot.lane.b32.xlu2 %v10109_v33, %s11154_s26  ;;  %v2804_v20 = vsel %vm16473_vm10, %v2771_v38, %v9902_v22  ;;  %v2805_v16 = vsel %vm16474_vm4, %v2772_v7, %v9903_v62  ;;  %vm16479_vm10 = vcmask 39936   ;;  %v9928_v33 = vunpack.i.h.bf16 %v12759_v24  ;;  %s16123_s26 = smov 80  }
 0x18b   : > { %v2838_v14 = vsel %vm16475_vm12, %v2805_v16, %v9908_v19  ;;  %v2837_v46 = vsel %vm16476_vm14, %v2804_v20, %v9907_v57  ;;  %vm16480_vm4 = vmmov %vm16479_vm10  ;;  %vm16481_vm12 = vcmask 48128   ;;  %v9898_v20 = vunpack.i.h.bf16 %v12702_v44 }
 0x18c   : > { %v12809_v9 = vpop.permute.xlu2 %9955  ;;  %v2870_v28 = vsel %vm16477_vm6, %v2837_v46, %v9912_v56  ;;  %v2871_v59 = vsel %vm16478_vm5, %v2838_v14, %v9913_v35  ;;  %vm16482_vm14 = vmmov %vm16481_vm12  ;;  %vm16483_vm6 = vcmask 56320   ;;  %v1528_v35 = vsel %vm12302_vm8, %v12137_v21, 0.0 }
 0x18d   : > { %2593 = vrot.lane.b32.xlu0 %v12619_v8, %s11155_s1  ;;  %10115 = vrot.lane.b32.xlu1 %v10114_v61, %s16129_s28  ;;  %v12822_v13 = vpop.f32.mrf.mxu0  ;;  %vm16484_vm5 = vmmov %vm16483_vm6  ;;  %v9943_v14 = vunpack.i.h.bf16 %v12785_v60  ;;  %v9942_v46 = vunpack.i.l.bf16 %v12785_v60  ;;  %s16125_s1 = smov 96  }
 0x18e   : > { %vm16503_vm8 = vmmov %vm16502_vm0 }
 0x18f   : > { %v9916_v4 = vpop.permute.xlu0 %9915  ;;  %v9921_v18 = vpop.permute.xlu1 %9920 }
 0x190   : > { %v9918_v48 = vunpack.i.h.bf16 %v9916_v4  ;;  %v9917_v41 = vunpack.i.l.bf16 %v9916_v4  ;;  %v9923_v50 = vunpack.i.h.bf16 %v9921_v18  ;;  %v9922_v8 = vunpack.i.l.bf16 %v9921_v18 }
 0x192   : > { %v2903_v34 = vsel %vm16479_vm10, %v2870_v28, %v9917_v41  ;;  %v2904_v42 = vsel %vm16480_vm4, %v2871_v59, %v9918_v48  ;;  %vm16485_vm10 = vcmask 64512  }
 0x193   : > { %v2936_v51 = vsel %vm16481_vm12, %v2903_v34, %v9922_v8  ;;  %v2937_v5 = vsel %vm16482_vm14, %v2904_v42, %v9923_v50  ;;  %vm16486_vm4 = vmmov %vm16485_vm10  ;;  %vm16487_vm12 = vcmask 72704   ;;  %vm16488_vm14 = vcmask 7168  }
 0x194   : > { %v9971_v52 = vpop.permute.xlu2 %9970  ;;  %v2969_v61 = vsel %vm16483_vm6, %v2936_v51, %v9927_v47  ;;  %v2970_v38 = vsel %vm16484_vm5, %v2937_v5, %v9928_v33  ;;  %v2773_v18 = vsel %vm16488_vm14, %v1528_v35, %v9898_v20  ;;  %vm16489_vm6 = vmmov %vm16488_vm14  ;;  %vm16490_vm5 = vcmask 15360  }
 0x195   : > { %v12844_v4 = vpop.f32.mrf.mxu0  ;;  %v2806_v21 = vsel %vm16490_vm5, %v2773_v18, %v9942_v46  ;;  %v9958_v33 = vunpack.i.h.bf16 %v12809_v9  ;;  %v9957_v47 = vunpack.i.l.bf16 %v12809_v9  ;;  %vm16494_vm14 = vcmask 31744  }
 0x196   : > { %v9972_v20 = vunpack.i.l.bf16 %v9971_v52 }
 0x197   : > { %v9931_v32 = vpop.permute.xlu0 %9930  ;;  %v12828_v62 = vpop.permute.xlu1 %9935 }
 0x198   : > { %v9933_v22 = vunpack.i.h.bf16 %v9931_v32  ;;  %v9932_v7 = vunpack.i.l.bf16 %v9931_v32  ;;  %v9937_v24 = vunpack.i.l.bf16 %v12828_v62 }
 0x19a   : > { %v3002_v19 = vsel %vm16485_vm10, %v2969_v61, %v9932_v7  ;;  %v3003_v57 = vsel %vm16486_vm4, %v2970_v38, %v9933_v22  ;;  %v2774_v44 = vsel %vm16489_vm6, %v12150_v49, %v9937_v24  ;;  %vm16491_vm10 = vmmov %vm16490_vm5  ;;  %vm16492_vm4 = vcmask 23552  }
 0x19b   : > { %v3024_v16 = vpack.c.bf16 %v3003_v57, %v3002_v19  ;;  %v2807_v50 = vsel %vm16491_vm10, %v2774_v44, %v9943_v14  ;;  %vm16495_vm6 = vmmov %vm16494_vm14  ;;  %v9973_v61 = vunpack.i.h.bf16 %v9971_v52  ;;  %vm16496_vm5 = vcmask 39936  }
 0x19c   : > { %v12839_v56 = vpop.permute.xlu2 %9985  ;;  %vm16497_vm10 = vmmov %vm16496_vm5 }
 0x19d   : > { %8825 = vmatmul.msk.bf16.gmra.mxu0 %vm16487_vm12, %v3024_v16  ;;  %vm16493_vm12 = vmmov %vm16492_vm4  ;;  %v12855_v51 = vpop.f32.mrf.mxu0 }
 0x19f   : > { %v9946_v48 = vpop.permute.xlu0 %9945  ;;  %v9951_v41 = vpop.permute.xlu1 %9950 }
 0x1a0   : > { %v9948_v28 = vunpack.i.h.bf16 %v9946_v48  ;;  %v9947_v59 = vunpack.i.l.bf16 %v9946_v48  ;;  %v9953_v8 = vunpack.i.h.bf16 %v9951_v41  ;;  %v9952_v34 = vunpack.i.l.bf16 %v9951_v41 }
 0x1a2   : > { %v2839_v42 = vsel %vm16492_vm4, %v2806_v21, %v9947_v59  ;;  %v2840_v60 = vsel %vm16493_vm12, %v2807_v50, %v9948_v28  ;;  %vm16498_vm4 = vcmask 48128  }
 0x1a3   : > { %v2872_v49 = vsel %vm16494_vm14, %v2839_v42, %v9952_v34  ;;  %v2873_v5 = vsel %vm16495_vm6, %v2840_v60, %v9953_v8  ;;  %vm16499_vm12 = vmmov %vm16498_vm4  ;;  %vm16500_vm14 = vcmask 56320   ;;  %v9938_v8 = vunpack.i.h.bf16 %v12828_v62 }
 0x1a4   : > { %v10001_v32 = vpop.permute.xlu2 %10000  ;;  %v2905_v24 = vsel %vm16496_vm5, %v2872_v49, %v9957_v47  ;;  %v2906_v16 = vsel %vm16497_vm10, %v2873_v5, %v9958_v33  ;;  %vm16501_vm6 = vmmov %vm16500_vm14  ;;  %v1530_v34 = vsel %vm12421_vm15, %v12231_v10, 0.0  ;;  %v9988_v49 = vunpack.i.h.bf16 %v12839_v56 }
 0x1a5   : > { %v12868_v59 = vpop.f32.mrf.mxu0  ;;  %v9987_v5 = vunpack.i.l.bf16 %v12839_v56  ;;  %vm16509_vm10 = vcmask 23552  }
 0x1a7   : > { %v9961_v22 = vpop.permute.xlu0 %9960  ;;  %v9966_v7 = vpop.permute.xlu1 %9965 }
 0x1a8   : > { %v9963_v38 = vunpack.i.h.bf16 %v9961_v22  ;;  %v9962_v19 = vunpack.i.l.bf16 %v9961_v22  ;;  %v9968_v57 = vunpack.i.h.bf16 %v9966_v7  ;;  %v9967_v35 = vunpack.i.l.bf16 %v9966_v7 }
 0x1aa   : > { %v2938_v9 = vsel %vm16498_vm4, %v2905_v24, %v9962_v19  ;;  %v2939_v14 = vsel %vm16499_vm12, %v2906_v16, %v9963_v38  ;;  %vm16510_vm4 = vmmov %vm16509_vm10  ;;  %vm16511_vm12 = vcmask 31744  }
 0x1ab   : > { %v2971_v46 = vsel %vm16500_vm14, %v2938_v9, %v9967_v35  ;;  %v2972_v18 = vsel %vm16501_vm6, %v2939_v14, %v9968_v57  ;;  %vm16512_vm14 = vmmov %vm16511_vm12  ;;  %v10003_v9 = vunpack.i.h.bf16 %v10001_v32  ;;  %v10002_v14 = vunpack.i.l.bf16 %v10001_v32 }
 0x1ac   : > { %v3004_v44 = vsel %vm16502_vm0, %v2971_v46, %v9972_v20  ;;  %v3005_v48 = vsel %vm16503_vm8, %v2972_v18, %v9973_v61  ;;  %v12870_v50 = vpop.permute.xlu2 %10015  ;;  %vm16505_vm8 = vcmask 7168   ;;  %vm16513_vm6 = vcmask 39936  }
 0x1ad   : > { %v3025_v41 = vpack.c.bf16 %v3005_v48, %v3004_v44  ;;  %vm16506_vm0 = vmmov %vm16505_vm8  ;;  %v12883_v38 = vpop.f32.mrf.mxu0 }
 0x1ae   : > { %v2775_v47 = vsel %vm16506_vm0, %v1530_v34, %v9938_v8  ;;  %vm16515_vm0 = vcmask 48128  }
 0x1af   : > { %v9976_v28 = vpop.permute.xlu0 %9975  ;;  %v9981_v52 = vpop.permute.xlu1 %9980  ;;  %8826 = vmatmul.msk.bf16.gmra.mxu0 %vm16504_vm1, %v3025_v41  ;;  %vm16507_vm1 = vcmask 15360  }
 0x1b0   : > { %v9977_v21 = vunpack.i.l.bf16 %v9976_v28  ;;  %v9983_v42 = vunpack.i.h.bf16 %v9981_v52  ;;  %v9982_v60 = vunpack.i.l.bf16 %v9981_v52  ;;  %vm16508_vm5 = vmmov %vm16507_vm1 }
 0x1b2   : > { %v2776_v33 = vsel %vm16505_vm8, %v12250_v6, %v9977_v21  ;;  %v2808_v7 = vsel %vm16508_vm5, %v2775_v47, %v9982_v60  ;;  %vm16514_vm8 = vmmov %vm16513_vm6  ;;  %vm16517_vm5 = vcmask 56320  }
 0x1b3   : > { %v2809_v22 = vsel %vm16507_vm1, %v2776_v33, %v9983_v42  ;;  %v2841_v57 = vsel %vm16509_vm10, %v2808_v7, %v9987_v5  ;;  %vm16516_vm1 = vmmov %vm16515_vm0 }
 0x1b4   : > { %v2842_v6 = vsel %vm16510_vm4, %v2809_v22, %v9988_v49  ;;  %v10031_v16 = vpop.permute.xlu2 %10030  ;;  %vm16518_vm10 = vmmov %vm16517_vm5  ;;  %vm16519_vm4 = vcmask 64512  }
 0x1b5   : > { %v12893_v60 = vpop.f32.mrf.mxu0 }
 0x1b7   : > { %v9991_v62 = vpop.permute.xlu0 %9990  ;;  %v9996_v61 = vpop.permute.xlu1 %9995 }
 0x1b8   : > { %v9993_v10 = vunpack.i.h.bf16 %v9991_v62  ;;  %v9992_v19 = vunpack.i.l.bf16 %v9991_v62  ;;  %v9998_v20 = vunpack.i.h.bf16 %v9996_v61  ;;  %v9997_v24 = vunpack.i.l.bf16 %v9996_v61 }
 0x1b9   : > { %v10017_v61 = vunpack.i.l.bf16 %v12870_v50 }
 0x1ba   : > { %v2874_v35 = vsel %vm16511_vm12, %v2841_v57, %v9992_v19  ;;  %v2875_v56 = vsel %vm16512_vm14, %v2842_v6, %v9993_v10  ;;  %vm16520_vm12 = vmmov %vm16519_vm4  ;;  %vm16521_vm14 = vcmask 72704   ;;  %v9978_v10 = vunpack.i.h.bf16 %v9976_v28 }
 0x1bb   : > { %v2907_v46 = vsel %vm16513_vm6, %v2874_v35, %v9997_v24  ;;  %v2908_v18 = vsel %vm16514_vm8, %v2875_v56, %v9998_v20  ;;  %v1532_v57 = vsel %vm12519_vm9, %v12345_v53, 0.0  ;;  %vm16522_vm6 = vcmask 7168  }
 0x1bc   : > { %v2940_v34 = vsel %vm16515_vm0, %v2907_v46, %v10002_v14  ;;  %v2941_v42 = vsel %vm16516_vm1, %v2908_v18, %v10003_v9  ;;  %v12899_v22 = vpop.permute.xlu2 %10045  ;;  %v2778_v24 = vsel %vm16522_vm6, %v12365_v43, %v10017_v61  ;;  %vm16523_vm8 = vmmov %vm16522_vm6  ;;  %vm16524_vm0 = vcmask 15360  }
 0x1bd   : > { %v2777_v35 = vsel %vm16523_vm8, %v1532_v57, %v9978_v10  ;;  %vm16525_vm1 = vmmov %vm16524_vm0  ;;  %vm16532_vm8 = vcmask 48128  }
 0x1bf   : > { %v10006_v44 = vpop.permute.xlu0 %10005  ;;  %v10011_v48 = vpop.permute.xlu1 %10010 }
 0x1c0   : > { %v10008_v41 = vunpack.i.h.bf16 %v10006_v44  ;;  %v10007_v52 = vunpack.i.l.bf16 %v10006_v44  ;;  %v10013_v21 = vunpack.i.h.bf16 %v10011_v48  ;;  %v10012_v8 = vunpack.i.l.bf16 %v10011_v48 }
 0x1c1   : > { %v10033_v48 = vunpack.i.h.bf16 %v10031_v16 }
 0x1c2   : > { %v2973_v33 = vsel %vm16517_vm5, %v2940_v34, %v10007_v52  ;;  %v2974_v32 = vsel %vm16518_vm10, %v2941_v42, %v10008_v41  ;;  %v10032_v41 = vunpack.i.l.bf16 %v10031_v16  ;;  %vm16526_vm5 = vcmask 23552  }
 0x1c3   : > { %v3006_v47 = vsel %vm16519_vm4, %v2973_v33, %v10012_v8  ;;  %v3007_v49 = vsel %vm16520_vm12, %v2974_v32, %v10013_v21  ;;  %v12903_v19 = vpop.f32.mrf.mxu0  ;;  %vm16527_vm10 = vmmov %vm16526_vm5  ;;  %vm16528_vm4 = vcmask 31744  }
 0x1c4   : > { %v3026_v5 = vpack.c.bf16 %v3007_v49, %v3006_v47  ;;  %v10061_v14 = vpop.permute.xlu2 %10060  ;;  %vm16529_vm12 = vmmov %vm16528_vm4 }
 0x1c6   : > { %8827 = vmatmul.msk.bf16.gmra.mxu0 %vm16521_vm14, %v3026_v5  ;;  %vm16530_vm14 = vcmask 39936  }
 0x1c7   : > { %v10021_v7 = vpop.permute.xlu0 %10020  ;;  %v10026_v62 = vpop.permute.xlu1 %10025  ;;  %vm16531_vm6 = vmmov %vm16530_vm14 }
 0x1c8   : > { %v10023_v6 = vunpack.i.h.bf16 %v10021_v7  ;;  %v10022_v20 = vunpack.i.l.bf16 %v10021_v7  ;;  %v10028_v56 = vunpack.i.h.bf16 %v10026_v62  ;;  %v10027_v9 = vunpack.i.l.bf16 %v10026_v62 }
 0x1c9   : > { %v10063_v7 = vunpack.i.h.bf16 %v10061_v14  ;;  %v10062_v62 = vunpack.i.l.bf16 %v10061_v14 }
 0x1ca   : > { %v2810_v46 = vsel %vm16524_vm0, %v2777_v35, %v10022_v20  ;;  %v2811_v28 = vsel %vm16525_vm1, %v2778_v24, %v10023_v6  ;;  %vm16533_vm0 = vmmov %vm16532_vm8  ;;  %vm16534_vm1 = vcmask 56320  }
 0x1cb   : > { %v2844_v53 = vsel %vm16526_vm5, %v2811_v28, %v10028_v56  ;;  %v2843_v52 = vsel %vm16527_vm10, %v2810_v46, %v10027_v9  ;;  %v12915_v43 = vpop.f32.mrf.mxu0  ;;  %vm16535_vm5 = vmmov %vm16534_vm1  ;;  %v10047_v56 = vunpack.i.l.bf16 %v12899_v22  ;;  %vm16536_vm10 = vcmask 64512  }
 0x1cc   : > { %v2876_v34 = vsel %vm16528_vm4, %v2843_v52, %v10032_v41  ;;  %v2877_v42 = vsel %vm16529_vm12, %v2844_v53, %v10033_v48  ;;  %v10076_v57 = vpop.permute.xlu2 %10075  ;;  %vm16537_vm4 = vmmov %vm16536_vm10  ;;  %vm16538_vm12 = vcmask 72704  }
 0x1cf   : > { %v10036_v18 = vpop.permute.xlu0 %10035  ;;  %v10041_v44 = vpop.permute.xlu1 %10040 }
 0x1d0   : > { %v10038_v21 = vunpack.i.h.bf16 %v10036_v18  ;;  %v10037_v8 = vunpack.i.l.bf16 %v10036_v18  ;;  %v10043_v33 = vunpack.i.h.bf16 %v10041_v44  ;;  %v10042_v32 = vunpack.i.l.bf16 %v10041_v44 }
 0x1d1   : > { %v10018_v18 = vunpack.i.h.bf16 %v12870_v50  ;;  %v1536_v44 = vsel %vm12636_vm11, %v12557_v17, 0.0  ;;  %vm16652_vm11 = vcmask 1040384  }
 0x1d2   : > { %v2909_v47 = vsel %vm16530_vm14, %v2876_v34, %v10037_v8  ;;  %v2910_v49 = vsel %vm16531_vm6, %v2877_v42, %v10038_v21  ;;  %vm16539_vm14 = vcmask 7168  }
 0x1d3   : > { %v2942_v6 = vsel %vm16532_vm8, %v2909_v47, %v10042_v32  ;;  %v2943_v20 = vsel %vm16533_vm0, %v2910_v49, %v10043_v33  ;;  %v2782_v53 = vsel %vm16539_vm14, %v12575_v58, %v10047_v56  ;;  %vm16540_vm6 = vmmov %vm16539_vm14  ;;  %vm16541_vm8 = vcmask 15360  }
 0x1d4   : > { %v2781_v42 = vsel %vm16540_vm6, %v1536_v44, %v10018_v18  ;;  %vm16542_vm0 = vmmov %vm16541_vm8  ;;  %v12940_v17 = vpop.permute.xlu2 %2718  ;;  %v10077_v58 = vunpack.i.l.bf16 %v10076_v57  ;;  %vm16549_vm6 = vcmask 48128  }
 0x1d7   : > { %v10051_v5 = vpop.permute.xlu0 %10050  ;;  %v10056_v16 = vpop.permute.xlu1 %10055 }
 0x1d8   : > { %v10053_v61 = vunpack.i.h.bf16 %v10051_v5  ;;  %v10052_v10 = vunpack.i.l.bf16 %v10051_v5  ;;  %v10058_v48 = vunpack.i.h.bf16 %v10056_v16  ;;  %v10057_v41 = vunpack.i.l.bf16 %v10056_v16 }
 0x1d9   : > { %v10078_v16 = vunpack.i.h.bf16 %v10076_v57 }
 0x1da   : > { %v2975_v24 = vsel %vm16534_vm1, %v2942_v6, %v10052_v10  ;;  %v2976_v35 = vsel %vm16535_vm5, %v2943_v20, %v10053_v61  ;;  %v2815_v33 = vsel %vm16541_vm8, %v2782_v53, %v10058_v48  ;;  %v2814_v50 = vsel %vm16542_vm0, %v2781_v42, %v10057_v41  ;;  %vm16550_vm8 = vmmov %vm16549_vm6 }
 0x1db   : > { %v3008_v9 = vsel %vm16536_vm10, %v2975_v24, %v10062_v62  ;;  %v3009_v46 = vsel %vm16537_vm4, %v2976_v35, %v10063_v7  ;;  %v12928_v28 = vpop.f32.mrf.mxu0  ;;  %vm16543_vm1 = vcmask 23552   ;;  %vm16545_vm10 = vcmask 31744  }
 0x1dc   : > { %v3027_v14 = vpack.c.bf16 %v3009_v46, %v3008_v9  ;;  %vm16544_vm5 = vmmov %vm16543_vm1  ;;  %vm16551_vm0 = vcmask 56320   ;;  %v10096_v41 = vpop.permute.xlu2 %10095  ;;  %v1534_v42 = vsel %vm12743_vm7, %v12468_v29, 0.0  ;;  %vm16659_vm7 = vcmask 1040384  }
 0x1dd   : > { %vm16546_vm4 = vmmov %vm16545_vm10 }
 0x1de   : > { %8828 = vmatmul.msk.bf16.gmra.mxu0 %vm16538_vm12, %v3027_v14  ;;  %vm16547_vm12 = vcmask 39936  }
 0x1df   : > { %v10066_v52 = vpop.permute.xlu0 %10065  ;;  %v10071_v21 = vpop.permute.xlu1 %10070  ;;  %vm16548_vm14 = vmmov %vm16547_vm12 }
 0x1e0   : > { %v10068_v8 = vunpack.i.h.bf16 %v10066_v52  ;;  %v10067_v34 = vunpack.i.l.bf16 %v10066_v52  ;;  %v10073_v32 = vunpack.i.h.bf16 %v10071_v21  ;;  %v10072_v47 = vunpack.i.l.bf16 %v10071_v21 }
 0x1e2   : > { %v2847_v49 = vsel %vm16543_vm1, %v2814_v50, %v10067_v34  ;;  %v2848_v5 = vsel %vm16544_vm5, %v2815_v33, %v10068_v8  ;;  %vm16552_vm1 = vmmov %vm16551_vm0  ;;  %vm16553_vm5 = vcmask 64512   ;;  %v10048_v34 = vunpack.i.h.bf16 %v12899_v22 }
 0x1e3   : > { %v2880_v7 = vsel %vm16545_vm10, %v2847_v49, %v10072_v47  ;;  %v2881_v62 = vsel %vm16546_vm4, %v2848_v5, %v10073_v32  ;;  %v3143_v61 = vpop.f32.mrf.mxu0  ;;  %vm16554_vm10 = vmmov %vm16553_vm5  ;;  %vm16555_vm4 = vcmask 72704   ;;  %v10098_v49 = vunpack.i.h.bf16 %v10096_v41 }
 0x1e4   : > { %v2913_v35 = vsel %vm16547_vm12, %v2880_v7, %v10077_v58  ;;  %v2914_v56 = vsel %vm16548_vm14, %v2881_v62, %v10078_v16  ;;  %vm16556_vm12 = vcmask 7168   ;;  %v10097_v5 = vunpack.i.l.bf16 %v10096_v41  ;;  %v10111_v7 = vpop.permute.xlu2 %10110 }
 0x1e5   : > { %vm16557_vm14 = vmmov %vm16556_vm12 }
 0x1e6   : > { %v2779_v47 = vsel %vm16557_vm14, %v1534_v42, %v10048_v34  ;;  %vm16566_vm14 = vcmask 48128  }
 0x1e7   : > { %v10081_v10 = vpop.permute.xlu0 %10080  ;;  %v10086_v6 = vpop.permute.xlu1 %10085 }
 0x1e8   : > { %v10083_v20 = vunpack.i.h.bf16 %v10081_v10  ;;  %v10082_v24 = vunpack.i.l.bf16 %v10081_v10  ;;  %v10087_v9 = vunpack.i.l.bf16 %v10086_v6  ;;  %v10088_v42 = vunpack.i.h.bf16 %v10086_v6 }
 0x1ea   : > { %v2946_v46 = vsel %vm16549_vm6, %v2913_v35, %v10082_v24  ;;  %v2947_v14 = vsel %vm16550_vm8, %v2914_v56, %v10083_v20  ;;  %vm16558_vm6 = vcmask 15360   ;;  %v12967_v35 = vld [vmem:[%s11187_s13] ss:$0 sm:$0xff] }
 0x1eb   : > { %v2979_v57 = vsel %vm16551_vm0, %v2946_v46, %v10087_v9  ;;  %v2980_v18 = vsel %vm16552_vm1, %v2947_v14, %v10087_v9  ;;  %vm16559_vm8 = vmmov %vm16558_vm6  ;;  %vm16560_vm0 = vcmask 23552   ;;  %v3142_v34 = vadd.f32 %v12967_v35, %v12928_v28 }
 0x1ec   : > { %v3012_v44 = vsel %vm16553_vm5, %v2979_v57, %v12940_v17  ;;  %v3013_v48 = vsel %vm16554_vm10, %v2980_v18, %v12940_v17  ;;  %v3146_v52 = vpop.f32.mrf.mxu0  ;;  %vm16561_vm1 = vmmov %vm16560_vm0  ;;  %vm16562_vm5 = vcmask 31744   ;;  %v10112_v57 = vunpack.i.l.bf16 %v10111_v7 }
 0x1ed   : > { %v3029_v53 = vpack.c.bf16 %v3013_v48, %v3012_v44  ;;  %vm16563_vm10 = vmmov %vm16562_vm5  ;;  %v3147_v18 = vadd.f32 %v12967_v35, %v3146_v52  ;;  %v10113_v48 = vunpack.i.h.bf16 %v10111_v7 }
 0x1ef   : > { %v1893_v21 = vpop.permute.xlu0 %1892  ;;  %v10091_v8 = vpop.permute.xlu1 %10090  ;;  %8830 = vmatmul.msk.bf16.vlgmr.msra.gmra.mxu3 %vm16555_vm4, %v3029_v53  ;;  %vm16564_vm4 = vcmask 39936  }
 0x1f0   : > { %v10093_v33 = vunpack.i.h.bf16 %v10091_v8  ;;  %v10092_v50 = vunpack.i.l.bf16 %v10091_v8  ;;  %v2780_v32 = vsel %vm16556_vm12, %v12490_v27, %v1893_v21  ;;  %vm16565_vm12 = vmmov %vm16564_vm4  ;;  %v3144_v21 = vadd.f32 %v12967_v35, %v3143_v61 }
 0x1f2   : > { %v2813_v16 = vsel %vm16558_vm6, %v2780_v32, %v10093_v33  ;;  %v2812_v58 = vsel %vm16559_vm8, %v2779_v47, %v10092_v50  ;;  %v12981_v33 = vmax.f32 %v3147_v18, 0.0  ;;  %vm16568_vm6 = vmmov %vm16566_vm14  ;;  %vm16570_vm8 = vcmask 56320  }
 0x1f3   : > { %v2845_v56 = vsel %vm16560_vm0, %v2812_v58, %v10097_v5  ;;  %v2846_v27 = vsel %vm16561_vm1, %v2813_v16, %v10098_v49  ;;  %vm16571_vm0 = vmmov %vm16570_vm8  ;;  %v3139_v58 = vadd.f32 %v12967_v35, %v12915_v43  ;;  %v12990_v7 = vmax.f32 %v3144_v21, 0.0 }
 0x1f4   : > { %v3148_v9 = vpop.f32.mrf.mxu0  ;;  %16567 = vst [vmem:[#allocation50_spill] sm:$0xff] %v12981_v33  ;;  %vm16573_vm1 = vcmask 64512   ;;  %v3134_v43 = vadd.f32 %v12967_v35, %v12893_v60  ;;  %v3129_v60 = vadd.f32 %v12967_v35, %v12868_v59 }
 0x1f5   : > { %v3149_v41 = vadd.f32 %v12967_v35, %v3148_v9  ;;  %16572 = vst [vmem:[#allocation52_spill] sm:$0xff] %v12990_v7  ;;  %v3279_v9 = vrot.slane %v12990_v7, 1 }
 0x1f7   : > { %v10101_v22 = vpop.permute.xlu0 %10100  ;;  %v10106_v62 = vpop.permute.xlu1 %10105  ;;  %v12984_v47 = vmax.f32 %v3149_v41, 0.0  ;;  %v13019_v41 = vmax.f32 %v3134_v43, 0.0 }
 0x1f8   : > { %v10103_v10 = vunpack.i.h.bf16 %v10101_v22  ;;  %v10102_v20 = vunpack.i.l.bf16 %v10101_v22  ;;  %v10108_v29 = vunpack.i.h.bf16 %v10106_v62  ;;  %v10107_v24 = vunpack.i.l.bf16 %v10106_v62 }
 0x1f9   : > { %16569 = vst [vmem:[#allocation51_spill] sm:$0xff] %v12984_v47  ;;  %v3137_v22 = vadd.f32 %v12967_v35, %v12903_v19 }
 0x1fa   : > { %v2878_v46 = vsel %vm16562_vm5, %v2845_v56, %v10102_v20  ;;  %v2879_v14 = vsel %vm16563_vm10, %v2846_v27, %v10103_v10  ;;  %vm16574_vm5 = vmmov %vm16573_vm1  ;;  %v12996_v20 = vmax.f32 %v3142_v34, 0.0  ;;  %vm16576_vm10 = vcmask 72704   ;;  %16582 = vst [vmem:[#allocation57_spill] sm:$0xff] %v13019_v41 }
 0x1fb   : > { %v2911_v44 = vsel %vm16564_vm4, %v2878_v46, %v10107_v24  ;;  %v2912_v53 = vsel %vm16565_vm12, %v2879_v14, %v10108_v29  ;;  %v3281_v29 = vrot.slane %v12981_v33, 1  ;;  %v3283_v24 = vrot.slane %v12984_v47, 1 }
 0x1fc   : > { %v2944_v8 = vsel %vm16566_vm14, %v2911_v44, %v10112_v57  ;;  %v2945_v52 = vsel %vm16568_vm6, %v2912_v53, %v10113_v48  ;;  %16575 = vst [vmem:[#allocation53_spill] sm:$0xff] %v12996_v20  ;;  %v13004_v27 = vmax.f32 %v3139_v58, 0.0  ;;  %v3132_v46 = vadd.f32 %v12967_v35, %v12883_v38 }
 0x1fd   : > { %v2977_v61 = vsel %vm16571_vm0, %v2944_v8, %v10088_v42  ;;  %v13011_v14 = vmax.f32 %v3137_v22, 0.0  ;;  %v3277_v57 = vrot.slane %v12996_v20, 1  ;;  %vm16580_vm4 = vcmask 1046528  }
 0x1fe   : > { %16577 = vst [vmem:[#allocation54_spill] sm:$0xff] %v13004_v27  ;;  %v3282_v44 = vsel %vm16580_vm4, %v3279_v9, %v3281_v29  ;;  %vm16581_vm12 = vmmov %vm16580_vm4  ;;  %v3275_v53 = vrot.slane %v13004_v27, 1  ;;  %v3127_v8 = vadd.f32 %v12967_v35, %v12855_v51  ;;  %v13033_v59 = vmax.f32 %v3132_v46, 0.0 }
 0x1ff   : > { %v2594_v50 = vpop.permute.xlu0 %2593  ;;  %v10116_v32 = vpop.permute.xlu1 %10115  ;;  %16579 = vst [vmem:[#allocation56_spill] sm:$0xff] %v13011_v14  ;;  %v3284_v48 = vsel %vm16581_vm12, %v3281_v29, %v3283_v24  ;;  %vm16583_vm14 = vmmov %vm16580_vm4  ;;  %v3361_v42 = vmax.f32 %v12990_v7, %v3282_v44  ;;  %v3124_v51 = vadd.f32 %v12967_v35, %v12844_v4  ;;  %v13042_v58 = vmax.f32 %v3129_v60, 0.0 }
 0x200   : > { %v2978_v49 = vsel %vm16570_vm8, %v2945_v52, %v2594_v50  ;;  %v10118_v5 = vunpack.i.h.bf16 %v10116_v32  ;;  %v10117_v16 = vunpack.i.l.bf16 %v10116_v32  ;;  %vm16584_vm6 = vmmov %vm16580_vm4  ;;  %v13031_v52 = vmax.f32 %v12981_v33, %v3284_v48  ;;  %16585 = vst [vmem:[#allocation58_spill] sm:$0xff] %v13033_v59 }
 0x201   : > { %v3280_v38 = vsel %vm16584_vm6, %v3277_v57, %v3279_v9  ;;  %v3273_v32 = vrot.slane %v13011_v14, 1  ;;  %vm16586_vm8 = vmmov %vm16580_vm4  ;;  %16587 = vst [vmem:[#allocation59_spill] sm:$0xff] %v13042_v58  ;;  %v13052_v29 = vmax.f32 %v3127_v8, 0.0  ;;  %v3119_v9 = vadd.f32 %v12967_v35, %v12805_v12 }
 0x202   : > { %v3010_v28 = vsel %vm16573_vm1, %v2977_v61, %v10117_v16  ;;  %v3011_v6 = vsel %vm16574_vm5, %v2978_v49, %v10118_v5  ;;  %v3278_v5 = vsel %vm16586_vm8, %v3275_v53, %v3277_v57  ;;  %v3360_v61 = vmax.f32 %v12996_v20, %v3280_v38  ;;  %vm16589_vm0 = vmmov %vm16580_vm4 }
 0x203   : > { %v3151_v62 = vpop.f32.mrf.mxu0  ;;  %v3028_v10 = vpack.c.bf16 %v3011_v6, %v3010_v28  ;;  %v3271_v28 = vrot.slane %v13019_v41, 1  ;;  %v3276_v22 = vsel %vm16589_vm0, %v3273_v32, %v3275_v53  ;;  %v3359_v4 = vmax.f32 %v13004_v27, %v3278_v5  ;;  %vm16590_vm1 = vmmov %vm16589_vm0 }
 0x204   : > { %v3152_v56 = vadd.f32 %v12967_v35, %v3151_v62  ;;  %v3122_v62 = vadd.f32 %v12967_v35, %v12822_v13  ;;  %v3358_v13 = vmax.f32 %v13011_v14, %v3276_v22  ;;  %v13060_v57 = vmax.f32 %v3124_v51, 0.0  ;;  %vm16591_vm5 = vmmov %vm16589_vm0 }
 0x205   : > { %8829 = vmatmul.msk.bf16.gmra.mxu0 %vm16576_vm10, %v3028_v10  ;;  %v3392_v10 = vmax.f32 %v3360_v61, %v13031_v52  ;;  %v3274_v43 = vsel %vm16590_vm1, %v3271_v28, %v3273_v32  ;;  %v3391_v46 = vmax.f32 %v3359_v4, %v3361_v42  ;;  %v3267_v44 = vrot.slane %v13042_v58, 1  ;;  %vm16592_vm10 = vmmov %vm16589_vm0 }
 0x206   : > { %v13007_v19 = vmax.f32 %v3152_v56, 0.0  ;;  %v3390_v53 = vmax.f32 %v3358_v13, %v3360_v61  ;;  %v3117_v38 = vadd.f32 %v12967_v35, %v12775_v54  ;;  %v13073_v8 = vmax.f32 %v3122_v62, 0.0  ;;  %vm16593_vm4 = vmmov %vm16589_vm0 }
 0x207   : > { %v3114_v5 = vadd.f32 %v12967_v35, %v12748_v15  ;;  %v13082_v51 = vmax.f32 %v3119_v9, 0.0  ;;  %v3263_v54 = vrot.slane %v13060_v57, 1  ;;  %vm16594_vm12 = vmmov %vm16589_vm0  ;;  %v3112_v22 = vadd.f32 %v12967_v35, %v12715_v55 }
 0x208   : > { %16578 = vst [vmem:[#allocation55_spill] sm:$0xff] %v13007_v19  ;;  %v3285_v18 = vrot.slane %v13007_v19, 1  ;;  %v13089_v62 = vmax.f32 %v3117_v38, 0.0  ;;  %vm16596_vm6 = vmmov %vm16589_vm0 }
 0x209   : > { %v13096_v9 = vmax.f32 %v3114_v5, 0.0  ;;  %vm16597_vm8 = vmmov %vm16589_vm0 }
 0x20a   : > { %v3286_v21 = vsel %vm16583_vm14, %v3283_v24, %v3285_v18  ;;  %v3269_v24 = vrot.slane %v13033_v59, 1  ;;  %vm16595_vm14 = vmmov %vm16589_vm0 }
 0x20b   : > { %v3153_v34 = vpop.f32.mrf.mxu0  ;;  %v13028_v50 = vmax.f32 %v12984_v47, %v3286_v21  ;;  %v3357_v21 = vmax.f32 %v13019_v41, %v3274_v43  ;;  %v3109_v43 = vadd.f32 %v12967_v35, %v12678_v40  ;;  %vm16598_vm1 = vmmov %vm16589_vm0 }
 0x20c   : > { %v3154_v49 = vadd.f32 %v12967_v35, %v3153_v34  ;;  %v3272_v48 = vsel %vm16591_vm5, %v3269_v24, %v3271_v28  ;;  %v3265_v34 = vrot.slane %v13052_v29, 1  ;;  %vm16599_vm5 = vmmov %vm16589_vm0 }
 0x20d   : > { %v3393_v16 = vmax.f32 %v3361_v42, %v13028_v50  ;;  %v3270_v42 = vsel %vm16593_vm4, %v3267_v44, %v3269_v24  ;;  %v3389_v32 = vmax.f32 %v3357_v21, %v3359_v4  ;;  %vm16601_vm4 = vmmov %vm16589_vm0 }
 0x20e   : > { %v13045_v6 = vmax.f32 %v3154_v49, 0.0  ;;  %v3355_v28 = vmax.f32 %v13042_v58, %v3270_v42  ;;  %v3266_v4 = vsel %vm16595_vm14, %v3263_v54, %v3265_v34  ;;  %v3255_v42 = vrot.slane %v13096_v9, 1  ;;  %vm16605_vm14 = vmmov %vm16589_vm0 }
 0x20f   : > { %3426 = vmatpush.msra.mxu1 %v3393_v16  ;;  %v3268_v16 = vsel %vm16594_vm12, %v3265_v34, %v3267_v44  ;;  %v3353_v44 = vmax.f32 %v13060_v57, %v3266_v4  ;;  %v13108_v34 = vmax.f32 %v3109_v43, 0.0  ;;  %vm16604_vm12 = vmmov %vm16589_vm0 }
 0x210   : > { %16588 = vst [vmem:[#allocation60_spill] sm:$0xff] %v13045_v6  ;;  %v16033_v56 = vrot.slane %v13045_v6, 1  ;;  %v3387_v15 = vmax.f32 %v3355_v28, %v3357_v21  ;;  %v3354_v24 = vmax.f32 %v13052_v29, %v3268_v16 }
 0x211   : > { %3427 = vmatpush.msra.mxu1 %v3392_v10  ;;  %v3261_v10 = vrot.slane %v13073_v8, 1  ;;  %v3385_v40 = vmax.f32 %v3353_v44, %v3355_v28 }
 0x212   : > { %v3288_v60 = vsel %vm16592_vm10, %v3285_v18, %v16033_v56  ;;  %v3356_v18 = vmax.f32 %v13033_v59, %v3272_v48  ;;  %v3107_v48 = vadd.f32 %v12967_v35, %v12622_v25  ;;  %vm16600_vm10 = vmmov %vm16589_vm0 }
 0x213   : > { %3428 = vmatpush.msra.mxu1 %v3391_v46  ;;  %v13069_v12 = vmax.f32 %v13007_v19, %v3288_v60  ;;  %v3259_v46 = vrot.slane %v13082_v51, 1  ;;  %v13103_v60 = vmax.f32 %v3112_v22, 0.0  ;;  %v3251_v22 = vrot.slane %v13108_v34, 1 }
 0x214   : > { %v3388_v61 = vmax.f32 %v3356_v18, %v3358_v13  ;;  %v3264_v13 = vsel %vm16596_vm6, %v3261_v10, %v3263_v54  ;;  %v3386_v55 = vmax.f32 %v3354_v24, %v3356_v18  ;;  %v13113_v5 = vmax.f32 %v3107_v48, 0.0  ;;  %vm16611_vm6 = vmmov %vm16589_vm0 }
 0x215   : > { %3429 = vmatpush.msra.mxu1 %v3390_v53  ;;  %v3257_v53 = vrot.slane %v13089_v62, 1  ;;  %v3262_v21 = vsel %vm16597_vm8, %v3259_v46, %v3261_v10  ;;  %v3352_v38 = vmax.f32 %v13073_v8, %v3264_v13  ;;  %v3253_v54 = vrot.slane %v13103_v60, 1  ;;  %vm16612_vm8 = vmmov %vm16589_vm0 }
 0x216   : > { %v3351_v25 = vmax.f32 %v13082_v51, %v3262_v21 }
 0x217   : > { %3430 = vmatpush.msra.mxu1 %v3389_v32  ;;  %v3260_v32 = vsel %vm16589_vm0, %v3257_v53, %v3259_v46  ;;  %v3384_v18 = vmax.f32 %v3352_v38, %v3354_v24  ;;  %v3258_v16 = vsel %vm16598_vm1, %v3255_v42, %v3257_v53  ;;  %v3256_v10 = vsel %vm16599_vm5, %v3253_v54, %v3255_v42  ;;  %vm16615_vm1 = vmmov %vm16589_vm0 }
 0x218   : > { %v3350_v28 = vmax.f32 %v13089_v62, %v3260_v32  ;;  %v3250_v24 = vrot.slane %v13113_v5, 1  ;;  %v3254_v43 = vsel %vm16600_vm10, %v3251_v22, %v3253_v54  ;;  %v3348_v13 = vmax.f32 %v13103_v60, %v3256_v10  ;;  %vm16617_vm5 = vmmov %vm16589_vm0 }
 0x219   : > { %3431 = vmatpush.msra.mxu1 %v3388_v61  ;;  %v3383_v61 = vmax.f32 %v3351_v25, %v3353_v44  ;;  %v3347_v48 = vmax.f32 %v13108_v34, %v3254_v43  ;;  %vm16619_vm10 = vmmov %vm16589_vm0 }
 0x21a   : > { %v3382_v4 = vmax.f32 %v3350_v28, %v3352_v38  ;;  %v3380_v44 = vmax.f32 %v3348_v13, %v3350_v28  ;;  %v3156_v38 = vpop.f32.mrf.mxu0 }
 0x21b   : > { %3432 = vmatpush.msra.mxu1 %v3387_v15  ;;  %v3349_v15 = vmax.f32 %v13096_v9, %v3258_v16 }
 0x21d   : > { %3433 = vmatpush.msra.mxu1 %v3386_v55  ;;  %v3381_v46 = vmax.f32 %v3349_v15, %v3351_v25  ;;  %v3252_v55 = vsel %vm16601_vm4, %v3250_v24, %v3251_v22  ;;  %v3379_v53 = vmax.f32 %v3347_v48, %v3349_v15  ;;  %vm16621_vm4 = vmmov %vm16589_vm0 }
 0x21e   : > { %v3346_v21 = vmax.f32 %v13113_v5, %v3252_v55 }
 0x21f   : > { %3434 = vmatpush.msra.mxu1 %v3385_v40 }
 0x220   : > { %v3378_v40 = vmax.f32 %v3346_v21, %v3348_v13 }
 0x221   : > { %3435 = vmatpush.msra.mxu1 %v3384_v18 }
 0x222   : > { %v3158_v42 = vpop.f32.mrf.mxu0 }
 0x223   : > { %3436 = vmatpush.msra.mxu1 %v3383_v61  ;;  %v3159_v39 = vadd.f32 %v12967_v35, %v3158_v42 }
 0x225   : > { %3437 = vmatpush.msra.mxu1 %v3382_v4  ;;  %v13181_v45 = vmax.f32 %v3159_v39, 0.0 }
 0x227   : > { %3438 = vmatpush.msra.mxu1 %v3381_v46  ;;  %16618 = vst [vmem:[#allocation71_spill] sm:$0xff] %v13181_v45 }
 0x229   : > { %3439 = vmatpush.msra.mxu1 %v3380_v44 }
 0x22b   : > { %3440 = vmatpush.msra.mxu1 %v3379_v53 }
 0x22c   : > { %v3161_v32 = vpop.f32.mrf.mxu0 }
 0x22d   : > { %3441 = vmatpush.msra.mxu1 %v3378_v40 }
 0x234   : > { %v3163_v18 = vpop.f32.mrf.mxu0 }
 0x243   : > { %v3166_v25 = vpop.f32.mrf.mxu0 }
 0x24b   : > { %v3168_v54 = vpop.f32.mrf.mxu0 }
 0x25b   : > { %v3171_v16 = vpop.f32.mrf.mxu0 }
 0x263   : > { %v3173_v28 = vpop.f32.mrf.mxu0 }
 0x272   : > { %v3181_v61 = vpop.f32.mrf.mxu3 }
 0x273   : > { %v3182_v22 = vadd.f32 %v12967_v35, %v3181_v61 }
 0x275   : > { %v13128_v4 = vmax.f32 %v3182_v22, 0.0  ;;  %v3174_v22 = vadd.f32 %v12967_v35, %v3173_v28 }
 0x277   : > { %16602 = vst [vmem:[#allocation61_spill] sm:$0xff] %v13128_v4  ;;  %v3309_v43 = vrot.slane %v13128_v4, 1  ;;  %v13146_v56 = vmax.f32 %v3174_v22, 0.0 }
 0x279   : > { %16607 = vst [vmem:[#allocation64_spill] sm:$0xff] %v13146_v56 }
 0x27a   : > { %v3183_v10 = vpop.f32.mrf.mxu3 }
 0x27b   : > { %v3184_v15 = vadd.f32 %v12967_v35, %v3183_v10 }
 0x27d   : > { %v13131_v24 = vmax.f32 %v3184_v15, 0.0  ;;  %v3172_v15 = vadd.f32 %v12967_v35, %v3171_v16  ;;  %v3164_v16 = vadd.f32 %v12967_v35, %v3163_v18 }
 0x27f   : > { %16603 = vst [vmem:[#allocation62_spill] sm:$0xff] %v13131_v24  ;;  %v3311_v46 = vrot.slane %v13131_v24, 1 }
 0x281   : > { %v3345_v13 = vsel %vm16604_vm12, %v3311_v46, 0.0  ;;  %v3312_v55 = vsel %vm16605_vm14, %v3309_v43, %v3311_v46  ;;  %vm16622_vm12 = vmmov %vm16589_vm0 }
 0x282   : > { %v3176_v44 = vpop.f32.mrf.mxu0  ;;  %v3377_v48 = vmax.f32 %v13131_v24, %v3345_v13  ;;  %v3376_v53 = vmax.f32 %v13128_v4, %v3312_v55  ;;  %v3169_v13 = vadd.f32 %v12967_v35, %v3168_v54  ;;  %vm16623_vm14 = vmmov %vm16589_vm0 }
 0x283   : > { %v3177_v61 = vadd.f32 %v12967_v35, %v3176_v44  ;;  %v13151_v44 = vmax.f32 %v3172_v15, 0.0  ;;  %v3162_v15 = vadd.f32 %v12967_v35, %v3161_v32 }
 0x284   : > { %v3409_v21 = vmax.f32 %v3377_v48, 0.0  ;;  %v3408_v40 = vmax.f32 %v3376_v53, 0.0 }
 0x285   : > { %v13142_v49 = vmax.f32 %v3177_v61, 0.0  ;;  %16609 = vst [vmem:[#allocation66_spill] sm:$0xff] %v13151_v44  ;;  %v13156_v61 = vmax.f32 %v3169_v13, 0.0  ;;  %v3301_v18 = vrot.slane %v13151_v44, 1 }
 0x286   : > { %3467 = vmatpush.msra.mxu2 %v3409_v21  ;;  %v3167_v21 = vadd.f32 %v12967_v35, %v3166_v25 }
 0x287   : > { %16606 = vst [vmem:[#allocation63_spill] sm:$0xff] %v13142_v49  ;;  %v3305_v28 = vrot.slane %v13142_v49, 1 }
 0x288   : > { %3468 = vmatpush.msra.mxu2 %v3408_v40  ;;  %16610 = vst [vmem:[#allocation67_spill] sm:$0xff] %v13156_v61  ;;  %v13165_v0 = vmax.f32 %v3167_v21, 0.0  ;;  %v3157_v21 = vadd.f32 %v12967_v35, %v3156_v38 }
 0x28a   : > { %v3178_v10 = vpop.f32.mrf.mxu0  ;;  %16613 = vst [vmem:[#allocation68_spill] sm:$0xff] %v13165_v0  ;;  %v13187_v38 = vmax.f32 %v3157_v21, 0.0 }
 0x28b   : > { %v3179_v46 = vadd.f32 %v12967_v35, %v3178_v10  ;;  %v3303_v10 = vrot.slane %v13146_v56, 1 }
 0x28c   : > { %16620 = vst [vmem:[#allocation72_spill] sm:$0xff] %v13187_v38  ;;  %v3289_v21 = vrot.slane %v13187_v38, 1 }
 0x28d   : > { %v13148_v55 = vmax.f32 %v3179_v46, 0.0  ;;  %v3410_v46 = vld [vmem:[%s11290_s20] sm:$0xff]  ;;  %v3306_v13 = vsel %vm16589_vm0, %v3303_v10, %v3305_v28 }
 0x28e   : > { %3442 = vmatmul.f32.vlgmr.msra.gmra.mxu1 %v3410_v46  ;;  %v3373_v32 = vmax.f32 %v13146_v56, %v3306_v13  ;;  %v13176_v46 = vmax.f32 %v3162_v15, 0.0 }
 0x28f   : > { %16608 = vst [vmem:[#allocation65_spill] sm:$0xff] %v13148_v55  ;;  %v3307_v40 = vrot.slane %v13148_v55, 1 }
 0x290   : > { %16616 = vst [vmem:[#allocation70_spill] sm:$0xff] %v13176_v46  ;;  %v3293_v15 = vrot.slane %v13176_v46, 1 }
 0x291   : > { %v3310_v54 = vsel %vm16611_vm6, %v3307_v40, %v3309_v43  ;;  %v3308_v22 = vsel %vm16612_vm8, %v3305_v28, %v3307_v40  ;;  %v13170_v43 = vmax.f32 %v3164_v16, 0.0  ;;  %v3299_v40 = vrot.slane %v13156_v61, 1  ;;  %vm16624_vm6 = vmmov %vm16589_vm0 }
 0x292   : > { %v3375_v63 = vmax.f32 %v13148_v55, %v3310_v54  ;;  %v3374_v25 = vmax.f32 %v13142_v49, %v3308_v22  ;;  %v3304_v54 = vsel %vm16615_vm1, %v3301_v18, %v3303_v10  ;;  %v3297_v28 = vrot.slane %v13165_v0, 1  ;;  %vm16626_vm8 = vmmov %vm16589_vm0 }
 0x293   : > { %16614 = vst [vmem:[#allocation69_spill] sm:$0xff] %v13170_v43  ;;  %v3372_v16 = vmax.f32 %v13151_v44, %v3304_v54  ;;  %v3295_v10 = vrot.slane %v13170_v43, 1  ;;  %v3291_v54 = vrot.slane %v13181_v45, 1 }
 0x294   : > { %v3407_v24 = vmax.f32 %v3375_v63, %v3377_v48  ;;  %v3406_v22 = vmax.f32 %v3374_v25, %v3376_v53  ;;  %v3302_v48 = vsel %vm16617_vm5, %v3299_v40, %v3301_v18  ;;  %v3405_v42 = vmax.f32 %v3373_v32, %v3375_v63  ;;  %v3412_v53 = vld [vmem:[%s11290_s20 + $0x10] sm:$0xff] }
 0x295   : > { %v3404_v13 = vmax.f32 %v3372_v16, %v3374_v25  ;;  %v3371_v35 = vmax.f32 %v13156_v61, %v3302_v48  ;;  %v3298_v63 = vsel %vm16621_vm4, %v3295_v10, %v3297_v28  ;;  %v3294_v48 = vsel %vm16623_vm14, %v3291_v54, %v3293_v15  ;;  %v16654_v61 = vld [vmem:[#allocation19_spill] sm:$0xff] }
 0x296   : > { %3469 = vmatpush.msra.mxu2 %v3407_v24  ;;  %v3300_v24 = vsel %vm16619_vm10, %v3297_v28, %v3299_v40  ;;  %3445 = vmatmul.f32.gmra.mxu1 %v3412_v53  ;;  %v3296_v40 = vsel %vm16622_vm12, %v3293_v15, %v3295_v10  ;;  %v3367_v10 = vmax.f32 %v13181_v45, %v3294_v48  ;;  %v3418_v48 = vld [vmem:[%s11290_s20 + $0x40] sm:$0xff]  ;;  %vm16634_vm4 = vcmask 1040384   ;;  %vm16635_vm12 = vmmov %vm16589_vm0 }
 0x297   : > { %v3403_v39 = vmax.f32 %v3371_v35, %v3373_v32  ;;  %v3370_v18 = vmax.f32 %v13165_v0, %v3300_v24  ;;  %v3368_v28 = vmax.f32 %v13176_v46, %v3296_v40  ;;  %v3292_v32 = vsel %vm16624_vm6, %v3289_v21, %v3291_v54  ;;  %v3414_v24 = vld [vmem:[%s11290_s20 + $0x20] sm:$0xff]  ;;  %v3416_v54 = vld [vmem:[%s11290_s20 + $0x30] sm:$0xff]  ;;  %vm16636_vm14 = vmmov %vm16634_vm4 }
 0x298   : > { %3470 = vmatpush.msra.mxu2 %v3406_v22  ;;  %v3369_v22 = vmax.f32 %v13170_v43, %v3298_v63  ;;  %v3540_v31 = vand.u32 7, %v16654_v61 }
 0x299   : > { %v3402_v25 = vmax.f32 %v3370_v18, %v3372_v16  ;;  %v3400_v53 = vmax.f32 %v3368_v28, %v3370_v18  ;;  %v16625_v16 = vrot.slane %v13045_v6, 1 }
 0x29a   : > { %3471 = vmatpush.msra.mxu2 %v3405_v42  ;;  %v3401_v42 = vmax.f32 %v3369_v22, %v3371_v35  ;;  %v3399_v15 = vmax.f32 %v3367_v10, %v3369_v22  ;;  %v3366_v35 = vmax.f32 %v13187_v38, %v3292_v32  ;;  %v3411_v22 = vld [vmem:[%s11290_s20 + $0x8] sm:$0xff]  ;;  %vm13377_vm15 = vcmp.ge.s32.totalorder %v3540_v31, 1 }
 0x29b   : > { %v3415_v32 = vld [vmem:[%s11290_s20 + $0x28] sm:$0xff] }
 0x29c   : > { %3472 = vmatpush.msra.mxu2 %v3404_v13  ;;  %v3290_v13 = vsel %vm16626_vm8, %v16625_v16, %v3289_v21  ;;  %v3398_v63 = vmax.f32 %v3366_v35, %v3368_v28  ;;  %v3396_v40 = vmax.f32 %v13069_v12, %v3366_v35  ;;  %v16627_v21 = vmax.f32 %v13031_v52, %v13069_v12  ;;  %v3420_v28 = vld [vmem:[%s11290_s20 + $0x50] sm:$0xff]  ;;  %v3419_v52 = vld [vmem:[%s11290_s20 + $0x48] sm:$0xff]  ;;  %v3421_v12 = vld [vmem:[%s11290_s20 + $0x58] sm:$0xff] }
 0x29d   : > { %v3425_v16 = vld [vmem:[%s11290_s20 + $0x78] sm:$0xff]  ;;  %vm16639_vm8 = vmmov %vm16589_vm0 }
 0x29e   : > { %3473 = vmatpush.msra.mxu2 %v3403_v39  ;;  %3448 = vmatmul.f32.gmra.mxu1 %v3414_v24  ;;  %v3365_v39 = vmax.f32 %v13045_v6, %v3290_v13  ;;  %v3417_v24 = vld [vmem:[%s11290_s20 + $0x38] sm:$0xff] }
 0x2a0   : > { %3474 = vmatpush.msra.mxu2 %v3402_v25  ;;  %v3397_v18 = vmax.f32 %v3365_v39, %v3367_v10  ;;  %v3395_v25 = vmax.f32 %v13028_v50, %v3365_v39  ;;  %v3422_v50 = vld [vmem:[%s11290_s20 + $0x60] sm:$0xff]  ;;  %v3423_v10 = vld [vmem:[%s11290_s20 + $0x68] sm:$0xff] }
 0x2a2   : > { %3475 = vmatpush.msra.mxu2 %v3401_v42  ;;  %v3413_v42 = vld [vmem:[%s11290_s20 + $0x18] sm:$0xff] }
 0x2a4   : > { %3476 = vmatpush.msra.mxu2 %v3400_v53  ;;  %v3424_v53 = vld [vmem:[%s11290_s20 + $0x70] sm:$0xff] }
 0x2a6   : > { %3477 = vmatpush.msra.mxu2 %v3399_v15  ;;  %3451 = vmatmul.f32.gmra.mxu1 %v3416_v54 }
 0x2a8   : > { %3478 = vmatpush.msra.mxu2 %v3398_v63 }
 0x2aa   : > { %3479 = vmatpush.msra.mxu2 %v3397_v18  ;;  %v3512_v18 = vand.u32 7, %v11332_v2 }
 0x2ac   : > { %3480 = vmatpush.msra.mxu2 %v3396_v40  ;;  %vm13227_vm1 = vcmp.lt.s32.totalorder %v3512_v18, 7  ;;  %vm13235_vm10 = vcmp.ge.s32.totalorder %v3512_v18, 1 }
 0x2ae   : > { %3481 = vmatpush.msra.mxu2 %v3395_v25  ;;  %3454 = vmatmul.f32.gmra.mxu1 %v3418_v48 }
 0x2b0   : > { %3482 = vmatpush.msra.mxu2 %v16627_v21 }
 0x2b1   : > { %3483 = vmatmul.f32.vlgmr.msra.gmra.mxu2 %v3411_v22  ;;  %v3519_v22 = vand.u32 7, %v11336_v3 }
 0x2b3   : > { %vm13231_vm5 = vcmp.lt.s32.totalorder %v3519_v22, 7  ;;  %vm13247_vm6 = vcmp.ge.s32.totalorder %v3519_v22, 1 }
 0x2b6   : > { %3457 = vmatmul.f32.gmra.mxu1 %v3420_v28 }
 0x2b9   : > { %3486 = vmatmul.f32.gmra.mxu2 %v3413_v42 }
 0x2be   : > { %3460 = vmatmul.f32.gmra.mxu1 %v3422_v50 }
 0x2c1   : > { %3489 = vmatmul.f32.gmra.mxu2 %v3415_v32 }
 0x2c6   : > { %3463 = vmatmul.f32.gmra.mxu1 %v3424_v53 }
 0x2c9   : > { %3492 = vmatmul.f32.gmra.mxu2 %v3417_v24 }
 0x2d1   : > { %3495 = vmatmul.f32.gmra.mxu2 %v3419_v52 }
 0x2d9   : > { %3498 = vmatmul.f32.gmra.mxu2 %v3421_v12 }
 0x2e1   : > { %3501 = vmatmul.f32.gmra.mxu2 %v3423_v10 }
 0x2e9   : > { %3504 = vmatmul.f32.gmra.mxu2 %v3425_v16  ;;  %v16637_v16 = vmov 0 }
 0x2ea   : > { %v16638_v16 = vsel %vm13247_vm6, 4294967295, %v16637_v16 }
 0x30b   : > { %v3443_v13 = vpop.f32.mrf.mxu1 }
 0x313   : > { %v3446_v15 = vpop.f32.mrf.mxu1 }
 0x31b   : > { %v3449_v39 = vpop.f32.mrf.mxu1 }
 0x323   : > { %v3452_v18 = vpop.f32.mrf.mxu1 }
 0x334   : > { %v3484_v35 = vpop.f32.mrf.mxu2 }
 0x335   : > { %v3485_v63 = vadd.f32 %v3484_v35, %v3443_v13 }
 0x337   : > { %v3664_v54 = vrot.slane %v3485_v63, 1  ;;  %v3611_v40 = vrot.slane %v3485_v63, 7 }
 0x339   : > { %v3687_v48 = vsel %vm16589_vm0, 0.0, %v3664_v54  ;;  %v13240_v52 = vsel %vm16634_vm4, 0.0, %v3611_v40  ;;  %vm16640_vm0 = vmmov %vm16634_vm4 }
 0x33a   : > { %v3712_v13 = vsel %vm13227_vm1, %v3687_v48, 0.0  ;;  %v3723_v35 = vsel %vm13235_vm10, %v13240_v52, 0.0  ;;  %vm16641_vm4 = vmmov %vm16639_vm8 }
 0x33c   : > { %v3487_v25 = vpop.f32.mrf.mxu2 }
 0x33d   : > { %v3488_v21 = vadd.f32 %v3487_v25, %v3446_v15 }
 0x33f   : > { %v10119_v50 = vpack.i.bf16 %v3488_v21, %v3485_v63  ;;  %v3665_v24 = vrot.slane %v3488_v21, 1  ;;  %v3612_v53 = vrot.slane %v3488_v21, 7 }
 0x341   : > { %10120 = vrot.lane.b32.xlu2 %v10119_v50, %s16129_s28  ;;  %v3666_v12 = vsel %vm16635_vm12, %v3664_v54, %v3665_v24  ;;  %v13245_v10 = vsel %vm16636_vm14, %v3611_v40, %v3612_v53  ;;  %vm13292_vm14 = vcmp.lt.s32.totalorder %v3526_v1, 7 }
 0x342   : > { %v3713_v15 = vsel %vm13231_vm5, %v3666_v12, 0.0  ;;  %v3724_v63 = vsel %vm13247_vm6, %v13245_v10, 0.0  ;;  %v16645_v37 = vsel %vm13292_vm14, 4294967295, %v16644_v37 }
 0x343   : > { %v10129_v54 = vpack.i.bf16 %v3713_v15, %v3712_v13  ;;  %v10134_v40 = vpack.i.bf16 %v3724_v63, %v3723_v35  ;;  %v3733_v13 = vsel %vm13227_vm1, %v3666_v12, 0.0  ;;  %v3743_v15 = vsel %vm13235_vm10, %v13245_v10, 0.0 }
 0x344   : > { %v3490_v25 = vpop.f32.mrf.mxu2  ;;  %v3533_v12 = vand.u32 7, %v11397_v36 }
 0x345   : > { %v3491_v22 = vadd.f32 %v3490_v25, %v3449_v39  ;;  %10130 = vrot.lane.b32.xlu0 %v10129_v54, %s11158_s2  ;;  %10135 = vrot.lane.b32.xlu1 %v10134_v40, %s11159_s12  ;;  %v3455_v54 = vpop.f32.mrf.mxu1 }
 0x346   : > { %vm13284_vm12 = vcmp.lt.s32.totalorder %v3533_v12, 7 }
 0x347   : > { %v3667_v48 = vrot.slane %v3491_v22, 1  ;;  %v3614_v4 = vrot.slane %v3491_v22, 7  ;;  %v10139_v40 = vpack.i.bf16 %v3491_v22, %v3488_v21 }
 0x349   : > { %10125 = vrot.lane.b32.xlu2 %v10119_v50, %s16131_s16  ;;  %v3668_v55 = vsel %vm16639_vm8, %v3665_v24, %v3667_v48  ;;  %v13266_v26 = vsel %vm16640_vm0, %v3612_v53, %v3614_v4  ;;  %vm16646_vm8 = vmmov %vm16640_vm0  ;;  %vm13305_vm0 = vcmp.ge.s32.totalorder %v3533_v12, 1 }
 0x34a   : > { %v3734_v39 = vsel %vm13231_vm5, %v3668_v55, 0.0  ;;  %v3744_v35 = vsel %vm13247_vm6, %v13266_v26, 0.0 }
 0x34b   : > { %v10144_v50 = vpack.i.bf16 %v3734_v39, %v3733_v13  ;;  %v10149_v63 = vpack.i.bf16 %v3744_v35, %v3743_v15  ;;  %v16642_v39 = vmov 0  ;;  %v3751_v15 = vsel %vm13227_vm1, %v3668_v55, 0.0 }
 0x34c   : > { %v3493_v24 = vpop.f32.mrf.mxu2  ;;  %v16643_v39 = vsel %vm13284_vm12, 4294967295, %v16642_v39 }
 0x34d   : > { %v3494_v53 = vadd.f32 %v3493_v24, %v3452_v18  ;;  %10145 = vrot.lane.b32.xlu0 %v10144_v50, %s11161_s15  ;;  %10150 = vrot.lane.b32.xlu1 %v10149_v63, %s16133_s18 }
 0x34f   : > { %v3669_v25 = vrot.slane %v3494_v53, 1  ;;  %v3616_v18 = vrot.slane %v3494_v53, 7  ;;  %v10154_v21 = vpack.i.bf16 %v3494_v53, %v3491_v22  ;;  %v3714_v22 = vsel %vm13292_vm14, %v3668_v55, 0.0 }
 0x351   : > { %10140 = vrot.lane.b32.xlu2 %v10139_v40, %s11163_s23  ;;  %v3670_v13 = vsel %vm16641_vm4, %v3667_v48, %v3669_v25  ;;  %v13301_v24 = vsel %vm16646_vm8, %v3614_v4, %v3616_v18  ;;  %v3458_v40 = vpop.f32.mrf.mxu1  ;;  %vm13312_vm4 = vcmp.ge.s32.totalorder %v3526_v1, 1  ;;  %vm16651_vm8 = vcmask 1046528  }
 0x352   : > { %v3752_v36 = vsel %vm13231_vm5, %v3670_v13, 0.0  ;;  %v3715_v48 = vsel %vm13284_vm12, %v3670_v13, 0.0  ;;  %v3725_v12 = vsel %vm13312_vm4, %v13266_v26, 0.0 }
 0x353   : > { %v10164_v35 = vpack.i.bf16 %v3752_v36, %v3751_v15  ;;  %v16647_v15 = vmov 0  ;;  %v10169_v36 = vpack.i.bf16 %v3715_v48, %v3714_v22 }
 0x354   : > { %v3496_v50 = vpop.f32.mrf.mxu2  ;;  %v16648_v15 = vsel %vm13305_vm0, 4294967295, %v16647_v15 }
 0x355   : > { %v3497_v63 = vadd.f32 %v3496_v50, %v3455_v54  ;;  %10155 = vrot.lane.b32.xlu1 %v10154_v21, %s16129_s28  ;;  %10165 = vrot.lane.b32.xlu0 %v10164_v35, %s16135_s22  ;;  %v3726_v54 = vsel %vm13305_vm0, %v13301_v24, 0.0  ;;  %v16649_v50 = vmov 0 }
 0x356   : > { %v16650_v50 = vsel %vm13312_vm4, 4294967295, %v16649_v50  ;;  %v10174_v35 = vpack.i.bf16 %v3726_v54, %v3725_v12 }
 0x357   : > { %v3671_v49 = vrot.slane %v3497_v63, 1  ;;  %v3618_v55 = vrot.slane %v3497_v63, 7 }
 0x359   : > { %10170 = vrot.lane.b32.xlu2 %v10169_v36, %s11158_s2  ;;  %v3672_v4 = vsel %vm16651_vm8, %v3669_v25, %v3671_v49  ;;  %v13328_v1 = vsel %vm16652_vm11, %v3616_v18, %v3618_v55  ;;  %v3735_v25 = vsel %vm13292_vm14, %v3670_v13, 0.0  ;;  %v3461_v54 = vpop.f32.mrf.mxu1  ;;  %v3745_v18 = vsel %vm13312_vm4, %v13301_v24, 0.0 }
 0x35a   : > { %v3736_v22 = vsel %vm13284_vm12, %v3672_v4, 0.0  ;;  %v3746_v12 = vsel %vm13305_vm0, %v13328_v1, 0.0 }
 0x35b   : > { %v10184_v36 = vpack.i.bf16 %v3736_v22, %v3735_v25  ;;  %v10189_v13 = vpack.i.bf16 %v3746_v12, %v3745_v18  ;;  %v16657_v18 = vmov 0 }
 0x35c   : > { %v3499_v48 = vpop.f32.mrf.mxu2 }
 0x35d   : > { %v13323_v56 = vadd.f32 %v3499_v48, %v3458_v40  ;;  %10160 = vrot.lane.b32.xlu1 %v10154_v21, %s16131_s16  ;;  %10175 = vrot.lane.b32.xlu0 %v10174_v35, %s11159_s12  ;;  %v10179_v40 = vpack.i.bf16 %v3497_v63, %v3494_v53  ;;  %v16653_v35 = vld [vmem:[#allocation18_spill] sm:$0xff] }
 0x35e   : > { %v3547_v48 = vand.u32 7, %v16653_v35 }
 0x35f   : > { %v3673_v44 = vrot.slane %v13323_v56, 1  ;;  %v3620_v53 = vrot.slane %v13323_v56, 7 }
 0x360   : > { %vm13349_vm11 = vcmp.lt.s32.totalorder %v3547_v48, 7  ;;  %vm13369_vm9 = vcmp.ge.s32.totalorder %v3547_v48, 1 }
 0x361   : > { %10185 = vrot.lane.b32.xlu2 %v10184_v36, %s11161_s15  ;;  %v3674_v21 = vsel %vm16651_vm8, %v3671_v49, %v3673_v44  ;;  %v16655_v49 = vmov 0  ;;  %v3753_v36 = vsel %vm13292_vm14, %v3672_v4, 0.0  ;;  %vm13356_vm8 = vcmp.lt.s32.totalorder %v3540_v31, 7  ;;  %v3464_v35 = vpop.f32.mrf.mxu1 }
 0x362   : > { %v3754_v25 = vsel %vm13284_vm12, %v3674_v21, 0.0  ;;  %v16656_v49 = vsel %vm13349_vm11, 4294967295, %v16655_v49  ;;  %v16658_v18 = vsel %vm13356_vm8, 4294967295, %v16657_v18  ;;  %v3717_v61 = vsel %vm13349_vm11, %v3674_v21, 0.0 }
 0x363   : > { %v10204_v12 = vpack.i.bf16 %v3754_v25, %v3753_v36  ;;  %v10194_v25 = vpack.i.bf16 %v13323_v56, %v3497_v63  ;;  %v3727_v63 = vsel %vm13377_vm15, %v13328_v1, 0.0  ;;  %vm16098_vm12 = vcmask 261120  }
 0x364   : > { %v3502_v22 = vpop.f32.mrf.mxu2  ;;  %vm16686_vm14 = vcmask 261120  }
 0x365   : > { %v13345_v0 = vadd.f32 %v3502_v22, %v3461_v54  ;;  %10180 = vrot.lane.b32.xlu1 %v10179_v40, %s11163_s23  ;;  %10190 = vrot.lane.b32.xlu0 %v10189_v13, %s16133_s18  ;;  %v13365_v40 = vsel %vm16659_vm7, %v3618_v55, %v3620_v53  ;;  %v3716_v13 = vsel %vm13356_vm8, %v3672_v4, 0.0  ;;  %v16660_v22 = vmov 0 }
 0x366   : > { %v16661_v22 = vsel %vm13369_vm9, 4294967295, %v16660_v22  ;;  %v10209_v36 = vpack.i.bf16 %v3717_v61, %v3716_v13  ;;  %v3728_v30 = vsel %vm13369_vm9, %v13365_v40, 0.0  ;;  %vm16664_vm7 = vcmask 1046528  }
 0x367   : > { %v3675_v54 = vrot.slane %v13345_v0, 1  ;;  %v3622_v55 = vrot.slane %v13345_v0, 7  ;;  %v10214_v48 = vpack.i.bf16 %v3728_v30, %v3727_v63 }
 0x369   : > { %10205 = vrot.lane.b32.xlu2 %v10204_v12, %s16135_s22  ;;  %v3676_v4 = vsel %vm16664_vm7, %v3673_v44, %v3675_v54  ;;  %v13392_v13 = vsel %vm16665_vm13, %v3620_v53, %v3622_v55 }
 0x36a   : > { %v3738_v31 = vsel %vm13349_vm11, %v3676_v4, 0.0  ;;  %v3748_v44 = vsel %vm13369_vm9, %v13392_v13, 0.0 }
 0x36c   : > { %v3505_v43 = vpop.f32.mrf.mxu2 }
 0x36d   : > { %v3506_v23 = vadd.f32 %v3505_v43, %v3464_v35  ;;  %10195 = vrot.lane.b32.xlu0 %v10194_v25, %s16129_s28  ;;  %10210 = vrot.lane.b32.xlu1 %v10209_v36, %s11158_s2  ;;  %v3737_v43 = vsel %vm13356_vm8, %v3674_v21, 0.0  ;;  %v3747_v36 = vsel %vm13377_vm15, %v13365_v40, 0.0 }
 0x36e   : > { %v10224_v35 = vpack.i.bf16 %v3738_v31, %v3737_v43  ;;  %v10229_v53 = vpack.i.bf16 %v3748_v44, %v3747_v36  ;;  %v16666_v31 = vld [vmem:[#allocation22_spill] sm:$0xff]  ;;  %v10219_v43 = vpack.i.bf16 %v13345_v0, %v13323_v56  ;;  %v16668_v36 = vmov 0 }
 0x36f   : > { %v3677_v61 = vrot.slane %v3506_v23, 1  ;;  %v3720_v21 = vrot.slane %v3506_v23, 7  ;;  %v10234_v45 = vpack.i.bf16 %v3506_v23, %v13345_v0 }
 0x371   : > { %10215 = vrot.lane.b32.xlu2 %v10214_v48, %s11159_s12  ;;  %v3678_v30 = vsel %vm16664_vm7, %v3675_v54, %v3677_v61  ;;  %v3755_v48 = vsel %vm13356_vm8, %v3676_v4, 0.0  ;;  %v3721_v44 = vsel %vm16665_vm13, %v3622_v55, %v3720_v21  ;;  %v16674_v55 = vmov 0 }
 0x372   : > { %v3756_v63 = vsel %vm13349_vm11, %v3678_v30, 0.0  ;;  %vm16676_vm8 = vcmask 1046528  }
 0x373   : > { %v10239_v54 = vpack.i.bf16 %v3756_v63, %v3755_v48 }
 0x375   : > { %10200 = vrot.lane.b32.xlu0 %v10194_v25, %s16131_s16  ;;  %10225 = vrot.lane.b32.xlu1 %v10224_v35, %s11161_s15  ;;  %v3561_v25 = vand.u32 7, %v16666_v31  ;;  %v16667_v35 = vld [vmem:[#allocation23_spill] sm:$0xff]  ;;  %v16672_v31 = vmov 0 }
 0x376   : > { %v3554_v46 = vand.u32 7, %v16667_v35  ;;  %v3732_v35 = vsel %vm16676_vm8, %v3677_v61, 0.0  ;;  %vm16677_vm8 = vcmask 1043456  }
 0x377   : > { %vm13417_vm7 = vcmp.lt.s32.totalorder %v3561_v25, 7  ;;  %vm13421_vm3 = vcmp.ge.s32.totalorder %v3561_v25, 1 }
 0x378   : > { %v16669_v36 = vsel %vm13417_vm7, 4294967295, %v16668_v36  ;;  %vm13425_vm2 = vcmp.lt.s32.totalorder %v3554_v46, 7  ;;  %v3730_v56 = vsel %vm13421_vm3, %v3721_v44, 0.0  ;;  %v3719_v63 = vsel %vm13417_vm7, %v3678_v30, 0.0 }
 0x379   : > { %10230 = vrot.lane.b32.xlu2 %v10229_v53, %s16133_s18  ;;  %v16670_v53 = vmov 0  ;;  %v16673_v31 = vsel %vm13425_vm2, 4294967295, %v16672_v31  ;;  %vm13433_vm11 = vcmp.ge.s32.totalorder %v3554_v46, 1  ;;  %v3718_v25 = vsel %vm13425_vm2, %v3676_v4, 0.0 }
 0x37a   : > { %v16671_v53 = vsel %vm13421_vm3, 4294967295, %v16670_v53  ;;  %v16675_v55 = vsel %vm13433_vm11, 4294967295, %v16674_v55  ;;  %v3729_v48 = vsel %vm13433_vm11, %v13392_v13, 0.0  ;;  %v3742_v46 = vsel %vm16665_vm13, %v3720_v21, 0.0 }
 0x37b   : > { %v3749_v38 = vsel %vm13433_vm11, %v3721_v44, 0.0  ;;  %v3750_v6 = vsel %vm13421_vm3, %v3742_v46, 0.0  ;;  %v3739_v4 = vsel %vm13425_vm2, %v3678_v30, 0.0  ;;  %v3757_v44 = vsel %vm13425_vm2, %v3732_v35, 0.0  ;;  %v9334_v46 = vld [vmem:[%s11192_s17] sm:$0xff] }
 0x37c   : > { %v10259_v21 = vpack.i.bf16 %v3750_v6, %v3749_v38  ;;  %v10269_v30 = vpack.i.bf16 0.0, %v3757_v44  ;;  %vm16678_vm13 = vcmask 64512   ;;  %vm16091_vm2 = vcmask 195584  }
 0x37d   : > { %10220 = vrot.lane.b32.xlu0 %v10219_v43, %s11163_s23  ;;  %10240 = vrot.lane.b32.xlu1 %v10239_v54, %s16135_s22  ;;  %v10249_v43 = vpack.i.bf16 %v3730_v56, %v3729_v48  ;;  %v10244_v54 = vpack.i.bf16 %v3719_v63, %v3718_v25  ;;  %v3740_v56 = vsel %vm13417_vm7, %v3732_v35, 0.0  ;;  %v9337_v25 = vld [vmem:[%s11192_s17 + $0x18] sm:$0xff]  ;;  %vm16092_vm7 = vcmask 130048  }
 0x37e   : > { %v10254_v61 = vpack.i.bf16 %v3740_v56, %v3739_v4 }
 0x381   : > { %3770 = vrot.lane.b32.xlu2 %v13345_v0, %s16129_s28  ;;  %v10264_v0 = vpack.i.bf16 0.0, %v3506_v23  ;;  %v9336_v23 = vld [vmem:[%s11192_s17 + $0x10] sm:$0xff] }
 0x385   : > { %10250 = vrot.lane.b32.xlu1 %v10249_v43, %s11159_s12  ;;  %10245 = vrot.lane.b32.xlu0 %v10244_v54, %s11158_s2  ;;  %v9335_v54 = vld [vmem:[%s11192_s17 + $0x8] sm:$0xff]  ;;  %s16127_s12 = smov 112  }
 0x389   : > { %10235 = vrot.lane.b32.xlu2 %v10234_v45, %s16131_s16  ;;  %v4069_v45 = vld [vmem:[%s11192_s17 + $0x20] sm:$0xf] }
 0x38a   : > { %v4091_v63 = vunpack.c.l.b16 %v4069_v45  ;;  %v3656_v45 = vsel %vm13247_vm6, %v13240_v52, 0.0  ;;  %vm16696_vm6 = vcmask 588800  }
 0x38c   : > { %v4096_v38 = vpack.c.b16 %v4091_v63, %v4091_v63 }
 0x38d   : > { %10260 = vrot.lane.b32.xlu1 %v10259_v21, %s16133_s18  ;;  %10255 = vrot.lane.b32.xlu0 %v10254_v61, %s11161_s15  ;;  %s16787_s15 = sld [smem:[#allocation3_spill]] }
 0x38e   : > { %v4115_v48 = vsel %vm16677_vm8, %v4096_v38, 0  ;;  %vm16679_vm8 = vmmov %vm16678_vm13 }
 0x38f   : > { %4120 = vmatpush.bf16.msrb.mxu3 %v4115_v48 }
 0x391   : > { %10265 = vrot.lane.b32.xlu2 %v10264_v0, %s11163_s23  ;;  %s16811_s23 = sld [smem:[#allocation5_spill]] }
 0x393   : > { %4121 = vmatpush.bf16.msrb.mxu3 %v9337_v25 }
 0x395   : > { %10270 = vrot.lane.b32.xlu0 %v10269_v30, %s16135_s22  ;;  %v3986_v30 = vsel %vm16678_vm13, 0.0, %v12940_v17  ;;  %vm16093_vm13 = vcmask 326656  }
 0x397   : > { %4122 = vmatpush.bf16.msrb.mxu3 %v9336_v23 }
 0x39b   : > { %v13465_v6 = vpop.permute.xlu2 %10120  ;;  %4123 = vmatpush.bf16.msrb.mxu3 %v9335_v54 }
 0x39c   : > { %v10122_v4 = vunpack.i.l.bf16 %v13465_v6 }
 0x39e   : > { %v3987_v63 = vsel %vm16679_vm8, %v3656_v45, %v10122_v4  ;;  %vm16097_vm8 = vcmask 392192  }
 0x39f   : > { %4124 = vmatpush.bf16.msrb.mxu3 %v9334_v46 }
 0x3a3   : > { %v10126_v43 = vpop.permute.xlu2 %10125 }
 0x3a4   : > { %v10128_v19 = vunpack.i.h.bf16 %v10126_v43  ;;  %v10127_v52 = vunpack.i.l.bf16 %v10126_v43 }
 0x3ab   : > { %v10141_v35 = vpop.permute.xlu2 %10140 }
 0x3ac   : > { %v10143_v43 = vunpack.i.h.bf16 %v10141_v35 }
 0x3b3   : > { %v13473_v61 = vpop.permute.xlu2 %10170 }
 0x3b7   : > { %v10131_v56 = vpop.permute.xlu0 %10130  ;;  %v10136_v21 = vpop.permute.xlu1 %10135 }
 0x3b8   : > { %v10133_v0 = vunpack.i.h.bf16 %v10131_v56  ;;  %v10132_v44 = vunpack.i.l.bf16 %v10131_v56  ;;  %v10138_v38 = vunpack.i.h.bf16 %v10136_v21  ;;  %v10137_v48 = vunpack.i.l.bf16 %v10136_v21 }
 0x3ba   : > { %v3996_v25 = vsel %vm16092_vm7, %v3987_v63, %v10133_v0  ;;  %v3995_v23 = vsel %vm16092_vm7, %v3986_v30, %v10132_v44  ;;  %vm16095_vm7 = vcmask 523264  }
 0x3bb   : > { %v4005_v54 = vsel %vm16091_vm2, %v3996_v25, %v10138_v38  ;;  %v4004_v46 = vsel %vm16091_vm2, %v3995_v23, %v10137_v48  ;;  %v10186_v45 = vpop.permute.xlu2 %10185  ;;  %vm16094_vm2 = vcmask 457728   ;;  %v10142_v23 = vunpack.i.l.bf16 %v10141_v35 }
 0x3bc   : > { %v4013_v21 = vsel %vm16098_vm12, %v4004_v46, %v10127_v52  ;;  %v4014_v0 = vsel %vm16098_vm12, %v4005_v54, %v10128_v19  ;;  %v10123_v35 = vunpack.i.h.bf16 %v13465_v6  ;;  %vm16684_vm12 = vcmask 195584  }
 0x3bf   : > { %v10146_v17 = vpop.permute.xlu0 %10145  ;;  %v10151_v56 = vpop.permute.xlu1 %10150 }
 0x3c0   : > { %v10148_v47 = vunpack.i.h.bf16 %v10146_v17  ;;  %v10147_v4 = vunpack.i.l.bf16 %v10146_v17  ;;  %v10153_v63 = vunpack.i.h.bf16 %v10151_v56  ;;  %v10152_v44 = vunpack.i.l.bf16 %v10151_v56 }
 0x3c2   : > { %v4023_v30 = vsel %vm16093_vm13, %v4014_v0, %v10148_v47  ;;  %v4022_v38 = vsel %vm16093_vm13, %v4013_v21, %v10147_v4  ;;  %vm16096_vm13 = vcmask 588800  }
 0x3c3   : > { %v4032_v48 = vsel %vm16097_vm8, %v4023_v30, %v10153_v63  ;;  %v4031_v25 = vsel %vm16097_vm8, %v4022_v38, %v10152_v44  ;;  %v10206_v63 = vpop.permute.xlu2 %10205  ;;  %v3658_v44 = vsel %vm13305_vm0, %v13266_v26, 0.0  ;;  %v10172_v30 = vunpack.i.l.bf16 %v13473_v61  ;;  %vm16687_vm0 = vmmov %vm16686_vm14 }
 0x3c4   : > { %v4040_v54 = vsel %vm16094_vm2, %v4031_v25, %v10142_v23  ;;  %v4041_v47 = vsel %vm16094_vm2, %v4032_v48, %v10143_v43  ;;  %vm16680_vm2 = vcmask 64512   ;;  %v3657_v43 = vsel %vm13312_vm4, %v13245_v10, 0.0 }
 0x3c5   : > { %v10173_v23 = vunpack.i.h.bf16 %v13473_v61  ;;  %v10188_v61 = vunpack.i.h.bf16 %v10186_v45 }
 0x3c7   : > { %v13491_v17 = vpop.permute.xlu1 %10155  ;;  %v10166_v46 = vpop.permute.xlu0 %10165 }
 0x3c8   : > { %v10168_v52 = vunpack.i.h.bf16 %v10166_v46  ;;  %v10167_v19 = vunpack.i.l.bf16 %v10166_v46  ;;  %v10157_v21 = vunpack.i.l.bf16 %v13491_v17 }
 0x3ca   : > { %v4050_v56 = vsel %vm16095_vm7, %v4041_v47, %v10168_v52  ;;  %v4049_v4 = vsel %vm16095_vm7, %v4040_v54, %v10167_v19  ;;  %v3989_v38 = vsel %vm16680_vm2, %v3658_v44, %v10157_v21  ;;  %vm16681_vm7 = vmmov %vm16680_vm2  ;;  %v10187_v44 = vunpack.i.l.bf16 %v10186_v45 }
 0x3cb   : > { %v4057_v0 = vpack.c.bf16 %v4050_v56, %v4049_v4  ;;  %v3988_v52 = vsel %vm16681_vm7, %v3657_v43, %v10123_v35  ;;  %vm16685_vm2 = vmmov %vm16684_vm12  ;;  %v10216_v21 = vpop.permute.xlu2 %10215  ;;  %vm16688_vm7 = vcmask 326656  }
 0x3cd   : > { %8847 = vmatmul.msk.bf16.vlgmr.msrb.gmra.mxu3 %vm16096_vm13, %v4057_v0  ;;  %vm16682_vm13 = vcmask 130048  }
 0x3ce   : > { %v3997_v19 = vsel %vm16682_vm13, %v3988_v52, %v10172_v30  ;;  %vm16683_vm8 = vmmov %vm16682_vm13 }
 0x3cf   : > { %v10161_v48 = vpop.permute.xlu1 %10160  ;;  %v10176_v25 = vpop.permute.xlu0 %10175  ;;  %v3998_v47 = vsel %vm16683_vm8, %v3989_v38, %v10173_v23  ;;  %vm16689_vm13 = vmmov %vm16688_vm7  ;;  %v10208_v23 = vunpack.i.h.bf16 %v10206_v63 }
 0x3d0   : > { %v10178_v46 = vunpack.i.h.bf16 %v10176_v25  ;;  %v10177_v6 = vunpack.i.l.bf16 %v10176_v25  ;;  %v10163_v54 = vunpack.i.h.bf16 %v10161_v48  ;;  %v10162_v26 = vunpack.i.l.bf16 %v10161_v48 }
 0x3d2   : > { %v4007_v56 = vsel %vm16684_vm12, %v3998_v47, %v10178_v46  ;;  %v4006_v4 = vsel %vm16685_vm2, %v3997_v19, %v10177_v6  ;;  %v10207_v46 = vunpack.i.l.bf16 %v10206_v63  ;;  %vm16690_vm12 = vcmask 392192  }
 0x3d3   : > { %v4016_v0 = vsel %vm16686_vm14, %v4007_v56, %v10163_v54  ;;  %v4015_v10 = vsel %vm16687_vm0, %v4006_v4, %v10162_v26  ;;  %vm16691_vm8 = vmmov %vm16690_vm12  ;;  %vm16692_vm14 = vcmask 457728   ;;  %vm16694_vm2 = vcmask 523264  }
 0x3d4   : > { %v4024_v48 = vsel %vm16688_vm7, %v4015_v10, %v10187_v44  ;;  %v4025_v38 = vsel %vm16689_vm13, %v4016_v0, %v10188_v61  ;;  %vm16693_vm0 = vmmov %vm16692_vm14  ;;  %v10231_v0 = vpop.permute.xlu2 %10230  ;;  %v10158_v63 = vunpack.i.h.bf16 %v13491_v17  ;;  %v3660_v61 = vsel %vm13369_vm9, %v13328_v1, 0.0 }
 0x3d5   : > { %vm16695_vm4 = vmmov %vm16694_vm2  ;;  %vm16697_vm7 = vcmask 64512  }
 0x3d7   : > { %v10181_v25 = vpop.permute.xlu1 %10180  ;;  %v10191_v33 = vpop.permute.xlu0 %10190 }
 0x3d8   : > { %v10183_v35 = vunpack.i.h.bf16 %v10181_v25  ;;  %v10182_v43 = vunpack.i.l.bf16 %v10181_v25  ;;  %v10193_v30 = vunpack.i.h.bf16 %v10191_v33  ;;  %v10192_v52 = vunpack.i.l.bf16 %v10191_v33 }
 0x3da   : > { %v4034_v6 = vsel %vm16690_vm12, %v4025_v38, %v10193_v30  ;;  %v4033_v19 = vsel %vm16691_vm8, %v4024_v48, %v10192_v52  ;;  %vm16701_vm12 = vcmask 195584  }
 0x3db   : > { %v4042_v54 = vsel %vm16692_vm14, %v4033_v19, %v10182_v43  ;;  %v4043_v45 = vsel %vm16693_vm0, %v4034_v6, %v10183_v35  ;;  %v3659_v43 = vsel %vm13377_vm15, %v13301_v24, 0.0  ;;  %vm16702_vm8 = vmmov %vm16701_vm12  ;;  %vm16703_vm14 = vcmask 261120  }
 0x3dc   : > { %v4051_v26 = vsel %vm16694_vm2, %v4042_v54, %v10207_v46  ;;  %v4052_v47 = vsel %vm16695_vm4, %v4043_v45, %v10208_v23  ;;  %vm16698_vm4 = vmmov %vm16697_vm7  ;;  %v10218_v23 = vunpack.i.h.bf16 %v10216_v21  ;;  %v10217_v46 = vunpack.i.l.bf16 %v10216_v21  ;;  %v3771_v19 = vpop.permute.xlu2 %3770 }
 0x3dd   : > { %v4058_v56 = vpack.c.bf16 %v4052_v47, %v4051_v26  ;;  %v3990_v30 = vsel %vm16698_vm4, %v3659_v43, %v10158_v63  ;;  %vm16704_vm0 = vmmov %vm16703_vm14  ;;  %vm16705_vm2 = vcmask 326656   ;;  %v10233_v63 = vunpack.i.h.bf16 %v10231_v0 }
 0x3de   : > { %vm16707_vm4 = vcmask 392192  }
 0x3df   : > { %v10196_v33 = vpop.permute.xlu0 %10195  ;;  %8848 = vmatmul.msk.bf16.gmra.mxu3 %vm16696_vm6, %v4058_v56  ;;  %v10211_v4 = vpop.permute.xlu1 %10210  ;;  %vm16699_vm6 = vcmask 130048  }
 0x3e0   : > { %v10197_v10 = vunpack.i.l.bf16 %v10196_v33  ;;  %v10213_v44 = vunpack.i.h.bf16 %v10211_v4  ;;  %v10212_v25 = vunpack.i.l.bf16 %v10211_v4  ;;  %vm16700_vm13 = vmmov %vm16699_vm6 }
 0x3e2   : > { %v3991_v35 = vsel %vm16697_vm7, %v3660_v61, %v10197_v10  ;;  %v3999_v48 = vsel %vm16700_vm13, %v3990_v30, %v10212_v25  ;;  %vm16706_vm7 = vmmov %vm16705_vm2  ;;  %v10232_v61 = vunpack.i.l.bf16 %v10231_v0  ;;  %vm16709_vm13 = vcmask 457728  }
 0x3e3   : > { %v4000_v52 = vsel %vm16699_vm6, %v3991_v35, %v10213_v44  ;;  %v4008_v54 = vsel %vm16701_vm12, %v3999_v48, %v10217_v46  ;;  %vm16708_vm6 = vmmov %vm16707_vm4 }
 0x3e4   : > { %v4009_v45 = vsel %vm16702_vm8, %v4000_v52, %v10218_v23  ;;  %vm16710_vm12 = vmmov %vm16709_vm13  ;;  %vm16711_vm8 = vcmask 523264  }
 0x3e7   : > { %v10201_v38 = vpop.permute.xlu0 %10200  ;;  %v10226_v17 = vpop.permute.xlu1 %10225 }
 0x3e8   : > { %v10203_v6 = vunpack.i.h.bf16 %v10201_v38  ;;  %v10202_v1 = vunpack.i.l.bf16 %v10201_v38  ;;  %v10228_v26 = vunpack.i.h.bf16 %v10226_v17  ;;  %v10227_v47 = vunpack.i.l.bf16 %v10226_v17 }
 0x3ea   : > { %v4017_v24 = vsel %vm16703_vm14, %v4008_v54, %v10202_v1  ;;  %v4018_v56 = vsel %vm16704_vm0, %v4009_v45, %v10203_v6  ;;  %vm16712_vm14 = vmmov %vm16711_vm8  ;;  %v10236_v6 = vpop.permute.xlu2 %10235  ;;  %v10198_v1 = vunpack.i.h.bf16 %v10196_v33  ;;  %vm16713_vm0 = vcmask 588800  }
 0x3eb   : > { %v4027_v4 = vsel %vm16705_vm2, %v4018_v56, %v10228_v26  ;;  %v4026_v10 = vsel %vm16706_vm7, %v4017_v24, %v10227_v47  ;;  %v3661_v54 = vsel %vm13433_vm11, %v13365_v40, 0.0  ;;  %v3662_v45 = vsel %vm13421_vm3, %v13392_v13, 0.0 }
 0x3ec   : > { %v4035_v52 = vsel %vm16707_vm4, %v4026_v10, %v10232_v61  ;;  %v4036_v48 = vsel %vm16708_vm6, %v4027_v4, %v10233_v63  ;;  %vm16714_vm2 = vcmask 64512   ;;  %vm16716_vm4 = vcmask 130048  }
 0x3ed   : > { %v3993_v63 = vsel %vm16714_vm2, %v3662_v45, %v3771_v19  ;;  %vm16715_vm7 = vmmov %vm16714_vm2  ;;  %v10238_v13 = vunpack.i.h.bf16 %v10236_v6 }
 0x3ee   : > { %v3992_v33 = vsel %vm16715_vm7, %v3661_v54, %v10198_v1  ;;  %vm16717_vm6 = vmmov %vm16716_vm4  ;;  %vm16724_vm7 = vcmask 392192  }
 0x3ef   : > { %v10221_v21 = vpop.permute.xlu0 %10220  ;;  %v10241_v44 = vpop.permute.xlu1 %10240 }
 0x3f0   : > { %v10223_v25 = vunpack.i.h.bf16 %v10221_v21  ;;  %v10222_v35 = vunpack.i.l.bf16 %v10221_v21  ;;  %v10243_v43 = vunpack.i.h.bf16 %v10241_v44  ;;  %v10242_v30 = vunpack.i.l.bf16 %v10241_v44 }
 0x3f2   : > { %v4044_v38 = vsel %vm16709_vm13, %v4035_v52, %v10222_v35  ;;  %v4045_v17 = vsel %vm16710_vm12, %v4036_v48, %v10223_v25  ;;  %vm16718_vm13 = vcmask 195584   ;;  %v10266_v25 = vpop.permute.xlu2 %10265  ;;  %v10237_v35 = vunpack.i.l.bf16 %v10236_v6 }
 0x3f3   : > { %v4053_v23 = vsel %vm16711_vm8, %v4044_v38, %v10242_v30  ;;  %v4054_v46 = vsel %vm16712_vm14, %v4045_v17, %v10243_v43  ;;  %vm16719_vm12 = vmmov %vm16718_vm13  ;;  %vm16720_vm8 = vcmask 261120  }
 0x3f4   : > { %v4059_v0 = vpack.c.bf16 %v4054_v46, %v4053_v23  ;;  %vm16721_vm14 = vmmov %vm16720_vm8  ;;  %v10268_v46 = vunpack.i.h.bf16 %v10266_v25 }
 0x3f6   : > { %8849 = vmatmul.msk.bf16.gmra.mxu3 %vm16713_vm0, %v4059_v0  ;;  %v10267_v0 = vunpack.i.l.bf16 %v10266_v25  ;;  %vm16722_vm0 = vcmask 326656  }
 0x3f7   : > { %v10251_v26 = vpop.permute.xlu1 %10250  ;;  %v10246_v47 = vpop.permute.xlu0 %10245  ;;  %vm16723_vm2 = vmmov %vm16722_vm0 }
 0x3f8   : > { %v10253_v24 = vunpack.i.h.bf16 %v10251_v26  ;;  %v10252_v56 = vunpack.i.l.bf16 %v10251_v26  ;;  %v10248_v4 = vunpack.i.h.bf16 %v10246_v47  ;;  %v10247_v10 = vunpack.i.l.bf16 %v10246_v47 }
 0x3fa   : > { %v4002_v61 = vsel %vm16716_vm4, %v3993_v63, %v10248_v4  ;;  %v4001_v21 = vsel %vm16717_vm6, %v3992_v33, %v10247_v10  ;;  %vm16725_vm4 = vmmov %vm16724_vm7  ;;  %vm16726_vm6 = vcmask 457728  }
 0x3fb   : > { %v4011_v40 = vsel %vm16718_vm13, %v4002_v61, %v10253_v24  ;;  %v4010_v44 = vsel %vm16719_vm12, %v4001_v21, %v10252_v56  ;;  %vm16727_vm13 = vmmov %vm16726_vm6  ;;  %vm16728_vm12 = vcmask 523264  }
 0x3fc   : > { %v4019_v19 = vsel %vm16720_vm8, %v4010_v44, %v10237_v35  ;;  %v4020_v23 = vsel %vm16721_vm14, %v4011_v40, %v10238_v13  ;;  %vm16729_vm8 = vmmov %vm16728_vm12  ;;  %vm16730_vm14 = vcmask 588800  }
 0x3ff   : > { %v10261_v43 = vpop.permute.xlu1 %10260  ;;  %v10256_v30 = vpop.permute.xlu0 %10255 }
 0x400   : > { %v10263_v52 = vunpack.i.h.bf16 %v10261_v43  ;;  %v10262_v48 = vunpack.i.l.bf16 %v10261_v43  ;;  %v10258_v38 = vunpack.i.h.bf16 %v10256_v30  ;;  %v10257_v17 = vunpack.i.l.bf16 %v10256_v30  ;;  %v11100_v43 = vld [vmem:[%s11197_s21] ss:$0 sm:$0xff] }
 0x402   : > { %v4028_v1 = vsel %vm16722_vm0, %v4019_v19, %v10257_v17  ;;  %v4029_v54 = vsel %vm16723_vm2, %v4020_v23, %v10258_v38  ;;  %vm16731_vm0 = vcmask 1046528  }
 0x403   : > { %v4037_v45 = vsel %vm16724_vm7, %v4028_v1, %v10262_v48  ;;  %v4038_v6 = vsel %vm16725_vm4, %v4029_v54, %v10263_v52  ;;  %vm16732_vm2 = vmmov %vm16731_vm0 }
 0x404   : > { %v4046_v26 = vsel %vm16726_vm6, %v4037_v45, %v10267_v0  ;;  %v4047_v47 = vsel %vm16727_vm13, %v4038_v6, %v10268_v46  ;;  %vm16733_vm7 = vmmov %vm16731_vm0 }
 0x405   : > { %vm16734_vm4 = vmmov %vm16731_vm0 }
 0x406   : > { %vm16735_vm6 = vmmov %vm16731_vm0 }
 0x407   : > { %v10271_v24 = vpop.permute.xlu0 %10270  ;;  %vm16736_vm13 = vmmov %vm16731_vm0 }
 0x408   : > { %v10273_v56 = vunpack.i.h.bf16 %v10271_v24  ;;  %v10272_v4 = vunpack.i.l.bf16 %v10271_v24 }
 0x40a   : > { %v4055_v10 = vsel %vm16728_vm12, %v4046_v26, %v10272_v4  ;;  %v4056_v63 = vsel %vm16729_vm8, %v4047_v47, %v10273_v56  ;;  %vm16737_vm12 = vmmov %vm16731_vm0 }
 0x40b   : > { %v4060_v33 = vpack.c.bf16 %v4056_v63, %v4055_v10  ;;  %vm16738_vm8 = vmmov %vm16731_vm0 }
 0x40d   : > { %8850 = vmatmul.msk.bf16.gmra.mxu3 %vm16730_vm14, %v4060_v33  ;;  %vm16739_vm14 = vcmask 523264  }
 0x450   : > { %v4126_v61 = vpop.f32.mrf.mxu3 }
 0x451   : > { %v4127_v33 = vadd.f32 %v11100_v43, %v4126_v61 }
 0x458   : > { %v4128_v21 = vpop.f32.mrf.mxu3 }
 0x459   : > { %v4129_v26 = vadd.f32 %v11100_v43, %v4128_v21 }
 0x462   : > { %v4131_v40 = vpop.f32.mrf.mxu3 }
 0x463   : > { %v4132_v1 = vadd.f32 %v11100_v43, %v4131_v40 }
 0x465   : > { %v13590_v40 = vmax.f32 %v4132_v1, 0.0 }
 0x467   : > { %v4165_v61 = vrot.slane %v13590_v40, 1 }
 0x46a   : > { %v4133_v44 = vpop.f32.mrf.mxu3 }
 0x46b   : > { %v4134_v23 = vadd.f32 %v11100_v43, %v4133_v44 }
 0x46d   : > { %v13583_v47 = vmax.f32 %v4134_v23, 0.0 }
 0x479   : > { %v4136_v25 = vpop.f32.mrf.mxu3 }
 0x47a   : > { %v4137_v38 = vadd.f32 %v11100_v43, %v4136_v25 }
 0x47c   : > { %v13579_v54 = vmax.f32 %v4137_v38, 0.0  ;;  %v13599_v38 = vmax.f32 %v4127_v33, 0.0 }
 0x47e   : > { %v4169_v44 = vrot.slane %v13579_v54, 1 }
 0x481   : > { %v4138_v13 = vpop.f32.mrf.mxu3 }
 0x482   : > { %v4139_v52 = vadd.f32 %v11100_v43, %v4138_v13  ;;  %v13594_v13 = vmax.f32 %v4129_v26, 0.0 }
 0x484   : > { %v13575_v46 = vmax.f32 %v4139_v52, 0.0  ;;  %v4163_v1 = vrot.slane %v13594_v13, 1 }
 0x486   : > { %v4171_v24 = vrot.slane %v13575_v46, 1 }
 0x490   : > { %v4141_v35 = vpop.f32.mrf.mxu3 }
 0x491   : > { %v4142_v30 = vadd.f32 %v11100_v43, %v4141_v35  ;;  %v4167_v35 = vrot.slane %v13583_v47, 1 }
 0x493   : > { %v13573_v17 = vmax.f32 %v4142_v30, 0.0  ;;  %v4172_v30 = vsel %vm16734_vm4, %v4169_v44, %v4171_v24  ;;  %vm16743_vm4 = vcmask 1040384  }
 0x494   : > { %v4190_v23 = vmax.f32 %v13579_v54, %v4172_v30  ;;  %v4202_v30 = vld [vmem:[%s11295_s27] sm:$0xff] }
 0x495   : > { %v4173_v45 = vrot.slane %v13573_v17, 1 }
 0x497   : > { %v4174_v25 = vsel %vm16733_vm7, %v4171_v24, %v4173_v45  ;;  %v4162_v24 = vrot.slane %v13599_v38, 1 }
 0x498   : > { %v4143_v48 = vpop.f32.mrf.mxu3 }
 0x499   : > { %v4144_v19 = vadd.f32 %v11100_v43, %v4143_v48  ;;  %v4191_v48 = vmax.f32 %v13575_v46, %v4174_v25  ;;  %v4170_v43 = vsel %vm16735_vm6, %v4167_v35, %v4169_v44 }
 0x49a   : > { %v4189_v26 = vmax.f32 %v13583_v47, %v4170_v43 }
 0x49b   : > { %v13577_v0 = vmax.f32 %v4144_v19, 0.0 }
 0x49d   : > { %v4175_v6 = vrot.slane %v13577_v0, 1 }
 0x49f   : > { %v4185_v56 = vsel %vm16731_vm0, %v4175_v6, 0.0  ;;  %v4176_v4 = vsel %vm16732_vm2, %v4173_v45, %v4175_v6  ;;  %v4168_v45 = vsel %vm16736_vm13, %v4165_v61, %v4167_v35  ;;  %v4198_v6 = vmax.f32 %v4190_v23, %v4191_v48  ;;  %vm16740_vm0 = vmmov %vm16739_vm14 }
 0x4a0   : > { %v4193_v10 = vmax.f32 %v13577_v0, %v4185_v56  ;;  %v4192_v63 = vmax.f32 %v13573_v17, %v4176_v4  ;;  %v4166_v56 = vsel %vm16737_vm12, %v4163_v1, %v4165_v61  ;;  %v4197_v4 = vmax.f32 %v4189_v26, %v4190_v23 }
 0x4a1   : > { %v4187_v44 = vmax.f32 %v13594_v13, %v4166_v56  ;;  %v4237_v61 = vand.u32 3, %v11332_v2  ;;  %v4244_v23 = vand.u32 3, %v11336_v3  ;;  %vm16112_vm2 = vcmask 1042432  }
 0x4a2   : > { %v4201_v21 = vmax.f32 %v4193_v10, 0.0  ;;  %v4200_v52 = vmax.f32 %v4192_v63, %v4193_v10  ;;  %v4199_v19 = vmax.f32 %v4191_v48, %v4192_v63  ;;  %v4188_v10 = vmax.f32 %v13590_v40, %v4168_v45 }
 0x4a3   : > { %v4164_v63 = vsel %vm16738_vm8, %v4162_v24, %v4163_v1  ;;  %vm13623_vm7 = vcmp.ge.s32.totalorder %v4237_v61, 1  ;;  %vm13629_vm6 = vcmp.lt.s32.totalorder %v4237_v61, 3  ;;  %vm13633_vm13 = vcmp.ge.s32.totalorder %v4244_v23, 1  ;;  %vm16750_vm8 = vmmov %vm16743_vm4 }
 0x4a4   : > { %4218 = vmatpush.msra.mxu3 %v4201_v21  ;;  %v4196_v33 = vmax.f32 %v4188_v10, %v4189_v26  ;;  %v4195_v25 = vmax.f32 %v4187_v44, %v4188_v10  ;;  %v4186_v21 = vmax.f32 %v13599_v38, %v4164_v63  ;;  %vm13637_vm12 = vcmp.lt.s32.totalorder %v4244_v23, 3 }
 0x4a6   : > { %4219 = vmatpush.msra.mxu3 %v4200_v52  ;;  %v4194_v35 = vmax.f32 %v4186_v21, %v4187_v44  ;;  %v4203_v52 = vld [vmem:[%s11295_s27 + $0x8] sm:$0xff] }
 0x4a8   : > { %4220 = vmatpush.msra.mxu3 %v4199_v19 }
 0x4aa   : > { %4221 = vmatpush.msra.mxu3 %v4198_v6 }
 0x4ac   : > { %4222 = vmatpush.msra.mxu3 %v4197_v4 }
 0x4ae   : > { %4223 = vmatpush.msra.mxu3 %v4196_v33 }
 0x4b0   : > { %4224 = vmatpush.msra.mxu3 %v4195_v25 }
 0x4b2   : > { %4225 = vmatpush.msra.mxu3 %v4194_v35 }
 0x4b3   : > { %8851 = vmatmul.msk.f32.vlgmr.msra.gmra.mxu3 %vm16739_vm14, %v4202_v30  ;;  %vm16751_vm14 = vcmask 1043456  }
 0x4b4   : > { %vm16756_vm3 = vmmov %vm16751_vm14 }
 0x4bb   : > { %8852 = vmatmul.msk.f32.gmra.mxu3 %vm16740_vm0, %v4203_v52  ;;  %vm16752_vm0 = vcmask 1046528  }
 0x536   : > { %v13617_v48 = vpop.f32.mrf.mxu3 }
 0x537   : > { %v4293_v43 = vrot.slane %v13617_v48, 7  ;;  %v4279_v19 = vrot.slane %v13617_v48, 5  ;;  %v4273_v4 = vrot.slane %v13617_v48, 4  ;;  %v4301_v44 = vrot.slane %v13617_v48, 1 }
 0x539   : > { %v4298_v45 = vsel %vm16743_vm4, 0.0, %v4293_v43  ;;  %v4284_v6 = vsel %vm16112_vm2, 0.0, %v4279_v19  ;;  %vm16753_vm4 = vmmov %vm16752_vm0 }
 0x53a   : > { %v4299_v25 = vsel %vm13623_vm7, %v4298_v45, 0.0  ;;  %v4291_v21 = vsel %vm13629_vm6, %v4284_v6, 0.0 }
 0x53e   : > { %v4230_v24 = vpop.f32.mrf.mxu3 }
 0x53f   : > { %v10274_v10 = vpack.i.bf16 %v4230_v24, %v13617_v48  ;;  %v4294_v63 = vrot.slane %v4230_v24, 7  ;;  %v4280_v33 = vrot.slane %v4230_v24, 5  ;;  %v4274_v35 = vrot.slane %v4230_v24, 4 }
 0x540   : > { %v4302_v30 = vrot.slane %v4230_v24, 1  ;;  %v4260_v7 = vrot.slane %v4230_v24, 3 }
 0x541   : > { %10275 = vrot.lane.b32.xlu1 %v10274_v10, %s16135_s22  ;;  %v4295_v52 = vsel %vm16750_vm8, %v4293_v43, %v4294_v63  ;;  %v4281_v61 = vsel %vm16112_vm2, %v4279_v19, %v4280_v33  ;;  %v4316_v23 = vsel %vm16112_vm2, %v4280_v33, 0.0  ;;  %v4259_v19 = vrot.slane %v13617_v48, 3 }
 0x542   : > { %v4300_v20 = vsel %vm13633_vm13, %v4295_v52, 0.0  ;;  %v4292_v45 = vsel %vm13637_vm12, %v4281_v61, 0.0  ;;  %v4317_v6 = vsel %vm13629_vm6, %v4281_v61, 0.0  ;;  %v4318_v27 = vsel %vm13637_vm12, %v4316_v23, 0.0 }
 0x543   : > { %v10289_v10 = vpack.i.bf16 %v4300_v20, %v4299_v25  ;;  %v13660_v14 = vpack.c.bf16 %v4318_v27, %v4317_v6  ;;  %v10284_v43 = vpack.i.bf16 %v4292_v45, %v4291_v21  ;;  %v4275_v24 = vsel %vm16751_vm14, %v4273_v4, %v4274_v35  ;;  %v9345_v45 = vld [vmem:[%s11202_s25 + $0x38] sm:$0xff]  ;;  %v9344_v6 = vld [vmem:[%s11202_s25 + $0x30] sm:$0xff] }
 0x544   : > { %v4303_v63 = vsel %vm16752_vm0, %v4301_v44, %v4302_v30  ;;  %v4306_v33 = vsel %vm16753_vm4, %v4302_v30, 0.0  ;;  %vm16754_vm8 = vcmask 1044480   ;;  %v4277_v20 = vsel %vm16756_vm3, 0.0, %v4273_v4  ;;  %4469 = vmatpush.bf16.msrb.mxu1 %v9345_v45 }
 0x545   : > { %10290 = vrot.lane.b32.xlu0 %v10289_v10, %s16133_s18  ;;  %10285 = vrot.lane.b32.xlu2 %v10284_v43, %s16131_s16  ;;  %v4261_v52 = vsel %vm16754_vm8, %v4259_v19, %v4260_v7  ;;  %vm16755_vm2 = vmmov %vm16754_vm8  ;;  %v10279_v27 = vpack.i.bf16 %v4275_v24, %v4277_v20  ;;  %v4307_v48 = vsel %vm13629_vm6, %v4303_v63, 0.0  ;;  %v4308_v25 = vsel %vm13637_vm12, %v4306_v33, 0.0  ;;  %v9342_v10 = vld [vmem:[%s11202_s25 + $0x20] sm:$0xff]  ;;  %v9341_v43 = vld [vmem:[%s11202_s25 + $0x18] sm:$0xff] }
 0x546   : > { %v4310_v61 = vsel %vm16755_vm2, %v4260_v7, 0.0  ;;  %v4311_v44 = vsel %vm13623_vm7, %v4261_v52, 0.0  ;;  %v10294_v7 = vpack.i.bf16 %v4308_v25, %v4307_v48  ;;  %v4314_v30 = vsel %vm16756_vm3, %v4274_v35, 0.0  ;;  %v9343_v35 = vld [vmem:[%s11202_s25 + $0x28] sm:$0xff]  ;;  %v9340_v63 = vld [vmem:[%s11202_s25 + $0x10] sm:$0xff] }
 0x547   : > { %v4312_v21 = vsel %vm13633_vm13, %v4310_v61, 0.0  ;;  %v10304_v23 = vpack.i.bf16 %v4314_v30, %v4275_v24  ;;  %v9339_v33 = vld [vmem:[%s11202_s25 + $0x8] sm:$0xff]  ;;  %v9338_v24 = vld [vmem:[%s11202_s25] sm:$0xff]  ;;  %v4264_v25 = vsel %vm16755_vm2, 0.0, %v4259_v19  ;;  %vm16757_vm0 = vcmask 130048  }
 0x548   : > { %v10299_v4 = vpack.i.bf16 %v4312_v21, %v4311_v44  ;;  %4470 = vmatpush.bf16.msrb.mxu1 %v9344_v6  ;;  %v9346_v61 = vld [vmem:[%s11202_s25 + $0x40] sm:$0xff]  ;;  %v4271_v21 = vsel %vm13623_vm7, %v4264_v25, 0.0  ;;  %v4272_v6 = vsel %vm13633_vm13, %v4261_v52, 0.0  ;;  %vm16758_vm4 = vmmov %vm16757_vm0  ;;  %vm16759_vm8 = vcmask 261120  }
 0x549   : > { %10280 = vrot.lane.b32.xlu1 %v10279_v27, %s11158_s2  ;;  %vm16760_vm3 = vmmov %vm16759_vm8  ;;  %vm16761_vm2 = vcmask 392192   ;;  %vm16763_vm14 = vcmask 523264  }
 0x54a   : > { %vm16762_vm11 = vmmov %vm16761_vm2 }
 0x54c   : > { %4471 = vmatpush.bf16.msrb.mxu1 %v9343_v35 }
 0x54d   : > { %10295 = vrot.lane.b32.xlu2 %v10294_v7, %s16123_s26  ;;  %10300 = vrot.lane.b32.xlu0 %v10299_v4, %s16125_s1  ;;  %s16817_s26 = sld [smem:[#allocation6_spill]] }
 0x550   : > { %4472 = vmatpush.bf16.msrb.mxu1 %v9342_v10 }
 0x551   : > { %10305 = vrot.lane.b32.xlu1 %v10304_v23, %s16127_s12 }
 0x554   : > { %4473 = vmatpush.bf16.msrb.mxu1 %v9341_v43 }
 0x558   : > { %4474 = vmatpush.bf16.msrb.mxu1 %v9340_v63 }
 0x55c   : > { %4475 = vmatpush.bf16.msrb.mxu1 %v9339_v33 }
 0x560   : > { %4476 = vmatpush.bf16.msrb.mxu1 %v9338_v24 }
 0x564   : > { %4490 = vmatpush.bf16.msra.mxu1 %v9346_v61 }
 0x59f   : > { %v10286_v20 = vpop.permute.xlu2 %10285 }
 0x5a0   : > { %v10288_v30 = vunpack.i.h.bf16 %v10286_v20  ;;  %v10287_v23 = vunpack.i.l.bf16 %v10286_v20 }
 0x5a7   : > { %v10296_v45 = vpop.permute.xlu2 %10295 }
 0x5a8   : > { %v10297_v20 = vunpack.i.l.bf16 %v10296_v45 }
 0x5b3   : > { %v10276_v27 = vpop.permute.xlu1 %10275 }
 0x5b4   : > { %v10278_v19 = vunpack.i.h.bf16 %v10276_v27  ;;  %v10277_v33 = vunpack.i.l.bf16 %v10276_v27 }
 0x5b7   : > { %v10291_v48 = vpop.permute.xlu0 %10290 }
 0x5b8   : > { %v10293_v35 = vunpack.i.h.bf16 %v10291_v48  ;;  %v10292_v10 = vunpack.i.l.bf16 %v10291_v48 }
 0x5bb   : > { %v10281_v44 = vpop.permute.xlu1 %10280 }
 0x5bc   : > { %v10283_v7 = vunpack.i.h.bf16 %v10281_v44  ;;  %v10282_v4 = vunpack.i.l.bf16 %v10281_v44  ;;  %v10298_v44 = vunpack.i.h.bf16 %v10296_v45 }
 0x5be   : > { %v4371_v43 = vsel %vm16757_vm0, %v4271_v21, %v10282_v4  ;;  %v4372_v63 = vsel %vm16758_vm4, %v4272_v6, %v10283_v7  ;;  %vm16764_vm0 = vmmov %vm16763_vm14  ;;  %vm16765_vm4 = vcmask 654336  }
 0x5bf   : > { %v4373_v24 = vsel %vm16759_vm8, %v4371_v43, %v10287_v23  ;;  %v4374_v61 = vsel %vm16760_vm3, %v4372_v63, %v10288_v30  ;;  %v10301_v25 = vpop.permute.xlu0 %10300  ;;  %vm16766_vm9 = vmmov %vm16765_vm4  ;;  %vm4382_vm8 = vcmask 785408   ;;  %vm4385_vm3 = vcmask 916480  }
 0x5c0   : > { %v4375_v41 = vsel %vm16761_vm2, %v4373_v24, %v10292_v10  ;;  %v4376_v52 = vsel %vm16762_vm11, %v4374_v61, %v10293_v35  ;;  %v10303_v59 = vunpack.i.h.bf16 %v10301_v25  ;;  %v10302_v58 = vunpack.i.l.bf16 %v10301_v25 }
 0x5c1   : > { %v4377_v48 = vsel %vm16763_vm14, %v4375_v41, %v10277_v33  ;;  %v4378_v21 = vsel %vm16764_vm0, %v4376_v52, %v10278_v19  ;;  %vm16767_vm11 = vcmask 130048   ;;  %v11101_v19 = vld [vmem:[%s11207_s29] ss:$0 sm:$0xff]  ;;  %vm16769_vm14 = vcmask 1043456  }
 0x5c2   : > { %v4380_v7 = vsel %vm16765_vm4, %v4377_v48, %v10297_v20  ;;  %v4381_v27 = vsel %vm16766_vm9, %v4378_v21, %v10298_v44  ;;  %vm16768_vm9 = vcmask 1046528   ;;  %vm16770_vm2 = vcmask 1042432   ;;  %vm16772_vm4 = vmmov %vm16769_vm14 }
 0x5c3   : > { %v10306_v4 = vpop.permute.xlu1 %10305  ;;  %v4383_v45 = vsel %vm4382_vm8, %v4380_v7, %v10302_v58  ;;  %v4384_v6 = vsel %vm4382_vm8, %v4381_v27, %v10303_v59  ;;  %vm16771_vm0 = vmmov %vm16768_vm9 }
 0x5c4   : > { %v10308_v30 = vunpack.i.h.bf16 %v10306_v4  ;;  %v10307_v23 = vunpack.i.l.bf16 %v10306_v4 }
 0x5c6   : > { %v4386_v35 = vsel %vm4385_vm3, %v4383_v45, %v10307_v23  ;;  %v4387_v41 = vsel %vm4385_vm3, %v4384_v6, %v10308_v30 }
 0x5c7   : > { %v4388_v10 = vpack.c.bf16 %v4387_v41, %v4386_v35 }
 0x5c9   : > { %4477 = vmatmul.bf16.vlgmr.msrb.gmra.mxu1 %v4388_v10 }
 0x5d9   : > { %8889 = vmatmul.msk.bf16.vlgmr.msra.gmra.mxu1 %vm16767_vm11, %v13660_v14  ;;  %vm16773_vm11 = vmmov %vm16770_vm2 }
 0x646   : > { %v4478_v43 = vpop.f32.mrf.mxu1 }
 0x647   : > { %v4479_v24 = vadd.f32 %v11101_v19, %v4478_v43 }
 0x64e   : > { %v4480_v63 = vpop.f32.mrf.mxu1 }
 0x64f   : > { %v4481_v25 = vadd.f32 %v11101_v19, %v4480_v63 }
 0x656   : > { %v4492_v33 = vpop.f32.mrf.mxu1 }
 0x657   : > { %v4493_v61 = vadd.f32 %v4492_v33, %v4479_v24  ;;  %v4525_v24 = vld [vmem:[%s11300_s4] sm:$0xf] }
 0x659   : > { %v13715_v58 = vmax.f32 %v4493_v61, 0.0  ;;  %v9364_v61 = vld [vmem:[%s11212_s3 + $0x88] sm:$0xff] }
 0x65b   : > { %v4501_v14 = vrot.slane %v13715_v58, 1  ;;  %v4509_v7 = vrot.slane %v13715_v58, 4  ;;  %v4515_v27 = vrot.slane %v13715_v58, 5 }
 0x65e   : > { %v4494_v44 = vpop.f32.mrf.mxu1 }
 0x65f   : > { %v4495_v59 = vadd.f32 %v4494_v44, %v4481_v25  ;;  %v9363_v25 = vld [vmem:[%s11212_s3 + $0x80] sm:$0xff]  ;;  %v9354_v44 = vld [vmem:[%s11212_s3 + $0x38] sm:$0xff] }
 0x660   : > { %4777 = vmatpush.bf16.msrb.mxu1 %v9354_v44  ;;  %v9353_v44 = vld [vmem:[%s11212_s3 + $0x30] sm:$0xff] }
 0x661   : > { %v13717_v20 = vmax.f32 %v4495_v59, 0.0  ;;  %v9362_v59 = vld [vmem:[%s11212_s3 + $0x78] sm:$0xff] }
 0x662   : > { %4790 = vmatpush.bf16.msrb.mxu2 %v9362_v59  ;;  %v9361_v59 = vld [vmem:[%s11212_s3 + $0x70] sm:$0xff] }
 0x663   : > { %v4502_v52 = vrot.slane %v13717_v20, 1  ;;  %v4510_v48 = vrot.slane %v13717_v20, 4  ;;  %v4516_v21 = vrot.slane %v13717_v20, 5 }
 0x664   : > { %4778 = vmatpush.bf16.msrb.mxu1 %v9353_v44 }
 0x665   : > { %v4506_v4 = vsel %vm16768_vm9, %v4502_v52, 0.0  ;;  %v4514_v30 = vsel %vm16769_vm14, %v4510_v48, 0.0  ;;  %v4520_v23 = vsel %vm16770_vm2, %v4516_v21, 0.0  ;;  %v4503_v45 = vsel %vm16771_vm0, %v4501_v14, %v4502_v52 }
 0x666   : > { %v4508_v6 = vmax.f32 %v13717_v20, %v4506_v4  ;;  %v4522_v35 = vmax.f32 %v4514_v30, %v4520_v23  ;;  %v4507_v41 = vmax.f32 %v13715_v58, %v4503_v45  ;;  %v4511_v10 = vsel %vm16772_vm4, %v4509_v7, %v4510_v48  ;;  %4791 = vmatpush.bf16.msrb.mxu2 %v9361_v59 }
 0x667   : > { %v4517_v43 = vsel %vm16773_vm11, %v4515_v27, %v4516_v21  ;;  %vm16774_vm9 = vcmask 130048   ;;  %v4553_v52 = vand.u32 1, %v11332_v2  ;;  %vm4571_vm14 = vcmask 1041408   ;;  %v9360_v21 = vld [vmem:[%s11212_s3 + $0x68] sm:$0xff] }
 0x668   : > { %v4524_v63 = vmax.f32 %v4508_v6, %v4522_v35  ;;  %v4521_v19 = vmax.f32 %v4511_v10, %v4517_v43  ;;  %vm16779_vm4 = vcmask 1040384  }
 0x669   : > { %vm13742_vm2 = vcmp.lt.s32.totalorder %v4553_v52, 1  ;;  %vm13746_vm0 = vcmp.ge.s32.totalorder %v4553_v52, 1  ;;  %v9352_v52 = vld [vmem:[%s11212_s3 + $0x28] sm:$0xff] }
 0x66a   : > { %4543 = vmatpush.msrb.mxu3 %v4524_v63  ;;  %v4523_v33 = vmax.f32 %v4507_v41, %v4521_v19  ;;  %4779 = vmatpush.bf16.msrb.mxu1 %v9352_v52 }
 0x66b   : > { %4792 = vmatpush.bf16.msrb.mxu2 %v9360_v21 }
 0x66c   : > { %4544 = vmatpush.msrb.mxu3 %v4523_v33 }
 0x66d   : > { %8890 = vmatmul.msk.f32.vlgmr.msrb.gmra.mxu3 %vm16774_vm9, %v4525_v24  ;;  %vm16780_vm9 = vmmov %vm16779_vm4 }
 0x66e   : > { %4809 = vmatpush.bf16.msra.mxu3 %v9364_v61 }
 0x672   : > { %4810 = vmatpush.bf16.msra.mxu3 %v9363_v25 }
 0x6f0   : > { %v13740_v48 = vpop.f32.mrf.mxu3 }
 0x6f1   : > { %v4586_v7 = vrot.slane %v13740_v48, 2  ;;  %v4589_v27 = vrot.slane %v13740_v48, 3  ;;  %v4569_v4 = vrot.slane %v13740_v48, 6  ;;  %v4581_v30 = vrot.slane %v13740_v48, 1 }
 0x6f2   : > { %v4573_v2 = vrot.slane %v13740_v48, 7 }
 0x6f3   : > { %v4588_v23 = vsel %vm4571_vm14, %v4586_v7, 0.0  ;;  %v4591_v45 = vsel %vm16779_vm4, %v4589_v27, 0.0  ;;  %v4572_v6 = vsel %vm4571_vm14, 0.0, %v4569_v4  ;;  %v4583_v35 = vsel %vm16773_vm11, %v4581_v30, 0.0  ;;  %v9351_v7 = vld [vmem:[%s11212_s3 + $0x20] sm:$0xff]  ;;  %v9350_v4 = vld [vmem:[%s11212_s3 + $0x18] sm:$0xff] }
 0x6f4   : > { %v4592_v41 = vsel %vm13742_vm2, %v4591_v45, 0.0  ;;  %4614 = vrot.lane.b32.xlu1 %v4588_v23, %s16125_s1  ;;  %v4584_v10 = vsel %vm13742_vm2, %v4583_v35, 0.0  ;;  %v4575_v43 = vsel %vm16780_vm9, 0.0, %v4573_v2  ;;  %v4585_v63 = vsel %vm13746_vm0, %v4583_v35, 0.0  ;;  %v9359_v27 = vld [vmem:[%s11212_s3 + $0x60] sm:$0xff]  ;;  %4780 = vmatpush.bf16.msrb.mxu1 %v9351_v7  ;;  %v9358_v30 = vld [vmem:[%s11212_s3 + $0x58] sm:$0xff] }
 0x6f5   : > { %v10309_v19 = vpack.i.bf16 %v4572_v6, %v4584_v10  ;;  %v4625_v33 = vpack.c.bf16 %v4592_v41, %v4592_v41  ;;  %v4579_v24 = vsel %vm13742_vm2, %v4575_v43, 0.0  ;;  %vm16781_vm14 = vcmask 261120   ;;  %4793 = vmatpush.bf16.msrb.mxu2 %v9359_v27  ;;  %v9349_v2 = vld [vmem:[%s11212_s3 + $0x10] sm:$0xff]  ;;  %v9348_v45 = vld [vmem:[%s11212_s3 + $0x8] sm:$0xff]  ;;  %v9347_v35 = vld [vmem:[%s11212_s3] sm:$0xff] }
 0x6f6   : > { %v10314_v61 = vpack.i.bf16 %v4579_v24, %v4585_v63  ;;  %v4580_v25 = vsel %vm13746_vm0, %v4575_v43, 0.0  ;;  %v9357_v23 = vld [vmem:[%s11212_s3 + $0x50] sm:$0xff]  ;;  %v9356_v6 = vld [vmem:[%s11212_s3 + $0x48] sm:$0xff]  ;;  %v9355_v41 = vld [vmem:[%s11212_s3 + $0x40] sm:$0xff]  ;;  %v4562_v43 = vrot.slane %v13740_v48, 5  ;;  %vm16785_vm9 = vcmask 523264  }
 0x6f7   : > { %8963 = vmatmul.msk.bf16.vlgmr.msra.gmra.mxu3 %vm16781_vm14, %v4625_v33  ;;  %10310 = vrot.lane.b32.xlu2 %v10309_v19, %s16131_s16  ;;  %vm16782_vm2 = vmmov %vm16773_vm11 }
 0x6f8   : > { %10315 = vrot.lane.b32.xlu0 %v10314_v61, %s16135_s22  ;;  %4781 = vmatpush.bf16.msrb.mxu1 %v9350_v4  ;;  %v4564_v33 = vsel %vm16782_vm2, 0.0, %v4562_v43  ;;  %vm16783_vm4 = vmmov %vm16781_vm14  ;;  %vm16789_vm2 = vcmask 1043456  }
 0x6f9   : > { %4794 = vmatpush.bf16.msrb.mxu2 %v9358_v30  ;;  %v4568_v61 = vsel %vm13746_vm0, %v4564_v33, 0.0  ;;  %vm16784_vm11 = vmmov %vm16783_vm4 }
 0x6fa   : > { %vm16786_vm14 = vmmov %vm16785_vm9 }
 0x6fb   : > { %vm16788_vm0 = vmmov %vm16785_vm9 }
 0x6fc   : > { %4782 = vmatpush.bf16.msrb.mxu1 %v9349_v2 }
 0x6fd   : > { %4795 = vmatpush.bf16.msrb.mxu2 %v9357_v23 }
 0x6ff   : > { %4602 = vrot.lane.b32.xlu2 %v4580_v25, %s16125_s1 }
 0x700   : > { %4783 = vmatpush.bf16.msrb.mxu1 %v9348_v45 }
 0x701   : > { %4796 = vmatpush.bf16.msrb.mxu2 %v9356_v6 }
 0x704   : > { %4784 = vmatpush.bf16.msrb.mxu1 %v9347_v35  ;;  %v9367_v35 = vld [vmem:[%s11222_s14 + $0x10] sm:$0xff] }
 0x705   : > { %4797 = vmatpush.bf16.msrb.mxu2 %v9355_v41  ;;  %v9366_v41 = vld [vmem:[%s11222_s14 + $0x8] sm:$0xff] }
 0x751   : > { %v10311_v10 = vpop.permute.xlu2 %10310 }
 0x752   : > { %v10313_v63 = vunpack.i.h.bf16 %v10311_v10  ;;  %v10312_v19 = vunpack.i.l.bf16 %v10311_v10  ;;  %v9365_v10 = vld [vmem:[%s11222_s14] sm:$0xff] }
 0x754   : > { %v4617_v59 = vsel %vm16783_vm4, %v4568_v61, %v10313_v63  ;;  %v4620_v52 = vsel %vm16784_vm11, %v13740_v48, %v10312_v19  ;;  %v9368_v48 = vld [vmem:[%s11222_s14 + $0x18] sm:$0xff]  ;;  %v11102_v63 = vld [vmem:[%s11217_s8] ss:$0 sm:$0xff]  ;;  %vm16790_vm4 = vcmask 31744  }
 0x755   : > { %4861 = vmatpush.bf16.msrb.mxu3 %v9368_v48  ;;  %vm16791_vm11 = vmmov %vm16790_vm4  ;;  %v9375_v48 = vld [vmem:[%s16787_s15 + $0x30] sm:$0xff] }
 0x759   : > { %v4603_v21 = vpop.permute.xlu2 %4602  ;;  %4862 = vmatpush.bf16.msrb.mxu3 %v9367_v35  ;;  %v9384_v35 = vld [vmem:[%s16787_s15 + $0x78] sm:$0xff] }
 0x75a   : > { %5312 = vmatpush.bf16.msra.mxu2 %v9384_v35 }
 0x75d   : > { %4863 = vmatpush.bf16.msrb.mxu3 %v9366_v41  ;;  %v9392_v41 = vld [vmem:[%s16787_s15 + $0xb8] sm:$0xff] }
 0x761   : > { %4864 = vmatpush.bf16.msrb.mxu3 %v9365_v10  ;;  %v9374_v10 = vld [vmem:[%s16787_s15 + $0x28] sm:$0xff] }
 0x766   : > { %v4615_v7 = vpop.permute.xlu1 %4614 }
 0x76a   : > { %v10316_v24 = vpop.permute.xlu0 %10315 }
 0x76b   : > { %v10318_v25 = vunpack.i.h.bf16 %v10316_v24  ;;  %v10317_v44 = vunpack.i.l.bf16 %v10316_v24 }
 0x76d   : > { %v4618_v27 = vsel %vm16785_vm9, %v4617_v59, %v10318_v25  ;;  %v4621_v4 = vsel %vm16786_vm14, %v4620_v52, %v10317_v44  ;;  %vm16792_vm9 = vcmask 261120  }
 0x76e   : > { %v4619_v14 = vsel %vm4382_vm8, %v4618_v27, %v4603_v21  ;;  %v4622_v30 = vsel %vm4382_vm8, %v4621_v4, %v4615_v7  ;;  %v11103_v21 = vld [vmem:[%s11227_s19] ss:$0 sm:$0xff]  ;;  %vm16793_vm14 = vmmov %vm16792_vm9 }
 0x76f   : > { %v4623_v2 = vpack.c.bf16 %v4619_v14, %v4619_v14  ;;  %v4624_v23 = vpack.c.bf16 %v4622_v30, %v4622_v30  ;;  %v4870_v4 = vld [vmem:[%s11305_s30] sm:$0xff]  ;;  %v4871_v30 = vld [vmem:[%s11305_s30 + $0x8] sm:$0xff] }
 0x771   : > { %4785 = vmatmul.bf16.vlgmr.msrb.gmra.mxu1 %v4623_v2  ;;  %4798 = vmatmul.bf16.vlgmr.msrb.gmra.mxu2 %v4624_v23 }
 0x77a   : > { %v4812_v45 = vpop.f32.mrf.mxu3 }
 0x782   : > { %v4814_v6 = vpop.f32.mrf.mxu3 }
 0x783   : > { %v9376_v6 = vld [vmem:[%s16787_s15 + $0x38] sm:$0xff] }
 0x784   : > { %5298 = vmatpush.bf16.msra.mxu1 %v9376_v6 }
 0x788   : > { %5299 = vmatpush.bf16.msra.mxu1 %v9375_v48 }
 0x78c   : > { %5300 = vmatpush.bf16.msra.mxu1 %v9374_v10 }
 0x7ee   : > { %v4786_v43 = vpop.f32.mrf.mxu1 }
 0x7ef   : > { %v4787_v19 = vadd.f32 %v11102_v63, %v4786_v43  ;;  %v9373_v43 = vld [vmem:[%s16787_s15 + $0x20] sm:$0xff] }
 0x7f0   : > { %5301 = vmatpush.bf16.msra.mxu1 %v9373_v43 }
 0x7f4   : > { %v4799_v33 = vpop.f32.mrf.mxu2 }
 0x7f5   : > { %v4800_v24 = vadd.f32 %v4799_v33, %v4787_v19 }
 0x7f6   : > { %v4788_v61 = vpop.f32.mrf.mxu1 }
 0x7f7   : > { %v4813_v25 = vadd.f32 %v4812_v45, %v4800_v24  ;;  %v9372_v24 = vld [vmem:[%s16787_s15 + $0x18] sm:$0xff] }
 0x7f8   : > { %5302 = vmatpush.bf16.msra.mxu1 %v9372_v24  ;;  %v9383_v24 = vld [vmem:[%s16787_s15 + $0x70] sm:$0xff] }
 0x7f9   : > { %v4816_v44 = vmax.f32 %v4813_v25, 0.0  ;;  %5313 = vmatpush.bf16.msra.mxu2 %v9383_v24 }
 0x7fb   : > { %v4817_v59 = vpack.c.bf16 %v4816_v44, %v4816_v44 }
 0x7fc   : > { %v4801_v52 = vpop.f32.mrf.mxu2 }
 0x7fd   : > { %8980 = vmatmul.msk.bf16.vlgmr.msrb.gmra.mxu3 %vm16788_vm0, %v4817_v59  ;;  %vm16794_vm0 = vmmov %vm16789_vm2 }
 0x880   : > { %v4866_v7 = vpop.f32.mrf.mxu3 }
 0x881   : > { %v4867_v27 = vadd.f32 %v11103_v21, %v4866_v7 }
 0x883   : > { %8981 = vmatpush.msk.msra.mxu3 %vm16789_vm2, %v4867_v27  ;;  %vm16795_vm2 = vmmov %vm16794_vm0 }
 0x884   : > { %8982 = vmatmul.msk.f32.vlgmr.msra.gmra.mxu3 %vm16790_vm4, %v4870_v4  ;;  %vm16796_vm4 = vcmask 1046528  }
 0x885   : > { %5326 = vmatpush.bf16.msrb.mxu3 %v9392_v41 }
 0x888   : > { %v4868_v14 = vpop.f32.mrf.mxu3 }
 0x88c   : > { %8983 = vmatmul.msk.f32.gmra.mxu3 %vm16791_vm11, %v4871_v30  ;;  %vm16797_vm11 = vmmov %vm16796_vm4  ;;  %v9371_v30 = vld [vmem:[%s16787_s15 + $0x10] sm:$0xff] }
 0x88d   : > { %5303 = vmatpush.bf16.msra.mxu1 %v9371_v30  ;;  %v9397_v30 = vld [vmem:[%s16787_s15 + $0xe0] sm:$0xff] }
 0x907   : > { %v4898_v2 = vpop.f32.mrf.mxu3 }
 0x90f   : > { %v4901_v23 = vpop.f32.mrf.mxu3 }
 0x910   : > { %v10319_v45 = vpack.i.bf16 %v4901_v23, %v4898_v2 }
 0x912   : > { %10320 = vrot.lane.b32.xlu0 %v10319_v45, %s16131_s16 }
 0x984   : > { %v10321_v63 = vpop.permute.xlu0 %10320 }
 0x985   : > { %v10323_v19 = vunpack.i.h.bf16 %v10321_v63  ;;  %v10322_v33 = vunpack.i.l.bf16 %v10321_v63  ;;  %v9370_v63 = vld [vmem:[%s16787_s15 + $0x8] sm:$0xff] }
 0x986   : > { %5304 = vmatpush.bf16.msra.mxu1 %v9370_v63  ;;  %v9385_v63 = vld [vmem:[%s16787_s15 + $0x80] sm:$0xff] }
 0x987   : > { %v13820_v61 = vsel %vm16792_vm9, %v13717_v20, %v10323_v19  ;;  %v13824_v25 = vsel %vm16793_vm14, %v13715_v58, %v10322_v33  ;;  %vm16798_vm9 = vcmask 1040384   ;;  %v9369_v33 = vld [vmem:[%s16787_s15] sm:$0xff] }
 0x988   : > { %v4924_v44 = vrot.slane %v13824_v25, 4  ;;  %v4925_v59 = vrot.slane %v13820_v61, 4  ;;  %v4945_v52 = vrot.slane %v13824_v25, 1  ;;  %v4946_v21 = vrot.slane %v13820_v61, 1  ;;  %vm16799_vm14 = vmmov %vm16798_vm9 }
 0x989   : > { %v4937_v7 = vrot.slane %v13824_v25, 7  ;;  %v4938_v27 = vrot.slane %v13820_v61, 7 }
 0x98a   : > { %v4926_v4 = vsel %vm16794_vm0, %v4924_v44, %v4925_v59  ;;  %v4928_v20 = vsel %vm16795_vm2, 0.0, %v4924_v44  ;;  %v4947_v14 = vsel %vm16796_vm4, %v4945_v52, %v4946_v21  ;;  %v4950_v58 = vsel %vm16797_vm11, %v4946_v21, 0.0  ;;  %v9391_v44 = vld [vmem:[%s16787_s15 + $0xb0] sm:$0xff]  ;;  %5305 = vmatpush.bf16.msra.mxu1 %v9369_v33  ;;  %v9400_v52 = vld [vmem:[%s16787_s15 + $0xf8] sm:$0xff]  ;;  %v9382_v21 = vld [vmem:[%s16787_s15 + $0x68] sm:$0xff] }
 0x98b   : > { %v10329_v2 = vpack.i.bf16 %v4926_v4, %v4928_v20  ;;  %v4951_v23 = vsel %vm13629_vm6, %v4947_v14, 0.0  ;;  %v4952_v45 = vsel %vm13637_vm12, %v4950_v58, 0.0  ;;  %v4939_v6 = vsel %vm16798_vm9, %v4937_v7, %v4938_v27  ;;  %5327 = vmatpush.bf16.msrb.mxu3 %v9391_v44  ;;  %v9399_v27 = vld [vmem:[%s16787_s15 + $0xf0] sm:$0xff]  ;;  %5314 = vmatpush.bf16.msra.mxu2 %v9382_v21  ;;  %v9389_v4 = vld [vmem:[%s16787_s15 + $0xa0] sm:$0xff]  ;;  %v9398_v20 = vld [vmem:[%s16787_s15 + $0xe8] sm:$0xff] }
 0x98c   : > { %v10334_v48 = vpack.i.bf16 %v4952_v45, %v4951_v23  ;;  %v4942_v35 = vsel %vm16799_vm14, 0.0, %v4937_v7  ;;  %v4944_v41 = vsel %vm13633_vm13, %v4939_v6, 0.0  ;;  %v4958_v19 = vsel %vm16794_vm0, %v4925_v59, 0.0  ;;  %v9390_v7 = vld [vmem:[%s16787_s15 + $0xa8] sm:$0xff]  ;;  %v9381_v59 = vld [vmem:[%s16787_s15 + $0x60] sm:$0xff]  ;;  %v9380_v14 = vld [vmem:[%s16787_s15 + $0x58] sm:$0xff] }
 0x98d   : > { %10330 = vrot.lane.b32.xlu2 %v10329_v2, %s16135_s22  ;;  %v4943_v10 = vsel %vm13623_vm7, %v4942_v35, 0.0  ;;  %v9388_v58 = vld [vmem:[%s16787_s15 + $0x98] sm:$0xff]  ;;  %v9379_v2 = vld [vmem:[%s16787_s15 + $0x50] sm:$0xff]  ;;  %v9378_v6 = vld [vmem:[%s16787_s15 + $0x48] sm:$0xff]  ;;  %v4917_v35 = vrot.slane %v13820_v61, 3  ;;  %vm16800_vm2 = vcmask 1044480  }
 0x98e   : > { %10335 = vrot.lane.b32.xlu0 %v10334_v48, %s16135_s22  ;;  %v10324_v43 = vpack.i.bf16 %v4944_v41, %v4943_v10  ;;  %5340 = vmatpush.bf16.msrb.mxu1 %v9400_v52  ;;  %v9387_v23 = vld [vmem:[%s16787_s15 + $0x90] sm:$0xff]  ;;  %v9396_v45 = vld [vmem:[%s16787_s15 + $0xd8] sm:$0xff]  ;;  %v9386_v48 = vld [vmem:[%s16787_s15 + $0x88] sm:$0xff]  ;;  %v4916_v41 = vrot.slane %v13824_v25, 3  ;;  %vm16802_vm11 = vcmask 523264   ;;  %vm16804_vm14 = vcmask 1042432  }
 0x98f   : > { %5328 = vmatpush.bf16.msrb.mxu3 %v9390_v7  ;;  %5315 = vmatpush.bf16.msra.mxu2 %v9381_v59  ;;  %v9395_v10 = vld [vmem:[%s16787_s15 + $0xd0] sm:$0xff]  ;;  %vm16801_vm4 = vmmov %vm16800_vm2  ;;  %v9394_v44 = vld [vmem:[%s16787_s15 + $0xc8] sm:$0xff] }
 0x990   : > { %10325 = vrot.lane.b32.xlu1 %v10324_v43, %s16135_s22  ;;  %v9377_v43 = vld [vmem:[%s16787_s15 + $0x40] sm:$0xff]  ;;  %v4921_v33 = vsel %vm16801_vm4, 0.0, %v4916_v41  ;;  %v9404_v7 = vld [vmem:[%s16787_s15 + $0x118] sm:$0xff]  ;;  %vm16803_vm9 = vmmov %vm16802_vm11 }
 0x991   : > { %vm16805_vm0 = vmmov %vm16804_vm14 }
 0x992   : > { %5341 = vmatpush.bf16.msrb.mxu1 %v9399_v27  ;;  %v4922_v27 = vsel %vm13623_vm7, %v4921_v33, 0.0 }
 0x993   : > { %5329 = vmatpush.bf16.msrb.mxu3 %v9389_v4  ;;  %5316 = vmatpush.bf16.msra.mxu2 %v9380_v14 }
 0x996   : > { %5342 = vmatpush.bf16.msrb.mxu1 %v9398_v20 }
 0x997   : > { %5330 = vmatpush.bf16.msrb.mxu3 %v9388_v58  ;;  %5317 = vmatpush.bf16.msra.mxu2 %v9379_v2  ;;  %v9393_v58 = vld [vmem:[%s16787_s15 + $0xc0] sm:$0xff]  ;;  %v9402_v2 = vld [vmem:[%s16787_s15 + $0x108] sm:$0xff] }
 0x998   : > { %4987 = vrot.lane.b32.xlu1 %v4958_v19, %s16135_s22  ;;  %v4918_v19 = vsel %vm16800_vm2, %v4916_v41, %v4917_v35  ;;  %vm16806_vm2 = vmmov %vm16803_vm9 }
 0x999   : > { %v4923_v59 = vsel %vm13633_vm13, %v4918_v19, 0.0  ;;  %vm16807_vm4 = vmmov %vm16806_vm2 }
 0x99a   : > { %5343 = vmatpush.bf16.msrb.mxu1 %v9397_v30  ;;  %v9403_v30 = vld [vmem:[%s16787_s15 + $0x110] sm:$0xff] }
 0x99b   : > { %5331 = vmatpush.bf16.msrb.mxu3 %v9387_v23  ;;  %5318 = vmatpush.bf16.msra.mxu2 %v9378_v6  ;;  %v9401_v23 = vld [vmem:[%s16787_s15 + $0x100] sm:$0xff]  ;;  %v4929_v6 = vrot.slane %v13824_v25, 5 }
 0x99e   : > { %5344 = vmatpush.bf16.msrb.mxu1 %v9396_v45  ;;  %v4930_v45 = vrot.slane %v13820_v61, 5 }
 0x99f   : > { %5332 = vmatpush.bf16.msrb.mxu3 %v9386_v48  ;;  %5319 = vmatpush.bf16.msra.mxu2 %v9377_v43 }
 0x9a0   : > { %v4931_v43 = vsel %vm16804_vm14, %v4929_v6, %v4930_v45  ;;  %vm16810_vm14 = vcmask 1044480  }
 0x9a2   : > { %5345 = vmatpush.bf16.msrb.mxu1 %v9395_v10 }
 0x9a3   : > { %5333 = vmatpush.bf16.msrb.mxu3 %v9385_v63  ;;  %5358 = vmatpush.bf16.msrb.mxu2 %v9404_v7  ;;  %v4934_v63 = vsel %vm16805_vm0, 0.0, %v4929_v6  ;;  %vm16812_vm0 = vmmov %vm16806_vm2 }
 0x9a6   : > { %5346 = vmatpush.bf16.msrb.mxu1 %v9394_v44 }
 0x9a7   : > { %5359 = vmatpush.bf16.msrb.mxu2 %v9403_v30 }
 0x9aa   : > { %5347 = vmatpush.bf16.msrb.mxu1 %v9393_v58 }
 0x9ab   : > { %5360 = vmatpush.bf16.msrb.mxu2 %v9402_v2  ;;  %v4955_v2 = vsel %vm13623_vm7, %v4918_v19, 0.0  ;;  %v9406_v19 = vld [vmem:[%s16811_s23 + $0x8] sm:$0xff]  ;;  %vm16818_vm7 = vcmask 261120  }
 0x9ac   : > { %5400 = vmatpush.bf16.msra.mxu3 %v9406_v19  ;;  %v5408_v19 = vld [vmem:[%s11310_s6] sm:$0xff] }
 0x9af   : > { %5361 = vmatpush.bf16.msrb.mxu2 %v9401_v23 }
 0x9e7   : > { %v10331_v24 = vpop.permute.xlu2 %10330 }
 0x9e8   : > { %v10333_v52 = vunpack.i.h.bf16 %v10331_v24  ;;  %v10332_v21 = vunpack.i.l.bf16 %v10331_v24 }
 0x9ea   : > { %v4990_v4 = vsel %vm16802_vm11, %v4922_v27, %v10332_v21  ;;  %v4991_v20 = vsel %vm16803_vm9, %v4923_v59, %v10333_v52  ;;  %v4935_v27 = vsel %vm13629_vm6, %v4934_v63, 0.0  ;;  %v4936_v59 = vsel %vm13637_vm12, %v4931_v43, 0.0  ;;  %vm16808_vm11 = vmmov %vm16806_vm2 }
 0x9eb   : > { %v4998_v14 = vpack.c.bf16 %v4991_v20, %v4990_v4  ;;  %vm16809_vm9 = vmmov %vm16806_vm2  ;;  %v4996_v23 = vsel %vm16812_vm0, %v4955_v2, %v10333_v52  ;;  %v9405_v52 = vld [vmem:[%s16811_s23] sm:$0xff] }
 0x9ec   : > { %5401 = vmatpush.bf16.msra.mxu3 %v9405_v52  ;;  %v5409_v52 = vld [vmem:[%s11310_s6 + $0x8] sm:$0xff] }
 0x9ed   : > { %5306 = vmatmul.bf16.vlgmr.msra.gmra.mxu1 %v4998_v14 }
 0xa00   : > { %v10336_v48 = vpop.permute.xlu0 %10335 }
 0xa01   : > { %v10338_v41 = vunpack.i.h.bf16 %v10336_v48  ;;  %v10337_v10 = vunpack.i.l.bf16 %v10336_v48 }
 0xa02   : > { %v10326_v33 = vpop.permute.xlu1 %10325 }
 0xa03   : > { %v4995_v24 = vsel %vm16806_vm2, %v13820_v61, %v10338_v41  ;;  %v4994_v44 = vsel %vm16807_vm4, %v13824_v25, %v10337_v10  ;;  %v10328_v21 = vunpack.i.h.bf16 %v10326_v33  ;;  %v10327_v7 = vunpack.i.l.bf16 %v10326_v33  ;;  %vm16813_vm2 = vmmov %vm16812_vm0 }
 0xa04   : > { %v5000_v4 = vpack.c.bf16 %v4995_v24, %v4994_v44  ;;  %v4954_v61 = vsel %vm16810_vm14, %v4917_v35, 0.0  ;;  %vm16815_vm4 = vcmask 1042432   ;;  %v4961_v35 = vsel %vm13629_vm6, %v4931_v43, 0.0  ;;  %v11104_v24 = vld [vmem:[%s16814_s0] ss:$0 sm:$0xff]  ;;  %s16829_s0 = sld [smem:[#allocation7_spill]] }
 0xa05   : > { %v4992_v20 = vsel %vm16808_vm11, %v4935_v27, %v10327_v7  ;;  %v4993_v14 = vsel %vm16809_vm9, %v4936_v59, %v10328_v21  ;;  %v4956_v25 = vsel %vm13633_vm13, %v4954_v61, 0.0  ;;  %v4960_v41 = vsel %vm16815_vm4, %v4930_v45, 0.0  ;;  %vm16816_vm13 = vmmov %vm16812_vm0 }
 0xa06   : > { %v4999_v58 = vpack.c.bf16 %v4993_v14, %v4992_v20  ;;  %5334 = vmatmul.bf16.vlgmr.msrb.gmra.mxu3 %v5000_v4  ;;  %v4962_v56 = vsel %vm13637_vm12, %v4960_v41, 0.0  ;;  %vm16819_vm6 = vcmask 130048  }
 0xa07   : > { %v5002_v10 = vpack.c.bf16 %v4962_v56, %v4961_v35  ;;  %v11105_v35 = vld [vmem:[%s16817_s26] ss:$0 sm:$0xff]  ;;  %vm16820_vm12 = vmmov %vm16819_vm6  ;;  %s16860_s26 = sld [smem:[#allocation9_spill]] }
 0xa08   : > { %5320 = vmatmul.bf16.vlgmr.msra.gmra.mxu2 %v4999_v58  ;;  %vm16821_vm11 = vmmov %vm16819_vm6 }
 0xa09   : > { %vm16822_vm9 = vmmov %vm16819_vm6 }
 0xa0a   : > { %v4988_v30 = vpop.permute.xlu1 %4987  ;;  %vm16823_vm14 = vmmov %vm16819_vm6 }
 0xa0b   : > { %v4997_v6 = vsel %vm16813_vm2, %v4956_v25, %v4988_v30  ;;  %vm16824_vm0 = vmmov %vm16819_vm6 }
 0xa0c   : > { %v5001_v48 = vpack.c.bf16 %v4997_v6, %v4996_v23  ;;  %vm16825_vm2 = vmmov %vm16824_vm0 }
 0xa0d   : > { %vm16826_vm4 = vmmov %vm16824_vm0 }
 0xa0e   : > { %5348 = vmatmul.bf16.vlgmr.msrb.gmra.mxu1 %v5001_v48 }
 0xa18   : > { %9128 = vmatmul.msk.bf16.vlgmr.msrb.gmra.mxu2 %vm16816_vm13, %v5002_v10  ;;  %vm16827_vm13 = vmmov %vm16824_vm0 }
 0xa6a   : > { %v5307_v1 = vpop.f32.mrf.mxu1 }
 0xa6b   : > { %v5308_v45 = vadd.f32 %v11104_v24, %v5307_v1 }
 0xa72   : > { %v5309_v33 = vpop.f32.mrf.mxu1 }
 0xa73   : > { %v5310_v26 = vadd.f32 %v11104_v24, %v5309_v33  ;;  %v5411_v33 = vld [vmem:[%s11310_s6 + $0x18] sm:$0xff]  ;;  %v5412_v24 = vld [vmem:[%s11310_s6 + $0x20] sm:$0xff] }
 0xa89   : > { %v5335_v44 = vpop.f32.mrf.mxu3 }
 0xa8b   : > { %v5321_v63 = vpop.f32.mrf.mxu2  ;;  %v5349_v7 = vpop.f32.mrf.mxu1 }
 0xa8c   : > { %v5322_v43 = vadd.f32 %v5321_v63, %v5308_v45  ;;  %v5410_v63 = vld [vmem:[%s11310_s6 + $0x10] sm:$0xff]  ;;  %v5415_v45 = vld [vmem:[%s11310_s6 + $0x38] sm:$0xff] }
 0xa8e   : > { %v5336_v59 = vadd.f32 %v5335_v44, %v5322_v43  ;;  %v5413_v44 = vld [vmem:[%s11310_s6 + $0x28] sm:$0xff] }
 0xa90   : > { %v5350_v14 = vadd.f32 %v5349_v7, %v5336_v59 }
 0xa91   : > { %v5337_v4 = vpop.f32.mrf.mxu3 }
 0xa93   : > { %v5323_v21 = vpop.f32.mrf.mxu2  ;;  %v5351_v58 = vpop.f32.mrf.mxu1 }
 0xa94   : > { %v5324_v27 = vadd.f32 %v5323_v21, %v5310_v26  ;;  %v5414_v21 = vld [vmem:[%s11310_s6 + $0x30] sm:$0xff] }
 0xa96   : > { %v5338_v20 = vadd.f32 %v5337_v4, %v5324_v27 }
 0xa98   : > { %v5352_v61 = vadd.f32 %v5351_v58, %v5338_v20 }
 0xa9b   : > { %v5363_v3 = vpop.f32.mrf.mxu2 }
 0xa9c   : > { %v5364_v25 = vadd.f32 %v5363_v3, %v5350_v14 }
 0xa9e   : > { %v5368_v23 = vmax.f32 %v5364_v25, 0.0 }
 0xaa3   : > { %v5365_v30 = vpop.f32.mrf.mxu2 }
 0xaa4   : > { %v5366_v2 = vadd.f32 %v5365_v30, %v5352_v61 }
 0xaa6   : > { %v5369_v6 = vmax.f32 %v5366_v2, 0.0 }
 0xaa8   : > { %v5370_v48 = vpack.c.bf16 %v5369_v6, %v5368_v23 }
 0xaaa   : > { %9137 = vmatmul.msk.bf16.vlgmr.msra.gmra.mxu3 %vm16818_vm7, %v5370_v48  ;;  %vm16828_vm7 = vmmov %vm16824_vm0 }
 0xb2d   : > { %v5403_v41 = vpop.f32.mrf.mxu3 }
 0xb2e   : > { %v5404_v1 = vadd.f32 %v11105_v35, %v5403_v41 }
 0xb35   : > { %v5405_v56 = vpop.f32.mrf.mxu3 }
 0xb36   : > { %v5406_v10 = vadd.f32 %v11105_v35, %v5405_v56 }
 0xb38   : > { %5454 = vmatpush.msra.mxu2 %v5406_v10 }
 0xb3a   : > { %5455 = vmatpush.msra.mxu2 %v5404_v1 }
 0xb3b   : > { %9138 = vmatmul.msk.f32.vlgmr.msra.gmra.mxu2 %vm16819_vm6, %v5408_v19  ;;  %vm16830_vm6 = vcmask 1046528  }
 0xb43   : > { %9139 = vmatmul.msk.f32.gmra.mxu2 %vm16820_vm12, %v5409_v52  ;;  %vm16831_vm12 = vmmov %vm16830_vm6 }
 0xb4b   : > { %9140 = vmatmul.msk.f32.gmra.mxu2 %vm16821_vm11, %v5410_v63  ;;  %vm16832_vm11 = vcmask 1040384  }
 0xb53   : > { %9141 = vmatmul.msk.f32.gmra.mxu2 %vm16822_vm9, %v5411_v33  ;;  %vm16833_vm9 = vmmov %vm16832_vm11 }
 0xb5b   : > { %9142 = vmatmul.msk.f32.gmra.mxu2 %vm16823_vm14, %v5412_v24  ;;  %vm16834_vm14 = vnez %v16638_v16 }
 0xb63   : > { %9143 = vmatmul.msk.f32.gmra.mxu2 %vm16824_vm0, %v5413_v44 }
 0xb6b   : > { %9144 = vmatmul.msk.f32.gmra.mxu2 %vm16825_vm2, %v5414_v21  ;;  %vm16835_vm2 = vmmov %vm16824_vm0 }
 0xb73   : > { %9145 = vmatmul.msk.f32.gmra.mxu2 %vm16826_vm4, %v5415_v45  ;;  %vm16836_vm4 = vmmov %vm16830_vm6 }
 0xbbe   : > { %v5457_v7 = vpop.f32.mrf.mxu2 }
 0xbc6   : > { %v5460_v26 = vpop.f32.mrf.mxu2 }
 0xbc7   : > { %v10339_v43 = vpack.i.bf16 %v5460_v26, %v5457_v7  ;;  %v9424_v7 = vld [vmem:[%s16829_s0 + $0x88] sm:$0xff]  ;;  %v9423_v26 = vld [vmem:[%s16829_s0 + $0x80] sm:$0xff] }
 0xbc8   : > { %6087 = vmatpush.bf16.msrb.mxu2 %v9424_v7 }
 0xbc9   : > { %10340 = vrot.lane.b32.xlu2 %v10339_v43, %s11158_s2 }
 0xbcc   : > { %6088 = vmatpush.bf16.msrb.mxu2 %v9423_v26 }
 0xbce   : > { %v5463_v27 = vpop.f32.mrf.mxu2 }
 0xbd6   : > { %v5466_v3 = vpop.f32.mrf.mxu2 }
 0xbd7   : > { %v10344_v59 = vpack.i.bf16 %v5466_v3, %v5463_v27 }
 0xbd9   : > { %10345 = vrot.lane.b32.xlu0 %v10344_v59, %s11158_s2 }
 0xbde   : > { %v5469_v4 = vpop.f32.mrf.mxu2 }
 0xbe6   : > { %v5472_v20 = vpop.f32.mrf.mxu2 }
 0xbe7   : > { %v10349_v14 = vpack.i.bf16 %v5472_v20, %v5469_v4 }
 0xbe9   : > { %10350 = vrot.lane.b32.xlu1 %v10349_v14, %s11158_s2 }
 0xbee   : > { %v5475_v58 = vpop.f32.mrf.mxu2 }
 0xbf6   : > { %v5478_v61 = vpop.f32.mrf.mxu2 }
 0xbf7   : > { %v10354_v25 = vpack.i.bf16 %v5478_v61, %v5475_v58 }
 0xbf9   : > { %10355 = vrot.lane.b32.xlu2 %v10354_v25, %s11158_s2 }
 0xc23   : > { %v10341_v30 = vpop.permute.xlu2 %10340 }
 0xc24   : > { %v10343_v2 = vunpack.i.h.bf16 %v10341_v30  ;;  %v10342_v23 = vunpack.i.l.bf16 %v10341_v30 }
 0xc26   : > { %v13944_v6 = vsel %vm16827_vm13, %v13594_v13, %v10343_v2  ;;  %v13948_v48 = vsel %vm16828_vm7, %v13599_v38, %v10342_v23  ;;  %vm16837_vm13 = vmmov %vm16836_vm4 }
 0xc27   : > { %v5529_v41 = vrot.slane %v13944_v6, 7  ;;  %v10359_v35 = vpack.i.bf16 %v13948_v48, %v16447_v11  ;;  %v5557_v56 = vrot.slane %v13948_v48, 1  ;;  %v5558_v10 = vrot.slane %v13944_v6, 1  ;;  %vm16838_vm7 = vmmov %vm16833_vm9 }
 0xc28   : > { %v5528_v1 = vrot.slane %v13948_v48, 7 }
 0xc29   : > { %10360 = vrot.lane.b32.xlu0 %v10359_v35, %s16131_s16  ;;  %v5559_v13 = vsel %vm16830_vm6, %v5557_v56, %v5558_v10  ;;  %v5580_v38 = vsel %vm16831_vm12, 0.0, %v5557_v56  ;;  %vm16839_vm6 = vmmov %vm16838_vm7  ;;  %vm16842_vm12 = vnez %v16648_v15 }
 0xc2a   : > { %v5581_v19 = vsel %vm13227_vm1, %v5580_v38, 0.0  ;;  %v5582_v52 = vsel %vm13231_vm5, %v5559_v13, 0.0  ;;  %v13964_v63 = vsel %vm16832_vm11, %v5528_v1, %v5529_v41  ;;  %v13967_v33 = vsel %vm16833_vm9, 0.0, %v5528_v1  ;;  %vm16845_vm9 = vmmov %vm16824_vm0 }
 0xc2b   : > { %v10364_v24 = vpack.i.bf16 %v5582_v52, %v5581_v19  ;;  %v5592_v44 = vsel %vm13235_vm10, %v13967_v33, 0.0  ;;  %v5593_v21 = vsel %vm16834_vm14, %v13964_v63, 0.0  ;;  %v5602_v30 = vsel %vm13227_vm1, %v5559_v13, 0.0 }
 0xc2c   : > { %v10369_v45 = vpack.i.bf16 %v5593_v21, %v5592_v44  ;;  %vm16844_vm11 = vnez %v16643_v39 }
 0xc2d   : > { %10365 = vrot.lane.b32.xlu1 %v10364_v24, %s16135_s22 }
 0xc2e   : > { %10370 = vrot.lane.b32.xlu2 %v10369_v45, %s16125_s1 }
 0xc4b   : > { %v10346_v43 = vpop.permute.xlu0 %10345 }
 0xc4c   : > { %v10348_v27 = vunpack.i.h.bf16 %v10346_v43  ;;  %v10347_v3 = vunpack.i.l.bf16 %v10346_v43 }
 0xc4e   : > { %v13981_v59 = vsel %vm16824_vm0, %v13583_v47, %v10348_v27  ;;  %v13985_v4 = vsel %vm16835_vm2, %v13590_v40, %v10347_v3  ;;  %v5612_v47 = vsel %vm13235_vm10, %v13964_v63, 0.0  ;;  %vm16840_vm10 = vcmask 261120   ;;  %vm16846_vm2 = vmmov %vm16836_vm4 }
 0xc4f   : > { %v5533_v20 = vrot.slane %v13981_v59, 7  ;;  %v5562_v14 = vrot.slane %v13981_v59, 1  ;;  %v5531_v58 = vrot.slane %v13985_v4, 7  ;;  %v5560_v61 = vrot.slane %v13985_v4, 1 }
 0xc50   : > { %v10374_v25 = vpack.i.bf16 %v13985_v4, %v13944_v6 }
 0xc51   : > { %v5561_v40 = vsel %vm16836_vm4, %v5558_v10, %v5560_v61  ;;  %v5563_v2 = vsel %vm16837_vm13, %v5560_v61, %v5562_v14  ;;  %v14001_v23 = vsel %vm16838_vm7, %v5529_v41, %v5531_v58  ;;  %v14004_v35 = vsel %vm16839_vm6, %v5531_v58, %v5533_v20  ;;  %vm16847_vm4 = vmmov %vm16846_vm2 }
 0xc52   : > { %10375 = vrot.lane.b32.xlu2 %v10374_v25, %s16125_s1  ;;  %v5620_v56 = vsel %vm13227_vm1, %v5561_v40, 0.0  ;;  %v5621_v1 = vsel %vm13231_vm5, %v5563_v2, 0.0  ;;  %v5603_v32 = vsel %vm13231_vm5, %v5561_v40, 0.0  ;;  %v5613_v10 = vsel %vm16834_vm14, %v14001_v23, 0.0  ;;  %vm16848_vm13 = vmmov %vm16839_vm6 }
 0xc53   : > { %v5853_v41 = vpack.c.bf16 %v5621_v1, %v5620_v56  ;;  %v10379_v13 = vpack.i.bf16 %v5603_v32, %v5602_v30  ;;  %v10389_v38 = vpack.i.bf16 %v5613_v10, %v5612_v47  ;;  %vm16841_vm1 = vnez %v16650_v50  ;;  %v10356_v30 = vpop.permute.xlu2 %10355  ;;  %vm16849_vm7 = vmmov %vm16839_vm6 }
 0xc54   : > { %v5594_v42 = vsel %vm16841_vm1, %v14001_v23, 0.0  ;;  %v5595_v28 = vsel %vm16842_vm12, %v14004_v35, 0.0  ;;  %vm16843_vm5 = vnez %v16645_v37  ;;  %v5584_v24 = vsel %vm16844_vm11, %v5563_v2, 0.0  ;;  %vm16850_vm6 = vmmov %vm16840_vm10 }
 0xc55   : > { %9218 = vmatmul.msk.bf16.vlgmr.msrb.gmra.mxu2 %vm16840_vm10, %v5853_v41  ;;  %10380 = vrot.lane.b32.xlu0 %v10379_v13, %s16131_s16  ;;  %v10399_v19 = vpack.i.bf16 %v5595_v28, %v5594_v42  ;;  %v5583_v52 = vsel %vm16843_vm5, %v5561_v40, 0.0  ;;  %v10357_v42 = vunpack.i.l.bf16 %v10356_v30  ;;  %vm16851_vm10 = vnez %v16661_v22  ;;  %v9414_v28 = vld [vmem:[%s16829_s0 + $0x38] sm:$0xff] }
 0xc56   : > { %10390 = vrot.lane.b32.xlu1 %v10389_v38, %s16135_s22  ;;  %v10394_v7 = vpack.i.bf16 %v5584_v24, %v5583_v52  ;;  %v10358_v38 = vunpack.i.h.bf16 %v10356_v30  ;;  %6023 = vmatpush.bf16.msrb.mxu3 %v9414_v28 }
 0xc5a   : > { %10400 = vrot.lane.b32.xlu2 %v10399_v19, %s16125_s1 }
 0xc5b   : > { %v10351_v44 = vpop.permute.xlu1 %10350 }
 0xc5c   : > { %v10353_v21 = vunpack.i.h.bf16 %v10351_v44  ;;  %v10352_v45 = vunpack.i.l.bf16 %v10351_v44 }
 0xc5d   : > { %10385 = vrot.lane.b32.xlu0 %v10374_v25, %s16131_s16 }
 0xc5e   : > { %v14033_v26 = vsel %vm16845_vm9, %v13575_v46, %v10353_v21  ;;  %v14037_v43 = vsel %vm16824_vm0, %v13579_v54, %v10352_v45  ;;  %10395 = vrot.lane.b32.xlu1 %v10394_v7, %s16135_s22  ;;  %v5604_v46 = vsel %vm16843_vm5, %v5563_v2, 0.0  ;;  %v5614_v54 = vsel %vm16841_vm1, %v14004_v35, 0.0  ;;  %v9413_v45 = vld [vmem:[%s16829_s0 + $0x30] sm:$0xff] }
 0xc5f   : > { %v5537_v27 = vrot.slane %v14033_v26, 7  ;;  %v5566_v3 = vrot.slane %v14033_v26, 1  ;;  %v5535_v58 = vrot.slane %v14037_v43, 7  ;;  %v5564_v61 = vrot.slane %v14037_v43, 1  ;;  %6024 = vmatpush.bf16.msrb.mxu3 %v9413_v45 }
 0xc60   : > { %v10404_v25 = vpack.i.bf16 %v14037_v43, %v13981_v59  ;;  %vm16854_vm9 = vnez %v16658_v18 }
 0xc61   : > { %v5565_v47 = vsel %vm16846_vm2, %v5562_v14, %v5564_v61  ;;  %v5567_v40 = vsel %vm16847_vm4, %v5564_v61, %v5566_v3  ;;  %v14054_v56 = vsel %vm16848_vm13, %v5533_v20, %v5535_v58  ;;  %v14057_v1 = vsel %vm16849_vm7, %v5535_v58, %v5537_v27  ;;  %v9412_v61 = vld [vmem:[%s16829_s0 + $0x28] sm:$0xff]  ;;  %vm16856_vm4 = vmmov %vm16849_vm7 }
 0xc62   : > { %10405 = vrot.lane.b32.xlu2 %v10404_v25, %s16125_s1  ;;  %v5622_v2 = vsel %vm16843_vm5, %v5565_v47, 0.0  ;;  %v5623_v32 = vsel %vm16844_vm11, %v5567_v40, 0.0  ;;  %v5605_v14 = vsel %vm16844_vm11, %v5565_v47, 0.0  ;;  %v5615_v20 = vsel %vm16842_vm12, %v14054_v56, 0.0  ;;  %vm16852_vm5 = vmmov %vm16824_vm0 }
 0xc63   : > { %v5856_v10 = vpack.c.bf16 %v5623_v32, %v5622_v2  ;;  %v10409_v41 = vpack.i.bf16 %v5605_v14, %v5604_v46  ;;  %v10419_v13 = vpack.i.bf16 %v5615_v20, %v5614_v54  ;;  %v5596_v37 = vsel %vm13377_vm15, %v14054_v56, 0.0  ;;  %vm16853_vm11 = vmmov %vm16824_vm0  ;;  %6025 = vmatpush.bf16.msrb.mxu3 %v9412_v61 }
 0xc64   : > { %v5597_v39 = vsel %vm16851_vm10, %v14057_v1, 0.0  ;;  %v14081_v19 = vsel %vm16852_vm5, %v13577_v0, %v10358_v38  ;;  %v14085_v52 = vsel %vm16853_vm11, %v13573_v17, %v10357_v42  ;;  %v5585_v44 = vsel %vm16854_vm9, %v5565_v47, 0.0  ;;  %vm16857_vm13 = vmmov %vm16846_vm2  ;;  %v9410_v38 = vld [vmem:[%s16829_s0 + $0x18] sm:$0xff] }
 0xc65   : > { %9219 = vmatmul.msk.bf16.gmra.mxu2 %vm16850_vm6, %v5856_v10  ;;  %10410 = vrot.lane.b32.xlu0 %v10409_v41, %s16131_s16  ;;  %v10429_v24 = vpack.i.bf16 %v5597_v39, %v5596_v37  ;;  %vm16855_vm0 = vnez %v16656_v49  ;;  %v5570_v7 = vrot.slane %v14081_v19, 1  ;;  %v5568_v0 = vrot.slane %v14085_v52, 1  ;;  %vm16858_vm7 = vmmov %vm16856_vm4  ;;  %v9409_v39 = vld [vmem:[%s16829_s0 + $0x10] sm:$0xff] }
 0xc66   : > { %10420 = vrot.lane.b32.xlu1 %v10419_v13, %s16135_s22  ;;  %v5586_v21 = vsel %vm16855_vm0, %v5567_v40, 0.0  ;;  %v5539_v58 = vrot.slane %v14085_v52, 7  ;;  %v5589_v30 = vrot.slane %v14081_v19, 7  ;;  %v10434_v2 = vpack.i.bf16 %v14085_v52, %v14033_v26 }
 0xc67   : > { %v10424_v17 = vpack.i.bf16 %v5586_v21, %v5585_v44  ;;  %v5569_v46 = vsel %vm16846_vm2, %v5566_v3, %v5568_v0  ;;  %v5571_v47 = vsel %vm16857_vm13, %v5568_v0, %v5570_v7  ;;  %v5616_v14 = vsel %vm13377_vm15, %v14057_v1, 0.0  ;;  %v9425_v0 = vld [vmem:[%s16860_s26] sm:$0xff]  ;;  %vm16864_vm13 = vmmov %vm16850_vm6  ;;  %s16889_s26 = sld [smem:[#allocation8_spill]] }
 0xc68   : > { %v14101_v54 = vsel %vm16856_vm4, %v5537_v27, %v5539_v58  ;;  %v5624_v32 = vsel %vm16854_vm9, %v5569_v46, 0.0  ;;  %v5607_v3 = vsel %vm16855_vm0, %v5569_v46, 0.0  ;;  %v9411_v27 = vld [vmem:[%s16829_s0 + $0x20] sm:$0xff]  ;;  %v5625_v18 = vsel %vm16855_vm0, %v5571_v47, 0.0  ;;  %6153 = vmatpush.bf16.msrb.mxu0 %v9425_v0  ;;  %v9417_v0 = vld [vmem:[%s16829_s0 + $0x50] sm:$0xff] }
 0xc69   : > { %v5617_v20 = vsel %vm16851_vm10, %v14101_v54, 0.0  ;;  %v5590_v13 = vsel %vm16858_vm7, %v5539_v58, %v5589_v30  ;;  %6026 = vmatpush.bf16.msrb.mxu3 %v9411_v27  ;;  %vm16859_vm5 = vnez %v16675_v55  ;;  %vm16861_vm11 = vnez %v16671_v53  ;;  %v9408_v58 = vld [vmem:[%s16829_s0 + $0x8] sm:$0xff]  ;;  %vm16865_vm7 = vmmov %vm16850_vm6 }
 0xc6a   : > { %10430 = vrot.lane.b32.xlu2 %v10429_v24, %s16125_s1  ;;  %v10449_v41 = vpack.i.bf16 %v5617_v20, %v5616_v14  ;;  %v5598_v42 = vsel %vm16859_vm5, %v14101_v54, 0.0  ;;  %v5599_v49 = vsel %vm16861_vm11, %v5590_v13, 0.0  ;;  %vm16863_vm0 = vnez %v16669_v36  ;;  %v9422_v36 = vld [vmem:[%s16829_s0 + $0x78] sm:$0xff]  ;;  %v9420_v27 = vld [vmem:[%s16829_s0 + $0x68] sm:$0xff] }
 0xc6b   : > { %v10459_v37 = vpack.i.bf16 %v5599_v49, %v5598_v42  ;;  %v5588_v24 = vsel %vm16863_vm0, %v5571_v47, 0.0  ;;  %v5601_v21 = vsel %vm16846_vm2, %v5570_v7, 0.0  ;;  %v5611_v45 = vsel %vm16856_vm4, %v5589_v30, 0.0  ;;  %6052 = vmatpush.bf16.msra.mxu1 %v9422_v36  ;;  %vm16869_vm2 = vmmov %vm16850_vm6 }
 0xc6c   : > { %v5618_v7 = vsel %vm16859_vm5, %v5590_v13, 0.0  ;;  %v5619_v30 = vsel %vm16861_vm11, %v5611_v45, 0.0  ;;  %v9418_v13 = vld [vmem:[%s16829_s0 + $0x58] sm:$0xff] }
 0xc6d   : > { %10415 = vrot.lane.b32.xlu0 %v10404_v25, %s16131_s16  ;;  %v5606_v25 = vsel %vm16854_vm9, %v5567_v40, 0.0  ;;  %v5859_v40 = vpack.c.bf16 %v5625_v18, %v5624_v32  ;;  %6027 = vmatpush.bf16.msrb.mxu3 %v9410_v38  ;;  %vm16862_vm9 = vnez %v16673_v31  ;;  %v10469_v31 = vpack.i.bf16 %v5619_v30, %v5618_v7 }
 0xc6e   : > { %10425 = vrot.lane.b32.xlu1 %v10424_v17, %s16135_s22  ;;  %v10439_v10 = vpack.i.bf16 %v5607_v3, %v5606_v25  ;;  %v5587_v28 = vsel %vm16862_vm9, %v5569_v46, 0.0  ;;  %v10474_v17 = vpack.i.bf16 0.0, %v14081_v19  ;;  %v5626_v61 = vsel %vm16862_vm9, %v5601_v21, 0.0  ;;  %v9421_v3 = vld [vmem:[%s16829_s0 + $0x70] sm:$0xff] }
 0xc6f   : > { %v10454_v44 = vpack.i.bf16 %v5588_v24, %v5587_v28  ;;  %v5608_v46 = vsel %vm16862_vm9, %v5571_v47, 0.0  ;;  %v5862_v32 = vpack.c.bf16 0.0, %v5626_v61  ;;  %v9407_v47 = vld [vmem:[%s16829_s0] sm:$0xff]  ;;  %6053 = vmatpush.bf16.msra.mxu1 %v9421_v3  ;;  %v5549_v38 = vsel %vm16834_vm14, %v13967_v33, 0.0  ;;  %vm16868_vm14 = vmmov %vm16850_vm6 }
 0xc70   : > { %vm16866_vm9 = vcmask 523264  }
 0xc71   : > { %6028 = vmatpush.bf16.msrb.mxu3 %v9409_v39 }
 0xc72   : > { %10435 = vrot.lane.b32.xlu2 %v10434_v2, %s16125_s1 }
 0xc73   : > { %6054 = vmatpush.bf16.msra.mxu1 %v9420_v27 }
 0xc75   : > { %9220 = vmatmul.msk.bf16.gmra.mxu2 %vm16850_vm6, %v5859_v40  ;;  %10440 = vrot.lane.b32.xlu0 %v10439_v10, %s16131_s16  ;;  %v9419_v40 = vld [vmem:[%s16829_s0 + $0x60] sm:$0xff] }
 0xc76   : > { %10450 = vrot.lane.b32.xlu1 %v10449_v41, %s16135_s22  ;;  %6029 = vmatpush.bf16.msrb.mxu3 %v9408_v58  ;;  %v9416_v58 = vld [vmem:[%s16829_s0 + $0x48] sm:$0xff] }
 0xc77   : > { %6055 = vmatpush.bf16.msra.mxu1 %v9419_v40 }
 0xc7a   : > { %10460 = vrot.lane.b32.xlu2 %v10459_v37, %s16125_s1  ;;  %6030 = vmatpush.bf16.msrb.mxu3 %v9407_v47 }
 0xc7b   : > { %6056 = vmatpush.bf16.msra.mxu1 %v9418_v13 }
 0xc7d   : > { %10445 = vrot.lane.b32.xlu0 %v10434_v2, %s16131_s16  ;;  %v5609_v2 = vsel %vm16863_vm0, %v5601_v21, 0.0  ;;  %vm16867_vm0 = vmmov %vm16866_vm9 }
 0xc7e   : > { %10455 = vrot.lane.b32.xlu1 %v10454_v44, %s16135_s22  ;;  %v10464_v25 = vpack.i.bf16 %v5609_v2, %v5608_v46  ;;  %vm16870_vm4 = vmmov %vm16867_vm0 }
 0xc7f   : > { %6057 = vmatpush.bf16.msra.mxu1 %v9417_v0 }
 0xc82   : > { %10475 = vrot.lane.b32.xlu2 %v10474_v17, %s16125_s1  ;;  %v9415_v17 = vld [vmem:[%s16829_s0 + $0x40] sm:$0xff]  ;;  %s17036_s0 = smov 64  }
 0xc83   : > { %6058 = vmatpush.bf16.msra.mxu1 %v9416_v58 }
 0xc85   : > { %9221 = vmatmul.msk.bf16.gmra.mxu2 %vm16864_vm13, %v5862_v32  ;;  %10465 = vrot.lane.b32.xlu0 %v10464_v25, %s16131_s16  ;;  %vm16871_vm13 = vmmov %vm16867_vm0 }
 0xc86   : > { %10470 = vrot.lane.b32.xlu1 %v10469_v31, %s16135_s22 }
 0xc87   : > { %6059 = vmatpush.bf16.msra.mxu1 %v9415_v17 }
 0xc88   : > { %v10371_v10 = vpop.permute.xlu2 %10370 }
 0xc89   : > { %v10373_v37 = vunpack.i.h.bf16 %v10371_v10  ;;  %v10372_v39 = vunpack.i.l.bf16 %v10371_v10 }
 0xc9b   : > { %v14164_v14 = vpop.permute.xlu0 %10360 }
 0xc9c   : > { %v10363_v20 = vunpack.i.h.bf16 %v14164_v14  ;;  %v10362_v18 = vunpack.i.l.bf16 %v14164_v14 }
 0xc9e   : > { %v5804_v28 = vsel %vm16865_vm7, %v5549_v38, %v10363_v20  ;;  %v5803_v24 = vsel %vm16850_vm6, 0.0, %v10362_v18  ;;  %vm16872_vm7 = vmmov %vm16869_vm2 }
 0xc9f   : > { %v10366_v41 = vpop.permute.xlu1 %10365  ;;  %vm16873_vm6 = vmmov %vm16869_vm2 }
 0xca0   : > { %v10368_v42 = vunpack.i.h.bf16 %v10366_v41  ;;  %v10367_v49 = vunpack.i.l.bf16 %v10366_v41 }
 0xca2   : > { %v5812_v44 = vsel %vm16866_vm9, %v5804_v28, %v10368_v42  ;;  %v5811_v21 = vsel %vm16867_vm0, %v5803_v24, %v10367_v49  ;;  %vm16874_vm9 = vmmov %vm16867_vm0 }
 0xca3   : > { %v5819_v45 = vsel %vm4382_vm8, %v5811_v21, %v10372_v39  ;;  %v5820_v16 = vsel %vm4382_vm8, %v5812_v44, %v10373_v37 }
 0xca4   : > { %v5851_v33 = vpack.c.bf16 %v5820_v16, %v5819_v45 }
 0xca6   : > { %6031 = vmatmul.bf16.vlgmr.msrb.gmra.mxu3 %v5851_v33 }
 0xcac   : > { %v10376_v61 = vpop.permute.xlu2 %10375 }
 0xcad   : > { %v10378_v47 = vunpack.i.h.bf16 %v10376_v61  ;;  %v10377_v36 = vunpack.i.l.bf16 %v10376_v61 }
 0xcb4   : > { %v10401_v46 = vpop.permute.xlu2 %10400 }
 0xcb5   : > { %v10403_v44 = vunpack.i.h.bf16 %v10401_v46  ;;  %v10402_v21 = vunpack.i.l.bf16 %v10401_v46 }
 0xcbc   : > { %v10406_v38 = vpop.permute.xlu2 %10405 }
 0xcc7   : > { %v10381_v2 = vpop.permute.xlu0 %10380 }
 0xcc8   : > { %v10383_v7 = vunpack.i.h.bf16 %v10381_v2  ;;  %v10382_v30 = vunpack.i.l.bf16 %v10381_v2  ;;  %v10391_v32 = vpop.permute.xlu1 %10390  ;;  %v10431_v2 = vpop.permute.xlu2 %10430 }
 0xcc9   : > { %v10393_v25 = vunpack.i.h.bf16 %v10391_v32  ;;  %v10392_v31 = vunpack.i.l.bf16 %v10391_v32  ;;  %v10407_v32 = vunpack.i.l.bf16 %v10406_v38 }
 0xcca   : > { %v5828_v3 = vsel %vm16868_vm14, %v13944_v6, %v10383_v7  ;;  %v5827_v27 = vsel %vm16869_vm2, %v13948_v48, %v10382_v30  ;;  %v5550_v6 = vsel %vm16841_vm1, %v13964_v63, 0.0  ;;  %v5551_v48 = vsel %vm16842_vm12, %v14001_v23, 0.0  ;;  %vm16875_vm1 = vmmov %vm16869_vm2 }
 0xccb   : > { %v5836_v20 = vsel %vm16870_vm4, %v5828_v3, %v10393_v25  ;;  %v5835_v40 = vsel %vm16871_vm13, %v5827_v27, %v10392_v31  ;;  %v10408_v30 = vunpack.i.h.bf16 %v10406_v38  ;;  %vm16876_vm12 = vmmov %vm16875_vm1 }
 0xccc   : > { %v5843_v10 = vsel %vm4382_vm8, %v5835_v40, %v10377_v36  ;;  %v5844_v41 = vsel %vm4382_vm8, %v5836_v20, %v10378_v47  ;;  %vm16877_vm14 = vmmov %vm16867_vm0 }
 0xccd   : > { %v5852_v13 = vpack.c.bf16 %v5844_v41, %v5843_v10  ;;  %vm16878_vm2 = vmmov %vm16867_vm0 }
 0xcce   : > { %vm16879_vm4 = vmmov %vm16875_vm1 }
 0xccf   : > { %v10386_v42 = vpop.permute.xlu0 %10385  ;;  %6060 = vmatmul.bf16.vlgmr.msra.gmra.mxu1 %v5852_v13  ;;  %vm16880_vm13 = vmmov %vm16875_vm1 }
 0xcd0   : > { %v10388_v49 = vunpack.i.h.bf16 %v10386_v42  ;;  %v10387_v37 = vunpack.i.l.bf16 %v10386_v42  ;;  %v10396_v39 = vpop.permute.xlu1 %10395 }
 0xcd1   : > { %v10398_v28 = vunpack.i.h.bf16 %v10396_v39  ;;  %v10397_v24 = vunpack.i.l.bf16 %v10396_v39 }
 0xcd2   : > { %v5805_v45 = vsel %vm16872_vm7, %v5550_v6, %v10387_v37  ;;  %v5806_v16 = vsel %vm16873_vm6, %v5551_v48, %v10388_v49  ;;  %v10433_v49 = vunpack.i.h.bf16 %v10431_v2  ;;  %v10432_v37 = vunpack.i.l.bf16 %v10431_v2  ;;  %v10436_v48 = vpop.permute.xlu2 %10435  ;;  %vm16881_vm7 = vmmov %vm16867_vm0 }
 0xcd3   : > { %v5814_v33 = vsel %vm16874_vm9, %v5806_v16, %v10398_v28  ;;  %v5813_v0 = vsel %vm16867_vm0, %v5805_v45, %v10397_v24  ;;  %vm16882_vm6 = vmmov %vm16867_vm0 }
 0xcd4   : > { %v5821_v58 = vsel %vm4382_vm8, %v5813_v0, %v10402_v21  ;;  %v5822_v50 = vsel %vm4382_vm8, %v5814_v33, %v10403_v44  ;;  %v10438_v0 = vunpack.i.h.bf16 %v10436_v48  ;;  %vm16885_vm9 = vmmov %vm16867_vm0 }
 0xcd5   : > { %v5854_v63 = vpack.c.bf16 %v5822_v50, %v5821_v58  ;;  %v10437_v58 = vunpack.i.l.bf16 %v10436_v48 }
 0xcd7   : > { %v10411_v17 = vpop.permute.xlu0 %10410  ;;  %6036 = vmatmul.bf16.gmra.mxu3 %v5854_v63 }
 0xcd8   : > { %v10413_v15 = vunpack.i.h.bf16 %v10411_v17  ;;  %v10412_v23 = vunpack.i.l.bf16 %v10411_v17  ;;  %v10421_v61 = vpop.permute.xlu1 %10420 }
 0xcd9   : > { %v10423_v46 = vunpack.i.h.bf16 %v10421_v61  ;;  %v10422_v7 = vunpack.i.l.bf16 %v10421_v61 }
 0xcda   : > { %v5830_v25 = vsel %vm16875_vm1, %v13981_v59, %v10413_v15  ;;  %v5829_v31 = vsel %vm16876_vm12, %v13985_v4, %v10412_v23  ;;  %v5552_v59 = vsel %vm13377_vm15, %v14004_v35, 0.0  ;;  %v5553_v4 = vsel %vm16851_vm10, %v14054_v56, 0.0  ;;  %vm16883_vm15 = vmmov %vm16875_vm1  ;;  %v10461_v2 = vpop.permute.xlu2 %10460 }
 0xcdb   : > { %v5837_v47 = vsel %vm16877_vm14, %v5829_v31, %v10422_v7  ;;  %v5838_v36 = vsel %vm16878_vm2, %v5830_v25, %v10423_v46  ;;  %vm16884_vm10 = vmmov %vm16875_vm1 }
 0xcdc   : > { %v5845_v3 = vsel %vm4382_vm8, %v5837_v47, %v10407_v32  ;;  %v5846_v27 = vsel %vm4382_vm8, %v5838_v36, %v10408_v30  ;;  %v10463_v36 = vunpack.i.h.bf16 %v10461_v2  ;;  %vm16886_vm12 = vmmov %vm16875_vm1 }
 0xcdd   : > { %v5855_v20 = vpack.c.bf16 %v5846_v27, %v5845_v3  ;;  %v10462_v3 = vunpack.i.l.bf16 %v10461_v2  ;;  %vm16887_vm14 = vmmov %vm16867_vm0 }
 0xcde   : > { %vm16888_vm2 = vmmov %vm16867_vm0 }
 0xcdf   : > { %v10416_v40 = vpop.permute.xlu0 %10415  ;;  %6065 = vmatmul.bf16.gmra.mxu1 %v5855_v20 }
 0xce0   : > { %v10418_v10 = vunpack.i.h.bf16 %v10416_v40  ;;  %v10417_v41 = vunpack.i.l.bf16 %v10416_v40  ;;  %v10426_v13 = vpop.permute.xlu1 %10425 }
 0xce1   : > { %v10428_v38 = vunpack.i.h.bf16 %v10426_v13  ;;  %v10427_v42 = vunpack.i.l.bf16 %v10426_v13 }
 0xce2   : > { %v5807_v39 = vsel %vm16879_vm4, %v5552_v59, %v10417_v41  ;;  %v5808_v6 = vsel %vm16880_vm13, %v5553_v4, %v10418_v10  ;;  %v14244_v13 = vpop.permute.xlu2 %10475  ;;  %vm16892_vm4 = vmmov %vm16867_vm0 }
 0xce3   : > { %v5815_v28 = vsel %vm16881_vm7, %v5807_v39, %v10427_v42  ;;  %v5816_v24 = vsel %vm16882_vm6, %v5808_v6, %v10428_v38  ;;  %vm16893_vm13 = vmmov %vm16867_vm0  ;;  %vm16894_vm7 = vcmask 130048  }
 0xce4   : > { %v5823_v12 = vsel %vm4382_vm8, %v5815_v28, %v10432_v37  ;;  %v5824_v35 = vsel %vm4382_vm8, %v5816_v24, %v10433_v49  ;;  %v16138_v49 = vunpack.i.h.bf16 %v14244_v13  ;;  %v10477_v37 = vunpack.i.l.bf16 %v14244_v13  ;;  %vm16895_vm6 = vmmov %vm16894_vm7 }
 0xce5   : > { %v5857_v44 = vpack.c.bf16 %v5824_v35, %v5823_v12 }
 0xce7   : > { %6041 = vmatmul.bf16.gmra.mxu3 %v5857_v44  ;;  %v10441_v22 = vpop.permute.xlu0 %10440  ;;  %v6090_v44 = vpop.f32.mrf.mxu2 }
 0xce8   : > { %v10443_v56 = vunpack.i.h.bf16 %v10441_v22  ;;  %v10442_v21 = vunpack.i.l.bf16 %v10441_v22  ;;  %v10451_v45 = vpop.permute.xlu1 %10450 }
 0xce9   : > { %v10453_v16 = vunpack.i.h.bf16 %v10451_v45  ;;  %v10452_v33 = vunpack.i.l.bf16 %v10451_v45 }
 0xcea   : > { %v5832_v50 = vsel %vm16883_vm15, %v14033_v26, %v10443_v56  ;;  %v5831_v63 = vsel %vm16884_vm10, %v14037_v43, %v10442_v21  ;;  %v5554_v26 = vsel %vm16859_vm5, %v14057_v1, 0.0  ;;  %v5555_v43 = vsel %vm16861_vm11, %v14101_v54, 0.0  ;;  %vm16890_vm5 = vmmov %vm16875_vm1  ;;  %v11106_v21 = vld [vmem:[%s16889_s26] ss:$0 sm:$0xff]  ;;  %s16897_s26 = sld [smem:[#allocation10_spill]] }
 0xceb   : > { %v5839_v17 = vsel %vm16885_vm9, %v5831_v63, %v10452_v33  ;;  %v5840_v15 = vsel %vm16867_vm0, %v5832_v50, %v10453_v16  ;;  %vm16891_vm11 = vmmov %vm16875_vm1 }
 0xcec   : > { %v5847_v23 = vsel %vm4382_vm8, %v5839_v17, %v10437_v58  ;;  %v5848_v61 = vsel %vm4382_vm8, %v5840_v15, %v10438_v0  ;;  %vm16896_vm15 = vmmov %vm16895_vm6 }
 0xced   : > { %v5858_v46 = vpack.c.bf16 %v5848_v61, %v5847_v23  ;;  %vm16898_vm10 = vmmov %vm16895_vm6 }
 0xcee   : > { %vm16899_vm9 = vmmov %vm16867_vm0 }
 0xcef   : > { %v10446_v7 = vpop.permute.xlu0 %10445  ;;  %6070 = vmatmul.bf16.gmra.mxu1 %v5858_v46  ;;  %v6092_v56 = vpop.f32.mrf.mxu2 }
 0xcf0   : > { %v10448_v30 = vunpack.i.h.bf16 %v10446_v7  ;;  %v10447_v32 = vunpack.i.l.bf16 %v10446_v7  ;;  %v10456_v25 = vpop.permute.xlu1 %10455 }
 0xcf1   : > { %v10458_v31 = vunpack.i.h.bf16 %v10456_v25  ;;  %v10457_v47 = vunpack.i.l.bf16 %v10456_v25 }
 0xcf2   : > { %v5809_v27 = vsel %vm16875_vm1, %v5554_v26, %v10447_v32  ;;  %v5810_v20 = vsel %vm16886_vm12, %v5555_v43, %v10448_v30  ;;  %vm16900_vm1 = vmmov %vm16867_vm0 }
 0xcf3   : > { %v5817_v40 = vsel %vm16887_vm14, %v5809_v27, %v10457_v47  ;;  %v5818_v10 = vsel %vm16888_vm2, %v5810_v20, %v10458_v31  ;;  %vm16901_vm12 = vmmov %vm16867_vm0 }
 0xcf4   : > { %v5825_v41 = vsel %vm4382_vm8, %v5817_v40, %v10462_v3  ;;  %v5826_v55 = vsel %vm4382_vm8, %v5818_v10, %v10463_v36  ;;  %vm16902_vm14 = vmmov %vm16867_vm0 }
 0xcf5   : > { %v5860_v1 = vpack.c.bf16 %v5826_v55, %v5825_v41  ;;  %vm16903_vm2 = vmmov %vm16867_vm0 }
 0xcf7   : > { %v10466_v53 = vpop.permute.xlu0 %10465  ;;  %6046 = vmatmul.bf16.gmra.mxu3 %v5860_v1  ;;  %v6095_v0 = vpop.f32.mrf.mxu2 }
 0xcf8   : > { %v10468_v54 = vunpack.i.h.bf16 %v10466_v53  ;;  %v10467_v59 = vunpack.i.l.bf16 %v10466_v53  ;;  %v10471_v4 = vpop.permute.xlu1 %10470 }
 0xcf9   : > { %v10473_v38 = vunpack.i.h.bf16 %v10471_v4  ;;  %v10472_v42 = vunpack.i.l.bf16 %v10471_v4 }
 0xcfa   : > { %v5834_v39 = vsel %vm16890_vm5, %v14081_v19, %v10468_v54  ;;  %v5833_v6 = vsel %vm16891_vm11, %v14085_v52, %v10467_v59  ;;  %vm16904_vm5 = vmmov %vm16867_vm0 }
 0xcfb   : > { %v5842_v48 = vsel %vm16892_vm4, %v5834_v39, %v10473_v38  ;;  %v5841_v28 = vsel %vm16893_vm13, %v5833_v6, %v10472_v42  ;;  %vm16905_vm11 = vmmov %vm16867_vm0 }
 0xcfc   : > { %v5849_v24 = vsel %vm4382_vm8, %v5841_v28, %v10477_v37  ;;  %v5850_v12 = vsel %vm4382_vm8, %v5842_v48, %v16138_v49  ;;  %vm16906_vm4 = vmmov %vm16867_vm0 }
 0xcfd   : > { %v5861_v35 = vpack.c.bf16 %v5850_v12, %v5849_v24  ;;  %vm16907_vm13 = vmmov %vm16867_vm0 }
 0xcff   : > { %6075 = vmatmul.bf16.gmra.mxu1 %v5861_v35  ;;  %v6097_v30 = vpop.f32.mrf.mxu2 }
 0xd07   : > { %v6100_v3 = vpop.f32.mrf.mxu2 }
 0xd0f   : > { %v6102_v53 = vpop.f32.mrf.mxu2 }
 0xd17   : > { %v6105_v24 = vpop.f32.mrf.mxu2 }
 0xd29   : > { %v6032_v22 = vpop.f32.mrf.mxu3 }
 0xd2a   : > { %v6033_v45 = vadd.f32 %v11106_v21, %v6032_v22 }
 0xd31   : > { %v6034_v16 = vpop.f32.mrf.mxu3 }
 0xd32   : > { %v6035_v33 = vadd.f32 %v11106_v21, %v6034_v16 }
 0xd4c   : > { %v6061_v19 = vpop.f32.mrf.mxu1 }
 0xd4d   : > { %v6062_v52 = vadd.f32 %v6061_v19, %v6033_v45 }
 0xd4f   : > { %v6091_v50 = vadd.f32 %v6090_v44, %v6062_v52  ;;  %v6107_v52 = vpop.f32.mrf.mxu2 }
 0xd51   : > { %v6110_v15 = vmax.f32 %v6091_v50, 0.0 }
 0xd54   : > { %v6063_v58 = vpop.f32.mrf.mxu1 }
 0xd55   : > { %v6064_v63 = vadd.f32 %v6063_v58, %v6035_v33 }
 0xd57   : > { %v6093_v17 = vadd.f32 %v6092_v56, %v6064_v63 }
 0xd59   : > { %v6111_v23 = vmax.f32 %v6093_v17, 0.0 }
 0xd5a   : > { %v6037_v61 = vpop.f32.mrf.mxu3 }
 0xd5b   : > { %v6118_v2 = vpack.c.bf16 %v6111_v23, %v6110_v15  ;;  %v6038_v7 = vadd.f32 %v11106_v21, %v6037_v61 }
 0xd5c   : > { %v6066_v46 = vpop.f32.mrf.mxu1 }
 0xd5d   : > { %9226 = vmatmul.msk.bf16.vlgmr.msrb.gmra.mxu0 %vm16894_vm7, %v6118_v2  ;;  %v6067_v32 = vadd.f32 %v6066_v46, %v6038_v7  ;;  %v11107_v7 = vld [vmem:[%s16897_s26] ss:$0 sm:$0xff]  ;;  %vm16908_vm7 = vmmov %vm16867_vm0  ;;  %s16923_s26 = sld [smem:[#allocation11_spill]] }
 0xd5f   : > { %v6096_v31 = vadd.f32 %v6095_v0, %v6067_v32 }
 0xd61   : > { %v6112_v27 = vmax.f32 %v6096_v31, 0.0 }
 0xd62   : > { %v6039_v25 = vpop.f32.mrf.mxu3 }
 0xd63   : > { %v6040_v26 = vadd.f32 %v11106_v21, %v6039_v25 }
 0xd64   : > { %v6068_v43 = vpop.f32.mrf.mxu1 }
 0xd65   : > { %v6069_v47 = vadd.f32 %v6068_v43, %v6040_v26 }
 0xd67   : > { %v6098_v36 = vadd.f32 %v6097_v30, %v6069_v47 }
 0xd69   : > { %v6113_v20 = vmax.f32 %v6098_v36, 0.0 }
 0xd6a   : > { %v6042_v40 = vpop.f32.mrf.mxu3 }
 0xd6b   : > { %v6119_v10 = vpack.c.bf16 %v6113_v20, %v6112_v27  ;;  %v6043_v55 = vadd.f32 %v11106_v21, %v6042_v40  ;;  %v6176_v27 = vld [vmem:[%s11315_s24 + $0x8] sm:$0xff]  ;;  %v6177_v20 = vld [vmem:[%s11315_s24 + $0x10] sm:$0xff]  ;;  %v6178_v40 = vld [vmem:[%s11315_s24 + $0x18] sm:$0xff] }
 0xd6c   : > { %v6071_v41 = vpop.f32.mrf.mxu1 }
 0xd6d   : > { %9227 = vmatmul.msk.bf16.gmra.mxu0 %vm16895_vm6, %v6119_v10  ;;  %v6072_v1 = vadd.f32 %v6071_v41, %v6043_v55  ;;  %v6179_v10 = vld [vmem:[%s11315_s24 + $0x20] sm:$0xff]  ;;  %v6180_v41 = vld [vmem:[%s11315_s24 + $0x28] sm:$0xff]  ;;  %v6181_v55 = vld [vmem:[%s11315_s24 + $0x30] sm:$0xff] }
 0xd6e   : > { %vm16909_vm6 = vmmov %vm16867_vm0 }
 0xd6f   : > { %v6101_v38 = vadd.f32 %v6100_v3, %v6072_v1  ;;  %v6175_v3 = vld [vmem:[%s11315_s24] sm:$0xff]  ;;  %v6182_v1 = vld [vmem:[%s11315_s24 + $0x38] sm:$0xff] }
 0xd71   : > { %v6114_v39 = vmax.f32 %v6101_v38, 0.0  ;;  %v6187_v38 = vld [vmem:[%s11315_s24 + $0x60] sm:$0xff] }
 0xd72   : > { %v6044_v54 = vpop.f32.mrf.mxu3 }
 0xd73   : > { %v6045_v59 = vadd.f32 %v11106_v21, %v6044_v54  ;;  %v6184_v54 = vld [vmem:[%s11315_s24 + $0x48] sm:$0xff] }
 0xd74   : > { %v6073_v4 = vpop.f32.mrf.mxu1 }
 0xd75   : > { %v6074_v42 = vadd.f32 %v6073_v4, %v6045_v59  ;;  %v6185_v59 = vld [vmem:[%s11315_s24 + $0x50] sm:$0xff]  ;;  %v6186_v4 = vld [vmem:[%s11315_s24 + $0x58] sm:$0xff] }
 0xd77   : > { %v6103_v37 = vadd.f32 %v6102_v53, %v6074_v42  ;;  %v6183_v53 = vld [vmem:[%s11315_s24 + $0x40] sm:$0xff]  ;;  %v6188_v42 = vld [vmem:[%s11315_s24 + $0x68] sm:$0xff] }
 0xd79   : > { %v6115_v6 = vmax.f32 %v6103_v37, 0.0  ;;  %v6189_v37 = vld [vmem:[%s11315_s24 + $0x70] sm:$0xff] }
 0xd7a   : > { %v6047_v48 = vpop.f32.mrf.mxu3 }
 0xd7b   : > { %v6120_v28 = vpack.c.bf16 %v6115_v6, %v6114_v39  ;;  %v6048_v35 = vadd.f32 %v11106_v21, %v6047_v48  ;;  %v6190_v39 = vld [vmem:[%s11315_s24 + $0x78] sm:$0xff]  ;;  %v6191_v6 = vld [vmem:[%s11315_s24 + $0x80] sm:$0xff] }
 0xd7c   : > { %v6076_v12 = vpop.f32.mrf.mxu1 }
 0xd7d   : > { %9228 = vmatmul.msk.bf16.gmra.mxu0 %vm16896_vm15, %v6120_v28  ;;  %v6077_v44 = vadd.f32 %v6076_v12, %v6048_v35  ;;  %vm16910_vm15 = vmmov %vm16867_vm0  ;;  %v6192_v28 = vld [vmem:[%s11315_s24 + $0x88] sm:$0xff]  ;;  %v6193_v35 = vld [vmem:[%s11315_s24 + $0x90] sm:$0xff] }
 0xd7f   : > { %v6106_v45 = vadd.f32 %v6105_v24, %v6077_v44 }
 0xd81   : > { %v6116_v0 = vmax.f32 %v6106_v45, 0.0  ;;  %v6195_v45 = vld [vmem:[%s11315_s24 + $0xa0] sm:$0xff] }
 0xd82   : > { %v6049_v22 = vpop.f32.mrf.mxu3 }
 0xd83   : > { %v6050_v56 = vadd.f32 %v11106_v21, %v6049_v22  ;;  %v6194_v22 = vld [vmem:[%s11315_s24 + $0x98] sm:$0xff] }
 0xd84   : > { %v6078_v19 = vpop.f32.mrf.mxu1 }
 0xd85   : > { %v6079_v16 = vadd.f32 %v6078_v19, %v6050_v56 }
 0xd87   : > { %v6108_v33 = vadd.f32 %v6107_v52, %v6079_v16  ;;  %v6196_v52 = vld [vmem:[%s11315_s24 + $0xa8] sm:$0xff] }
 0xd89   : > { %v6117_v58 = vmax.f32 %v6108_v33, 0.0 }
 0xd8b   : > { %v6121_v50 = vpack.c.bf16 %v6117_v58, %v6116_v0  ;;  %v6197_v58 = vld [vmem:[%s11315_s24 + $0xb0] sm:$0xff] }
 0xd8d   : > { %9229 = vmatmul.msk.bf16.gmra.mxu0 %vm16898_vm10, %v6121_v50  ;;  %vm16911_vm10 = vmmov %vm16867_vm0 }
 0xdda   : > { %v6155_v63 = vpop.f32.mrf.mxu0 }
 0xddb   : > { %v6156_v36 = vadd.f32 %v11107_v7, %v6155_v63  ;;  %v6198_v63 = vld [vmem:[%s11315_s24 + $0xb8] sm:$0xff] }
 0xde2   : > { %v6157_v17 = vpop.f32.mrf.mxu0 }
 0xde3   : > { %v6158_v47 = vadd.f32 %v11107_v7, %v6157_v17 }
 0xdea   : > { %v6160_v15 = vpop.f32.mrf.mxu0 }
 0xdeb   : > { %v6161_v31 = vadd.f32 %v11107_v7, %v6160_v15 }
 0xdf2   : > { %v6162_v23 = vpop.f32.mrf.mxu0 }
 0xdf3   : > { %v6163_v43 = vadd.f32 %v11107_v7, %v6162_v23  ;;  %v6199_v23 = vld [vmem:[%s11315_s24 + $0xc0] sm:$0xff] }
 0xdfa   : > { %v6165_v61 = vpop.f32.mrf.mxu0 }
 0xdfb   : > { %v6166_v26 = vadd.f32 %v11107_v7, %v6165_v61 }
 0xe02   : > { %v6167_v2 = vpop.f32.mrf.mxu0 }
 0xe03   : > { %v6168_v25 = vadd.f32 %v11107_v7, %v6167_v2  ;;  %v6200_v2 = vld [vmem:[%s11315_s24 + $0xc8] sm:$0xff] }
 0xe0a   : > { %v6170_v46 = vpop.f32.mrf.mxu0 }
 0xe0b   : > { %v6171_v32 = vadd.f32 %v11107_v7, %v6170_v46 }
 0xe12   : > { %v6172_v21 = vpop.f32.mrf.mxu0 }
 0xe13   : > { %v6173_v30 = vadd.f32 %v11107_v7, %v6172_v21  ;;  %v6201_v21 = vld [vmem:[%s11315_s24 + $0xd0] sm:$0xff] }
 0xe15   : > { %6311 = vmatpush.msra.mxu3 %v6173_v30 }
 0xe17   : > { %6312 = vmatpush.msra.mxu3 %v6171_v32 }
 0xe19   : > { %6313 = vmatpush.msra.mxu3 %v6168_v25 }
 0xe1b   : > { %6314 = vmatpush.msra.mxu3 %v6166_v26 }
 0xe1d   : > { %6315 = vmatpush.msra.mxu3 %v6163_v43  ;;  %v6202_v43 = vld [vmem:[%s11315_s24 + $0xd8] sm:$0xff] }
 0xe1f   : > { %6316 = vmatpush.msra.mxu3 %v6161_v31 }
 0xe21   : > { %6317 = vmatpush.msra.mxu3 %v6158_v47 }
 0xe23   : > { %6318 = vmatpush.msra.mxu3 %v6156_v36  ;;  %v6203_v36 = vld [vmem:[%s11315_s24 + $0xe0] sm:$0xff] }
 0xe24   : > { %9230 = vmatmul.msk.f32.vlgmr.msra.gmra.mxu3 %vm16899_vm9, %v6175_v3  ;;  %vm16912_vm9 = vmmov %vm16867_vm0  ;;  %v9434_v3 = vld [vmem:[%s16923_s26 + $0x40] sm:$0xff] }
 0xe25   : > { %8379 = vmatpush.bf16.msra.mxu2 %v9434_v3 }
 0xe2c   : > { %9231 = vmatmul.msk.f32.gmra.mxu3 %vm16867_vm0, %v6176_v27  ;;  %v6204_v27 = vld [vmem:[%s11315_s24 + $0xe8] sm:$0xff] }
 0xe34   : > { %9232 = vmatmul.msk.f32.gmra.mxu3 %vm16900_vm1, %v6177_v20  ;;  %vm16913_vm1 = vmmov %vm16867_vm0 }
 0xe3c   : > { %9233 = vmatmul.msk.f32.gmra.mxu3 %vm16901_vm12, %v6178_v40  ;;  %vm16914_vm12 = vmmov %vm16867_vm0 }
 0xe44   : > { %9234 = vmatmul.msk.f32.gmra.mxu3 %vm16902_vm14, %v6179_v10  ;;  %vm16915_vm14 = vmmov %vm16867_vm0 }
 0xe4c   : > { %9235 = vmatmul.msk.f32.gmra.mxu3 %vm16903_vm2, %v6180_v41  ;;  %vm16916_vm2 = vmmov %vm16867_vm0 }
 0xe54   : > { %9236 = vmatmul.msk.f32.gmra.mxu3 %vm16904_vm5, %v6181_v55  ;;  %vm16917_vm5 = vmmov %vm16867_vm0  ;;  %v6205_v55 = vld [vmem:[%s11315_s24 + $0xf0] sm:$0xff] }
 0xe5c   : > { %9237 = vmatmul.msk.f32.gmra.mxu3 %vm16905_vm11, %v6182_v1  ;;  %vm16918_vm11 = vmmov %vm16867_vm0 }
 0xe64   : > { %9238 = vmatmul.msk.f32.gmra.mxu3 %vm16906_vm4, %v6183_v53  ;;  %vm16919_vm4 = vmmov %vm16867_vm0 }
 0xe6c   : > { %9239 = vmatmul.msk.f32.gmra.mxu3 %vm16907_vm13, %v6184_v54  ;;  %vm16920_vm13 = vmmov %vm16867_vm0 }
 0xe74   : > { %9240 = vmatmul.msk.f32.gmra.mxu3 %vm16908_vm7, %v6185_v59  ;;  %vm16921_vm7 = vmmov %vm16867_vm0 }
 0xe7c   : > { %9241 = vmatmul.msk.f32.gmra.mxu3 %vm16909_vm6, %v6186_v4  ;;  %vm16922_vm6 = vmmov %vm16867_vm0 }
 0xe84   : > { %9242 = vmatmul.msk.f32.gmra.mxu3 %vm16910_vm15, %v6187_v38  ;;  %vm16924_vm15 = vmmov %vm16867_vm0 }
 0xe8c   : > { %9243 = vmatmul.msk.f32.gmra.mxu3 %vm16911_vm10, %v6188_v42  ;;  %vm16925_vm10 = vmmov %vm16867_vm0 }
 0xe94   : > { %9244 = vmatmul.msk.f32.gmra.mxu3 %vm16912_vm9, %v6189_v37  ;;  %vm16926_vm9 = vmmov %vm16867_vm0 }
 0xe9c   : > { %9245 = vmatmul.msk.f32.gmra.mxu3 %vm16867_vm0, %v6190_v39 }
 0xea4   : > { %9246 = vmatmul.msk.f32.gmra.mxu3 %vm16913_vm1, %v6191_v6  ;;  %vm16927_vm1 = vcmask 64512  }
 0xea7   : > { %v6320_v48 = vpop.f32.mrf.mxu3 }
 0xeac   : > { %9247 = vmatmul.msk.f32.gmra.mxu3 %vm16914_vm12, %v6192_v28  ;;  %vm16928_vm12 = vmmov %vm16927_vm1 }
 0xeaf   : > { %v6323_v24 = vpop.f32.mrf.mxu3 }
 0xeb0   : > { %v10479_v12 = vpack.i.bf16 %v6323_v24, %v6320_v48  ;;  %v16936_v24 = vld [vmem:[#allocation15_spill] sm:$0xff] }
 0xeb2   : > { %10480 = vrot.lane.b32.xlu0 %v10479_v12, %s16129_s28 }
 0xeb4   : > { %9248 = vmatmul.msk.f32.gmra.mxu3 %vm16915_vm14, %v6193_v35  ;;  %vm16929_vm14 = vmmov %vm16867_vm0 }
 0xeb7   : > { %v6326_v44 = vpop.f32.mrf.mxu3 }
 0xebc   : > { %9249 = vmatmul.msk.f32.gmra.mxu3 %vm16916_vm2, %v6194_v22  ;;  %vm16930_vm2 = vcmask 1046528  }
 0xebf   : > { %v6329_v56 = vpop.f32.mrf.mxu3 }
 0xec0   : > { %v10484_v19 = vpack.i.bf16 %v6329_v56, %v6326_v44  ;;  %v6206_v56 = vld [vmem:[%s11315_s24 + $0xf8] sm:$0xff] }
 0xec2   : > { %10485 = vrot.lane.b32.xlu1 %v10484_v19, %s16129_s28 }
 0xec4   : > { %9250 = vmatmul.msk.f32.gmra.mxu3 %vm16917_vm5, %v6195_v45  ;;  %vm16931_vm5 = vmmov %vm16930_vm2 }
 0xec7   : > { %v6332_v16 = vpop.f32.mrf.mxu3 }
 0xecc   : > { %9251 = vmatmul.msk.f32.gmra.mxu3 %vm16918_vm11, %v6196_v52  ;;  %vm16932_vm11 = vcmask 1040384  }
 0xecf   : > { %v6335_v33 = vpop.f32.mrf.mxu3 }
 0xed0   : > { %v10489_v0 = vpack.i.bf16 %v6335_v33, %v6332_v16 }
 0xed2   : > { %10490 = vrot.lane.b32.xlu2 %v10489_v0, %s16129_s28 }
 0xed4   : > { %9252 = vmatmul.msk.f32.gmra.mxu3 %vm16919_vm4, %v6197_v58  ;;  %vm16933_vm4 = vmmov %vm16932_vm11 }
 0xed7   : > { %v6338_v50 = vpop.f32.mrf.mxu3 }
 0xedc   : > { %9253 = vmatmul.msk.f32.gmra.mxu3 %vm16920_vm13, %v6198_v63 }
 0xedf   : > { %v6341_v17 = vpop.f32.mrf.mxu3 }
 0xee0   : > { %v10494_v15 = vpack.i.bf16 %v6341_v17, %v6338_v50 }
 0xee2   : > { %10495 = vrot.lane.b32.xlu0 %v10494_v15, %s16129_s28 }
 0xee4   : > { %9254 = vmatmul.msk.f32.gmra.mxu3 %vm16921_vm7, %v6199_v23  ;;  %vm16937_vm7 = vnez %v16936_v24 }
 0xee7   : > { %v6344_v61 = vpop.f32.mrf.mxu3 }
 0xeec   : > { %9255 = vmatmul.msk.f32.gmra.mxu3 %vm16922_vm6, %v6200_v2  ;;  %vm16938_vm6 = vmmov %vm16867_vm0 }
 0xeef   : > { %v6347_v46 = vpop.f32.mrf.mxu3 }
 0xef0   : > { %v10499_v7 = vpack.i.bf16 %v6347_v46, %v6344_v61 }
 0xef2   : > { %10500 = vrot.lane.b32.xlu1 %v10499_v7, %s16129_s28 }
 0xef4   : > { %9256 = vmatmul.msk.f32.gmra.mxu3 %vm16924_vm15, %v6201_v21  ;;  %vm16939_vm15 = vmmov %vm16927_vm1 }
 0xef7   : > { %v6350_v30 = vpop.f32.mrf.mxu3 }
 0xefc   : > { %9257 = vmatmul.msk.f32.gmra.mxu3 %vm16925_vm10, %v6202_v43  ;;  %vm16940_vm10 = vmmov %vm16927_vm1 }
 0xeff   : > { %v6353_v32 = vpop.f32.mrf.mxu3 }
 0xf00   : > { %v10504_v25 = vpack.i.bf16 %v6353_v32, %v6350_v30 }
 0xf02   : > { %10505 = vrot.lane.b32.xlu2 %v10504_v25, %s16129_s28 }
 0xf04   : > { %9258 = vmatmul.msk.f32.gmra.mxu3 %vm16926_vm9, %v6203_v36  ;;  %vm16941_vm9 = vmmov %vm16927_vm1  ;;  %v16947_v36 = vld [vmem:[#allocation17_spill] sm:$0xff] }
 0xf07   : > { %v6356_v26 = vpop.f32.mrf.mxu3 }
 0xf0c   : > { %9259 = vmatmul.msk.f32.gmra.mxu3 %vm16867_vm0, %v6204_v27  ;;  %vm16942_vm0 = vmmov %vm16930_vm2 }
 0xf0f   : > { %v6359_v31 = vpop.f32.mrf.mxu3 }
 0xf10   : > { %v10509_v47 = vpack.i.bf16 %v6359_v31, %v6356_v26 }
 0xf12   : > { %10510 = vrot.lane.b32.xlu0 %v10509_v47, %s16129_s28 }
 0xf14   : > { %9260 = vmatmul.msk.f32.gmra.mxu3 %vm16929_vm14, %v6205_v55  ;;  %vm16945_vm14 = vmmov %vm16933_vm4 }
 0xf17   : > { %v6362_v20 = vpop.f32.mrf.mxu3 }
 0xf1c   : > { %9261 = vmatmul.msk.f32.gmra.mxu3 %vm16938_vm6, %v6206_v56 }
 0xf1f   : > { %v6365_v37 = vpop.f32.mrf.mxu3 }
 0xf20   : > { %v10519_v45 = vpack.i.bf16 %v6365_v37, %v6362_v20 }
 0xf24   : > { %v10481_v40 = vpop.permute.xlu0 %10480 }
 0xf25   : > { %v10483_v10 = vunpack.i.h.bf16 %v10481_v40  ;;  %v10482_v41 = vunpack.i.l.bf16 %v10481_v40 }
 0xf27   : > { %v6545_v1 = vsel %vm16927_vm1, %v13108_v34, %v10483_v10  ;;  %v6544_v53 = vsel %vm16928_vm12, %v13113_v5, %v10482_v41  ;;  %v16934_v5 = vld [vmem:[#allocation14_spill] sm:$0xff]  ;;  %v6368_v16 = vpop.f32.mrf.mxu3  ;;  %vm16943_vm1 = vmmov %vm16942_vm0 }
 0xf28   : > { %v6607_v54 = vrot.slane %v6545_v1, 7  ;;  %v6792_v59 = vrot.slane %v6545_v1, 1  ;;  %v6606_v4 = vrot.slane %v6544_v53, 7  ;;  %v6791_v38 = vrot.slane %v6544_v53, 1  ;;  %vm16944_vm12 = vmmov %vm16933_vm4 }
 0xf29   : > { %v10514_v42 = vpack.i.bf16 %v6544_v53, %v16447_v11  ;;  %vm16935_vm13 = vnez %v16934_v5  ;;  %v10524_v7 = vpack.i.bf16 %v6545_v1, %v6544_v53 }
 0xf2a   : > { %v6793_v39 = vsel %vm16930_vm2, %v6791_v38, %v6792_v59  ;;  %v6883_v6 = vsel %vm16931_vm5, 0.0, %v6791_v38  ;;  %v14342_v48 = vsel %vm16932_vm11, %v6606_v4, %v6607_v54  ;;  %v14345_v34 = vsel %vm16933_vm4, 0.0, %v6606_v4  ;;  %vm16949_vm11 = vmmov %vm16942_vm0 }
 0xf2b   : > { %10515 = vrot.lane.b32.xlu1 %v10514_v42, %s11158_s2  ;;  %v6948_v28 = vsel %vm16935_vm13, %v6883_v6, 0.0  ;;  %v6986_v12 = vsel %vm16937_vm7, %v14345_v34, 0.0  ;;  %vm16946_vm2 = vcmask 130048   ;;  %vm16948_vm5 = vnez %v16947_v36  ;;  %vm16951_vm4 = vmmov %vm16941_vm9 }
 0xf2c   : > { %v10529_v35 = vpack.i.bf16 %v6793_v39, %v6948_v28  ;;  %v10534_v44 = vpack.i.bf16 %v14342_v48, %v6986_v12  ;;  %v10491_v22 = vpop.permute.xlu2 %10490  ;;  %vm16955_vm6 = vmmov %vm16951_vm4 }
 0xf2d   : > { %v10492_v19 = vunpack.i.l.bf16 %v10491_v22  ;;  %v10493_v55 = vunpack.i.h.bf16 %v10491_v22 }
 0xf2e   : > { %10530 = vrot.lane.b32.xlu2 %v10529_v35, %s16131_s16  ;;  %10535 = vrot.lane.b32.xlu0 %v10534_v44, %s16133_s18 }
 0xf2f   : > { %v14361_v52 = vsel %vm16939_vm15, %v13089_v62, %v10492_v19  ;;  %v6371_v43 = vpop.f32.mrf.mxu3  ;;  %v6549_v53 = vsel %vm16951_vm4, %v13082_v51, %v10493_v55  ;;  %vm16956_vm15 = vmmov %vm16942_vm0 }
 0xf30   : > { %v6798_v50 = vrot.slane %v14361_v52, 1  ;;  %v10544_v31 = vpack.i.bf16 %v6371_v43, %v6368_v16  ;;  %v10594_v4 = vpack.i.bf16 %v6549_v53, %v14361_v52  ;;  %v6613_v37 = vrot.slane %v14361_v52, 7 }
 0xf31   : > { %v6615_v24 = vrot.slane %v6549_v53, 7  ;;  %v6800_v12 = vrot.slane %v6549_v53, 1 }
 0xf33   : > { %10520 = vrot.lane.b32.xlu1 %v10519_v45, %s16129_s28 }
 0xf34   : > { %v10486_v33 = vpop.permute.xlu1 %10485 }
 0xf35   : > { %v10488_v0 = vunpack.i.h.bf16 %v10486_v33  ;;  %v10487_v58 = vunpack.i.l.bf16 %v10486_v33 }
 0xf37   : > { %v6547_v63 = vsel %vm16940_vm10, %v13096_v9, %v10488_v0  ;;  %v6546_v17 = vsel %vm16941_vm9, %v13103_v60, %v10487_v58  ;;  %v6374_v10 = vpop.f32.mrf.mxu3  ;;  %vm16957_vm10 = vmmov %vm16942_vm0 }
 0xf38   : > { %v6611_v15 = vrot.slane %v6547_v63, 7  ;;  %v6796_v23 = vrot.slane %v6547_v63, 1  ;;  %v6609_v61 = vrot.slane %v6546_v17, 7  ;;  %v6794_v2 = vrot.slane %v6546_v17, 1  ;;  %vm16958_vm9 = vmmov %vm16944_vm12 }
 0xf39   : > { %v10539_v46 = vpack.i.bf16 %v6546_v17, %v6545_v1  ;;  %v10554_v47 = vpack.i.bf16 %v6547_v63, %v6546_v17  ;;  %v10579_v1 = vpack.i.bf16 %v14361_v52, %v6547_v63  ;;  %v6801_v45 = vsel %vm16957_vm10, %v6798_v50, %v6800_v12  ;;  %v16961_v63 = vld [vmem:[#allocation20_spill] sm:$0xff] }
 0xf3a   : > { %v6797_v62 = vsel %vm16942_vm0, %v6794_v2, %v6796_v23  ;;  %v14370_v21 = vsel %vm16943_vm1, %v6796_v23, %v6798_v50  ;;  %v14373_v30 = vsel %vm16944_vm12, %v6607_v54, %v6609_v61  ;;  %v14376_v32 = vsel %vm16945_vm14, %v6609_v61, %v6611_v15  ;;  %v16952_v54 = vld [vmem:[#allocation16_spill] sm:$0xff]  ;;  %vm16959_vm0 = vmmov %vm16946_vm2  ;;  %v16963_v23 = vld [vmem:[#allocation21_spill] sm:$0xff] }
 0xf3b   : > { %10540 = vrot.lane.b32.xlu2 %v10539_v46, %s11158_s2  ;;  %10525 = vrot.lane.b32.xlu1 %v10524_v7, %s16135_s22  ;;  %v7089_v9 = vsel %vm16935_vm13, %v14370_v21, 0.0  ;;  %v7057_v60 = vsel %vm16937_vm7, %v14373_v30, 0.0  ;;  %v6988_v3 = vsel %vm16948_vm5, %v14373_v30, 0.0  ;;  %v6795_v27 = vsel %vm16949_vm11, %v6792_v59, %v6794_v2  ;;  %vm16965_vm14 = vmmov %vm16951_vm4 }
 0xf3c   : > { %v8128_v25 = vpack.c.bf16 %v7089_v9, %v6797_v62  ;;  %v10564_v26 = vpack.i.bf16 %v14376_v32, %v7057_v60  ;;  %v10574_v20 = vpack.i.bf16 %v14376_v32, %v6988_v3  ;;  %v7024_v40 = vsel %vm16935_vm13, %v6795_v27, 0.0  ;;  %vm16954_vm13 = vmmov %vm16944_vm12 }
 0xf3d   : > { %v10549_v41 = vpack.i.bf16 %v7024_v40, %v6793_v39  ;;  %vm16953_vm7 = vnez %v16952_v54  ;;  %v14416_v28 = vsel %vm16954_vm13, %v6611_v15, %v6613_v37  ;;  %v14430_v52 = vsel %vm16958_vm9, %v6613_v37, %v6615_v24  ;;  %vm16967_vm11 = vmmov %vm16951_vm4  ;;  %v16976_v37 = vld [vmem:[#allocation58_spill] sm:$0xff] }
 0xf3e   : > { %9298 = vmatmul.msk.bf16.vlgmr.msra.gmra.mxu2 %vm16946_vm2, %v8128_v25  ;;  %10565 = vrot.lane.b32.xlu0 %v10564_v26, %s16125_s1  ;;  %s16950_s1 = smov 80   ;;  %v6950_v59 = vsel %vm16953_vm7, %v6795_v27, 0.0  ;;  %v7026_v51 = vsel %vm16953_vm7, %v14370_v21, 0.0  ;;  %v7059_v56 = vsel %vm16948_vm5, %v14416_v28, 0.0  ;;  %vm16962_vm1 = vnez %v16961_v63  ;;  %vm16966_vm2 = vmmov %vm16958_vm9 }
 0xf3f   : > { %v10569_v38 = vpack.i.bf16 %v6797_v62, %v6950_v59  ;;  %v6377_v42 = vpop.f32.mrf.mxu3  ;;  %v10589_v22 = vpack.i.bf16 %v7026_v51, %v6797_v62  ;;  %v10604_v33 = vpack.i.bf16 %v14430_v52, %v7059_v56  ;;  %v6952_v17 = vsel %vm16962_vm1, %v14370_v21, 0.0  ;;  %vm16968_vm4 = vmmov %vm16966_vm2  ;;  %v16972_v59 = vld [vmem:[#allocation24_spill] sm:$0xff]  ;;  %v16978_v51 = vld [vmem:[#allocation25_spill] sm:$0xff] }
 0xf40   : > { %v10584_v39 = vpack.i.bf16 %v6377_v42, %v6374_v10  ;;  %v10609_v15 = vpack.i.bf16 %v6801_v45, %v6952_v17  ;;  %vm16964_vm12 = vnez %v16963_v23  ;;  %v9433_v17 = vld [vmem:[%s16923_s26 + $0x38] sm:$0xff] }
 0xf41   : > { %v6990_v61 = vsel %vm16964_vm12, %v14416_v28, 0.0  ;;  %8283 = vmatpush.bf16.msrb.mxu1 %v9433_v17 }
 0xf42   : > { %v10614_v62 = vpack.i.bf16 %v14430_v52, %v6990_v61 }
 0xf43   : > { %10555 = vrot.lane.b32.xlu1 %v10554_v47, %s16127_s12  ;;  %10545 = vrot.lane.b32.xlu2 %v10544_v31, %s16129_s28 }
 0xf46   : > { %10575 = vrot.lane.b32.xlu0 %v10574_v20, %s16133_s18 }
 0xf47   : > { %v6380_v0 = vpop.f32.mrf.mxu3 }
 0xf4b   : > { %10560 = vrot.lane.b32.xlu1 %v10554_v47, %s16135_s22  ;;  %10550 = vrot.lane.b32.xlu2 %v10549_v41, %s16950_s1 }
 0xf4e   : > { %10580 = vrot.lane.b32.xlu0 %v10579_v1, %s11158_s2 }
 0xf4f   : > { %v6383_v21 = vpop.f32.mrf.mxu3 }
 0xf50   : > { %v10624_v47 = vpack.i.bf16 %v6383_v21, %v6380_v0  ;;  %v16989_v21 = vld [vmem:[#allocation57_spill] sm:$0xff] }
 0xf53   : > { %10595 = vrot.lane.b32.xlu1 %v10594_v4, %s16127_s12  ;;  %10570 = vrot.lane.b32.xlu2 %v10569_v38, %s16131_s16  ;;  %s16960_s12 = smov 96   ;;  %v16974_v38 = vld [vmem:[#allocation59_spill] sm:$0xff] }
 0xf54   : > { %v10496_v6 = vpop.permute.xlu0 %10495 }
 0xf55   : > { %v10497_v5 = vunpack.i.l.bf16 %v10496_v6  ;;  %v10498_v58 = vunpack.i.h.bf16 %v10496_v6 }
 0xf56   : > { %10585 = vrot.lane.b32.xlu0 %v10584_v39, %s16129_s28 }
 0xf57   : > { %v6550_v35 = vsel %vm16955_vm6, %v13073_v8, %v10497_v5  ;;  %v6551_v2 = vsel %vm16965_vm14, %v13060_v57, %v10498_v58  ;;  %vm16971_vm6 = vmmov %vm16959_vm0 }
 0xf58   : > { %v6802_v44 = vrot.slane %v6550_v35, 1  ;;  %v10619_v50 = vpack.i.bf16 %v6550_v35, %v6549_v53  ;;  %v6617_v46 = vrot.slane %v6550_v35, 7  ;;  %v6619_v9 = vrot.slane %v6551_v2, 7  ;;  %vm16982_vm14 = vmmov %vm16966_vm2 }
 0xf59   : > { %v6804_v57 = vrot.slane %v6551_v2, 1  ;;  %v10634_v5 = vpack.i.bf16 %v6551_v2, %v6550_v35 }
 0xf5a   : > { %v6803_v19 = vsel %vm16956_vm15, %v6800_v12, %v6802_v44  ;;  %v14450_v26 = vsel %vm16966_vm2, %v6615_v24, %v6617_v46  ;;  %v14455_v27 = vsel %vm16968_vm4, %v6617_v46, %v6619_v9  ;;  %vm16973_vm15 = vnez %v16972_v59 }
 0xf5b   : > { %10600 = vrot.lane.b32.xlu1 %v10594_v4, %s16135_s22  ;;  %10590 = vrot.lane.b32.xlu2 %v10589_v22, %s16950_s1  ;;  %v7091_v16 = vsel %vm16953_vm7, %v6803_v19, 0.0  ;;  %v7028_v25 = vsel %vm16962_vm1, %v6803_v19, 0.0  ;;  %v7061_v20 = vsel %vm16964_vm12, %v14450_v26, 0.0  ;;  %vm16969_vm7 = vmmov %vm16957_vm10  ;;  %v6954_v4 = vsel %vm16973_vm15, %v6803_v19, 0.0  ;;  %v6386_v22 = vpop.f32.mrf.mxu3 }
 0xf5c   : > { %v8130_v8 = vpack.c.bf16 %v7091_v16, %v6801_v45  ;;  %v10629_v3 = vpack.i.bf16 %v7028_v25, %v6801_v45  ;;  %v10506_v40 = vpop.permute.xlu2 %10505  ;;  %vm16970_vm13 = vmmov %vm16969_vm7  ;;  %v10644_v53 = vpack.i.bf16 %v14455_v27, %v7061_v20 }
 0xf5d   : > { %v10507_v54 = vunpack.i.l.bf16 %v10506_v40  ;;  %vm16975_vm10 = vmmov %vm16967_vm11 }
 0xf5e   : > { %9299 = vmatmul.msk.bf16.gmra.mxu2 %vm16959_vm0, %v8130_v8  ;;  %10605 = vrot.lane.b32.xlu0 %v10604_v33, %s16960_s12  ;;  %vm16977_vm9 = vmmov %vm16975_vm10  ;;  %vm16979_vm0 = vnez %v16978_v51 }
 0xf5f   : > { %v14480_v39 = vsel %vm16977_vm9, %v16976_v37, %v10507_v54  ;;  %v6992_v24 = vsel %vm16979_vm0, %v14450_v26, 0.0  ;;  %v9430_v54 = vld [vmem:[%s16923_s26 + $0x20] sm:$0xff] }
 0xf60   : > { %v6810_v56 = vrot.slane %v14480_v39, 1  ;;  %v10654_v19 = vpack.i.bf16 %v14455_v27, %v6992_v24 }
 0xf63   : > { %10620 = vrot.lane.b32.xlu1 %v10619_v50, %s11158_s2  ;;  %10610 = vrot.lane.b32.xlu2 %v10609_v15, %s16131_s16  ;;  %v6389_v61 = vpop.f32.mrf.mxu3 }
 0xf64   : > { %v10501_v7 = vpop.permute.xlu1 %10500  ;;  %v10664_v46 = vpack.i.bf16 %v6389_v61, %v6386_v22 }
 0xf65   : > { %v10502_v60 = vunpack.i.l.bf16 %v10501_v7  ;;  %v10503_v41 = vunpack.i.h.bf16 %v10501_v7 }
 0xf66   : > { %10615 = vrot.lane.b32.xlu0 %v10614_v62, %s16133_s18  ;;  %v16986_v62 = vld [vmem:[#allocation26_spill] sm:$0xff] }
 0xf67   : > { %v6552_v43 = vsel %vm16967_vm11, %v13052_v29, %v10502_v60  ;;  %v6805_v29 = vsel %vm16970_vm13, %v6802_v44, %v6804_v57  ;;  %v14476_v42 = vsel %vm16975_vm10, %v16974_v38, %v10503_v41  ;;  %vm16984_vm11 = vmmov %vm16968_vm4  ;;  %v9432_v60 = vld [vmem:[%s16923_s26 + $0x30] sm:$0xff] }
 0xf68   : > { %v6806_v31 = vrot.slane %v6552_v43, 1  ;;  %v10649_v6 = vpack.i.bf16 %v6805_v29, %v6954_v4  ;;  %v6808_v12 = vrot.slane %v14476_v42, 1  ;;  %v6621_v44 = vrot.slane %v6552_v43, 7  ;;  %vm16985_vm4 = vmmov %vm16971_vm6  ;;  %8284 = vmatpush.bf16.msrb.mxu1 %v9432_v60  ;;  %v16995_v38 = vld [vmem:[#allocation27_spill] sm:$0xff]  ;;  %v17001_v60 = vld [vmem:[#allocation28_spill] sm:$0xff] }
 0xf69   : > { %v6623_v45 = vrot.slane %v14476_v42, 7  ;;  %v10659_v8 = vpack.i.bf16 %v6552_v43, %v6551_v2  ;;  %v10508_v2 = vunpack.i.h.bf16 %v10506_v40  ;;  %v10674_v7 = vpack.i.bf16 %v14476_v42, %v6552_v43  ;;  %vm16990_vm13 = vmmov %vm16977_vm9  ;;  %v16991_v40 = vld [vmem:[#allocation56_spill] sm:$0xff] }
 0xf6a   : > { %v14461_v10 = vsel %vm16969_vm7, %v6804_v57, %v6806_v31  ;;  %v14496_v16 = vsel %vm16982_vm14, %v6619_v9, %v6621_v44  ;;  %vm16999_vm14 = vmmov %vm16984_vm11 }
 0xf6b   : > { %10630 = vrot.lane.b32.xlu2 %v10629_v3, %s16950_s1  ;;  %10625 = vrot.lane.b32.xlu1 %v10624_v47, %s16129_s28  ;;  %v7093_v55 = vsel %vm16962_vm1, %v14461_v10, 0.0  ;;  %s16980_s28 = smov 112   ;;  %vm16981_vm1 = vmmov %vm16969_vm7  ;;  %v14507_v58 = vsel %vm16984_vm11, %v6621_v44, %v6623_v45  ;;  %v7063_v63 = vsel %vm16979_vm0, %v14496_v16, 0.0  ;;  %vm16987_vm7 = vnez %v16986_v62  ;;  %v9431_v47 = vld [vmem:[%s16923_s26 + $0x28] sm:$0xff]  ;;  %v9428_v44 = vld [vmem:[%s16923_s26 + $0x10] sm:$0xff] }
 0xf6c   : > { %v8132_v1 = vpack.c.bf16 %v7093_v55, %v6805_v29  ;;  %v14493_v35 = vsel %vm16981_vm1, %v6808_v12, %v6810_v56  ;;  %vm16983_vm2 = vmmov %vm16981_vm1  ;;  %v10684_v15 = vpack.i.bf16 %v14507_v58, %v7063_v63  ;;  %v6994_v9 = vsel %vm16987_vm7, %v14496_v16, 0.0  ;;  %v6392_v55 = vpop.f32.mrf.mxu3  ;;  %8285 = vmatpush.bf16.msrb.mxu1 %v9431_v47  ;;  %v9427_v63 = vld [vmem:[%s16923_s26 + $0x8] sm:$0xff] }
 0xf6d   : > { %v14499_v33 = vsel %vm16983_vm2, %v6806_v31, %v6808_v12  ;;  %v7095_v0 = vsel %vm16973_vm15, %v14493_v35, 0.0  ;;  %v14528_v25 = vsel %vm16990_vm13, %v16989_v21, %v10508_v2  ;;  %v10694_v31 = vpack.i.bf16 %v14507_v58, %v6994_v9  ;;  %vm16993_vm10 = vmmov %vm16981_vm1  ;;  %v9426_v2 = vld [vmem:[%s16923_s26] sm:$0xff] }
 0xf6e   : > { %9300 = vmatmul.msk.bf16.gmra.mxu2 %vm16971_vm6, %v8132_v1  ;;  %10645 = vrot.lane.b32.xlu0 %v10644_v53, %s16960_s12  ;;  %v8134_v50 = vpack.c.bf16 %v7095_v0, %v14499_v33  ;;  %v7030_v3 = vsel %vm16973_vm15, %v14461_v10, 0.0  ;;  %v6812_v20 = vrot.slane %v14528_v25, 1  ;;  %vm16992_vm6 = vmmov %vm16977_vm9  ;;  %vm16996_vm9 = vnez %v16995_v38 }
 0xf6f   : > { %v10669_v53 = vpack.i.bf16 %v7030_v3, %v6805_v29  ;;  %vm16994_vm15 = vmmov %vm16981_vm1  ;;  %v6956_v12 = vsel %vm16996_vm9, %v14461_v10, 0.0  ;;  %v10714_v22 = vpack.i.bf16 %v14528_v25, %v14480_v39  ;;  %v7032_v10 = vsel %vm16996_vm9, %v14493_v35, 0.0 }
 0xf70   : > { %v14551_v59 = vsel %vm16994_vm15, %v6810_v56, %v6812_v20  ;;  %8286 = vmatpush.bf16.msrb.mxu1 %v9430_v54  ;;  %vm16997_vm1 = vmmov %vm16985_vm4  ;;  %v10689_v56 = vpack.i.bf16 %v14499_v33, %v6956_v12  ;;  %v17009_v12 = vld [vmem:[#allocation53_spill] sm:$0xff] }
 0xf71   : > { %vm17000_vm2 = vmmov %vm16984_vm11  ;;  %vm17002_vm11 = vnez %v17001_v60 }
 0xf72   : > { %v6958_v21 = vsel %vm17002_vm11, %v14493_v35, 0.0  ;;  %vm17011_vm15 = vmmov %vm17000_vm2 }
 0xf73   : > { %10650 = vrot.lane.b32.xlu2 %v10649_v6, %s16131_s16  ;;  %10635 = vrot.lane.b32.xlu1 %v10634_v5, %s16980_s28  ;;  %s16988_s16 = smov 8   ;;  %v10699_v6 = vpack.i.bf16 %v14480_v39, %v14476_v42  ;;  %v10729_v3 = vpack.i.bf16 %v14551_v59, %v6958_v21 }
 0xf76   : > { %10655 = vrot.lane.b32.xlu0 %v10654_v19, %s16133_s18  ;;  %v6395_v19 = vpop.f32.mrf.mxu3 }
 0xf77   : > { %v10704_v0 = vpack.i.bf16 %v6395_v19, %v6392_v55 }
 0xf7b   : > { %10660 = vrot.lane.b32.xlu2 %v10659_v8, %s11158_s2  ;;  %10640 = vrot.lane.b32.xlu1 %v10634_v5, %s16135_s22  ;;  %v9429_v5 = vld [vmem:[%s16923_s26 + $0x18] sm:$0xff]  ;;  %v6625_v8 = vrot.slane %v14480_v39, 7  ;;  %v10709_v39 = vpack.i.bf16 %v7032_v10, %v14499_v33 }
 0xf7c   : > { %8287 = vmatpush.bf16.msrb.mxu1 %v9429_v5 }
 0xf7e   : > { %9301 = vmatmul.msk.bf16.gmra.mxu2 %vm16985_vm4, %v8134_v50  ;;  %10685 = vrot.lane.b32.xlu0 %v10684_v15, %s16960_s12  ;;  %v14584_v50 = vsel %vm16999_vm14, %v6623_v45, %v6625_v8  ;;  %v6627_v15 = vrot.slane %v14528_v25, 7  ;;  %v6398_v45 = vpop.f32.mrf.mxu3  ;;  %vm17004_vm4 = vmmov %vm16992_vm6 }
 0xf7f   : > { %v7065_v61 = vsel %vm16987_vm7, %v14584_v50, 0.0 }
 0xf80   : > { %8288 = vmatpush.bf16.msrb.mxu1 %v9428_v44 }
 0xf83   : > { %10675 = vrot.lane.b32.xlu1 %v10674_v7, %s16980_s28  ;;  %10665 = vrot.lane.b32.xlu2 %v10664_v46, %s16988_s16  ;;  %v14595_v46 = vsel %vm17000_vm2, %v6625_v8, %v6627_v15 }
 0xf84   : > { %v10511_v57 = vpop.permute.xlu0 %10510  ;;  %8289 = vmatpush.bf16.msrb.mxu1 %v9427_v63  ;;  %v10724_v42 = vpack.i.bf16 %v14595_v46, %v7065_v61 }
 0xf85   : > { %v10512_v43 = vunpack.i.l.bf16 %v10511_v57 }
 0xf86   : > { %10695 = vrot.lane.b32.xlu0 %v10694_v31, %s16133_s18  ;;  %s16998_s18 = smov 32   ;;  %v17003_v31 = vld [vmem:[#allocation54_spill] sm:$0xff]  ;;  %v6401_v38 = vpop.f32.mrf.mxu3 }
 0xf87   : > { %v14539_v41 = vsel %vm16992_vm6, %v16991_v40, %v10512_v43  ;;  %vm17008_vm6 = vmmov %vm17000_vm2  ;;  %v10744_v19 = vpack.i.bf16 %v6401_v38, %v6398_v45  ;;  %vm17016_vm2 = vcmask 130048  }
 0xf88   : > { %v6814_v1 = vrot.slane %v14539_v41, 1  ;;  %v14560_v24 = vpop.permute.xlu2 %10530  ;;  %8290 = vmatpush.bf16.msrb.mxu1 %v9426_v2  ;;  %v10739_v43 = vpack.i.bf16 %v14539_v41, %v14528_v25  ;;  %v6629_v40 = vrot.slane %v14539_v41, 7 }
 0xf89   : > { %v10532_v60 = vunpack.i.l.bf16 %v14560_v24 }
 0xf8a   : > { %v14546_v4 = vsel %vm16993_vm10, %v6812_v20, %v6814_v1  ;;  %vm17010_vm10 = vmmov %vm17004_vm4 }
 0xf8b   : > { %10680 = vrot.lane.b32.xlu1 %v10674_v7, %s16135_s22  ;;  %10670 = vrot.lane.b32.xlu2 %v10669_v53, %s16950_s1  ;;  %v7097_v37 = vsel %vm16996_vm9, %v14546_v4, 0.0  ;;  %v10513_v7 = vunpack.i.h.bf16 %v10511_v57  ;;  %v17005_v57 = vld [vmem:[#allocation29_spill] sm:$0xff]  ;;  %vm17012_vm9 = vcmask 1046528  }
 0xf8c   : > { %v8136_v29 = vpack.c.bf16 %v7097_v37, %v14551_v59  ;;  %vm17006_vm13 = vnez %v17005_v57  ;;  %v7034_v37 = vsel %vm17002_vm11, %v14546_v4, 0.0 }
 0xf8d   : > { %v14608_v47 = vsel %vm17004_vm4, %v17003_v31, %v10513_v7  ;;  %v6996_v20 = vsel %vm17006_vm13, %v14584_v50, 0.0  ;;  %v10749_v8 = vpack.i.bf16 %v7034_v37, %v14551_v59  ;;  %v17014_v7 = vld [vmem:[#allocation30_spill] sm:$0xff] }
 0xf8e   : > { %9302 = vmatmul.msk.bf16.gmra.mxu2 %vm16997_vm1, %v8136_v29  ;;  %10700 = vrot.lane.b32.xlu0 %v10699_v6, %s11158_s2  ;;  %v6631_v35 = vrot.slane %v14608_v47, 7  ;;  %v10734_v55 = vpack.i.bf16 %v14595_v46, %v6996_v20  ;;  %v14628_v29 = vsel %vm17008_vm6, %v6627_v15, %v6629_v40  ;;  %v6816_v6 = vrot.slane %v14608_v47, 1  ;;  %vm17013_vm1 = vmmov %vm17012_vm9  ;;  %v17017_v20 = vld [vmem:[#allocation52_spill] sm:$0xff] }
 0xf8f   : > { %vm17015_vm14 = vnez %v17014_v7  ;;  %v10754_v38 = vpack.i.bf16 %v14608_v47, %v14539_v41  ;;  %vm17020_vm6 = vcmask 261120  }
 0xf90   : > { %v14656_v59 = vsel %vm17013_vm1, %v6814_v1, %v6816_v6  ;;  %v6960_v21 = vsel %vm17015_vm14, %v14546_v4, 0.0  ;;  %vm17026_vm1 = vcmask 392192  }
 0xf91   : > { %v10769_v4 = vpack.i.bf16 %v14656_v59, %v6960_v21 }
 0xf93   : > { %10715 = vrot.lane.b32.xlu1 %v10714_v22, %s16980_s28  ;;  %10690 = vrot.lane.b32.xlu2 %v10689_v56, %s16998_s18 }
 0xf95   : > { %v14575_v17 = vpop.permute.xlu2 %10540 }
 0xf96   : > { %10705 = vrot.lane.b32.xlu0 %v10704_v0, %s16988_s16  ;;  %v7067_v0 = vsel %vm17006_vm13, %v14628_v29, 0.0 }
 0xf9b   : > { %10720 = vrot.lane.b32.xlu1 %v10714_v22, %s16135_s22  ;;  %10710 = vrot.lane.b32.xlu2 %v10709_v39, %s16950_s1  ;;  %s17007_s22 = smov 48   ;;  %v14638_v22 = vsel %vm17011_vm15, %v6629_v40, %v6631_v35 }
 0xf9c   : > { %v10764_v61 = vpack.i.bf16 %v14638_v22, %v7067_v0 }
 0xf9d   : > { %v14598_v9 = vpop.permute.xlu1 %10515  ;;  %v14600_v33 = vpop.permute.xlu2 %10545 }
 0xf9e   : > { %10725 = vrot.lane.b32.xlu0 %v10724_v42, %s16960_s12  ;;  %v10517_v63 = vunpack.i.l.bf16 %v14598_v9  ;;  %v10547_v1 = vunpack.i.l.bf16 %v14600_v33 }
 0xfa0   : > { %v10536_v5 = vpop.permute.xlu0 %10535  ;;  %v7904_v31 = vsel %vm17016_vm2, 0.0, %v10517_v63 }
 0xfa1   : > { %v7935_v37 = vsel %vm17020_vm6, %v7904_v31, %v10362_v18 }
 0xfa3   : > { %10740 = vrot.lane.b32.xlu1 %v10739_v43, %s11158_s2  ;;  %10730 = vrot.lane.b32.xlu2 %v10729_v3, %s16998_s18  ;;  %v10538_v43 = vunpack.i.h.bf16 %v10536_v5  ;;  %v10537_v3 = vunpack.i.l.bf16 %v10536_v5 }
 0xfa5   : > { %v10521_v53 = vpop.permute.xlu1 %10520  ;;  %v14621_v54 = vpop.permute.xlu2 %10550 }
 0xfa6   : > { %v10522_v25 = vunpack.i.l.bf16 %v10521_v53  ;;  %10735 = vrot.lane.b32.xlu0 %v10734_v55, %s17007_s22  ;;  %v10523_v10 = vunpack.i.h.bf16 %v10521_v53  ;;  %v10552_v21 = vunpack.i.l.bf16 %v14621_v54 }
 0xfa8   : > { %v14633_v44 = vsel %vm17010_vm10, %v17009_v12, %v10522_v25  ;;  %vm17021_vm10 = vmmov %vm17020_vm6  ;;  %v17022_v12 = vld [vmem:[#allocation31_spill] sm:$0xff]  ;;  %vm17030_vm6 = vcmask 1040384  }
 0xfa9   : > { %v6818_v56 = vrot.slane %v14633_v44, 1  ;;  %v6633_v5 = vrot.slane %v14633_v44, 7  ;;  %vm17023_vm15 = vnez %v17022_v12 }
 0xfab   : > { %10750 = vrot.lane.b32.xlu2 %v10749_v8, %s16950_s1  ;;  %10745 = vrot.lane.b32.xlu1 %v10744_v19, %s16988_s16  ;;  %v14651_v15 = vsel %vm17012_vm9, %v6816_v6, %v6818_v56  ;;  %v7936_v6 = vsel %vm17021_vm10, %v7904_v31, %v10532_v60  ;;  %v6998_v19 = vsel %vm17023_vm15, %v14628_v29, 0.0  ;;  %v17024_v8 = vld [vmem:[#allocation50_spill] sm:$0xff]  ;;  %vm17031_vm10 = vcmask 654336  }
 0xfac   : > { %v7099_v39 = vsel %vm17002_vm11, %v14651_v15, 0.0  ;;  %vm17018_vm11 = vmmov %vm17004_vm4  ;;  %v7968_v63 = vsel %vm17026_vm1, %v7936_v6, %v10538_v43  ;;  %v10774_v31 = vpack.i.bf16 %v14638_v22, %v6998_v19 }
 0xfad   : > { %v10526_v2 = vpop.permute.xlu1 %10525  ;;  %v14662_v42 = vpop.permute.xlu2 %10570  ;;  %v8138_v45 = vpack.c.bf16 %v7099_v39, %v14656_v59  ;;  %v14674_v40 = vsel %vm17018_vm11, %v17017_v20, %v10523_v10  ;;  %vm17019_vm4 = vmmov %vm17016_vm2  ;;  %v14709_v20 = vsel %vm17030_vm6, %v6631_v35, %v6633_v5 }
 0xfae   : > { %10765 = vrot.lane.b32.xlu0 %v10764_v61, %s16960_s12  ;;  %v10528_v55 = vunpack.i.h.bf16 %v10526_v2  ;;  %v10527_v53 = vunpack.i.l.bf16 %v10526_v2  ;;  %vm17025_vm9 = vmmov %vm17018_vm11  ;;  %v6820_v14 = vrot.slane %v14674_v40, 1  ;;  %v6404_v10 = vpop.f32.mrf.mxu3  ;;  %vm17028_vm11 = vcmask 523264  }
 0xfaf   : > { %9303 = vmatmul.msk.bf16.gmra.mxu2 %vm17019_vm4, %v8138_v45  ;;  %v14690_v0 = vsel %vm17025_vm9, %v17024_v8, %v10547_v1  ;;  %vm17027_vm2 = vmmov %vm17026_vm1  ;;  %v10553_v45 = vunpack.i.h.bf16 %v14621_v54  ;;  %v6635_v43 = vrot.slane %v14674_v40, 7  ;;  %vm17033_vm1 = vcmask 1046528  }
 0xfb0   : > { %v10566_v25 = vpop.permute.xlu0 %10565  ;;  %v7967_v41 = vsel %vm17027_vm2, %v7935_v37, %v10537_v3  ;;  %v8000_v18 = vsel %vm17028_vm11, %v7968_v63, %v10528_v55  ;;  %vm17029_vm4 = vmmov %vm17028_vm11  ;;  %v6822_v1 = vrot.slane %v14690_v0, 1 }
 0xfb1   : > { %v7999_v39 = vsel %vm17029_vm4, %v7967_v41, %v10527_v53  ;;  %v10568_v61 = vunpack.i.h.bf16 %v10566_v25  ;;  %v10567_v2 = vunpack.i.l.bf16 %v10566_v25  ;;  %vm17032_vm9 = vmmov %vm17031_vm10  ;;  %v10779_v41 = vpack.i.bf16 %v14633_v44, %v14608_v47 }
 0xfb2   : > { %v8031_v55 = vsel %vm17031_vm10, %v7999_v39, %v10552_v21  ;;  %v8032_v53 = vsel %vm17032_vm9, %v8000_v18, %v10553_v45  ;;  %v14719_v6 = vsel %vm17033_vm1, %v6820_v14, %v6822_v1  ;;  %vm17034_vm2 = vmmov %vm17030_vm6  ;;  %v7069_v39 = vsel %vm17023_vm15, %v14709_v20, 0.0 }
 0xfb3   : > { %10770 = vrot.lane.b32.xlu2 %v10769_v4, %s16998_s18  ;;  %10755 = vrot.lane.b32.xlu1 %v10754_v38, %s16980_s28  ;;  %v8063_v4 = vsel %vm4382_vm8, %v8031_v55, %v10567_v2  ;;  %v8064_v37 = vsel %vm4382_vm8, %v8032_v53, %v10568_v61  ;;  %v14728_v18 = vsel %vm17034_vm2, %v6633_v5, %v6635_v43  ;;  %vm17035_vm11 = vmmov %vm17033_vm1  ;;  %v7101_v2 = vsel %vm17015_vm14, %v14719_v6, 0.0 }
 0xfb4   : > { %v14736_v61 = vsel %vm17035_vm11, %v6818_v56, %v6820_v14  ;;  %v10804_v47 = vpack.i.bf16 %v14728_v18, %v7069_v39  ;;  %vm17037_vm4 = vcmask 130048   ;;  %vm17041_vm10 = vcmask 64512  }
 0xfb5   : > { %v10556_v3 = vpop.permute.xlu1 %10555  ;;  %v14704_v60 = vpop.permute.xlu2 %10590  ;;  %vm17045_vm9 = vmmov %vm17037_vm4  ;;  %vm17046_vm1 = vcmask 261120   ;;  %vm17048_vm11 = vcmask 392192  }
 0xfb6   : > { %v10558_v25 = vunpack.i.h.bf16 %v10556_v3  ;;  %v10557_v54 = vunpack.i.l.bf16 %v10556_v3  ;;  %10775 = vrot.lane.b32.xlu0 %v10774_v31, %s17007_s22  ;;  %v6407_v5 = vpop.f32.mrf.mxu3  ;;  %v8140_v31 = vpack.c.bf16 %v7101_v2, %v14736_v61  ;;  %v17038_v3 = vld [vmem:[#allocation32_spill] sm:$0xff]  ;;  %vm17047_vm2 = vmmov %vm17046_vm1 }
 0xfb7   : > { %v10784_v14 = vpack.i.bf16 %v6407_v5, %v6404_v10  ;;  %vm17039_vm6 = vnez %v17038_v3  ;;  %v10518_v10 = vunpack.i.h.bf16 %v14598_v9  ;;  %v10572_v9 = vunpack.i.l.bf16 %v14662_v42 }
 0xfb8   : > { %v8095_v35 = vsel %vm4385_vm3, %v8063_v4, %v10557_v54  ;;  %v8096_v19 = vsel %vm4385_vm3, %v8064_v37, %v10558_v25  ;;  %v10576_v8 = vpop.permute.xlu0 %10575  ;;  %v7000_v55 = vsel %vm17039_vm6, %v14709_v20, 0.0  ;;  %v10548_v25 = vunpack.i.h.bf16 %v14600_v33  ;;  %v17040_v33 = vld [vmem:[#allocation51_spill] sm:$0xff] }
 0xfb9   : > { %v8127_v63 = vpack.c.bf16 %v8096_v19, %v8095_v35  ;;  %v10814_v53 = vpack.i.bf16 %v14728_v18, %v7000_v55  ;;  %v7036_v37 = vsel %vm17015_vm14, %v14651_v15, 0.0  ;;  %v10542_v35 = vunpack.i.l.bf16 %v14575_v17  ;;  %vm17042_vm14 = vmmov %vm17037_vm4 }
 0xfba   : > { %v6760_v19 = vsel %vm16948_vm5, %v14345_v34, 0.0  ;;  %v10789_v7 = vpack.i.bf16 %v7036_v37, %v14656_v59  ;;  %v10577_v5 = vunpack.i.l.bf16 %v10576_v8  ;;  %vm17044_vm5 = vmmov %vm17041_vm10 }
 0xfbb   : > { %8291 = vmatmul.bf16.vlgmr.msrb.gmra.mxu1 %v8127_v63  ;;  %10780 = vrot.lane.b32.xlu2 %v10779_v41, %s11158_s2  ;;  %v14775_v41 = vsel %vm17041_vm10, %v17040_v33, %v10548_v25  ;;  %v7905_v2 = vsel %vm17042_vm14, %v6760_v19, %v10518_v10  ;;  %vm17052_vm14 = vcmask 523264  }
 0xfbc   : > { %10760 = vrot.lane.b32.xlu1 %v10754_v38, %s17036_s0  ;;  %v10794_v38 = vpack.i.bf16 %v14674_v40, %v14633_v44  ;;  %v6824_v25 = vrot.slane %v14775_v41, 1 }
 0xfbd   : > { %v10561_v45 = vpop.permute.xlu1 %10560  ;;  %v14744_v21 = vpop.permute.xlu2 %10610 }
 0xfbe   : > { %10805 = vrot.lane.b32.xlu0 %v10804_v47, %s16960_s12  ;;  %v6410_v44 = vpop.f32.mrf.mxu3  ;;  %v10578_v47 = vunpack.i.h.bf16 %v10576_v8  ;;  %v10563_v36 = vunpack.i.h.bf16 %v10561_v45  ;;  %v10562_v34 = vunpack.i.l.bf16 %v10561_v45 }
 0xfbf   : > { %9304 = vmatmul.msk.bf16.gmra.mxu2 %vm17037_vm4, %v8140_v31  ;;  %v10533_v31 = vunpack.i.h.bf16 %v14560_v24  ;;  %v10819_v24 = vpack.i.bf16 %v14690_v0, %v14674_v40  ;;  %vm17049_vm4 = vmmov %vm17048_vm11  ;;  %v10573_v40 = vunpack.i.h.bf16 %v14662_v42 }
 0xfc0   : > { %v14749_v56 = vpop.permute.xlu0 %10580 }
 0xfc1   : > { %v7937_v45 = vsel %vm17047_vm2, %v7905_v2, %v10533_v31  ;;  %v10593_v2 = vunpack.i.h.bf16 %v14704_v60  ;;  %vm17056_vm2 = vcmask 654336  }
 0xfc2   : > { %v7969_v19 = vsel %vm17048_vm11, %v7937_v45, %v10577_v5  ;;  %vm17057_vm11 = vmmov %vm17056_vm2 }
 0xfc3   : > { %10785 = vrot.lane.b32.xlu2 %v10784_v14, %s16988_s16  ;;  %v17043_v14 = vld [vmem:[#allocation55_spill] sm:$0xff]  ;;  %v8001_v33 = vsel %vm17052_vm14, %v7969_v19, %v10562_v34 }
 0xfc4   : > { %10795 = vrot.lane.b32.xlu1 %v10794_v38, %s16980_s28 }
 0xfc5   : > { %v10596_v54 = vpop.permute.xlu1 %10595  ;;  %v14760_v4 = vpop.permute.xlu2 %10630 }
 0xfc6   : > { %10815 = vrot.lane.b32.xlu0 %v10814_v53, %s17007_s22  ;;  %v7906_v53 = vsel %vm17045_vm9, %v14342_v48, %v10542_v35  ;;  %v17050_v35 = vld [vmem:[#allocation33_spill] sm:$0xff]  ;;  %vm17054_vm9 = vcmask 1046528   ;;  %v10597_v45 = vunpack.i.l.bf16 %v10596_v54 }
 0xfc7   : > { %v7938_v8 = vsel %vm17046_vm1, %v7906_v53, %v10572_v9  ;;  %vm17051_vm10 = vnez %v17050_v35  ;;  %vm17055_vm1 = vmmov %vm17054_vm9 }
 0xfc8   : > { %v14771_v63 = vpop.permute.xlu0 %10585  ;;  %v7970_v48 = vsel %vm17049_vm4, %v7938_v8, %v10578_v47  ;;  %v10592_v47 = vunpack.i.l.bf16 %v14704_v60  ;;  %v10598_v8 = vunpack.i.h.bf16 %v10596_v54  ;;  %vm17058_vm4 = vcmask 130048  }
 0xfc9   : > { %v10587_v39 = vunpack.i.l.bf16 %v14771_v63 }
 0xfca   : > { %v8033_v60 = vsel %vm17056_vm2, %v8001_v33, %v10592_v47  ;;  %v7038_v47 = vsel %vm17051_vm10, %v14719_v6, 0.0  ;;  %vm17066_vm2 = vmmov %vm17058_vm4 }
 0xfcb   : > { %v14784_v55 = vsel %vm17044_vm5, %v17043_v14, %v10587_v39  ;;  %10790 = vrot.lane.b32.xlu2 %v10789_v7, %s16950_s1  ;;  %vm17053_vm5 = vmmov %vm17052_vm14  ;;  %v10834_v7 = vpack.i.bf16 %v14775_v41, %v14690_v0  ;;  %vm17059_vm14 = vcmask 1040384  }
 0xfcc   : > { %v6826_v59 = vrot.slane %v14784_v55, 1  ;;  %10800 = vrot.lane.b32.xlu1 %v10794_v38, %s17036_s0  ;;  %v6962_v38 = vsel %vm17051_vm10, %v14651_v15, 0.0  ;;  %v8002_v9 = vsel %vm17053_vm5, %v7970_v48, %v10563_v36  ;;  %v14820_v15 = vsel %vm17055_vm1, %v6822_v1, %v6824_v25  ;;  %vm17061_vm5 = vmmov %vm17059_vm14 }
 0xfcd   : > { %v14796_v10 = vpop.permute.xlu1 %10600  ;;  %v14798_v37 = vpop.permute.xlu2 %10650  ;;  %v10809_v53 = vpack.i.bf16 %v14736_v61, %v6962_v38  ;;  %v8034_v19 = vsel %vm17057_vm11, %v8002_v9, %v10593_v2  ;;  %v6637_v48 = vrot.slane %v14690_v0, 7  ;;  %vm17065_vm1 = vcmask 64512  }
 0xfce   : > { %10820 = vrot.lane.b32.xlu0 %v10819_v24, %s11158_s2  ;;  %v14811_v39 = vsel %vm17054_vm9, %v6824_v25, %v6826_v59  ;;  %v6413_v24 = vpop.f32.mrf.mxu3  ;;  %vm17067_vm11 = vcmask 261120  }
 0xfcf   : > { %v7103_v31 = vsel %vm17051_vm10, %v14811_v39, 0.0  ;;  %v10824_v38 = vpack.i.bf16 %v6413_v24, %v6410_v44  ;;  %v14848_v0 = vsel %vm17059_vm14, %v6635_v43, %v6637_v48  ;;  %v6639_v44 = vrot.slane %v14775_v41, 7  ;;  %vm17060_vm10 = vmmov %vm17058_vm4 }
 0xfd0   : > { %v10606_v5 = vpop.permute.xlu0 %10605  ;;  %v8142_v14 = vpack.c.bf16 %v7103_v31, %v14820_v15  ;;  %v10582_v31 = vunpack.i.l.bf16 %v14749_v56  ;;  %v7071_v35 = vsel %vm17039_vm6, %v14848_v0, 0.0  ;;  %vm17070_vm14 = vmmov %vm17067_vm11 }
 0xfd1   : > { %v10608_v36 = vunpack.i.h.bf16 %v10606_v5  ;;  %v10607_v34 = vunpack.i.l.bf16 %v10606_v5 }
 0xfd2   : > { %9305 = vmatmul.msk.bf16.gmra.mxu2 %vm17058_vm4, %v8142_v14  ;;  %v10829_v14 = vpack.i.bf16 %v7038_v47, %v14736_v61  ;;  %v7908_v43 = vsel %vm17060_vm10, %v14376_v32, %v10582_v31  ;;  %v6762_v32 = vsel %vm16964_vm12, %v14373_v30, 0.0  ;;  %vm17071_vm12 = vcmask 392192  }
 0xfd3   : > { %v8066_v1 = vsel %vm4382_vm8, %v8034_v19, %v10608_v36  ;;  %v8065_v25 = vsel %vm4382_vm8, %v8033_v60, %v10607_v34  ;;  %10810 = vrot.lane.b32.xlu2 %v10809_v53, %s16998_s18  ;;  %v10588_v34 = vunpack.i.h.bf16 %v14771_v63  ;;  %v10543_v53 = vunpack.i.h.bf16 %v14575_v17  ;;  %v17062_v17 = vld [vmem:[#allocation34_spill] sm:$0xff]  ;;  %v17064_v60 = vld [vmem:[#allocation60_spill] sm:$0xff]  ;;  %vm17072_vm10 = vmmov %vm17071_vm12 }
 0xfd4   : > { %10835 = vrot.lane.b32.xlu1 %v10834_v7, %s16980_s28  ;;  %v8097_v5 = vsel %vm4385_vm3, %v8065_v25, %v10597_v45  ;;  %v8098_v54 = vsel %vm4385_vm3, %v8066_v1, %v10598_v8  ;;  %v14863_v8 = vsel %vm17061_vm5, %v6637_v48, %v6639_v44  ;;  %v10612_v63 = vunpack.i.l.bf16 %v14744_v21  ;;  %vm17074_vm5 = vmmov %vm17065_vm1 }
 0xfd5   : > { %v14837_v33 = vpop.permute.xlu1 %10620  ;;  %v14839_v9 = vpop.permute.xlu2 %10660  ;;  %v8129_v2 = vpack.c.bf16 %v8098_v54, %v8097_v5  ;;  %v10844_v45 = vpack.i.bf16 %v14863_v8, %v7071_v35  ;;  %vm17063_vm9 = vnez %v17062_v17  ;;  %v14876_v19 = vsel %vm17065_vm1, %v17064_v60, %v10588_v34  ;;  %v17083_v17 = vld [vmem:[#allocation71_spill] sm:$0xff] }
 0xfd6   : > { %10825 = vrot.lane.b32.xlu0 %v10824_v38, %s16988_s16  ;;  %v6964_v42 = vsel %vm17063_vm9, %v14719_v6, 0.0  ;;  %v7907_v48 = vsel %vm17066_vm2, %v6762_v32, %v10543_v53  ;;  %v17068_v6 = vld [vmem:[#allocation35_spill] sm:$0xff]  ;;  %v10603_v47 = vunpack.i.h.bf16 %v14796_v10  ;;  %v6641_v35 = vrot.slane %v14784_v55, 7  ;;  %s17149_s16 = sld [smem:[#allocation13_spill]] }
 0xfd7   : > { %8296 = vmatmul.bf16.gmra.mxu1 %v8129_v2  ;;  %vm17069_vm4 = vnez %v17068_v6  ;;  %v7939_v30 = vsel %vm17070_vm14, %v7907_v48, %v10573_v40  ;;  %v10849_v54 = vpack.i.bf16 %v14820_v15, %v6964_v42  ;;  %v6828_v2 = vrot.slane %v14876_v19, 1 }
 0xfd8   : > { %v10616_v36 = vpop.permute.xlu0 %10615  ;;  %v7002_v5 = vsel %vm17069_vm4, %v14848_v0, 0.0  ;;  %v10602_v53 = vunpack.i.l.bf16 %v14796_v10  ;;  %vm17075_vm1 = vcmask 523264  }
 0xfd9   : > { %v10618_v24 = vunpack.i.h.bf16 %v10616_v36  ;;  %v10617_v61 = vunpack.i.l.bf16 %v10616_v36  ;;  %v17073_v36 = vld [vmem:[#allocation72_spill] sm:$0xff]  ;;  %vm17076_vm2 = vmmov %vm17075_vm1 }
 0xfdb   : > { %10830 = vrot.lane.b32.xlu2 %v10829_v14, %s16950_s1  ;;  %v7971_v31 = vsel %vm17072_vm10, %v7939_v30, %v10617_v61  ;;  %v10859_v61 = vpack.i.bf16 %v14784_v55, %v14775_v41  ;;  %vm17080_vm10 = vcmask 654336  }
 0xfdc   : > { %10840 = vrot.lane.b32.xlu1 %v10834_v7, %s17036_s0  ;;  %v7940_v7 = vsel %vm17067_vm11, %v7908_v43, %v10612_v63  ;;  %v10854_v43 = vpack.i.bf16 %v14863_v8, %v7002_v5  ;;  %v10632_v63 = vunpack.i.l.bf16 %v14760_v4  ;;  %v8003_v42 = vsel %vm17076_vm2, %v7971_v31, %v10602_v53 }
 0xfdd   : > { %v10626_v1 = vpop.permute.xlu1 %10625  ;;  %v14878_v25 = vpop.permute.xlu2 %10665  ;;  %v7972_v23 = vsel %vm17071_vm12, %v7940_v7, %v10618_v24  ;;  %v10633_v24 = vunpack.i.h.bf16 %v14760_v4  ;;  %vm17077_vm11 = vcmask 1046528   ;;  %vm17079_vm12 = vcmask 1040384  }
 0xfde   : > { %v10627_v38 = vunpack.i.l.bf16 %v10626_v1  ;;  %10845 = vrot.lane.b32.xlu0 %v10844_v45, %s16960_s12  ;;  %v8004_v45 = vsel %vm17075_vm1, %v7972_v23, %v10603_v47  ;;  %v10628_v48 = vunpack.i.h.bf16 %v10626_v1  ;;  %v10667_v7 = vunpack.i.l.bf16 %v14878_v25  ;;  %vm17078_vm14 = vmmov %vm17077_vm11 }
 0xfdf   : > { %v14917_v4 = vsel %vm17078_vm14, %v6826_v59, %v6828_v2  ;;  %v7040_v23 = vsel %vm17063_vm9, %v14811_v39, 0.0  ;;  %v8035_v59 = vsel %vm17080_vm10, %v8003_v42, %v10632_v63  ;;  %vm17082_vm1 = vcmask 130048  }
 0xfe0   : > { %v14894_v34 = vsel %vm17074_vm5, %v17073_v36, %v10627_v38  ;;  %v10646_v14 = vpop.permute.xlu0 %10645  ;;  %v6643_v38 = vrot.slane %v14876_v19, 7  ;;  %vm17081_vm5 = vmmov %vm17080_vm10  ;;  %v10583_v36 = vunpack.i.h.bf16 %v14749_v56  ;;  %v10864_v42 = vpack.i.bf16 %v7040_v23, %v14820_v15 }
 0xfe1   : > { %v6830_v40 = vrot.slane %v14894_v34, 1  ;;  %v10648_v32 = vunpack.i.h.bf16 %v10646_v14  ;;  %v10647_v60 = vunpack.i.l.bf16 %v10646_v14  ;;  %v6764_v15 = vsel %vm16979_vm0, %v14416_v28, 0.0  ;;  %vm17088_vm14 = vmmov %vm17082_vm1  ;;  %v17090_v28 = vld [vmem:[#allocation36_spill] sm:$0xff] }
 0xfe2   : > { %v7909_v23 = vsel %vm17088_vm14, %v6764_v15, %v10583_v36  ;;  %vm17091_vm0 = vnez %v17090_v28  ;;  %vm17092_vm10 = vcmask 1046528  }
 0xfe3   : > { %10850 = vrot.lane.b32.xlu2 %v10849_v54, %s16998_s18  ;;  %v14910_v10 = vsel %vm17077_vm11, %v6828_v2, %v6830_v40  ;;  %v14930_v54 = vsel %vm17079_vm12, %v6639_v44, %v6641_v35  ;;  %v8036_v2 = vsel %vm17081_vm5, %v8004_v45, %v10633_v24  ;;  %v8067_v14 = vsel %vm4382_vm8, %v8035_v59, %v10647_v60  ;;  %vm17087_vm11 = vmmov %vm17079_vm12 }
 0xfe4   : > { %10860 = vrot.lane.b32.xlu1 %v10859_v61, %s11158_s2  ;;  %v7105_v41 = vsel %vm17063_vm9, %v14910_v10, 0.0  ;;  %v8068_v53 = vsel %vm4382_vm8, %v8036_v2, %v10648_v32  ;;  %vm17084_vm9 = vcmask 64512   ;;  %v17085_v61 = vld [vmem:[#allocation70_spill] sm:$0xff]  ;;  %v14953_v32 = vsel %vm17087_vm11, %v6641_v35, %v6643_v38  ;;  %vm17089_vm12 = vmmov %vm17082_vm1 }
 0xfe5   : > { %v10636_v5 = vpop.permute.xlu1 %10635  ;;  %v14923_v30 = vpop.permute.xlu2 %10670  ;;  %v8144_v1 = vpack.c.bf16 %v7105_v41, %v14917_v4  ;;  %v14941_v44 = vsel %vm17084_vm9, %v17083_v17, %v10628_v48  ;;  %vm17086_vm2 = vmmov %vm17084_vm9  ;;  %v7073_v60 = vsel %vm17069_vm4, %v14930_v54, 0.0  ;;  %v10622_v48 = vunpack.i.l.bf16 %v14837_v33 }
 0xfe6   : > { %v10638_v47 = vunpack.i.h.bf16 %v10636_v5  ;;  %v10637_v31 = vunpack.i.l.bf16 %v10636_v5  ;;  %10855 = vrot.lane.b32.xlu0 %v10854_v43, %s17007_s22  ;;  %v14945_v63 = vsel %vm17086_vm2, %v17085_v61, %v10667_v7  ;;  %v10869_v7 = vpack.i.bf16 %v14876_v19, %v14784_v55  ;;  %vm17099_vm14 = vmmov %vm17092_vm10 }
 0xfe7   : > { %9306 = vmatmul.msk.bf16.gmra.mxu2 %vm17082_vm1, %v8144_v1  ;;  %v6832_v41 = vrot.slane %v14941_v44, 1  ;;  %v6834_v5 = vrot.slane %v14945_v63, 1  ;;  %v10879_v35 = vpack.i.bf16 %v14953_v32, %v7073_v60  ;;  %v10613_v1 = vunpack.i.h.bf16 %v14744_v21 }
 0xfe8   : > { %v10656_v24 = vpop.permute.xlu0 %10655  ;;  %v8099_v45 = vsel %vm4385_vm3, %v8067_v14, %v10637_v31  ;;  %v8100_v43 = vsel %vm4385_vm3, %v8068_v53, %v10638_v47  ;;  %v7910_v2 = vsel %vm17089_vm12, %v14430_v52, %v10622_v48  ;;  %v6966_v51 = vsel %vm17091_vm0, %v14811_v39, 0.0  ;;  %v17095_v39 = vld [vmem:[#allocation37_spill] sm:$0xff] }
 0xfe9   : > { %v8131_v56 = vpack.c.bf16 %v8100_v43, %v8099_v45  ;;  %v10658_v47 = vunpack.i.h.bf16 %v10656_v24  ;;  %v10657_v31 = vunpack.i.l.bf16 %v10656_v24  ;;  %v10652_v14 = vunpack.i.l.bf16 %v14798_v37 }
 0xfea   : > { %v14983_v36 = vsel %vm17092_vm10, %v6832_v41, %v6834_v5  ;;  %vm17093_vm5 = vcmask 261120   ;;  %v6645_v61 = vrot.slane %v14894_v34, 7  ;;  %v10884_v45 = vpack.i.bf16 %v14917_v4, %v6966_v51 }
 0xfeb   : > { %8301 = vmatmul.bf16.gmra.mxu1 %v8131_v56  ;;  %10865 = vrot.lane.b32.xlu2 %v10864_v42, %s16950_s1  ;;  %v7941_v17 = vsel %vm17093_vm5, %v7909_v23, %v10613_v1  ;;  %vm17094_vm1 = vmmov %vm17093_vm5  ;;  %vm17096_vm9 = vnez %v17095_v39  ;;  %vm17097_vm2 = vcmask 392192   ;;  %v14997_v60 = vsel %vm17099_vm14, %v6830_v40, %v6832_v41 }
 0xfec   : > { %10870 = vrot.lane.b32.xlu1 %v10869_v7, %s16980_s28  ;;  %v7942_v24 = vsel %vm17094_vm1, %v7910_v2, %v10652_v14  ;;  %v7004_v43 = vsel %vm17096_vm9, %v14930_v54, 0.0  ;;  %vm17098_vm11 = vmmov %vm17097_vm2  ;;  %v7107_v48 = vsel %vm17091_vm0, %v14983_v36, 0.0  ;;  %vm17100_vm12 = vcmask 523264  }
 0xfed   : > { %v10641_v55 = vpop.permute.xlu1 %10640  ;;  %v14971_v59 = vpop.permute.xlu2 %10690  ;;  %v7974_v56 = vsel %vm17097_vm2, %v7942_v24, %v10658_v47  ;;  %v7973_v42 = vsel %vm17098_vm11, %v7941_v17, %v10657_v31  ;;  %vm17101_vm10 = vmmov %vm17100_vm12  ;;  %v10672_v2 = vunpack.i.l.bf16 %v14923_v30  ;;  %v10889_v40 = vpack.i.bf16 %v14953_v32, %v7004_v43 }
 0xfee   : > { %10880 = vrot.lane.b32.xlu0 %v10879_v35, %s16960_s12  ;;  %v10643_v53 = vunpack.i.h.bf16 %v10641_v55  ;;  %v10642_v21 = vunpack.i.l.bf16 %v10641_v55  ;;  %v10673_v55 = vunpack.i.h.bf16 %v14923_v30  ;;  %v6647_v41 = vrot.slane %v14941_v44, 7 }
 0xfef   : > { %v8146_v51 = vpack.c.bf16 %v7107_v48, %v14997_v60  ;;  %vm17102_vm5 = vcmask 1040384   ;;  %vm17103_vm1 = vcmask 654336   ;;  %vm17105_vm11 = vcmask 130048  }
 0xff0   : > { %v10686_v52 = vpop.permute.xlu0 %10685  ;;  %v8006_v15 = vsel %vm17100_vm12, %v7974_v56, %v10643_v53  ;;  %v8005_v35 = vsel %vm17101_vm10, %v7973_v42, %v10642_v21  ;;  %v15016_v14 = vsel %vm17102_vm5, %v6643_v38, %v6645_v61  ;;  %vm17104_vm2 = vmmov %vm17103_vm1  ;;  %v10894_v56 = vpack.i.bf16 %v14894_v34, %v14876_v19 }
 0xff1   : > { %v10688_v1 = vunpack.i.h.bf16 %v10686_v52  ;;  %v10687_v23 = vunpack.i.l.bf16 %v10686_v52  ;;  %v8037_v53 = vsel %vm17103_vm1, %v8005_v35, %v10672_v2  ;;  %v8038_v30 = vsel %vm17104_vm2, %v8006_v15, %v10673_v55  ;;  %vm17106_vm14 = vmmov %vm17102_vm5  ;;  %v17107_v55 = vld [vmem:[#allocation38_spill] sm:$0xff] }
 0xff2   : > { %v15031_v42 = vsel %vm17106_vm14, %v6645_v61, %v6647_v41  ;;  %v7075_v48 = vsel %vm17096_vm9, %v15016_v14, 0.0  ;;  %v10904_v15 = vpack.i.bf16 %v14941_v44, %v14894_v34  ;;  %v7042_v61 = vsel %vm17091_vm0, %v14910_v10, 0.0  ;;  %vm17113_vm5 = vmmov %vm17105_vm11 }
 0xff3   : > { %10885 = vrot.lane.b32.xlu2 %v10884_v45, %s16998_s18  ;;  %v8069_v17 = vsel %vm4382_vm8, %v8037_v53, %v10687_v23  ;;  %v8070_v52 = vsel %vm4382_vm8, %v8038_v30, %v10688_v1  ;;  %v10914_v35 = vpack.i.bf16 %v15031_v42, %v7075_v48  ;;  %v10899_v34 = vpack.i.bf16 %v7042_v61, %v14917_v4  ;;  %v17109_v30 = vld [vmem:[#allocation69_spill] sm:$0xff] }
 0xff4   : > { %10875 = vrot.lane.b32.xlu1 %v10869_v7, %s17036_s0  ;;  %vm17108_vm12 = vnez %v17107_v55  ;;  %vm17110_vm0 = vcmask 64512   ;;  %v6649_v48 = vrot.slane %v14945_v63, 7  ;;  %vm17117_vm2 = vcmask 261120  }
 0xff5   : > { %v10676_v47 = vpop.permute.xlu1 %10675  ;;  %v15010_v31 = vpop.permute.xlu2 %10710  ;;  %v7006_v2 = vsel %vm17108_vm12, %v15016_v14, 0.0  ;;  %vm17116_vm1 = vmmov %vm17110_vm0  ;;  %vm17119_vm14 = vcmask 1046528  }
 0xff6   : > { %v10678_v21 = vunpack.i.h.bf16 %v10676_v47  ;;  %v10677_v7 = vunpack.i.l.bf16 %v10676_v47  ;;  %10890 = vrot.lane.b32.xlu0 %v10889_v40, %s17007_s22  ;;  %v10668_v40 = vunpack.i.h.bf16 %v14878_v25  ;;  %v10623_v47 = vunpack.i.h.bf16 %v14837_v33  ;;  %v17111_v25 = vld [vmem:[#allocation39_spill] sm:$0xff] }
 0xff7   : > { %9307 = vmatmul.msk.bf16.gmra.mxu2 %vm17105_vm11, %v8146_v51  ;;  %v10924_v51 = vpack.i.bf16 %v15031_v42, %v7006_v2  ;;  %vm17112_vm10 = vnez %v17111_v25  ;;  %v6766_v33 = vsel %vm16987_vm7, %v14450_v26, 0.0  ;;  %vm17114_vm7 = vmmov %vm17113_vm5 }
 0xff8   : > { %v10696_v24 = vpop.permute.xlu0 %10695  ;;  %v8101_v45 = vsel %vm4385_vm3, %v8069_v17, %v10677_v7  ;;  %v8102_v38 = vsel %vm4385_vm3, %v8070_v52, %v10678_v21  ;;  %v15064_v4 = vsel %vm17110_vm0, %v17109_v30, %v10668_v40  ;;  %v6968_v21 = vsel %vm17112_vm10, %v14910_v10, 0.0  ;;  %vm17118_vm11 = vmmov %vm17117_vm2 }
 0xff9   : > { %v8133_v43 = vpack.c.bf16 %v8102_v38, %v8101_v45  ;;  %v10662_v7 = vunpack.i.l.bf16 %v14839_v9  ;;  %v10653_v17 = vunpack.i.h.bf16 %v14798_v37  ;;  %v7911_v52 = vsel %vm17113_vm5, %v6766_v33, %v10623_v47 }
 0xffa   : > { %v6836_v38 = vrot.slane %v15064_v4, 1  ;;  %v10919_v10 = vpack.i.bf16 %v14997_v60, %v6968_v21  ;;  %v10698_v62 = vunpack.i.h.bf16 %v10696_v24  ;;  %v10697_v26 = vunpack.i.l.bf16 %v10696_v24 }
 0xffb   : > { %8306 = vmatmul.bf16.gmra.mxu1 %v8133_v43  ;;  %10895 = vrot.lane.b32.xlu2 %v10894_v56, %s11158_s2  ;;  %v10692_v43 = vunpack.i.l.bf16 %v14971_v59  ;;  %v7912_v37 = vsel %vm17114_vm7, %v14455_v27, %v10662_v7  ;;  %v6651_v40 = vrot.slane %v15064_v4, 7  ;;  %v10929_v24 = vpack.i.bf16 %v14945_v63, %v14941_v44 }
 0xffc   : > { %10905 = vrot.lane.b32.xlu1 %v10904_v15, %s16980_s28  ;;  %v7044_v27 = vsel %vm17112_vm10, %v14983_v36, 0.0  ;;  %v15109_v33 = vsel %vm17119_vm14, %v6834_v5, %v6836_v38  ;;  %vm17120_vm0 = vcmask 392192   ;;  %vm17122_vm7 = vcmask 1040384  }
 0xffd   : > { %v10681_v19 = vpop.permute.xlu1 %10680  ;;  %v15041_v1 = vpop.permute.xlu2 %10730  ;;  %vm17121_vm5 = vmmov %vm17120_vm0  ;;  %v10934_v5 = vpack.i.bf16 %v7044_v27, %v14997_v60 }
 0xffe   : > { %10915 = vrot.lane.b32.xlu0 %v10914_v35, %s16960_s12  ;;  %v10683_v35 = vunpack.i.h.bf16 %v10681_v19  ;;  %v10682_v61 = vunpack.i.l.bf16 %v10681_v19  ;;  %v7944_v19 = vsel %vm17117_vm2, %v7912_v37, %v10692_v43  ;;  %v15117_v43 = vsel %vm17122_vm7, %v6647_v41, %v6649_v48 }
 0xfff   : > { %v7077_v60 = vsel %vm17108_vm12, %v15117_v43, 0.0 }
0x1000   : > { %v15047_v23 = vpop.permute.xlu0 %10700 }
0x1003   : > { %10900 = vrot.lane.b32.xlu2 %v10899_v34, %s16950_s1  ;;  %v17115_v34 = vld [vmem:[#allocation68_spill] sm:$0xff] }
0x1004   : > { %10910 = vrot.lane.b32.xlu1 %v10904_v15, %s17036_s0  ;;  %v10939_v15 = vpack.i.bf16 %v15064_v4, %v14945_v63 }
0x1005   : > { %v15058_v28 = vpop.permute.xlu1 %10715  ;;  %v15060_v53 = vpop.permute.xlu2 %10750 }
0x1006   : > { %10925 = vrot.lane.b32.xlu0 %v10924_v51, %s17007_s22  ;;  %v7943_v51 = vsel %vm17118_vm11, %v7911_v52, %v10653_v17  ;;  %vm17125_vm11 = vmmov %vm17119_vm14 }
0x1007   : > { %v7975_v7 = vsel %vm17120_vm0, %v7943_v51, %v10697_v26  ;;  %vm17126_vm14 = vmmov %vm17122_vm7  ;;  %vm17127_vm0 = vcmask 654336  }
0x1008   : > { %v15076_v45 = vpop.permute.xlu0 %10705  ;;  %v15135_v41 = vsel %vm17126_vm14, %v6649_v48, %v6651_v40 }
0x1009   : > { %v10707_v56 = vunpack.i.l.bf16 %v15076_v45  ;;  %v10949_v27 = vpack.i.bf16 %v15135_v41, %v7077_v60 }
0x100b   : > { %v15089_v2 = vsel %vm17116_vm1, %v17115_v34, %v10707_v56  ;;  %10920 = vrot.lane.b32.xlu2 %v10919_v10, %s16998_s18  ;;  %v7976_v56 = vsel %vm17121_vm5, %v7944_v19, %v10698_v62  ;;  %vm17123_vm1 = vcmask 523264   ;;  %v10713_v10 = vunpack.i.h.bf16 %v15010_v31 }
0x100c   : > { %v6838_v47 = vrot.slane %v15089_v2, 1  ;;  %10940 = vrot.lane.b32.xlu1 %v10939_v15, %s16980_s28  ;;  %v8007_v17 = vsel %vm17123_vm1, %v7975_v7, %v10682_v61  ;;  %vm17124_vm2 = vmmov %vm17123_vm1  ;;  %v10712_v62 = vunpack.i.l.bf16 %v15010_v31  ;;  %v10718_v31 = vunpack.i.h.bf16 %v15058_v28 }
0x100d   : > { %v15102_v30 = vpop.permute.xlu1 %10720  ;;  %v15104_v21 = vpop.permute.xlu2 %10770  ;;  %v8008_v52 = vsel %vm17124_vm2, %v7976_v56, %v10683_v35  ;;  %v10717_v61 = vunpack.i.l.bf16 %v15058_v28  ;;  %vm17129_vm5 = vcmask 130048   ;;  %v6653_v60 = vrot.slane %v15089_v2, 7 }
0x100e   : > { %10930 = vrot.lane.b32.xlu0 %v10929_v24, %s11158_s2  ;;  %v15124_v63 = vsel %vm17125_vm11, %v6836_v38, %v6838_v47  ;;  %v8039_v25 = vsel %vm17127_vm0, %v8007_v17, %v10712_v62  ;;  %v10702_v17 = vunpack.i.l.bf16 %v15047_v23  ;;  %v10663_v62 = vunpack.i.h.bf16 %v14839_v9  ;;  %vm17134_vm2 = vmmov %vm17129_vm5 }
0x100f   : > { %v7109_v44 = vsel %vm17112_vm10, %v15124_v63, 0.0  ;;  %vm17128_vm10 = vmmov %vm17127_vm0  ;;  %vm17136_vm11 = vcmask 64512   ;;  %v10693_v9 = vunpack.i.h.bf16 %v14971_v59  ;;  %vm17138_vm0 = vcmask 261120  }
0x1010   : > { %v10726_v26 = vpop.permute.xlu0 %10725  ;;  %v8148_v38 = vpack.c.bf16 %v7109_v44, %v15109_v33  ;;  %v8040_v34 = vsel %vm17128_vm10, %v8008_v52, %v10713_v10  ;;  %v10708_v52 = vunpack.i.h.bf16 %v15076_v45  ;;  %v17132_v44 = vld [vmem:[#allocation41_spill] sm:$0xff]  ;;  %v17135_v45 = vld [vmem:[#allocation67_spill] sm:$0xff]  ;;  %vm17137_vm14 = vmmov %vm17134_vm2 }
0x1011   : > { %v10728_v37 = vunpack.i.h.bf16 %v10726_v26  ;;  %v10727_v35 = vunpack.i.l.bf16 %v10726_v26  ;;  %vm17133_vm1 = vnez %v17132_v44  ;;  %vm17140_vm10 = vmmov %vm17138_vm0 }
0x1012   : > { %9308 = vmatmul.msk.bf16.gmra.mxu2 %vm17129_vm5, %v8148_v38  ;;  %v15172_v38 = vsel %vm17136_vm11, %v17135_v45, %v10708_v52  ;;  %v10753_v52 = vunpack.i.h.bf16 %v15060_v53  ;;  %vm17141_vm5 = vcmask 392192  }
0x1013   : > { %v8072_v24 = vsel %vm4382_vm8, %v8040_v34, %v10728_v37  ;;  %v8071_v48 = vsel %vm4382_vm8, %v8039_v25, %v10727_v35  ;;  %10935 = vrot.lane.b32.xlu2 %v10934_v5, %s16950_s1  ;;  %v17130_v5 = vld [vmem:[#allocation40_spill] sm:$0xff]  ;;  %v7008_v37 = vsel %vm17133_vm1, %v15117_v43, 0.0  ;;  %v7914_v35 = vsel %vm17134_vm2, %v14507_v58, %v10702_v17  ;;  %vm17142_vm2 = vmmov %vm17141_vm5 }
0x1014   : > { %10945 = vrot.lane.b32.xlu1 %v10939_v15, %s17036_s0  ;;  %v8103_v19 = vsel %vm4385_vm3, %v8071_v48, %v10717_v61  ;;  %v8104_v28 = vsel %vm4385_vm3, %v8072_v24, %v10718_v31  ;;  %vm17131_vm7 = vnez %v17130_v5  ;;  %v10732_v31 = vunpack.i.l.bf16 %v15041_v1 }
0x1015   : > { %v15153_v51 = vpop.permute.xlu1 %10740  ;;  %v15155_v7 = vpop.permute.xlu2 %10780  ;;  %v8135_v56 = vpack.c.bf16 %v8104_v28, %v8103_v19  ;;  %v6970_v15 = vsel %vm17131_vm7, %v14983_v36, 0.0  ;;  %v10964_v36 = vpack.i.bf16 %v15089_v2, %v15064_v4  ;;  %v6768_v58 = vsel %vm17006_vm13, %v14496_v16, 0.0 }
0x1016   : > { %10950 = vrot.lane.b32.xlu0 %v10949_v27, %s16960_s12  ;;  %v10954_v26 = vpack.i.bf16 %v15109_v33, %v6970_v15  ;;  %v10959_v34 = vpack.i.bf16 %v15135_v41, %v7008_v37  ;;  %v7913_v24 = vsel %vm17137_vm14, %v6768_v58, %v10663_v62  ;;  %v6655_v48 = vrot.slane %v15172_v38, 7  ;;  %v17143_v37 = vld [vmem:[#allocation66_spill] sm:$0xff] }
0x1017   : > { %8311 = vmatmul.bf16.gmra.mxu1 %v8135_v56  ;;  %v7946_v59 = vsel %vm17138_vm0, %v7914_v35, %v10732_v31  ;;  %v6840_v28 = vrot.slane %v15172_v38, 1  ;;  %v7046_v16 = vsel %vm17131_vm7, %v15124_v63, 0.0  ;;  %vm17139_vm13 = vcmask 1040384  }
0x1018   : > { %v10736_v10 = vpop.permute.xlu0 %10735  ;;  %v15198_v57 = vsel %vm17139_vm13, %v6651_v40, %v6653_v60  ;;  %v7945_v17 = vsel %vm17140_vm10, %v7913_v24, %v10693_v9  ;;  %v10722_v62 = vunpack.i.l.bf16 %v15102_v30  ;;  %v10969_v45 = vpack.i.bf16 %v7046_v16, %v15109_v33  ;;  %vm17144_vm14 = vmmov %vm17139_vm13 }
0x1019   : > { %v10738_v61 = vunpack.i.h.bf16 %v10736_v10  ;;  %v10737_v25 = vunpack.i.l.bf16 %v10736_v10  ;;  %v10723_v10 = vunpack.i.h.bf16 %v15102_v30  ;;  %v7079_v30 = vsel %vm17133_vm1, %v15198_v57, 0.0 }
0x101a   : > { %v10752_v9 = vunpack.i.l.bf16 %v15060_v53  ;;  %vm17145_vm0 = vcmask 523264   ;;  %vm17146_vm13 = vcmask 1046528  }
0x101b   : > { %10955 = vrot.lane.b32.xlu2 %v10954_v26, %s16998_s18  ;;  %v7978_v15 = vsel %vm17141_vm5, %v7946_v59, %v10738_v61  ;;  %v7977_v26 = vsel %vm17142_vm2, %v7945_v17, %v10737_v25  ;;  %v10974_v61 = vpack.i.bf16 %v15172_v38, %v15089_v2  ;;  %v15227_v33 = vsel %vm17146_vm13, %v6838_v47, %v6840_v28  ;;  %vm17147_vm10 = vmmov %vm17145_vm0 }
0x101c   : > { %10965 = vrot.lane.b32.xlu1 %v10964_v36, %s11158_s2  ;;  %v15215_v36 = vsel %vm17144_vm14, %v6653_v60, %v6655_v48  ;;  %v8010_v31 = vsel %vm17145_vm0, %v7978_v15, %v10723_v10  ;;  %v8009_v58 = vsel %vm17147_vm10, %v7977_v26, %v10722_v62  ;;  %vm17148_vm5 = vmmov %vm17146_vm13  ;;  %vm17156_vm0 = vcmask 64512  }
0x101d   : > { %v10746_v27 = vpop.permute.xlu1 %10745  ;;  %v15188_v19 = vpop.permute.xlu2 %10785  ;;  %v10984_v47 = vpack.i.bf16 %v15215_v36, %v7079_v30  ;;  %vm17158_vm13 = vmmov %vm17156_vm0 }
0x101e   : > { %v10747_v56 = vunpack.i.l.bf16 %v10746_v27  ;;  %10960 = vrot.lane.b32.xlu0 %v10959_v34, %s17007_s22  ;;  %v10748_v34 = vunpack.i.h.bf16 %v10746_v27  ;;  %v10787_v24 = vunpack.i.l.bf16 %v15188_v19 }
0x1020   : > { %v15208_v35 = vsel %vm17136_vm11, %v17143_v37, %v10747_v56  ;;  %v10766_v4 = vpop.permute.xlu0 %10765  ;;  %vm17152_vm11 = vcmask 654336   ;;  %v17155_v37 = vld [vmem:[#allocation64_spill] sm:$0xff] }
0x1021   : > { %v6842_v40 = vrot.slane %v15208_v35, 1  ;;  %v10768_v60 = vunpack.i.h.bf16 %v10766_v4  ;;  %v10767_v25 = vunpack.i.l.bf16 %v10766_v4  ;;  %v8041_v17 = vsel %vm17152_vm11, %v8009_v58, %v10752_v9  ;;  %vm17153_vm14 = vmmov %vm17152_vm11 }
0x1022   : > { %v8042_v15 = vsel %vm17153_vm14, %v8010_v31, %v10753_v52  ;;  %v15256_v4 = vsel %vm17156_vm0, %v17155_v37, %v10748_v34  ;;  %v8509_v31 = vld [vmem:[%s17149_s16] sm:$0xf]  ;;  %v6657_v34 = vrot.slane %v15208_v35, 7  ;;  %vm17162_vm11 = vcmask 1040384   ;;  %s17174_s16 = sld [smem:[#allocation12_spill]] }
0x1023   : > { %10970 = vrot.lane.b32.xlu2 %v10969_v45, %s16950_s1  ;;  %v15234_v53 = vsel %vm17148_vm5, %v6840_v28, %v6842_v40  ;;  %v17150_v28 = vld [vmem:[#allocation42_spill] sm:$0xff]  ;;  %v8073_v5 = vsel %vm4382_vm8, %v8041_v17, %v10767_v25  ;;  %v8074_v26 = vsel %vm4382_vm8, %v8042_v15, %v10768_v60  ;;  %v17157_v45 = vld [vmem:[#allocation63_spill] sm:$0xff]  ;;  %vm17161_vm5 = vcmask 1043456   ;;  %v15278_v15 = vpop.f32.mrf.mxu2  ;;  %vm17166_vm0 = vmmov %vm17162_vm11 }
0x1024   : > { %10975 = vrot.lane.b32.xlu1 %v10974_v61, %s16980_s28  ;;  %v7111_v2 = vsel %vm17131_vm7, %v15234_v53, 0.0  ;;  %vm17151_vm2 = vnez %v17150_v28  ;;  %vm17154_vm7 = vcmask 130048   ;;  %v17159_v60 = vld [vmem:[#allocation43_spill] sm:$0xff]  ;;  %v10742_v17 = vunpack.i.l.bf16 %v15153_v51 }
0x1025   : > { %v10756_v59 = vpop.permute.xlu1 %10755  ;;  %v15242_v56 = vpop.permute.xlu2 %10790  ;;  %v8150_v16 = vpack.c.bf16 %v7111_v2, %v15227_v33  ;;  %v6972_v27 = vsel %vm17151_vm2, %v15124_v63, 0.0  ;;  %v15260_v63 = vsel %vm17158_vm13, %v17157_v45, %v10787_v24  ;;  %vm17160_vm10 = vnez %v17159_v60  ;;  %vm17163_vm14 = vmmov %vm17154_vm7 }
0x1026   : > { %v10758_v10 = vunpack.i.h.bf16 %v10756_v59  ;;  %v10757_v62 = vunpack.i.l.bf16 %v10756_v59  ;;  %10985 = vrot.lane.b32.xlu0 %v10984_v47, %s16960_s12  ;;  %v10989_v25 = vpack.i.bf16 %v15227_v33, %v6972_v27  ;;  %v7010_v2 = vsel %vm17160_vm10, %v15198_v57, 0.0 }
0x1027   : > { %9309 = vmatmul.msk.bf16.gmra.mxu2 %vm17154_vm7, %v8150_v16  ;;  %v10703_v47 = vunpack.i.h.bf16 %v15047_v23  ;;  %v6844_v24 = vrot.slane %v15256_v4, 1  ;;  %v6846_v59 = vrot.slane %v15260_v63, 1  ;;  %v8563_v16 = vsel %vm17161_vm5, %v8509_v31, 0 }
0x1028   : > { %v10776_v30 = vpop.permute.xlu0 %10775  ;;  %v8105_v52 = vsel %vm4385_vm3, %v8073_v5, %v10757_v62  ;;  %v8106_v9 = vsel %vm4385_vm3, %v8074_v26, %v10758_v10  ;;  %v10994_v27 = vpack.i.bf16 %v15215_v36, %v7010_v2  ;;  %8572 = vmatpush.bf16.msra.mxu0 %v8563_v16  ;;  %v6659_v23 = vrot.slane %v15256_v4, 7 }
0x1029   : > { %v8137_v58 = vpack.c.bf16 %v8106_v9, %v8105_v52  ;;  %v6770_v62 = vsel %vm17023_vm15, %v14584_v50, 0.0  ;;  %v10733_v26 = vunpack.i.h.bf16 %v15041_v1  ;;  %v10777_v45 = vunpack.i.l.bf16 %v10776_v30  ;;  %vm17165_vm15 = vmmov %vm17163_vm14 }
0x102a   : > { %v7915_v37 = vsel %vm17163_vm14, %v6770_v62, %v10703_v47  ;;  %vm17164_vm7 = vcmask 1046528   ;;  %v10772_v50 = vunpack.i.l.bf16 %v15104_v21  ;;  %v7916_v12 = vsel %vm17165_vm15, %v14595_v46, %v10742_v17 }
0x102b   : > { %8316 = vmatmul.bf16.gmra.mxu1 %v8137_v58  ;;  %10990 = vrot.lane.b32.xlu2 %v10989_v25, %s16998_s18  ;;  %v15297_v52 = vsel %vm17164_vm7, %v6844_v24, %v6846_v59  ;;  %v10778_v9 = vunpack.i.h.bf16 %v10776_v30  ;;  %v10999_v1 = vpack.i.bf16 %v15208_v35, %v15172_v38  ;;  %v15307_v25 = vsel %vm17166_vm0, %v6657_v34, %v6659_v23  ;;  %vm17168_vm5 = vmmov %vm17164_vm7 }
0x102c   : > { %10980 = vrot.lane.b32.xlu1 %v10974_v61, %s17036_s0  ;;  %v15290_v61 = vsel %vm17162_vm11, %v6655_v48, %v6657_v34  ;;  %vm17167_vm13 = vcmask 261120   ;;  %v11009_v46 = vpack.i.bf16 %v15256_v4, %v15208_v35  ;;  %v15318_v30 = vsel %vm17168_vm5, %v6842_v40, %v6844_v24 }
0x102d   : > { %v15281_v10 = vpop.permute.xlu2 %10810  ;;  %v7081_v2 = vsel %vm17160_vm10, %v15290_v61, 0.0  ;;  %v7947_v47 = vsel %vm17167_vm13, %v7915_v37, %v10733_v26  ;;  %v7113_v38 = vsel %vm17151_vm2, %v15297_v52, 0.0  ;;  %vm17169_vm11 = vmmov %vm17167_vm13  ;;  %vm17170_vm14 = vcmask 392192  }
0x102e   : > { %v10761_v5 = vpop.permute.xlu1 %10760  ;;  %10995 = vrot.lane.b32.xlu0 %v10994_v27, %s17007_s22  ;;  %v7948_v34 = vsel %vm17169_vm11, %v7916_v12, %v10772_v50  ;;  %v7979_v16 = vsel %vm17170_vm14, %v7947_v47, %v10777_v45  ;;  %vm17171_vm7 = vmmov %vm17170_vm14  ;;  %vm17172_vm15 = vcmask 523264   ;;  %v11019_v35 = vpack.i.bf16 %v15307_v25, %v7081_v2 }
0x102f   : > { %v10762_v31 = vunpack.i.l.bf16 %v10761_v5  ;;  %v10763_v48 = vunpack.i.h.bf16 %v10761_v5  ;;  %v7980_v17 = vsel %vm17171_vm7, %v7948_v34, %v10778_v9  ;;  %v10792_v40 = vunpack.i.l.bf16 %v15242_v56  ;;  %vm17173_vm0 = vmmov %vm17172_vm15  ;;  %v8383_v9 = vpop.f32.mrf.mxu2  ;;  %v15348_v34 = vld [vmem:[%s17174_s16] ss:$0 sm:$0xff] }
0x1030   : > { %v10806_v58 = vpop.permute.xlu0 %10805  ;;  %v8152_v37 = vpack.c.bf16 %v7113_v38, %v15318_v30  ;;  %v10793_v45 = vunpack.i.h.bf16 %v15242_v56  ;;  %v7048_v12 = vsel %vm17151_vm2, %v15234_v53, 0.0  ;;  %vm17175_vm13 = vcmask 654336  }
0x1031   : > { %v8011_v27 = vsel %vm17172_vm15, %v7979_v16, %v10762_v31  ;;  %v10807_v62 = vunpack.i.l.bf16 %v10806_v58  ;;  %v8012_v24 = vsel %vm17173_vm0, %v7980_v17, %v10763_v48  ;;  %v10808_v5 = vunpack.i.h.bf16 %v10806_v58  ;;  %vm17177_vm11 = vmmov %vm17175_vm13  ;;  %v17178_v17 = vld [vmem:[#allocation45_spill] sm:$0xff] }
0x1032   : > { %v8043_v31 = vsel %vm17175_vm13, %v8011_v27, %v10792_v40  ;;  %vm17176_vm5 = vcmask 130048   ;;  %v8044_v58 = vsel %vm17177_vm11, %v8012_v24, %v10793_v45  ;;  %v11004_v28 = vpack.i.bf16 %v7048_v12, %v15227_v33  ;;  %v17180_v45 = vld [vmem:[#allocation44_spill] sm:$0xff] }
0x1033   : > { %11000 = vrot.lane.b32.xlu2 %v10999_v1, %s11158_s2  ;;  %v8075_v2 = vsel %vm4382_vm8, %v8043_v31, %v10807_v62  ;;  %v8076_v38 = vsel %vm4382_vm8, %v8044_v58, %v10808_v5  ;;  %vm17179_vm2 = vnez %v17178_v17  ;;  %v10788_v24 = vunpack.i.h.bf16 %v15188_v19  ;;  %vm17185_vm0 = vmmov %vm17176_vm5 }
0x1034   : > { %11010 = vrot.lane.b32.xlu1 %v11009_v46, %s16980_s28  ;;  %v7012_v27 = vsel %vm17179_vm2, %v15290_v61, 0.0  ;;  %vm17181_vm14 = vnez %v17180_v45  ;;  %vm17183_vm7 = vcmask 64512   ;;  %vm17184_vm15 = vcmask 1040384  }
0x1035   : > { %v15332_v26 = vpop.permute.xlu2 %10830  ;;  %v11029_v40 = vpack.i.bf16 %v15307_v25, %v7012_v27  ;;  %vm17187_vm13 = vmmov %vm17183_vm7 }
0x1036   : > { %v10796_v50 = vpop.permute.xlu1 %10795  ;;  %11020 = vrot.lane.b32.xlu0 %v11019_v35, %s16960_s12  ;;  %vm17190_vm11 = vmmov %vm17183_vm7 }
0x1037   : > { %v10798_v1 = vunpack.i.h.bf16 %v10796_v50  ;;  %v10797_v48 = vunpack.i.l.bf16 %v10796_v50  ;;  %9310 = vmatmul.msk.bf16.gmra.mxu2 %vm17176_vm5, %v8152_v37  ;;  %v6974_v50 = vsel %vm17181_vm14, %v15234_v53, 0.0  ;;  %v15379_v53 = vpop.f32.mrf.mxu2  ;;  %vm17188_vm5 = vmmov %vm17185_vm0 }
0x1038   : > { %v8292_v47 = vpop.f32.mrf.mxu1  ;;  %v15344_v56 = vpop.permute.xlu0 %10815  ;;  %v11024_v19 = vpack.i.bf16 %v15318_v30, %v6974_v50 }
0x1039   : > { %v8107_v16 = vsel %vm4385_vm3, %v8075_v2, %v10797_v48  ;;  %v8108_v35 = vsel %vm4385_vm3, %v8076_v38, %v10798_v1  ;;  %v8293_v5 = vadd.f32 %v15348_v34, %v8292_v47  ;;  %v17182_v48 = vld [vmem:[#allocation65_spill] sm:$0xff]  ;;  %v6661_v2 = vrot.slane %v15260_v63, 7 }
0x103a   : > { %v8139_v62 = vpack.c.bf16 %v8108_v35, %v8107_v16  ;;  %v15374_v58 = vsel %vm17183_vm7, %v17182_v48, %v10788_v24  ;;  %v10743_v47 = vunpack.i.h.bf16 %v15153_v51  ;;  %v7050_v51 = vsel %vm17181_vm14, %v15297_v52, 0.0 }
0x103b   : > { %11005 = vrot.lane.b32.xlu2 %v11004_v28, %s16950_s1  ;;  %v11034_v28 = vpack.i.bf16 %v15260_v63, %v15256_v4  ;;  %v10818_v4 = vunpack.i.h.bf16 %v15344_v56  ;;  %vm17191_vm7 = vcmask 261120  }
0x103c   : > { %11015 = vrot.lane.b32.xlu1 %v11009_v46, %s17036_s0  ;;  %8321 = vmatmul.bf16.gmra.mxu1 %v8139_v62  ;;  %v8382_v46 = vadd.f32 %v15278_v15, %v8293_v5  ;;  %v6663_v15 = vrot.slane %v15374_v58, 7  ;;  %v10782_v5 = vunpack.i.l.bf16 %v15155_v7 }
0x103d   : > { %v15361_v33 = vpop.permute.xlu2 %10850 }
0x103e   : > { %v10801_v37 = vpop.permute.xlu1 %10800  ;;  %11030 = vrot.lane.b32.xlu0 %v11029_v40, %s17007_s22  ;;  %v8461_v16 = vmax.f32 %v8382_v46, 0.0  ;;  %v15400_v40 = vsel %vm17184_vm15, %v6659_v23, %v6661_v2  ;;  %v6848_v46 = vrot.slane %v15374_v58, 1  ;;  %v10817_v23 = vunpack.i.l.bf16 %v15344_v56 }
0x103f   : > { %v7083_v48 = vsel %vm17179_vm2, %v15400_v40, 0.0 }
0x1040   : > { %v8294_v12 = vpop.f32.mrf.mxu1  ;;  %v15367_v31 = vpop.permute.xlu0 %10820 }
0x1041   : > { %v8295_v1 = vadd.f32 %v15348_v34, %v8294_v12  ;;  %v10812_v12 = vunpack.i.l.bf16 %v15281_v10 }
0x1043   : > { %v8384_v38 = vadd.f32 %v8383_v9, %v8295_v1  ;;  %11025 = vrot.lane.b32.xlu2 %v11024_v19, %s16998_s18  ;;  %v6772_v9 = vsel %vm17039_vm6, %v14628_v29, 0.0  ;;  %v11039_v29 = vpack.i.bf16 %v7050_v51, %v15318_v30  ;;  %vm17186_vm6 = vmmov %vm17184_vm15  ;;  %v10802_v30 = vunpack.i.l.bf16 %v10801_v37 }
0x1044   : > { %7178 = vrot.lane.b32.xlu1 %v15374_v58, %s11158_s2  ;;  %v7917_v24 = vsel %vm17185_vm0, %v6772_v9, %v10743_v47  ;;  %v15410_v1 = vsel %vm17186_vm6, %v6661_v2, %v6663_v15  ;;  %v10773_v47 = vunpack.i.h.bf16 %v15104_v21  ;;  %v7918_v2 = vsel %vm17188_vm5, %v14638_v22, %v10782_v5  ;;  %vm17192_vm15 = vmmov %vm17191_vm7 }
0x1045   : > { %v8462_v27 = vmax.f32 %v8384_v38, 0.0  ;;  %v15386_v35 = vpop.permute.xlu2 %10865  ;;  %v10803_v38 = vunpack.i.h.bf16 %v10801_v37  ;;  %v11054_v37 = vpack.i.bf16 %v15410_v1, %v7083_v48  ;;  %vm17193_vm0 = vcmask 392192  }
0x1046   : > { %v15394_v62 = vpop.permute.xlu1 %10835  ;;  %11035 = vrot.lane.b32.xlu0 %v11034_v28, %s11158_s2  ;;  %v11044_v28 = vpack.i.bf16 %v15374_v58, %v15260_v63  ;;  %v7949_v51 = vsel %vm17192_vm15, %v7917_v24, %v10773_v47  ;;  %vm17194_vm6 = vmmov %vm17193_vm0 }
0x1047   : > { %v8493_v50 = vpack.c.bf16 %v8462_v27, %v8461_v16  ;;  %v17189_v16 = vld [vmem:[#allocation61_spill] sm:$0xff]  ;;  %v7950_v27 = vsel %vm17191_vm7, %v7918_v2, %v10812_v12  ;;  %v7981_v9 = vsel %vm17193_vm0, %v7949_v51, %v10817_v23  ;;  %v17196_v12 = vld [vmem:[#allocation48_spill] sm:$0xff] }
0x1048   : > { %v10826_v3 = vpop.permute.xlu0 %10825  ;;  %v7982_v22 = vsel %vm17194_vm6, %v7950_v27, %v10818_v4  ;;  %vm17197_vm5 = vnez %v17196_v12  ;;  %v17201_v2 = vld [vmem:[#allocation49_spill] sm:$0xff]  ;;  %vm17203_vm6 = vcmask 654336  }
0x1049   : > { %9313 = vmatmul.msk.bf16.vlgmr.msra.gmra.mxu0 %vm17187_vm13, %v8493_v50  ;;  %v10827_v19 = vunpack.i.l.bf16 %v10826_v3  ;;  %vm17195_vm13 = vcmask 1046528   ;;  %v6976_v24 = vsel %vm17197_vm5, %v15297_v52, 0.0  ;;  %v10828_v47 = vunpack.i.h.bf16 %v10826_v3 }
0x104a   : > { %v6849_v50 = vsel %vm17195_vm13, %v6846_v59, %v6848_v46  ;;  %vm17200_vm15 = vmmov %vm17195_vm13  ;;  %v10833_v59 = vunpack.i.h.bf16 %v15332_v26  ;;  %v10832_v52 = vunpack.i.l.bf16 %v15332_v26  ;;  %vm17202_vm0 = vnez %v17201_v2 }
0x104b   : > { %v15425_v56 = vsel %vm17190_vm11, %v17189_v16, %v10827_v19  ;;  %11040 = vrot.lane.b32.xlu2 %v11039_v29, %s16950_s1  ;;  %v15443_v29 = vpop.f32.mrf.mxu2  ;;  %vm17198_vm11 = vcmask 523264   ;;  %v7014_v16 = vsel %vm17202_vm0, %v15400_v40, 0.0  ;;  %vm17204_vm13 = vmmov %vm17203_vm6  ;;  %v10837_v26 = vunpack.i.l.bf16 %v15394_v62 }
0x104c   : > { %v6850_v21 = vrot.slane %v15425_v56, 1  ;;  %11045 = vrot.lane.b32.xlu1 %v11044_v28, %s16980_s28  ;;  %v8013_v19 = vsel %vm17198_vm11, %v7981_v9, %v10802_v30  ;;  %vm17199_vm7 = vmmov %vm17198_vm11  ;;  %v10838_v9 = vunpack.i.h.bf16 %v15394_v62  ;;  %vm17206_vm11 = vcmask 64512  }
0x104d   : > { %v15435_v5 = vpop.permute.xlu2 %10885  ;;  %v8014_v48 = vsel %vm17199_vm7, %v7982_v22, %v10803_v38  ;;  %v11059_v38 = vpack.i.bf16 %v6849_v50, %v6976_v24  ;;  %v8045_v27 = vsel %vm17203_vm6, %v8013_v19, %v10832_v52  ;;  %v17205_v22 = vld [vmem:[#allocation62_spill] sm:$0xff]  ;;  %v6980_v24 = vrot.slane %v15425_v56, 7 }
0x104e   : > { %v15447_v23 = vpop.permute.xlu1 %10840  ;;  %11055 = vrot.lane.b32.xlu0 %v11054_v37, %s16960_s12  ;;  %v15453_v63 = vsel %vm17200_vm15, %v6848_v46, %v6850_v21  ;;  %v8046_v46 = vsel %vm17204_vm13, %v8014_v48, %v10833_v59  ;;  %v15469_v45 = vsel %vm17206_vm11, %v17205_v22, %v10828_v47  ;;  %v10822_v48 = vunpack.i.l.bf16 %v15367_v31 }
0x104f   : > { %v7115_v4 = vsel %vm17181_vm14, %v15453_v63, 0.0  ;;  %vm17207_vm14 = vcmask 130048   ;;  %v11064_v62 = vpack.i.bf16 %v15410_v1, %v7014_v16  ;;  %vm17208_vm7 = vcmask 1040384  }
0x1050   : > { %v10846_v30 = vpop.permute.xlu0 %10845  ;;  %v8154_v3 = vpack.c.bf16 %v7115_v4, %v6849_v50  ;;  %v6981_v16 = vsel %vm17208_vm7, %v6663_v15, %v6980_v24  ;;  %vm17209_vm15 = vmmov %vm17207_vm14  ;;  %vm17213_vm11 = vcmask 261120  }
0x1051   : > { %v10848_v51 = vunpack.i.h.bf16 %v10846_v30  ;;  %v10847_v37 = vunpack.i.l.bf16 %v10846_v30  ;;  %v6982_v30 = vrot.slane %v15469_v45, 7  ;;  %v7920_v22 = vsel %vm17209_vm15, %v14728_v18, %v10822_v48  ;;  %vm17210_vm6 = vmmov %vm17208_vm7 }
0x1052   : > { %9311 = vmatmul.msk.bf16.gmra.mxu2 %vm17207_vm14, %v8154_v3  ;;  %v7085_v15 = vsel %vm17202_vm0, %v6981_v16, 0.0  ;;  %vm17211_vm13 = vmmov %vm17207_vm14  ;;  %v10843_v48 = vunpack.i.h.bf16 %v15447_v23  ;;  %vm17215_vm7 = vcmask 392192  }
0x1053   : > { %v8078_v4 = vsel %vm4382_vm8, %v8046_v46, %v10848_v51  ;;  %v8077_v19 = vsel %vm4382_vm8, %v8045_v27, %v10847_v37  ;;  %11060 = vrot.lane.b32.xlu2 %v11059_v38, %s16998_s18  ;;  %v7052_v38 = vsel %vm17197_vm5, %v15453_v63, 0.0  ;;  %v10783_v27 = vunpack.i.h.bf16 %v15155_v7  ;;  %vm17214_vm14 = vmmov %vm17213_vm11 }
0x1054   : > { %11050 = vrot.lane.b32.xlu1 %v11044_v28, %s17036_s0  ;;  %v8297_v59 = vpop.f32.mrf.mxu1  ;;  %v8109_v47 = vsel %vm4385_vm3, %v8077_v19, %v10837_v26  ;;  %v8110_v52 = vsel %vm4385_vm3, %v8078_v4, %v10838_v9  ;;  %v7018_v28 = vrot.slane %v15469_v45, 1  ;;  %v10813_v37 = vunpack.i.h.bf16 %v15281_v10  ;;  %v15496_v9 = vpop.f32.mrf.mxu2  ;;  %vm17216_vm15 = vmmov %vm17215_vm7 }
0x1055   : > { %v15482_v3 = vpop.permute.xlu2 %10895  ;;  %v8141_v46 = vpack.c.bf16 %v8110_v52, %v8109_v47  ;;  %v6774_v26 = vsel %vm17069_vm4, %v14709_v20, 0.0  ;;  %v10852_v7 = vunpack.i.l.bf16 %v15361_v33  ;;  %v11069_v19 = vpack.i.bf16 %v7052_v38, %v6849_v50 }
0x1056   : > { %v15489_v51 = vpop.permute.xlu1 %10860  ;;  %11065 = vrot.lane.b32.xlu0 %v11064_v62, %s17007_s22  ;;  %v8298_v58 = vadd.f32 %v15348_v34, %v8297_v59  ;;  %v6983_v10 = vsel %vm17210_vm6, %v6980_v24, %v6982_v30  ;;  %v7919_v6 = vsel %vm17211_vm13, %v6774_v26, %v10783_v27  ;;  %v11074_v47 = vpack.i.bf16 %v15469_v45, %v15425_v56 }
0x1057   : > { %8326 = vmatmul.bf16.gmra.mxu1 %v8141_v46  ;;  %vm17212_vm4 = vcmask 1046528   ;;  %v7951_v50 = vsel %vm17213_vm11, %v7919_v6, %v10813_v37  ;;  %v7952_v59 = vsel %vm17214_vm14, %v7920_v22, %v10852_v7  ;;  %v10842_v24 = vunpack.i.l.bf16 %v15447_v23 }
0x1058   : > { %v10856_v4 = vpop.permute.xlu0 %10855  ;;  %v15514_v18 = vsel %vm17212_vm4, %v7018_v28, 0.0  ;;  %v11084_v27 = vpack.i.bf16 %v6983_v10, %v7085_v15  ;;  %v8387_v26 = vadd.f32 %v15379_v53, %v8298_v58  ;;  %vm17217_vm6 = vmmov %vm17212_vm4  ;;  %v10868_v22 = vunpack.i.h.bf16 %v15386_v35 }
0x1059   : > { %v10858_v62 = vunpack.i.h.bf16 %v10856_v4  ;;  %v10857_v20 = vunpack.i.l.bf16 %v10856_v4  ;;  %v7019_v7 = vsel %vm17217_vm6, %v6850_v21, %v7018_v28  ;;  %v7117_v23 = vsel %vm17197_vm5, %v15514_v18, 0.0  ;;  %v17220_v21 = vld [vmem:[#allocation46_spill] sm:$0xff]  ;;  %v17222_v28 = vld [vmem:[#allocation47_spill] sm:$0xff] }
0x105a   : > { %vm17218_vm13 = vcmask 523264   ;;  %v8156_v6 = vpack.c.bf16 %v7117_v23, %v7019_v7  ;;  %vm17221_vm11 = vnez %v17220_v21  ;;  %vm17223_vm5 = vnez %v17222_v28 }
0x105b   : > { %11070 = vrot.lane.b32.xlu2 %v11069_v19, %s16950_s1  ;;  %v7984_v52 = vsel %vm17215_vm7, %v7952_v59, %v10858_v62  ;;  %v7983_v46 = vsel %vm17216_vm15, %v7951_v50, %v10857_v20  ;;  %v10867_v62 = vunpack.i.l.bf16 %v15386_v35  ;;  %vm17219_vm4 = vmmov %vm17218_vm13  ;;  %v6978_v12 = vsel %vm17221_vm11, %v15453_v63, 0.0 }
0x105c   : > { %11075 = vrot.lane.b32.xlu1 %v11074_v47, %s16980_s28  ;;  %v8299_v38 = vpop.f32.mrf.mxu1  ;;  %v8016_v53 = vsel %vm17218_vm13, %v7984_v52, %v10843_v48  ;;  %v8015_v58 = vsel %vm17219_vm4, %v7983_v46, %v10842_v24  ;;  %v7016_v20 = vsel %vm17223_vm5, %v6981_v16, 0.0  ;;  %v8463_v50 = vmax.f32 %v8387_v26, 0.0  ;;  %v8393_v35 = vpop.f32.mrf.mxu2 }
0x105d   : > { %v8300_v37 = vadd.f32 %v15348_v34, %v8299_v38  ;;  %v15526_v4 = vpop.permute.xlu2 %10900  ;;  %vm17224_vm14 = vcmask 654336   ;;  %vm17226_vm15 = vcmask 130048   ;;  %v10823_v52 = vunpack.i.h.bf16 %v15367_v31 }
0x105e   : > { %v10871_v19 = vpop.permute.xlu1 %10870  ;;  %11085 = vrot.lane.b32.xlu0 %v11084_v27, %s16960_s12  ;;  %v8047_v24 = vsel %vm17224_vm14, %v8015_v58, %v10867_v62  ;;  %vm17225_vm7 = vmmov %vm17224_vm14  ;;  %v10862_v26 = vunpack.i.l.bf16 %v15489_v51  ;;  %vm17227_vm6 = vcmask 64512  }
0x105f   : > { %v8389_v15 = vadd.f32 %v15443_v29, %v8300_v37  ;;  %v10873_v49 = vunpack.i.h.bf16 %v10871_v19  ;;  %v10872_v48 = vunpack.i.l.bf16 %v10871_v19  ;;  %v8048_v29 = vsel %vm17225_vm7, %v8016_v53, %v10868_v22  ;;  %vm17228_vm13 = vmmov %vm17226_vm15 }
0x1060   : > { %v10881_v56 = vpop.permute.xlu0 %10880  ;;  %v11089_v37 = vpack.i.bf16 %v6983_v10, %v7016_v20  ;;  %v7054_v53 = vsel %vm17221_vm11, %v15514_v18, 0.0  ;;  %v6776_v10 = vsel %vm17096_vm9, %v14848_v0, 0.0  ;;  %vm17229_vm4 = vmmov %vm17228_vm13  ;;  %vm17230_vm11 = vcmask 1040384  }
0x1061   : > { %v8464_v59 = vmax.f32 %v8389_v15, 0.0  ;;  %v10883_v38 = vunpack.i.h.bf16 %v10881_v56  ;;  %v10882_v27 = vunpack.i.l.bf16 %v10881_v56  ;;  %v7922_v58 = vsel %vm17229_vm4, %v14863_v8, %v10862_v26 }
0x1062   : > { %9312 = vmatmul.msk.bf16.gmra.mxu2 %vm17226_vm15, %v8156_v6  ;;  %v10887_v6 = vunpack.i.l.bf16 %v15435_v5  ;;  %v11094_v21 = vpack.i.bf16 %v7054_v53, %v7019_v7  ;;  %v7056_v39 = vsel %vm17230_vm11, %v6982_v30, 0.0  ;;  %vm17231_vm9 = vcmask 261120  }
0x1063   : > { %v8494_v46 = vpack.c.bf16 %v8464_v59, %v8463_v50  ;;  %v8079_v63 = vsel %vm4382_vm8, %v8047_v24, %v10882_v27  ;;  %v8080_v16 = vsel %vm4382_vm8, %v8048_v29, %v10883_v38  ;;  %7302 = vrot.lane.b32.xlu2 %v6978_v12, %s16998_s18  ;;  %vm17232_vm14 = vmmov %vm17231_vm9  ;;  %vm17233_vm7 = vcmask 392192  }
0x1064   : > { %11080 = vrot.lane.b32.xlu1 %v11074_v47, %s17036_s0  ;;  %v8111_v23 = vsel %vm4385_vm3, %v8079_v63, %v10872_v48  ;;  %v8112_v22 = vsel %vm4385_vm3, %v8080_v16, %v10873_v49  ;;  %v10853_v47 = vunpack.i.h.bf16 %v15361_v33  ;;  %v7921_v49 = vsel %vm17228_vm13, %v6776_v10, %v10823_v52  ;;  %vm17234_vm15 = vmmov %vm17233_vm7 }
0x1065   : > { %v15556_v19 = vpop.permute.xlu2 %10920  ;;  %9314 = vmatmul.msk.bf16.gmra.mxu0 %vm17227_vm6, %v8494_v46  ;;  %v8143_v31 = vpack.c.bf16 %v8112_v22, %v8111_v23  ;;  %v7954_v33 = vsel %vm17232_vm14, %v7922_v58, %v10887_v6  ;;  %v7087_v30 = vsel %vm17223_vm5, %v7056_v39, 0.0  ;;  %vm17235_vm6 = vcmask 523264   ;;  %v8396_v6 = vpop.f32.mrf.mxu2 }
0x1066   : > { %v10876_v62 = vpop.permute.xlu1 %10875  ;;  %11090 = vrot.lane.b32.xlu0 %v11089_v37, %s17007_s22  ;;  %v7953_v0 = vsel %vm17231_vm9, %v7921_v49, %v10853_v47  ;;  %vm17236_vm13 = vmmov %vm17235_vm6  ;;  %v10903_v24 = vunpack.i.h.bf16 %v15526_v4  ;;  %vm17237_vm4 = vcmask 654336   ;;  %vm17239_vm9 = vcmask 64512  }
0x1067   : > { %8331 = vmatmul.bf16.gmra.mxu1 %v8143_v31  ;;  %v10878_v50 = vunpack.i.h.bf16 %v10876_v62  ;;  %v10877_v59 = vunpack.i.l.bf16 %v10876_v62  ;;  %vm17238_vm11 = vmmov %vm17237_vm4  ;;  %vm17240_vm14 = vcmask 130048  }
0x1068   : > { %v8302_v15 = vpop.f32.mrf.mxu1  ;;  %v10891_v56 = vpop.permute.xlu0 %10890 }
0x1069   : > { %v10893_v12 = vunpack.i.h.bf16 %v10891_v56  ;;  %v10892_v20 = vunpack.i.l.bf16 %v10891_v56  ;;  %v8303_v7 = vadd.f32 %v15348_v34, %v8302_v15 }
0x106b   : > { %11095 = vrot.lane.b32.xlu2 %v11094_v21, %s16950_s1  ;;  %v7986_v18 = vsel %vm17233_vm7, %v7954_v33, %v10893_v12  ;;  %v7985_v8 = vsel %vm17234_vm15, %v7953_v0, %v10892_v20  ;;  %v8392_v46 = vadd.f32 %v15496_v9, %v8303_v7  ;;  %v10897_v0 = vunpack.i.l.bf16 %v15482_v3  ;;  %vm17241_vm7 = vmmov %vm17240_vm14 }
0x106c   : > { %7871 = vrot.lane.b32.xlu1 %v16447_v11, %s16980_s28  ;;  %v8018_v27 = vsel %vm17235_vm6, %v7986_v18, %v10878_v50  ;;  %v8017_v48 = vsel %vm17236_vm13, %v7985_v8, %v10877_v59  ;;  %v10902_v11 = vunpack.i.l.bf16 %v15526_v4  ;;  %v6778_v18 = vsel %vm17108_vm12, %v14930_v54, 0.0  ;;  %s17273_s28 = sshll.u32 %s17334_s11, 8 }
0x106d   : > { %v15582_v45 = vpop.permute.xlu2 %10935  ;;  %v8050_v31 = vsel %vm17238_vm11, %v8018_v27, %v10903_v24  ;;  %v8465_v9 = vmax.f32 %v8392_v46, 0.0  ;;  %v10922_v8 = vunpack.i.l.bf16 %v15556_v19  ;;  %v7924_v54 = vsel %vm17241_vm7, %v14953_v32, %v10897_v0  ;;  %s15738_s2 = scalar_lea.vmem %s11320_s7, %s17273_s28 }
0x106e   : > { %v10906_v38 = vpop.permute.xlu1 %10905  ;;  %7778 = vrot.lane.b32.xlu0 %v7087_v30, %s16960_s12  ;;  %v8049_v22 = vsel %vm17237_vm4, %v8017_v48, %v10902_v11  ;;  %v8398_v11 = vpop.f32.mrf.mxu2  ;;  %vm17242_vm12 = vcmask 261120   ;;  %vm17244_vm6 = vcmask 392192   ;;  %vm17246_vm4 = vcmask 523264  }
0x106f   : > { %v10908_v37 = vunpack.i.h.bf16 %v10906_v38  ;;  %v10907_v23 = vunpack.i.l.bf16 %v10906_v38  ;;  %v7956_v55 = vsel %vm17242_vm12, %v7924_v54, %v10922_v8  ;;  %vm17243_vm15 = vmmov %vm17242_vm12  ;;  %v10938_v32 = vunpack.i.h.bf16 %v15582_v45 }
0x1070   : > { %v8304_v29 = vpop.f32.mrf.mxu1  ;;  %v10916_v52 = vpop.permute.xlu0 %10915  ;;  %vm17245_vm13 = vmmov %vm17244_vm6  ;;  %v10898_v0 = vunpack.i.h.bf16 %v15482_v3  ;;  %vm17250_vm12 = vcmask 130048  }
0x1071   : > { %v8305_v63 = vadd.f32 %v15348_v34, %v8304_v29  ;;  %v10918_v16 = vunpack.i.h.bf16 %v10916_v52  ;;  %v10917_v26 = vunpack.i.l.bf16 %v10916_v52  ;;  %vm17247_vm11 = vmmov %vm17246_vm4 }
0x1073   : > { %v8394_v62 = vadd.f32 %v8393_v35, %v8305_v63  ;;  %v8081_v53 = vsel %vm4382_vm8, %v8049_v22, %v10917_v26  ;;  %v8082_v10 = vsel %vm4382_vm8, %v8050_v31, %v10918_v16  ;;  %v10863_v35 = vunpack.i.h.bf16 %v15489_v51 }
0x1074   : > { %v8113_v4 = vsel %vm4385_vm3, %v8081_v53, %v10907_v23  ;;  %v8114_v47 = vsel %vm4385_vm3, %v8082_v10, %v10908_v37  ;;  %v10888_v51 = vunpack.i.h.bf16 %v15435_v5  ;;  %v10937_v53 = vunpack.i.l.bf16 %v15582_v45 }
0x1075   : > { %v8466_v49 = vmax.f32 %v8394_v62, 0.0  ;;  %v15599_v58 = vpop.permute.xlu2 %10955  ;;  %v8145_v15 = vpack.c.bf16 %v8114_v47, %v8113_v4  ;;  %v7923_v59 = vsel %vm17240_vm14, %v6778_v18, %v10863_v35  ;;  %vm17248_vm14 = vcmask 654336  }
0x1076   : > { %v10911_v56 = vpop.permute.xlu1 %10910  ;;  %v7955_v29 = vsel %vm17243_vm15, %v7923_v59, %v10888_v51  ;;  %vm17249_vm7 = vmmov %vm17248_vm14  ;;  %v8401_v3 = vpop.f32.mrf.mxu2 }
0x1077   : > { %v8495_v12 = vpack.c.bf16 %v8466_v49, %v8465_v9  ;;  %8336 = vmatmul.bf16.gmra.mxu1 %v8145_v15  ;;  %v10913_v16 = vunpack.i.h.bf16 %v10911_v56  ;;  %v10912_v26 = vunpack.i.l.bf16 %v10911_v56  ;;  %vm17251_vm15 = vmmov %vm17250_vm12 }
0x1078   : > { %v8307_v20 = vpop.f32.mrf.mxu1  ;;  %v10926_v21 = vpop.permute.xlu0 %10925 }
0x1079   : > { %9315 = vmatmul.msk.bf16.gmra.mxu0 %vm17239_vm9, %v8495_v12  ;;  %v8308_v39 = vadd.f32 %v15348_v34, %v8307_v20  ;;  %v10928_v7 = vunpack.i.h.bf16 %v10926_v21  ;;  %v10927_v30 = vunpack.i.l.bf16 %v10926_v21 }
0x107b   : > { %v8397_v48 = vadd.f32 %v8396_v6, %v8308_v39  ;;  %v7988_v46 = vsel %vm17244_vm6, %v7956_v55, %v10928_v7  ;;  %v7987_v63 = vsel %vm17245_vm13, %v7955_v29, %v10927_v30  ;;  %v6780_v7 = vsel %vm17133_vm1, %v15016_v14, 0.0 }
0x107c   : > { %v8020_v22 = vsel %vm17246_vm4, %v7988_v46, %v10913_v16  ;;  %v8019_v31 = vsel %vm17247_vm11, %v7987_v63, %v10912_v26  ;;  %v10957_v30 = vunpack.i.l.bf16 %v15599_v58  ;;  %vm17252_vm6 = vcmask 261120  }
0x107d   : > { %v15609_v50 = vpop.permute.xlu2 %10970  ;;  %v8467_v37 = vmax.f32 %v8397_v48, 0.0  ;;  %v8051_v56 = vsel %vm17248_vm14, %v8019_v31, %v10937_v53  ;;  %v8052_v6 = vsel %vm17249_vm7, %v8020_v22, %v10938_v32  ;;  %v7925_v48 = vsel %vm17251_vm15, %v6780_v7, %v10898_v0  ;;  %vm17253_vm13 = vmmov %vm17252_vm6 }
0x107e   : > { %v10941_v33 = vpop.permute.xlu1 %10940  ;;  %vm17254_vm4 = vcmask 392192   ;;  %vm17256_vm1 = vcmask 523264   ;;  %v10973_v63 = vunpack.i.h.bf16 %v15609_v50  ;;  %v10972_v16 = vunpack.i.l.bf16 %v15609_v50  ;;  %vm17258_vm14 = vmmov %vm17249_vm7 }
0x107f   : > { %v10943_v49 = vunpack.i.h.bf16 %v10941_v33  ;;  %v10942_v15 = vunpack.i.l.bf16 %v10941_v33  ;;  %v10923_v33 = vunpack.i.h.bf16 %v15556_v19  ;;  %vm17255_vm11 = vmmov %vm17254_vm4 }
0x1080   : > { %v8309_v38 = vpop.f32.mrf.mxu1  ;;  %v15612_v27 = vpop.permute.xlu0 %10930  ;;  %vm17259_vm15 = vmmov %vm17250_vm12 }
0x1081   : > { %v8310_v24 = vadd.f32 %v15348_v34, %v8309_v38  ;;  %v10932_v21 = vunpack.i.l.bf16 %v15612_v27 }
0x1083   : > { %v8399_v52 = vadd.f32 %v8398_v11, %v8310_v24  ;;  %v7926_v8 = vsel %vm17250_vm12, %v15031_v42, %v10932_v21  ;;  %v7957_v24 = vsel %vm17252_vm6, %v7925_v48, %v10923_v33 }
0x1084   : > { %v7958_v19 = vsel %vm17253_vm13, %v7926_v8, %v10957_v30  ;;  %vm17261_vm13 = vmmov %vm17254_vm4 }
0x1085   : > { %v8468_v5 = vmax.f32 %v8399_v52, 0.0  ;;  %v15626_v4 = vpop.permute.xlu2 %10990 }
0x1086   : > { %v10946_v23 = vpop.permute.xlu1 %10945  ;;  %v10992_v33 = vunpack.i.l.bf16 %v15626_v4 }
0x1087   : > { %v8496_v62 = vpack.c.bf16 %v8468_v5, %v8467_v37  ;;  %v10948_v44 = vunpack.i.h.bf16 %v10946_v23  ;;  %v10947_v14 = vunpack.i.l.bf16 %v10946_v23 }
0x1088   : > { %v10951_v10 = vpop.permute.xlu0 %10950 }
0x1089   : > { %9316 = vmatmul.msk.bf16.gmra.mxu0 %vm17239_vm9, %v8496_v62  ;;  %v10953_v47 = vunpack.i.h.bf16 %v10951_v10  ;;  %v10952_v9 = vunpack.i.l.bf16 %v10951_v10  ;;  %vm17257_vm9 = vmmov %vm17256_vm1 }
0x108b   : > { %v8083_v12 = vsel %vm4382_vm8, %v8051_v56, %v10952_v9  ;;  %v8084_v20 = vsel %vm4382_vm8, %v8052_v6, %v10953_v47  ;;  %v10933_v47 = vunpack.i.h.bf16 %v15612_v27  ;;  %v8403_v56 = vpop.f32.mrf.mxu2  ;;  %v10958_v27 = vunpack.i.h.bf16 %v15599_v58 }
0x108c   : > { %v8115_v45 = vsel %vm4385_vm3, %v8083_v12, %v10942_v15  ;;  %v8116_v35 = vsel %vm4385_vm3, %v8084_v20, %v10943_v49 }
0x108d   : > { %v8147_v39 = vpack.c.bf16 %v8116_v35, %v8115_v45  ;;  %v15648_v11 = vpop.permute.xlu2 %11000  ;;  %v6782_v35 = vsel %vm17160_vm10, %v15117_v43, 0.0  ;;  %vm17260_vm10 = vmmov %vm17252_vm6 }
0x108e   : > { %v15637_v18 = vpop.permute.xlu1 %10965  ;;  %v7927_v0 = vsel %vm17250_vm12, %v6782_v35, %v10933_v47  ;;  %v11002_v35 = vunpack.i.l.bf16 %v15648_v11 }
0x108f   : > { %8341 = vmatmul.bf16.gmra.mxu1 %v8147_v39  ;;  %v10967_v9 = vunpack.i.l.bf16 %v15637_v18  ;;  %v7959_v43 = vsel %vm17260_vm10, %v7927_v0, %v10958_v27  ;;  %v6784_v27 = vsel %vm17179_vm2, %v15198_v57, 0.0  ;;  %vm17267_vm2 = vmmov %vm17260_vm10 }
0x1090   : > { %v10961_v59 = vpop.permute.xlu0 %10960 }
0x1091   : > { %v10963_v38 = vunpack.i.h.bf16 %v10961_v59  ;;  %v10962_v51 = vunpack.i.l.bf16 %v10961_v59  ;;  %v7928_v8 = vsel %vm17259_vm15, %v15135_v41, %v10967_v9 }
0x1092   : > { %v7960_v60 = vsel %vm17252_vm6, %v7928_v8, %v10992_v33  ;;  %vm17266_vm6 = vmmov %vm17250_vm12 }
0x1093   : > { %v7989_v42 = vsel %vm17254_vm4, %v7957_v24, %v10962_v51  ;;  %v7990_v54 = vsel %vm17255_vm11, %v7958_v19, %v10963_v38  ;;  %v8406_v24 = vpop.f32.mrf.mxu2  ;;  %vm17262_vm11 = vcmask 64512  }
0x1094   : > { %v8312_v55 = vpop.f32.mrf.mxu1  ;;  %v8021_v52 = vsel %vm17256_vm1, %v7989_v42, %v10947_v14  ;;  %v8022_v46 = vsel %vm17257_vm9, %v7990_v54, %v10948_v44  ;;  %vm17263_vm9 = vmmov %vm17256_vm1 }
0x1095   : > { %v8313_v37 = vadd.f32 %v15348_v34, %v8312_v55  ;;  %v8053_v32 = vsel %vm17258_vm14, %v8021_v52, %v10972_v16  ;;  %v8054_v23 = vsel %vm17249_vm7, %v8022_v46, %v10973_v63  ;;  %v11006_v12 = vpop.permute.xlu2 %11005  ;;  %vm17264_vm14 = vmmov %vm17249_vm7 }
0x1096   : > { %v10976_v29 = vpop.permute.xlu1 %10975  ;;  %v11008_v14 = vunpack.i.h.bf16 %v11006_v12  ;;  %vm17265_vm15 = vmmov %vm17262_vm11 }
0x1097   : > { %v10978_v31 = vunpack.i.h.bf16 %v10976_v29  ;;  %v10977_v62 = vunpack.i.l.bf16 %v10976_v29  ;;  %v8402_v6 = vadd.f32 %v8401_v3, %v8313_v37  ;;  %v11007_v29 = vunpack.i.l.bf16 %v11006_v12 }
0x1098   : > { %v10986_v26 = vpop.permute.xlu0 %10985 }
0x1099   : > { %v10988_v5 = vunpack.i.h.bf16 %v10986_v26  ;;  %v10987_v22 = vunpack.i.l.bf16 %v10986_v26  ;;  %v8469_v7 = vmax.f32 %v8402_v6, 0.0 }
0x109b   : > { %v8085_v53 = vsel %vm4382_vm8, %v8053_v32, %v10987_v22  ;;  %v8086_v10 = vsel %vm4382_vm8, %v8054_v23, %v10988_v5  ;;  %v8408_v9 = vpop.f32.mrf.mxu2 }
0x109c   : > { %v8314_v50 = vpop.f32.mrf.mxu1  ;;  %v8117_v49 = vsel %vm4385_vm3, %v8085_v53, %v10977_v62  ;;  %v8118_v15 = vsel %vm4385_vm3, %v8086_v10, %v10978_v31 }
0x109d   : > { %v8315_v20 = vadd.f32 %v15348_v34, %v8314_v50  ;;  %v8149_v21 = vpack.c.bf16 %v8118_v15, %v8117_v49  ;;  %v15680_v54 = vpop.permute.xlu2 %11025 }
0x109e   : > { %v10981_v45 = vpop.permute.xlu1 %10980  ;;  %v11027_v0 = vunpack.i.l.bf16 %v15680_v54 }
0x109f   : > { %v8404_v39 = vadd.f32 %v8403_v56, %v8315_v20  ;;  %8346 = vmatmul.bf16.gmra.mxu1 %v8149_v21  ;;  %v10983_v19 = vunpack.i.h.bf16 %v10981_v45  ;;  %v10982_v42 = vunpack.i.l.bf16 %v10981_v45  ;;  %v10968_v20 = vunpack.i.h.bf16 %v15637_v18 }
0x10a0   : > { %v10996_v59 = vpop.permute.xlu0 %10995  ;;  %v10993_v18 = vunpack.i.h.bf16 %v15626_v4 }
0x10a1   : > { %v8470_v30 = vmax.f32 %v8404_v39, 0.0  ;;  %v10998_v38 = vunpack.i.h.bf16 %v10996_v59  ;;  %v10997_v51 = vunpack.i.l.bf16 %v10996_v59  ;;  %v7929_v8 = vsel %vm17250_vm12, %v6784_v27, %v10968_v20  ;;  %vm17274_vm12 = vmmov %vm17266_vm6 }
0x10a3   : > { %v8497_v48 = vpack.c.bf16 %v8470_v30, %v8469_v7  ;;  %v7992_v3 = vsel %vm17261_vm13, %v7960_v60, %v10998_v38  ;;  %v7991_v58 = vsel %vm17254_vm4, %v7959_v43, %v10997_v51  ;;  %v8411_v38 = vpop.f32.mrf.mxu2  ;;  %v7930_v51 = vsel %vm17266_vm6, %v15215_v36, %v11002_v35  ;;  %vm17268_vm13 = vmmov %vm17254_vm4 }
0x10a4   : > { %v8024_v55 = vsel %vm17256_vm1, %v7992_v3, %v10983_v19  ;;  %v8023_v44 = vsel %vm17263_vm9, %v7991_v58, %v10982_v42  ;;  %v7962_v57 = vsel %vm17260_vm10, %v7930_v51, %v11027_v0  ;;  %v7961_v60 = vsel %vm17267_vm2, %v7929_v8, %v10993_v18  ;;  %vm17270_vm9 = vmmov %vm17249_vm7 }
0x10a5   : > { %9317 = vmatmul.msk.bf16.gmra.mxu0 %vm17262_vm11, %v8497_v48  ;;  %v8055_v5 = vsel %vm17264_vm14, %v8023_v44, %v11007_v29  ;;  %v8056_v22 = vsel %vm17249_vm7, %v8024_v55, %v11008_v14  ;;  %v11041_v15 = vpop.permute.xlu2 %11040  ;;  %vm17269_vm11 = vmmov %vm17256_vm1 }
0x10a6   : > { %v11011_v41 = vpop.permute.xlu1 %11010  ;;  %v11042_v55 = vunpack.i.l.bf16 %v11041_v15  ;;  %vm17271_vm14 = vmmov %vm17249_vm7 }
0x10a7   : > { %v11013_v26 = vunpack.i.h.bf16 %v11011_v41  ;;  %v11012_v37 = vunpack.i.l.bf16 %v11011_v41  ;;  %v11043_v41 = vunpack.i.h.bf16 %v11041_v15  ;;  %vm17272_vm7 = vmmov %vm17266_vm6  ;;  %vm17277_vm6 = vcmask 64512  }
0x10a8   : > { %v8317_v52 = vpop.f32.mrf.mxu1  ;;  %v11021_v46 = vpop.permute.xlu0 %11020  ;;  %vm17278_vm10 = vmmov %vm17267_vm2 }
0x10a9   : > { %v11023_v63 = vunpack.i.h.bf16 %v11021_v46  ;;  %v11022_v16 = vunpack.i.l.bf16 %v11021_v46  ;;  %v8318_v53 = vadd.f32 %v15348_v34, %v8317_v52 }
0x10ab   : > { %v8087_v31 = vsel %vm4382_vm8, %v8055_v5, %v11022_v16  ;;  %v8088_v62 = vsel %vm4382_vm8, %v8056_v22, %v11023_v63  ;;  %v8407_v56 = vadd.f32 %v8406_v24, %v8318_v53 }
0x10ac   : > { %v8119_v32 = vsel %vm4385_vm3, %v8087_v31, %v11012_v37  ;;  %v8120_v23 = vsel %vm4385_vm3, %v8088_v62, %v11013_v26  ;;  %v15721_v62 = vld [vmem:[#allocation2] ss:$0 sm:$0xff] }
0x10ad   : > { %v8151_v10 = vpack.c.bf16 %v8120_v23, %v8119_v32  ;;  %v8471_v21 = vmax.f32 %v8407_v56, 0.0  ;;  %v15708_v17 = vpop.permute.xlu2 %11060  ;;  %v8413_v32 = vpop.f32.mrf.mxu2 }
0x10ae   : > { %v11016_v47 = vpop.permute.xlu1 %11015  ;;  %v11062_v35 = vunpack.i.l.bf16 %v15708_v17 }
0x10af   : > { %8351 = vmatmul.bf16.gmra.mxu1 %v8151_v10  ;;  %v11018_v58 = vunpack.i.h.bf16 %v11016_v47  ;;  %v11017_v24 = vunpack.i.l.bf16 %v11016_v47 }
0x10b0   : > { %v8319_v50 = vpop.f32.mrf.mxu1  ;;  %v11031_v49 = vpop.permute.xlu0 %11030 }
0x10b1   : > { %v8320_v6 = vadd.f32 %v15348_v34, %v8319_v50  ;;  %v11033_v59 = vunpack.i.h.bf16 %v11031_v49  ;;  %v11032_v7 = vunpack.i.l.bf16 %v11031_v49  ;;  %v11003_v49 = vunpack.i.h.bf16 %v15648_v11 }
0x10b3   : > { %v8409_v12 = vadd.f32 %v8408_v9, %v8320_v6  ;;  %v7994_v43 = vsel %vm17268_vm13, %v7962_v57, %v11033_v59  ;;  %v7993_v3 = vsel %vm17254_vm4, %v7961_v60, %v11032_v7  ;;  %v11028_v6 = vunpack.i.h.bf16 %v15680_v54 }
0x10b4   : > { %v8026_v19 = vsel %vm17269_vm11, %v7994_v43, %v11018_v58  ;;  %v8025_v42 = vsel %vm17256_vm1, %v7993_v3, %v11017_v24  ;;  %v11168_v59 = vmov 0.0|0.0   ;;  %vm17282_vm11 = vmmov %vm17256_vm1 }
0x10b5   : > { %v8472_v45 = vmax.f32 %v8409_v12, 0.0  ;;  %v8057_v16 = vsel %vm17270_vm9, %v8025_v42, %v11042_v55  ;;  %v8058_v26 = vsel %vm17271_vm14, %v8026_v19, %v11043_v41  ;;  %v11071_v47 = vpop.permute.xlu2 %11070  ;;  %8455 = vmatmul.bf16.gmra.mxu2 %v11168_v59 }
0x10b6   : > { %v15694_v39 = vpop.permute.xlu1 %7178  ;;  %v11072_v19 = vunpack.i.l.bf16 %v11071_v47 }
0x10b7   : > { %v8498_v33 = vpack.c.bf16 %v8472_v45, %v8471_v21  ;;  %v6786_v45 = vsel %vm17202_vm0, %v15290_v61, 0.0  ;;  %vm17276_vm0 = vcmask 7168  }
0x10b8   : > { %v15701_v30 = vpop.permute.xlu0 %11035  ;;  %v7931_v7 = vsel %vm17274_vm12, %v6786_v45, %v11003_v49  ;;  %vm17285_vm14 = vmmov %vm17276_vm0 }
0x10b9   : > { %9318 = vmatmul.msk.bf16.gmra.mxu0 %vm17265_vm15, %v8498_v33  ;;  %v8322_v48 = vpop.f32.mrf.mxu1  ;;  %v11037_v23 = vunpack.i.l.bf16 %v15701_v30  ;;  %vm17275_vm15 = vmmov %vm17267_vm2 }
0x10ba   : > { %v8323_v36 = vadd.f32 %v15348_v34, %v8322_v48  ;;  %v7963_v61 = vsel %vm17275_vm15, %v7931_v7, %v11028_v6  ;;  %vm17279_vm2 = vmmov %vm17254_vm4 }
0x10bb   : > { %v7932_v27 = vsel %vm17272_vm7, %v15307_v25, %v11037_v23  ;;  %vm17280_vm13 = vmmov %vm17279_vm2 }
0x10bc   : > { %v8412_v37 = vadd.f32 %v8411_v38, %v8323_v36  ;;  %v7964_v25 = vsel %vm17278_vm10, %v7932_v27, %v11062_v35  ;;  %v8416_v38 = vpop.f32.mrf.mxu2  ;;  %vm17281_vm4 = vmmov %vm17256_vm1 }
0x10bd   : > { %v7303_v43 = vpop.permute.xlu2 %7302  ;;  %vm17283_vm1 = vmmov %vm17270_vm9 }
0x10be   : > { %v11046_v4 = vpop.permute.xlu1 %11045  ;;  %v8473_v12 = vmax.f32 %v8412_v37, 0.0  ;;  %vm17284_vm9 = vmmov %vm17283_vm1 }
0x10bf   : > { %v11048_v52 = vunpack.i.h.bf16 %v11046_v4  ;;  %v11047_v46 = vunpack.i.l.bf16 %v11046_v4  ;;  %v11073_v4 = vunpack.i.h.bf16 %v11071_v47  ;;  %vm17286_vm12 = vmmov %vm17272_vm7 }
0x10c0   : > { %v11056_v44 = vpop.permute.xlu0 %11055  ;;  %v7934_v47 = vsel %vm17286_vm12, %v15410_v1, %v15694_v39  ;;  %vm17287_vm15 = vmmov %vm17278_vm10 }
0x10c1   : > { %v11058_v14 = vunpack.i.h.bf16 %v11056_v44  ;;  %v11057_v29 = vunpack.i.l.bf16 %v11056_v44  ;;  %v8324_v63 = vpop.f32.mrf.mxu1  ;;  %v7966_v28 = vsel %vm17287_vm15, %v7934_v47, %v7303_v43 }
0x10c2   : > { %v8325_v5 = vadd.f32 %v15348_v34, %v8324_v63 }
0x10c3   : > { %v8089_v22 = vsel %vm4382_vm8, %v8057_v16, %v11057_v29  ;;  %v8090_v31 = vsel %vm4382_vm8, %v8058_v26, %v11058_v14 }
0x10c4   : > { %v8121_v53 = vsel %vm4385_vm3, %v8089_v22, %v11047_v46  ;;  %v8122_v10 = vsel %vm4385_vm3, %v8090_v31, %v11048_v52  ;;  %v8414_v9 = vadd.f32 %v8413_v32, %v8325_v5  ;;  %v11038_v46 = vunpack.i.h.bf16 %v15701_v30  ;;  %v8418_v30 = vpop.f32.mrf.mxu2 }
0x10c5   : > { %v8153_v50 = vpack.c.bf16 %v8122_v10, %v8121_v53  ;;  %v6788_v31 = vsel %vm17223_vm5, %v15400_v40, 0.0  ;;  %v11063_v53 = vunpack.i.h.bf16 %v15708_v17  ;;  %vm17288_vm5 = vmmov %vm17278_vm10 }
0x10c6   : > { %v11051_v15 = vpop.permute.xlu1 %11050  ;;  %v8574_v56 = vpop.f32.mrf.mxu0  ;;  %v8474_v20 = vmax.f32 %v8414_v9, 0.0  ;;  %v7933_v32 = vsel %vm17272_vm7, %v6788_v31, %v11038_v46  ;;  %vm17291_vm10 = vmmov %vm17281_vm4 }
0x10c7   : > { %v8575_v21 = vadd.f32 %v15721_v62, %v8574_v56  ;;  %8356 = vmatmul.bf16.gmra.mxu1 %v8153_v50  ;;  %v11053_v51 = vunpack.i.h.bf16 %v11051_v15  ;;  %v11052_v48 = vunpack.i.l.bf16 %v11051_v15  ;;  %v11096_v9 = vpop.permute.xlu2 %11095  ;;  %v7965_v56 = vsel %vm17288_vm5, %v7933_v32, %v11063_v53 }
0x10c8   : > { %v11066_v11 = vpop.permute.xlu0 %11065  ;;  %v8499_v54 = vpack.c.bf16 %v8474_v20, %v8473_v12  ;;  %v11098_v20 = vunpack.i.h.bf16 %v11096_v9  ;;  %v11097_v27 = vunpack.i.l.bf16 %v11096_v9 }
0x10c9   : > { %v8654_v0 = vmax.f32 %v8575_v21, 0.0  ;;  %v11068_v33 = vunpack.i.h.bf16 %v11066_v11  ;;  %v11067_v8 = vunpack.i.l.bf16 %v11066_v11 }
0x10ca   : > { %9319 = vmatmul.msk.bf16.gmra.mxu0 %vm17277_vm6, %v8499_v54 }
0x10cb   : > { %8686 = vst.msk [vmem:[%s15738_s2] sm:$0xff] %vm17276_vm0, %v8654_v0  ;;  %v7995_v2 = vsel %vm17279_vm2, %v7963_v61, %v11067_v8  ;;  %v7996_v18 = vsel %vm17280_vm13, %v7964_v25, %v11068_v33  ;;  %vm17289_vm0 = vmmov %vm17279_vm2  ;;  %v17295_v25 = vunpack.i.h.bf16 %v14244_v13  ;;  %v15789_v13 = vld [vmem:[%s17174_s16] ss:$0 sm:$0xff] }
0x10cc   : > { %v8027_v3 = vsel %vm17281_vm4, %v7995_v2, %v11052_v48  ;;  %v8028_v58 = vsel %vm17282_vm11, %v7996_v18, %v11053_v51  ;;  %vm17290_vm6 = vmmov %vm17289_vm0  ;;  %v8421_v0 = vpop.f32.mrf.mxu2  ;;  %vm17296_vm11 = vcmask 64512  }
0x10cd   : > { %v8059_v29 = vsel %vm17283_vm1, %v8027_v3, %v11072_v19  ;;  %v8060_v52 = vsel %vm17284_vm9, %v8028_v58, %v11073_v4  ;;  %vm17292_vm2 = vmmov %vm17281_vm4 }
0x10ce   : > { %v11076_v57 = vpop.permute.xlu1 %11075  ;;  %v8576_v60 = vpop.f32.mrf.mxu0  ;;  %vm17293_vm13 = vmmov %vm17283_vm1 }
0x10cf   : > { %v8577_v24 = vadd.f32 %v15721_v62, %v8576_v60  ;;  %v11078_v44 = vunpack.i.h.bf16 %v11076_v57  ;;  %v11077_v14 = vunpack.i.l.bf16 %v11076_v57  ;;  %vm17294_vm4 = vmmov %vm17283_vm1 }
0x10d0   : > { %v11086_v42 = vpop.permute.xlu0 %11085  ;;  %vm17297_vm1 = vmmov %vm17285_vm14 }
0x10d1   : > { %v8655_v36 = vmax.f32 %v8577_v24, 0.0  ;;  %v11088_v41 = vunpack.i.h.bf16 %v11086_v42  ;;  %v11087_v55 = vunpack.i.l.bf16 %v11086_v42  ;;  %vm17300_vm9 = vmmov %vm17297_vm1 }
0x10d2   : > { %vm17303_vm12 = vmmov %vm17297_vm1 }
0x10d3   : > { %8687 = vst.msk [vmem:[%s15738_s2 + $0x8] sm:$0xff] %vm17285_vm14, %v8655_v36  ;;  %v8091_v63 = vsel %vm4382_vm8, %v8059_v29, %v11087_v55  ;;  %v8092_v16 = vsel %vm4382_vm8, %v8060_v52, %v11088_v41  ;;  %vm17301_vm14 = vmmov %vm17297_vm1 }
0x10d4   : > { %v8327_v26 = vpop.f32.mrf.mxu1  ;;  %v8123_v37 = vsel %vm4385_vm3, %v8091_v63, %v11077_v14  ;;  %v8124_v5 = vsel %vm4385_vm3, %v8092_v16, %v11078_v44  ;;  %v8423_v24 = vpop.f32.mrf.mxu2  ;;  %vm17304_vm15 = vmmov %vm17297_vm1 }
0x10d5   : > { %v8155_v22 = vpack.c.bf16 %v8124_v5, %v8123_v37  ;;  %v8328_v50 = vadd.f32 %v15348_v34, %v8327_v26 }
0x10d6   : > { %v11081_v23 = vpop.permute.xlu1 %11080 }
0x10d7   : > { %8361 = vmatmul.bf16.gmra.mxu1 %v8155_v22  ;;  %v11083_v40 = vunpack.i.h.bf16 %v11081_v23  ;;  %v11082_v6 = vunpack.i.l.bf16 %v11081_v23  ;;  %v8417_v1 = vadd.f32 %v8416_v38, %v8328_v50 }
0x10d8   : > { %v11091_v10 = vpop.permute.xlu0 %11090 }
0x10d9   : > { %v11093_v49 = vunpack.i.h.bf16 %v11091_v10  ;;  %v11092_v15 = vunpack.i.l.bf16 %v11091_v10  ;;  %v8475_v59 = vmax.f32 %v8417_v1, 0.0 }
0x10db   : > { %v7997_v12 = vsel %vm17289_vm0, %v7965_v56, %v11092_v15  ;;  %v7998_v17 = vsel %vm17290_vm6, %v7966_v28, %v11093_v49  ;;  %vm17306_vm0 = vmmov %vm17297_vm1 }
0x10dc   : > { %v8329_v21 = vpop.f32.mrf.mxu1  ;;  %v8030_v45 = vsel %vm17291_vm10, %v7998_v17, %v11083_v40  ;;  %v8029_v35 = vsel %vm17292_vm2, %v7997_v12, %v11082_v6  ;;  %v8426_v46 = vpop.f32.mrf.mxu2  ;;  %vm17308_vm10 = vmmov %vm17306_vm0 }
0x10dd   : > { %v8330_v39 = vadd.f32 %v15348_v34, %v8329_v21  ;;  %v8062_v11 = vsel %vm17293_vm13, %v8030_v45, %v11098_v20  ;;  %v8061_v8 = vsel %vm17294_vm4, %v8029_v35, %v11097_v27  ;;  %vm17309_vm2 = vmmov %vm17306_vm0 }
0x10de   : > { %v7872_v61 = vpop.permute.xlu1 %7871  ;;  %v8094_v2 = vsel %vm4382_vm8, %v8062_v11, %v17295_v25  ;;  %vm17311_vm4 = vmmov %vm17306_vm0 }
0x10df   : > { %v8419_v54 = vadd.f32 %v8418_v30, %v8330_v39  ;;  %v8126_v57 = vsel %vm4385_vm3, %v8094_v2, %v7872_v61 }
0x10e0   : > { %v7779_v33 = vpop.permute.xlu0 %7778 }
0x10e1   : > { %v8476_v7 = vmax.f32 %v8419_v54, 0.0  ;;  %v8093_v34 = vsel %vm4382_vm8, %v8061_v8, %v7779_v33  ;;  %vm17298_vm8 = vmmov %vm17297_vm1 }
0x10e2   : > { %v8125_v18 = vsel %vm4385_vm3, %v8093_v34, %v7872_v61  ;;  %v8579_v38 = vpop.f32.mrf.mxu0  ;;  %vm17299_vm3 = vmmov %vm17296_vm11 }
0x10e3   : > { %v8500_v51 = vpack.c.bf16 %v8476_v7, %v8475_v59  ;;  %v8580_v48 = vadd.f32 %v15721_v62, %v8579_v38  ;;  %v8157_v3 = vpack.c.bf16 %v8126_v57, %v8125_v18  ;;  %vm17302_vm7 = vmmov %vm17299_vm3 }
0x10e4   : > { %v8332_v60 = vpop.f32.mrf.mxu1  ;;  %v8428_v23 = vpop.f32.mrf.mxu2  ;;  %vm17305_vm5 = vmmov %vm17299_vm3 }
0x10e5   : > { %v8656_v43 = vmax.f32 %v8580_v48, 0.0  ;;  %9320 = vmatmul.msk.bf16.gmra.mxu0 %vm17296_vm11, %v8500_v51  ;;  %v8333_v58 = vadd.f32 %v15789_v13, %v8332_v60  ;;  %vm17307_vm6 = vmmov %vm17299_vm3 }
0x10e6   : > { %vm17310_vm13 = vmmov %vm17299_vm3 }
0x10e7   : > { %8688 = vst.msk [vmem:[%s15738_s2 + $0x10] sm:$0xff] %vm17297_vm1, %v8656_v43  ;;  %8366 = vmatmul.bf16.gmra.mxu1 %v8157_v3  ;;  %v8422_v36 = vadd.f32 %v8421_v0, %v8333_v58  ;;  %vm17312_vm11 = vmmov %vm17306_vm0 }
0x10e8   : > { %vm17313_vm1 = vmmov %vm17306_vm0 }
0x10e9   : > { %v8477_v14 = vmax.f32 %v8422_v36, 0.0 }
0x10ea   : > { %v8581_v4 = vpop.f32.mrf.mxu0 }
0x10eb   : > { %v8582_v19 = vadd.f32 %v15721_v62, %v8581_v4 }
0x10ec   : > { %v8334_v42 = vpop.f32.mrf.mxu1  ;;  %v8431_v15 = vpop.f32.mrf.mxu2 }
0x10ed   : > { %v8657_v41 = vmax.f32 %v8582_v19, 0.0  ;;  %v8335_v55 = vadd.f32 %v15789_v13, %v8334_v42 }
0x10ef   : > { %8689 = vst.msk [vmem:[%s15738_s2 + $0x18] sm:$0xff] %vm17298_vm8, %v8657_v41  ;;  %v8424_v44 = vadd.f32 %v8423_v24, %v8335_v55  ;;  %vm17314_vm8 = vmmov %vm17299_vm3 }
0x10f1   : > { %v8478_v29 = vmax.f32 %v8424_v44, 0.0 }
0x10f3   : > { %v8501_v52 = vpack.c.bf16 %v8478_v29, %v8477_v14 }
0x10f4   : > { %v8337_v63 = vpop.f32.mrf.mxu1  ;;  %v8433_v20 = vpop.f32.mrf.mxu2 }
0x10f5   : > { %9321 = vmatmul.msk.bf16.gmra.mxu0 %vm17299_vm3, %v8501_v52  ;;  %v8338_v37 = vadd.f32 %v15789_v13, %v8337_v63 }
0x10f6   : > { %v8584_v16 = vpop.f32.mrf.mxu0 }
0x10f7   : > { %v8585_v26 = vadd.f32 %v15721_v62, %v8584_v16  ;;  %v8427_v31 = vadd.f32 %v8426_v46, %v8338_v37 }
0x10f9   : > { %v8658_v5 = vmax.f32 %v8585_v26, 0.0  ;;  %v8479_v47 = vmax.f32 %v8427_v31, 0.0 }
0x10fb   : > { %8690 = vst.msk [vmem:[%s15738_s2 + $0x20] sm:$0xff] %vm17300_vm9, %v8658_v5  ;;  %vm17315_vm9 = vmmov %vm17306_vm0 }
0x10fc   : > { %v8339_v22 = vpop.f32.mrf.mxu1  ;;  %v8436_v11 = vpop.f32.mrf.mxu2 }
0x10fd   : > { %v8340_v32 = vadd.f32 %v15789_v13, %v8339_v22 }
0x10fe   : > { %v8586_v30 = vpop.f32.mrf.mxu0 }
0x10ff   : > { %v8429_v53 = vadd.f32 %v8428_v23, %v8340_v32  ;;  %v8587_v10 = vadd.f32 %v15721_v62, %v8586_v30 }
0x1101   : > { %v8480_v9 = vmax.f32 %v8429_v53, 0.0  ;;  %v8659_v50 = vmax.f32 %v8587_v10, 0.0 }
0x1103   : > { %v8502_v49 = vpack.c.bf16 %v8480_v9, %v8479_v47  ;;  %8691 = vst.msk [vmem:[%s15738_s2 + $0x28] sm:$0xff] %vm17301_vm14, %v8659_v50  ;;  %vm17316_vm14 = vmmov %vm17306_vm0 }
0x1104   : > { %v8438_v7 = vpop.f32.mrf.mxu2 }
0x1105   : > { %9322 = vmatmul.msk.bf16.gmra.mxu0 %vm17302_vm7, %v8502_v49  ;;  %vm17317_vm7 = vmmov %vm17299_vm3 }
0x1106   : > { %v8589_v28 = vpop.f32.mrf.mxu0 }
0x1107   : > { %v8590_v40 = vadd.f32 %v15721_v62, %v8589_v28 }
0x1109   : > { %v8660_v56 = vmax.f32 %v8590_v40, 0.0 }
0x110b   : > { %8692 = vst.msk [vmem:[%s15738_s2 + $0x30] sm:$0xff] %vm17303_vm12, %v8660_v56  ;;  %vm17318_vm12 = vmmov %vm17306_vm0 }
0x110c   : > { %v8342_v6 = vpop.f32.mrf.mxu1  ;;  %v8441_v58 = vpop.f32.mrf.mxu2 }
0x110d   : > { %v8343_v21 = vadd.f32 %v15789_v13, %v8342_v6 }
0x110e   : > { %v8591_v12 = vpop.f32.mrf.mxu0 }
0x110f   : > { %v8592_v17 = vadd.f32 %v15721_v62, %v8591_v12  ;;  %v8432_v39 = vadd.f32 %v8431_v15, %v8343_v21 }
0x1111   : > { %v8661_v45 = vmax.f32 %v8592_v17, 0.0  ;;  %v8481_v54 = vmax.f32 %v8432_v39, 0.0 }
0x1113   : > { %8693 = vst.msk [vmem:[%s15738_s2 + $0x38] sm:$0xff] %vm17304_vm15, %v8661_v45  ;;  %vm17319_vm15 = vmmov %vm17306_vm0 }
0x1114   : > { %v8344_v1 = vpop.f32.mrf.mxu1  ;;  %v8443_v55 = vpop.f32.mrf.mxu2 }
0x1115   : > { %v8345_v35 = vadd.f32 %v15789_v13, %v8344_v1 }
0x1117   : > { %v8434_v27 = vadd.f32 %v8433_v20, %v8345_v35 }
0x1119   : > { %v8482_v0 = vmax.f32 %v8434_v27, 0.0 }
0x111b   : > { %v8503_v33 = vpack.c.bf16 %v8482_v0, %v8481_v54 }
0x111c   : > { %v8347_v8 = vpop.f32.mrf.mxu1  ;;  %v8446_v26 = vpop.f32.mrf.mxu2 }
0x111d   : > { %9323 = vmatmul.msk.bf16.gmra.mxu0 %vm17305_vm5, %v8503_v33  ;;  %v8348_v59 = vadd.f32 %v15789_v13, %v8347_v8  ;;  %vm17320_vm5 = vmmov %vm17306_vm0 }
0x111f   : > { %v8437_v34 = vadd.f32 %v8436_v11, %v8348_v59 }
0x1121   : > { %v8483_v48 = vmax.f32 %v8437_v34, 0.0 }
0x1122   : > { %v8594_v61 = vpop.f32.mrf.mxu0 }
0x1123   : > { %v8595_v25 = vadd.f32 %v15721_v62, %v8594_v61 }
0x1124   : > { %v8349_v2 = vpop.f32.mrf.mxu1  ;;  %v8448_v32 = vpop.f32.mrf.mxu2 }
0x1125   : > { %v8662_v18 = vmax.f32 %v8595_v25, 0.0  ;;  %v8350_v38 = vadd.f32 %v15789_v13, %v8349_v2 }
0x1127   : > { %8694 = vst.msk [vmem:[%s15738_s2 + $0x40] sm:$0xff] %vm17306_vm0, %v8662_v18  ;;  %v8439_v51 = vadd.f32 %v8438_v7, %v8350_v38 }
0x1129   : > { %v8484_v57 = vmax.f32 %v8439_v51, 0.0 }
0x112a   : > { %v8596_v60 = vpop.f32.mrf.mxu0 }
0x112b   : > { %v8504_v43 = vpack.c.bf16 %v8484_v57, %v8483_v48  ;;  %v8597_v3 = vadd.f32 %v15721_v62, %v8596_v60 }
0x112c   : > { %v8352_v24 = vpop.f32.mrf.mxu1  ;;  %v8451_v6 = vpop.f32.mrf.mxu2 }
0x112d   : > { %v8663_v4 = vmax.f32 %v8597_v3, 0.0  ;;  %9324 = vmatmul.msk.bf16.gmra.mxu0 %vm17307_vm6, %v8504_v43  ;;  %v8353_v19 = vadd.f32 %v15789_v13, %v8352_v24  ;;  %vm17321_vm6 = vmmov %vm17306_vm0 }
0x112f   : > { %8695 = vst.msk [vmem:[%s15738_s2 + $0x48] sm:$0xff] %vm17308_vm10, %v8663_v4  ;;  %v8442_v36 = vadd.f32 %v8441_v58, %v8353_v19  ;;  %vm17322_vm10 = vmmov %vm17306_vm0 }
0x1131   : > { %v8485_v52 = vmax.f32 %v8442_v36, 0.0 }
0x1134   : > { %v8354_v42 = vpop.f32.mrf.mxu1  ;;  %v8453_v45 = vpop.f32.mrf.mxu2 }
0x1135   : > { %v8355_v41 = vadd.f32 %v15789_v13, %v8354_v42 }
0x1136   : > { %v8599_v44 = vpop.f32.mrf.mxu0 }
0x1137   : > { %v8444_v14 = vadd.f32 %v8443_v55, %v8355_v41  ;;  %v8600_v29 = vadd.f32 %v15721_v62, %v8599_v44 }
0x1139   : > { %v8486_v46 = vmax.f32 %v8444_v14, 0.0  ;;  %v8664_v63 = vmax.f32 %v8600_v29, 0.0 }
0x113b   : > { %v8505_v16 = vpack.c.bf16 %v8486_v46, %v8485_v52  ;;  %8696 = vst.msk [vmem:[%s15738_s2 + $0x50] sm:$0xff] %vm17309_vm2, %v8664_v63  ;;  %vm17323_vm2 = vmmov %vm17306_vm0 }
0x113c   : > { %v8456_v7 = vpop.f32.mrf.mxu2 }
0x113d   : > { %9325 = vmatmul.msk.bf16.gmra.mxu0 %vm17310_vm13, %v8505_v16  ;;  %vm17324_vm13 = vmmov %vm17306_vm0 }
0x113e   : > { %v8601_v37 = vpop.f32.mrf.mxu0 }
0x113f   : > { %v8602_v5 = vadd.f32 %v15721_v62, %v8601_v37 }
0x1141   : > { %v8665_v22 = vmax.f32 %v8602_v5, 0.0 }
0x1143   : > { %8697 = vst.msk [vmem:[%s15738_s2 + $0x58] sm:$0xff] %vm17311_vm4, %v8665_v22  ;;  %vm17325_vm4 = vmmov %vm17306_vm0 }
0x1144   : > { %v8357_v31 = vpop.f32.mrf.mxu1  ;;  %v8458_v57 = vpop.f32.mrf.mxu2 }
0x1145   : > { %v8358_v30 = vadd.f32 %v15789_v13, %v8357_v31 }
0x1147   : > { %v8604_v23 = vpop.f32.mrf.mxu0  ;;  %v8447_v9 = vadd.f32 %v8446_v26, %v8358_v30 }
0x1148   : > { %v8605_v53 = vadd.f32 %v15721_v62, %v8604_v23 }
0x1149   : > { %v8487_v28 = vmax.f32 %v8447_v9, 0.0 }
0x114a   : > { %v8666_v10 = vmax.f32 %v8605_v53, 0.0 }
0x114c   : > { %v8359_v47 = vpop.f32.mrf.mxu1  ;;  %8698 = vst.msk [vmem:[%s15738_s2 + $0x60] sm:$0xff] %vm17312_vm11, %v8666_v10  ;;  %vm17326_vm11 = vmmov %vm17306_vm0 }
0x114d   : > { %v8360_v50 = vadd.f32 %v15789_v13, %v8359_v47 }
0x114f   : > { %v8449_v49 = vadd.f32 %v8448_v32, %v8360_v50  ;;  %v8606_v15 = vpop.f32.mrf.mxu0 }
0x1150   : > { %v8607_v56 = vadd.f32 %v15721_v62, %v8606_v15 }
0x1151   : > { %v8488_v40 = vmax.f32 %v8449_v49, 0.0 }
0x1152   : > { %v8667_v17 = vmax.f32 %v8607_v56, 0.0 }
0x1153   : > { %v8506_v12 = vpack.c.bf16 %v8488_v40, %v8487_v28 }
0x1154   : > { %v8362_v20 = vpop.f32.mrf.mxu1  ;;  %8699 = vst.msk [vmem:[%s15738_s2 + $0x68] sm:$0xff] %vm17313_vm1, %v8667_v17  ;;  %vm17327_vm1 = vmmov %vm17306_vm0 }
0x1155   : > { %9326 = vmatmul.msk.bf16.gmra.mxu0 %vm17314_vm8, %v8506_v12  ;;  %v8363_v21 = vadd.f32 %v15789_v13, %v8362_v20  ;;  %vm17328_vm8 = vmmov %vm17306_vm0 }
0x1157   : > { %v8452_v39 = vadd.f32 %v8451_v6, %v8363_v21 }
0x1159   : > { %v8489_v11 = vmax.f32 %v8452_v39, 0.0 }
0x115c   : > { %v8364_v1 = vpop.f32.mrf.mxu1 }
0x115d   : > { %v8365_v35 = vadd.f32 %v15789_v13, %v8364_v1 }
0x115f   : > { %v8454_v27 = vadd.f32 %v8453_v45, %v8365_v35 }
0x1161   : > { %v8490_v54 = vmax.f32 %v8454_v27, 0.0 }
0x1162   : > { %v8609_v0 = vpop.f32.mrf.mxu0 }
0x1163   : > { %v8507_v33 = vpack.c.bf16 %v8490_v54, %v8489_v11  ;;  %v8610_v8 = vadd.f32 %v15721_v62, %v8609_v0 }
0x1164   : > { %v8367_v59 = vpop.f32.mrf.mxu1 }
0x1165   : > { %v8668_v61 = vmax.f32 %v8610_v8, 0.0  ;;  %9327 = vmatmul.msk.bf16.gmra.mxu0 %vm17299_vm3, %v8507_v33  ;;  %v8368_v25 = vadd.f32 %v15789_v13, %v8367_v59  ;;  %vm17329_vm3 = vmmov %vm17306_vm0 }
0x1167   : > { %8700 = vst.msk [vmem:[%s15738_s2 + $0x70] sm:$0xff] %vm17315_vm9, %v8668_v61  ;;  %v8457_v38 = vadd.f32 %v8456_v7, %v8368_v25  ;;  %vm17330_vm9 = vmmov %vm17306_vm0 }
0x1169   : > { %v8491_v43 = vmax.f32 %v8457_v38, 0.0 }
0x116a   : > { %v8611_v2 = vpop.f32.mrf.mxu0 }
0x116b   : > { %v8612_v34 = vadd.f32 %v15721_v62, %v8611_v2 }
0x116c   : > { %v8369_v18 = vpop.f32.mrf.mxu1 }
0x116d   : > { %v8669_v51 = vmax.f32 %v8612_v34, 0.0  ;;  %v8370_v48 = vadd.f32 %v15789_v13, %v8369_v18 }
0x116f   : > { %8701 = vst.msk [vmem:[%s15738_s2 + $0x78] sm:$0xff] %vm17316_vm14, %v8669_v51  ;;  %v8459_v60 = vadd.f32 %v8458_v57, %v8370_v48  ;;  %vm17331_vm14 = vmmov %vm17306_vm0 }
0x1171   : > { %v8492_v3 = vmax.f32 %v8459_v60, 0.0 }
0x1172   : > { %v8614_v58 = vpop.f32.mrf.mxu0 }
0x1173   : > { %v8508_v24 = vpack.c.bf16 %v8492_v3, %v8491_v43  ;;  %v8615_v4 = vadd.f32 %v15721_v62, %v8614_v58 }
0x1175   : > { %v8670_v19 = vmax.f32 %v8615_v4, 0.0  ;;  %9328 = vmatmul.msk.bf16.gmra.mxu0 %vm17317_vm7, %v8508_v24  ;;  %vm17332_vm7 = vmmov %vm17306_vm0 }
0x1177   : > { %8702 = vst.msk [vmem:[%s15738_s2 + $0x80] sm:$0xff] %vm17318_vm12, %v8670_v19 }
0x117a   : > { %v8616_v42 = vpop.f32.mrf.mxu0 }
0x117b   : > { %v8617_v13 = vadd.f32 %v15721_v62, %v8616_v42 }
0x117d   : > { %v8671_v36 = vmax.f32 %v8617_v13, 0.0 }
0x117f   : > { %8703 = vst.msk [vmem:[%s15738_s2 + $0x88] sm:$0xff] %vm17319_vm15, %v8671_v36 }
0x1182   : > { %v8619_v41 = vpop.f32.mrf.mxu0 }
0x1183   : > { %v8620_v55 = vadd.f32 %v15721_v62, %v8619_v41 }
0x1185   : > { %v8672_v44 = vmax.f32 %v8620_v55, 0.0 }
0x1187   : > { %8704 = vst.msk [vmem:[%s15738_s2 + $0x90] sm:$0xff] %vm17320_vm5, %v8672_v44 }
0x118a   : > { %v8621_v14 = vpop.f32.mrf.mxu0 }
0x118b   : > { %v8622_v29 = vadd.f32 %v15721_v62, %v8621_v14 }
0x118d   : > { %v8673_v52 = vmax.f32 %v8622_v29, 0.0 }
0x118f   : > { %8705 = vst.msk [vmem:[%s15738_s2 + $0x98] sm:$0xff] %vm17306_vm0, %v8673_v52 }
0x119a   : > { %v8624_v46 = vpop.f32.mrf.mxu0 }
0x119b   : > { %v8625_v63 = vadd.f32 %v15721_v62, %v8624_v46 }
0x119d   : > { %v8674_v16 = vmax.f32 %v8625_v63, 0.0 }
0x119f   : > { %8706 = vst.msk [vmem:[%s15738_s2 + $0xa0] sm:$0xff] %vm17321_vm6, %v8674_v16 }
0x11a2   : > { %v8626_v26 = vpop.f32.mrf.mxu0 }
0x11a3   : > { %v8627_v37 = vadd.f32 %v15721_v62, %v8626_v26 }
0x11a5   : > { %v8675_v5 = vmax.f32 %v8627_v37, 0.0 }
0x11a7   : > { %8707 = vst.msk [vmem:[%s15738_s2 + $0xa8] sm:$0xff] %vm17322_vm10, %v8675_v5 }
0x11aa   : > { %v8629_v22 = vpop.f32.mrf.mxu0 }
0x11ab   : > { %v8630_v31 = vadd.f32 %v15721_v62, %v8629_v22 }
0x11ad   : > { %v8676_v32 = vmax.f32 %v8630_v31, 0.0 }
0x11af   : > { %8708 = vst.msk [vmem:[%s15738_s2 + $0xb0] sm:$0xff] %vm17323_vm2, %v8676_v32 }
0x11b2   : > { %v8631_v23 = vpop.f32.mrf.mxu0 }
0x11b3   : > { %v8632_v30 = vadd.f32 %v15721_v62, %v8631_v23 }
0x11b5   : > { %v8677_v53 = vmax.f32 %v8632_v30, 0.0 }
0x11b7   : > { %8709 = vst.msk [vmem:[%s15738_s2 + $0xb8] sm:$0xff] %vm17324_vm13, %v8677_v53 }
0x11ba   : > { %v8634_v10 = vpop.f32.mrf.mxu0 }
0x11bb   : > { %v8635_v47 = vadd.f32 %v15721_v62, %v8634_v10 }
0x11bd   : > { %v8678_v9 = vmax.f32 %v8635_v47, 0.0 }
0x11bf   : > { %8710 = vst.msk [vmem:[%s15738_s2 + $0xc0] sm:$0xff] %vm17325_vm4, %v8678_v9 }
0x11c2   : > { %v8636_v50 = vpop.f32.mrf.mxu0 }
0x11c3   : > { %v8637_v49 = vadd.f32 %v15721_v62, %v8636_v50 }
0x11c5   : > { %v8679_v15 = vmax.f32 %v8637_v49, 0.0 }
0x11c7   : > { %8711 = vst.msk [vmem:[%s15738_s2 + $0xc8] sm:$0xff] %vm17326_vm11, %v8679_v15 }
0x11d2   : > { %v8639_v28 = vpop.f32.mrf.mxu0 }
0x11d3   : > { %v8640_v40 = vadd.f32 %v15721_v62, %v8639_v28 }
0x11d5   : > { %v8680_v56 = vmax.f32 %v8640_v40, 0.0 }
0x11d7   : > { %8712 = vst.msk [vmem:[%s15738_s2 + $0xd0] sm:$0xff] %vm17327_vm1, %v8680_v56 }
0x11da   : > { %v8641_v6 = vpop.f32.mrf.mxu0 }
0x11db   : > { %v8642_v12 = vadd.f32 %v15721_v62, %v8641_v6 }
0x11dd   : > { %v8681_v17 = vmax.f32 %v8642_v12, 0.0 }
0x11df   : > { %8713 = vst.msk [vmem:[%s15738_s2 + $0xd8] sm:$0xff] %vm17328_vm8, %v8681_v17 }
0x11e2   : > { %v8644_v20 = vpop.f32.mrf.mxu0 }
0x11e3   : > { %v8645_v21 = vadd.f32 %v15721_v62, %v8644_v20 }
0x11e5   : > { %v8682_v45 = vmax.f32 %v8645_v21, 0.0 }
0x11e7   : > { %8714 = vst.msk [vmem:[%s15738_s2 + $0xe0] sm:$0xff] %vm17329_vm3, %v8682_v45 }
0x11ea   : > { %v8646_v1 = vpop.f32.mrf.mxu0 }
0x11eb   : > { %v8647_v39 = vadd.f32 %v15721_v62, %v8646_v1 }
0x11ed   : > { %v8683_v35 = vmax.f32 %v8647_v39, 0.0 }
0x11ef   : > { %8715 = vst.msk [vmem:[%s15738_s2 + $0xe8] sm:$0xff] %vm17330_vm9, %v8683_v35 }
0x11f2   : > { %v8649_v27 = vpop.f32.mrf.mxu0 }
0x11f3   : > { %v8650_v11 = vadd.f32 %v15721_v62, %v8649_v27 }
0x11f5   : > { %v8684_v54 = vmax.f32 %v8650_v11, 0.0 }
0x11f7   : > { %8716 = vst.msk [vmem:[%s15738_s2 + $0xf0] sm:$0xff] %vm17331_vm14, %v8684_v54 }
0x11fa   : > { %v8651_v0 = vpop.f32.mrf.mxu0 }
0x11fb   : > { %v8652_v33 = vadd.f32 %v15721_v62, %v8651_v0 }
0x11fd   : > { %v8685_v8 = vmax.f32 %v8652_v33, 0.0 }
0x11ff   : > { %8717 = vst.msk [vmem:[%s15738_s2 + $0xf8] sm:$0xff] %vm17332_vm7, %v8685_v8 }
0x1200 PF: > { %s71_s10 = sadd.s32 1, %s11117_s10  }
0x1201   : > { %p68_p4 = scmp.ge.s32.totalorder %s71_s10, 4  }
0x1203   :  { %70 = sbr.rel (!%p68_p4) target bundleno = 43 (0x2b), region = 195 }

</bundles_post_ra>
